<compile_context>
chip_gen: v6e
topology: v6e:2x2x1
jax: 0.10.0
libtpu: 0.0.40
codegen_flags: <defaults>
</compile_context>

<pallas_src>
import jax
import jax.numpy as jnp
from jax import lax
from jax.experimental import pallas as pl
from jax.experimental.pallas import tpu as pltpu

# --- model hyper-parameters (match the PyTorch module's globals) -------------
n_embd = 384
block_size = 256
n_head = 6
n_layer = 6
vocab_size = 65
head_size = n_embd // n_head          # 64
vocab_padded = 128                    # lane-dense lm-head output
LN_EPS = 1e-5                         # torch.nn.LayerNorm default
TM_TARGET = 256                       # M-tile target (safe for v5e/v6e/v7x VMEM)


# =============================== kernels =====================================

def _layernorm_f32(x_ref, g_ref, b_ref):
    x = x_ref[...].astype(jnp.float32)
    mean = jnp.mean(x, axis=-1, keepdims=True)
    var = jnp.mean((x - mean) ** 2, axis=-1, keepdims=True)
    xhat = (x - mean) * lax.rsqrt(var + LN_EPS)
    return x, xhat * g_ref[...].astype(jnp.float32) + b_ref[...].astype(jnp.float32)


def ln_matmul_kernel(x_ref, g_ref, b_ref, w_ref, bias_ref, o_ref):
    # fused: LayerNorm(x) @ W + bias   (one M-tile per grid step)
    _, h = _layernorm_f32(x_ref, g_ref, b_ref)
    acc = jnp.dot(h.astype(w_ref.dtype), w_ref[...],
                  preferred_element_type=jnp.float32)
    acc = acc + bias_ref[...].astype(jnp.float32)
    o_ref[...] = acc.astype(o_ref.dtype)


def ln_ffn_kernel(x_ref, g_ref, b_ref, w1_ref, b1_ref, w2_ref, b2_ref, o_ref):
    # fused: x + (ReLU(LayerNorm(x) @ W1 + b1) @ W2 + b2)
    x_f32, h = _layernorm_f32(x_ref, g_ref, b_ref)
    f = jnp.dot(h.astype(w1_ref.dtype), w1_ref[...],
                preferred_element_type=jnp.float32)
    f = jnp.maximum(f + b1_ref[...].astype(jnp.float32), 0.0)
    y = jnp.dot(f.astype(w2_ref.dtype), w2_ref[...],
                preferred_element_type=jnp.float32)
    y = y + b2_ref[...].astype(jnp.float32) + x_f32
    o_ref[...] = y.astype(o_ref.dtype)


def matmul_residual_kernel(x_ref, w_ref, bias_ref, res_ref, o_ref):
    # fused: (x @ W + b) + residual   (attention output projection)
    acc = jnp.dot(x_ref[...], w_ref[...], preferred_element_type=jnp.float32)
    acc = acc + bias_ref[...].astype(jnp.float32) + res_ref[...].astype(jnp.float32)
    o_ref[...] = acc.astype(o_ref.dtype)


def attention_kernel(qkv_ref, o_ref):
    # one batch element per grid step; qkv_ref: (1, T, 3C), o_ref: (1, T, C)
    qkv = qkv_ref[0]                      # (T, 3C) bf16
    T = qkv.shape[0]
    scale = float(n_embd) ** -0.5         # reference scales by C = n_embd

    row = lax.broadcasted_iota(jnp.int32, (T, T), 0)
    col = lax.broadcasted_iota(jnp.int32, (T, T), 1)
    causal = col <= row

    outs = []
    for h in range(n_head):
        lo = h * head_size
        q = qkv[:, lo:lo + head_size]                                  # (T, hs)
        k = qkv[:, n_embd + lo:n_embd + lo + head_size]                # (T, hs)
        v = qkv[:, 2 * n_embd + lo:2 * n_embd + lo + head_size]        # (T, hs)

        s = lax.dot_general(q, k, (((1,), (1,)), ((), ())),
                            preferred_element_type=jnp.float32) * scale
        s = jnp.where(causal, s, -jnp.inf)
        s = s - jnp.max(s, axis=-1, keepdims=True)
        p = jnp.exp(s)
        p = p * pl.reciprocal(jnp.sum(p, axis=-1, keepdims=True), approx=True)
        outs.append(jnp.dot(p.astype(qkv.dtype), v,
                            preferred_element_type=jnp.float32))       # (T, hs)

    o_ref[0] = jnp.concatenate(outs, axis=-1).astype(o_ref.dtype)      # (T, C)


# =============================== wrappers ====================================

def _choose_tm(M, target=TM_TARGET):
    """Largest M-tile <= target that divides M (or the full M)."""
    if M <= target:
        return M
    for tm in (target, 128, 64, 32, 16, 8):
        if M % tm == 0:
            return tm
    return M


def _parallel_params():
    return pltpu.CompilerParams(dimension_semantics=("parallel",))


def ln_matmul(x2d, gamma, beta, w, bias):
    M, C = x2d.shape
    N = w.shape[1]
    tm = _choose_tm(M)
    return pl.pallas_call(
        ln_matmul_kernel,
        out_shape=jax.ShapeDtypeStruct((M, N), x2d.dtype),
        grid=(M // tm,),
        in_specs=[pl.BlockSpec((tm, C), lambda i: (i, 0)),
                  pl.BlockSpec((1, C), lambda i: (0, 0)),
                  pl.BlockSpec((1, C), lambda i: (0, 0)),
                  pl.BlockSpec((C, N), lambda i: (0, 0)),
                  pl.BlockSpec((1, N), lambda i: (0, 0))],
        out_specs=pl.BlockSpec((tm, N), lambda i: (i, 0)),
        compiler_params=_parallel_params(),
    )(x2d, gamma.reshape(1, C), beta.reshape(1, C), w, bias.reshape(1, N))


def ln_ffn(x2d, gamma, beta, w1, b1, w2, b2):
    M, C = x2d.shape
    H = w1.shape[1]
    tm = _choose_tm(M)
    return pl.pallas_call(
        ln_ffn_kernel,
        out_shape=jax.ShapeDtypeStruct((M, C), x2d.dtype),
        grid=(M // tm,),
        in_specs=[pl.BlockSpec((tm, C), lambda i: (i, 0)),
                  pl.BlockSpec((1, C), lambda i: (0, 0)),
                  pl.BlockSpec((1, C), lambda i: (0, 0)),
                  pl.BlockSpec((C, H), lambda i: (0, 0)),
                  pl.BlockSpec((1, H), lambda i: (0, 0)),
                  pl.BlockSpec((H, C), lambda i: (0, 0)),
                  pl.BlockSpec((1, C), lambda i: (0, 0))],
        out_specs=pl.BlockSpec((tm, C), lambda i: (i, 0)),
        compiler_params=_parallel_params(),
    )(x2d, gamma.reshape(1, C), beta.reshape(1, C),
      w1, b1.reshape(1, H), w2, b2.reshape(1, C))


def matmul_residual(x2d, w, bias, res2d):
    M, K = x2d.shape
    N = w.shape[1]
    tm = _choose_tm(M)
    return pl.pallas_call(
        matmul_residual_kernel,
        out_shape=jax.ShapeDtypeStruct((M, N), x2d.dtype),
        grid=(M // tm,),
        in_specs=[pl.BlockSpec((tm, K), lambda i: (i, 0)),
                  pl.BlockSpec((K, N), lambda i: (0, 0)),
                  pl.BlockSpec((1, N), lambda i: (0, 0)),
                  pl.BlockSpec((tm, N), lambda i: (i, 0))],
        out_specs=pl.BlockSpec((tm, N), lambda i: (i, 0)),
        compiler_params=_parallel_params(),
    )(x2d, w, bias.reshape(1, N), res2d)


def causal_attention(qkv):
    # qkv: (B, T, 3C) with layout [q heads | k heads | v heads] on the lane dim
    B, T, threeC = qkv.shape
    return pl.pallas_call(
        attention_kernel,
        out_shape=jax.ShapeDtypeStruct((B, T, n_embd), qkv.dtype),
        grid=(B,),
        in_specs=[pl.BlockSpec((1, T, threeC), lambda b: (b, 0, 0))],
        out_specs=pl.BlockSpec((1, T, n_embd), lambda b: (b, 0, 0)),
        compiler_params=_parallel_params(),
    )(qkv)


# =============================== parameters ==================================

def init_params(key):
    def nrm(k, shape, scale=0.02):
        return (scale * jax.random.normal(k, shape)).astype(jnp.bfloat16)

    keys = iter(jax.random.split(key, 8 + n_layer * 8))

    w_lm = 0.02 * jax.random.normal(next(keys), (n_embd, vocab_size))
    w_lm_pad = jnp.zeros((n_embd, vocab_padded), jnp.float32).at[:, :vocab_size].set(w_lm)

    params = {
        "tok_emb": nrm(next(keys), (vocab_size, n_embd)),
        "pos_emb": nrm(next(keys), (block_size, n_embd)),
        "lnf_g": jnp.ones((n_embd,), jnp.float32),
        "lnf_b": jnp.zeros((n_embd,), jnp.float32),
        "w_lm_pad": w_lm_pad.astype(jnp.bfloat16),           # padded to 128 lanes
        "b_lm_pad": jnp.zeros((vocab_padded,), jnp.float32),
        "blocks": [],
    }
    for _ in range(n_layer):
        # per-head q/k/v projections are concatenated head0|head1|... along the
        # output dim; q|k|v fused into one (C, 3C) weight (bias=False -> zeros).
        wq = nrm(next(keys), (n_embd, n_embd))
        wk = nrm(next(keys), (n_embd, n_embd))
        wv = nrm(next(keys), (n_embd, n_embd))
        params["blocks"].append({
            "ln1_g": jnp.ones((n_embd,), jnp.float32),
            "ln1_b": jnp.zeros((n_embd,), jnp.float32),
            "w_qkv": jnp.concatenate([wq, wk, wv], axis=1),   # (C, 3C)
            "b_qkv": jnp.zeros((3 * n_embd,), jnp.float32),
            "wo": nrm(next(keys), (n_embd, n_embd)),
            "bo": jnp.zeros((n_embd,), jnp.float32),
            "ln2_g": jnp.ones((n_embd,), jnp.float32),
            "ln2_b": jnp.zeros((n_embd,), jnp.float32),
            "w1": nrm(next(keys), (n_embd, 4 * n_embd)),
            "b1": jnp.zeros((4 * n_embd,), jnp.float32),
            "w2": nrm(next(keys), (4 * n_embd, n_embd)),
            "b2": jnp.zeros((n_embd,), jnp.float32),
        })
    return params


# =============================== forward =====================================

def forward(params, idx):
    """Returns (logits[B,T,vocab], loss=None) — matches forward(idx, targets=None)."""
    B, T = idx.shape
    C = n_embd

    # embedding lookups are glue (gather, not the hot path)
    tok_emb = jnp.take(params["tok_emb"], idx, axis=0)          # (B, T, C)
    pos_emb = params["pos_emb"][:T]                             # (T, C)
    x2 = (tok_emb + pos_emb).astype(jnp.bfloat16).reshape(B * T, C)

    for blk in params["blocks"]:
        # --- self attention (pre-norm), fused LN1 + QKV GEMM -----------------
        qkv = ln_matmul(x2, blk["ln1_g"], blk["ln1_b"],
                        blk["w_qkv"], blk["b_qkv"])             # (B*T, 3C)
        att = causal_attention(qkv.reshape(B, T, 3 * C))        # (B, T, C)
        x2 = matmul_residual(att.reshape(B * T, C),
                             blk["wo"], blk["bo"], x2)          # proj + residual
        # (dropout: eval-mode identity)

        # --- feed-forward (pre-norm), fully fused (LN2, w1, ReLU, w2, +res) --
        x2 = ln_ffn(x2, blk["ln2_g"], blk["ln2_b"],
                    blk["w1"], blk["b1"], blk["w2"], blk["b2"])

    # final LN fused into the lm head; output padded to 128 lanes, then sliced
    logits = ln_matmul(x2, params["lnf_g"], params["lnf_b"],
                       params["w_lm_pad"], params["b_lm_pad"])  # (B*T, 128)
    logits = logits[:, :vocab_size].astype(jnp.float32).reshape(B, T, vocab_size)

    # TODO(synk): cross-entropy loss path (targets != None) not kernelized;
    # reference returns loss=None when targets is None, which is what we do.
    return logits, None


# =============================== main ========================================

if __name__ == "__main__":
    key = jax.random.PRNGKey(0)
    pkey, ikey = jax.random.split(key)

    params = init_params(pkey)

    B, T = 2, 16   # small sequence, T <= block_size
    idx = jax.random.randint(ikey, (B, T), 0, vocab_size, dtype=jnp.int32)

    fwd = jax.jit(forward)
    logits, loss = fwd(params, idx)
    logits = jax.block_until_ready(logits)

    assert logits.shape == (B, T, vocab_size)
    assert loss is None
    print("KERNEL_OK")
</pallas_src>

<mosaic_0001>
module attributes {stable_mosaic.version = 11 : i64} {
  func.func @ln_matmul_kernel(%arg0: i32, %arg1: memref<32x384xbf16, #tpu.memory_space<vmem>>, %arg2: memref<1x384xf32, #tpu.memory_space<vmem>>, %arg3: memref<1x384xf32, #tpu.memory_space<vmem>>, %arg4: memref<384x1152xbf16, #tpu.memory_space<vmem>>, %arg5: memref<1x1152xf32, #tpu.memory_space<vmem>>, %arg6: memref<32x1152xbf16, #tpu.memory_space<vmem>>) attributes {dimension_semantics = [#tpu.dimension_semantics<parallel>], iteration_bounds = array<i64: 1>, scalar_prefetch = 0 : i64, scratch_operands = 0 : i64, tpu.core_type = #tpu.core_type<tc>, window_params = [{transform_indices = @transform_0, window_bounds = array<i64: 32, 384>}, {pipeline_mode = #tpu.pipeline_mode<synchronous>, transform_indices = @transform_1, window_bounds = array<i64: 1, 384>}, {pipeline_mode = #tpu.pipeline_mode<synchronous>, transform_indices = @transform_2, window_bounds = array<i64: 1, 384>}, {pipeline_mode = #tpu.pipeline_mode<synchronous>, transform_indices = @transform_3, window_bounds = array<i64: 384, 1152>}, {pipeline_mode = #tpu.pipeline_mode<synchronous>, transform_indices = @transform_4, window_bounds = array<i64: 1, 1152>}, {transform_indices = @transform_5, window_bounds = array<i64: 32, 1152>}]} {
    %c0 = arith.constant 0 : index
    %c0_0 = arith.constant 0 : index
    %0 = vector.load %arg1[%c0, %c0_0] : memref<32x384xbf16, #tpu.memory_space<vmem>>, vector<32x384xbf16>
    %1 = arith.extf %0 : vector<32x384xbf16> to vector<32x384xf32>
    %cst = arith.constant dense<0.000000e+00> : vector<32xf32>
    %2 = vector.multi_reduction <add>, %1, %cst [1] : vector<32x384xf32> to vector<32xf32>
    %3 = vector.shape_cast %2 : vector<32xf32> to vector<32x1xf32>
    %cst_1 = arith.constant 3.840000e+02 : f32
    %4 = vector.broadcast %cst_1 : f32 to vector<32x1xf32>
    %5 = arith.divf %3, %4 : vector<32x1xf32>
    %6 = vector.broadcast %5 : vector<32x1xf32> to vector<32x384xf32>
    %7 = arith.subf %1, %6 : vector<32x384xf32>
    %8 = arith.mulf %7, %7 : vector<32x384xf32>
    %cst_2 = arith.constant dense<0.000000e+00> : vector<32xf32>
    %9 = vector.multi_reduction <add>, %8, %cst_2 [1] : vector<32x384xf32> to vector<32xf32>
    %10 = vector.shape_cast %9 : vector<32xf32> to vector<32x1xf32>
    %cst_3 = arith.constant 3.840000e+02 : f32
    %11 = vector.broadcast %cst_3 : f32 to vector<32x1xf32>
    %12 = arith.divf %10, %11 : vector<32x1xf32>
    %13 = vector.broadcast %5 : vector<32x1xf32> to vector<32x384xf32>
    %14 = arith.subf %1, %13 : vector<32x384xf32>
    %cst_4 = arith.constant 9.99999974E-6 : f32
    %15 = vector.broadcast %cst_4 : f32 to vector<32x1xf32>
    %16 = arith.addf %12, %15 : vector<32x1xf32>
    %17 = math.rsqrt %16 : vector<32x1xf32>
    %18 = vector.broadcast %17 : vector<32x1xf32> to vector<32x384xf32>
    %19 = arith.mulf %14, %18 : vector<32x384xf32>
    %c0_5 = arith.constant 0 : index
    %c0_6 = arith.constant 0 : index
    %20 = vector.load %arg2[%c0_5, %c0_6] : memref<1x384xf32, #tpu.memory_space<vmem>>, vector<1x384xf32>
    %21 = vector.broadcast %20 : vector<1x384xf32> to vector<32x384xf32>
    %22 = arith.mulf %19, %21 : vector<32x384xf32>
    %c0_7 = arith.constant 0 : index
    %c0_8 = arith.constant 0 : index
    %23 = vector.load %arg3[%c0_7, %c0_8] : memref<1x384xf32, #tpu.memory_space<vmem>>, vector<1x384xf32>
    %24 = vector.broadcast %23 : vector<1x384xf32> to vector<32x384xf32>
    %25 = arith.addf %22, %24 : vector<32x384xf32>
    %26 = arith.truncf %25 : vector<32x384xf32> to vector<32x384xbf16>
    %c0_9 = arith.constant 0 : index
    %c0_10 = arith.constant 0 : index
    %27 = vector.load %arg4[%c0_9, %c0_10] : memref<384x1152xbf16, #tpu.memory_space<vmem>>, vector<384x1152xbf16>
    %cst_11 = arith.constant dense<0.000000e+00> : vector<32x1152xf32>
    %28 = tpu.matmul %26, %27, %cst_11 {dimension_numbers = #tpu.dot_dimension_numbers<[1], [0], [0], [1], [0, 0, 1, 1], [], []>} : vector<32x384xbf16>, vector<384x1152xbf16>, vector<32x1152xf32> -> vector<32x1152xf32>
    %c0_12 = arith.constant 0 : index
    %c0_13 = arith.constant 0 : index
    %29 = vector.load %arg5[%c0_12, %c0_13] : memref<1x1152xf32, #tpu.memory_space<vmem>>, vector<1x1152xf32>
    %30 = vector.broadcast %29 : vector<1x1152xf32> to vector<32x1152xf32>
    %31 = arith.addf %28, %30 : vector<32x1152xf32>
    %32 = arith.truncf %31 : vector<32x1152xf32> to vector<32x1152xbf16>
    %c0_14 = arith.constant 0 : index
    %c0_15 = arith.constant 0 : index
    %33 = vector.load %arg6[%c0_14, %c0_15] : memref<32x1152xbf16, #tpu.memory_space<vmem>>, vector<32x1152xbf16>
    tpu.vector_store %arg6[%c0_14, %c0_15], %32 {strides = array<i32>} : memref<32x1152xbf16, #tpu.memory_space<vmem>>, vector<32x1152xbf16>,
    return
  }
  func.func @transform_0(%arg0: i32) -> (i32, i32) {
    %c0_i32 = arith.constant 0 : i32
    %c0_i32_0 = arith.constant 0 : i32
    return %arg0, %c0_i32 : i32, i32
  }
  func.func @transform_1(%arg0: i32) -> (i32, i32) {
    %c0_i32 = arith.constant 0 : i32
    %c0_i32_0 = arith.constant 0 : i32
    %c0_i32_1 = arith.constant 0 : i32
    return %c0_i32, %c0_i32_0 : i32, i32
  }
  func.func @transform_2(%arg0: i32) -> (i32, i32) {
    %c0_i32 = arith.constant 0 : i32
    %c0_i32_0 = arith.constant 0 : i32
    %c0_i32_1 = arith.constant 0 : i32
    return %c0_i32, %c0_i32_0 : i32, i32
  }
  func.func @transform_3(%arg0: i32) -> (i32, i32) {
    %c0_i32 = arith.constant 0 : i32
    %c0_i32_0 = arith.constant 0 : i32
    %c0_i32_1 = arith.constant 0 : i32
    return %c0_i32, %c0_i32_0 : i32, i32
  }
  func.func @transform_4(%arg0: i32) -> (i32, i32) {
    %c0_i32 = arith.constant 0 : i32
    %c0_i32_0 = arith.constant 0 : i32
    %c0_i32_1 = arith.constant 0 : i32
    return %c0_i32, %c0_i32_0 : i32, i32
  }
  func.func @transform_5(%arg0: i32) -> (i32, i32) {
    %c0_i32 = arith.constant 0 : i32
    %c0_i32_0 = arith.constant 0 : i32
    return %arg0, %c0_i32 : i32, i32
  }
}

module attributes {stable_mosaic.version = 11 : i64} {
  func.func @matmul_residual_kernel(%arg0: i32, %arg1: memref<32x384xbf16, #tpu.memory_space<vmem>>, %arg2: memref<384x384xbf16, #tpu.memory_space<vmem>>, %arg3: memref<1x384xf32, #tpu.memory_space<vmem>>, %arg4: memref<32x384xbf16, #tpu.memory_space<vmem>>, %arg5: memref<32x384xbf16, #tpu.memory_space<vmem>>) attributes {dimension_semantics = [#tpu.dimension_semantics<parallel>], iteration_bounds = array<i64: 1>, scalar_prefetch = 0 : i64, scratch_operands = 0 : i64, tpu.core_type = #tpu.core_type<tc>, window_params = [{transform_indices = @transform_0, window_bounds = array<i64: 32, 384>}, {pipeline_mode = #tpu.pipeline_mode<synchronous>, transform_indices = @transform_1, window_bounds = array<i64: 384, 384>}, {pipeline_mode = #tpu.pipeline_mode<synchronous>, transform_indices = @transform_2, window_bounds = array<i64: 1, 384>}, {transform_indices = @transform_3, window_bounds = array<i64: 32, 384>}, {transform_indices = @transform_4, window_bounds = array<i64: 32, 384>}]} {
    %c0 = arith.constant 0 : index
    %c0_0 = arith.constant 0 : index
    %0 = vector.load %arg1[%c0, %c0_0] : memref<32x384xbf16, #tpu.memory_space<vmem>>, vector<32x384xbf16>
    %c0_1 = arith.constant 0 : index
    %c0_2 = arith.constant 0 : index
    %1 = vector.load %arg2[%c0_1, %c0_2] : memref<384x384xbf16, #tpu.memory_space<vmem>>, vector<384x384xbf16>
    %cst = arith.constant dense<0.000000e+00> : vector<32x384xf32>
    %2 = tpu.matmul %0, %1, %cst {dimension_numbers = #tpu.dot_dimension_numbers<[1], [0], [0], [1], [0, 0, 1, 1], [], []>} : vector<32x384xbf16>, vector<384x384xbf16>, vector<32x384xf32> -> vector<32x384xf32>
    %c0_3 = arith.constant 0 : index
    %c0_4 = arith.constant 0 : index
    %3 = vector.load %arg3[%c0_3, %c0_4] : memref<1x384xf32, #tpu.memory_space<vmem>>, vector<1x384xf32>
    %4 = vector.broadcast %3 : vector<1x384xf32> to vector<32x384xf32>
    %5 = arith.addf %2, %4 : vector<32x384xf32>
    %c0_5 = arith.constant 0 : index
    %c0_6 = arith.constant 0 : index
    %6 = vector.load %arg4[%c0_5, %c0_6] : memref<32x384xbf16, #tpu.memory_space<vmem>>, vector<32x384xbf16>
    %7 = arith.extf %6 : vector<32x384xbf16> to vector<32x384xf32>
    %8 = arith.addf %5, %7 : vector<32x384xf32>
    %9 = arith.truncf %8 : vector<32x384xf32> to vector<32x384xbf16>
    %c0_7 = arith.constant 0 : index
    %c0_8 = arith.constant 0 : index
    %10 = vector.load %arg5[%c0_7, %c0_8] : memref<32x384xbf16, #tpu.memory_space<vmem>>, vector<32x384xbf16>
    tpu.vector_store %arg5[%c0_7, %c0_8], %9 {strides = array<i32>} : memref<32x384xbf16, #tpu.memory_space<vmem>>, vector<32x384xbf16>,
    return
  }
  func.func @transform_0(%arg0: i32) -> (i32, i32) {
    %c0_i32 = arith.constant 0 : i32
    %c0_i32_0 = arith.constant 0 : i32
    return %arg0, %c0_i32 : i32, i32
  }
  func.func @transform_1(%arg0: i32) -> (i32, i32) {
    %c0_i32 = arith.constant 0 : i32
    %c0_i32_0 = arith.constant 0 : i32
    %c0_i32_1 = arith.constant 0 : i32
    return %c0_i32, %c0_i32_0 : i32, i32
  }
  func.func @transform_2(%arg0: i32) -> (i32, i32) {
    %c0_i32 = arith.constant 0 : i32
    %c0_i32_0 = arith.constant 0 : i32
    %c0_i32_1 = arith.constant 0 : i32
    return %c0_i32, %c0_i32_0 : i32, i32
  }
  func.func @transform_3(%arg0: i32) -> (i32, i32) {
    %c0_i32 = arith.constant 0 : i32
    %c0_i32_0 = arith.constant 0 : i32
    return %arg0, %c0_i32 : i32, i32
  }
  func.func @transform_4(%arg0: i32) -> (i32, i32) {
    %c0_i32 = arith.constant 0 : i32
    %c0_i32_0 = arith.constant 0 : i32
    return %arg0, %c0_i32 : i32, i32
  }
}

module attributes {stable_mosaic.version = 11 : i64} {
  func.func @attention_kernel(%arg0: i32, %arg1: memref<1x16x1152xbf16, #tpu.memory_space<vmem>>, %arg2: memref<1x16x384xbf16, #tpu.memory_space<vmem>>) attributes {dimension_semantics = [#tpu.dimension_semantics<parallel>], iteration_bounds = array<i64: 2>, scalar_prefetch = 0 : i64, scratch_operands = 0 : i64, tpu.core_type = #tpu.core_type<tc>, window_params = [{transform_indices = @transform_0, window_bounds = array<i64: 1, 16, 1152>}, {transform_indices = @transform_1, window_bounds = array<i64: 1, 16, 384>}]} {
    %c0 = arith.constant 0 : index
    %c0_0 = arith.constant 0 : index
    %c0_1 = arith.constant 0 : index
    %0 = vector.load %arg1[%c0, %c0_0, %c0_1] : memref<1x16x1152xbf16, #tpu.memory_space<vmem>>, vector<1x16x1152xbf16>
    %1 = vector.shape_cast %0 : vector<1x16x1152xbf16> to vector<16x1152xbf16>
    %2 = tpu.iota {dimensions = array<i32: 0>} : vector<16x16xi32>
    %3 = tpu.iota {dimensions = array<i32: 1>} : vector<16x16xi32>
    %4 = arith.cmpi sle, %3, %2 : vector<16x16xi32>
    %5 = vector.extract_strided_slice %1 {offsets = [0, 0], sizes = [16, 64], strides = [1, 1]} : vector<16x1152xbf16> to vector<16x64xbf16>
    %6 = vector.extract_strided_slice %1 {offsets = [0, 384], sizes = [16, 64], strides = [1, 1]} : vector<16x1152xbf16> to vector<16x64xbf16>
    %7 = vector.extract_strided_slice %1 {offsets = [0, 768], sizes = [16, 64], strides = [1, 1]} : vector<16x1152xbf16> to vector<16x64xbf16>
    %cst = arith.constant dense<0.000000e+00> : vector<16x16xf32>
    %8 = tpu.matmul %5, %6, %cst {dimension_numbers = #tpu.dot_dimension_numbers<[1], [1], [0], [0], [0, 0, 1, 0], [], []>} : vector<16x64xbf16>, vector<16x64xbf16>, vector<16x16xf32> -> vector<16x16xf32>
    %cst_2 = arith.constant 0.0510310382 : f32
    %9 = vector.broadcast %cst_2 : f32 to vector<16x16xf32>
    %10 = arith.mulf %8, %9 : vector<16x16xf32>
    %cst_3 = arith.constant 0xFF800000 : f32
    %11 = vector.broadcast %cst_3 : f32 to vector<16x16xf32>
    %12 = arith.select %4, %10, %11 : vector<16x16xi1>, vector<16x16xf32>
    %cst_4 = arith.constant dense<0xFF800000> : vector<16xf32>
    %13 = vector.multi_reduction <maximumf>, %12, %cst_4 [1] : vector<16x16xf32> to vector<16xf32>
    %14 = vector.shape_cast %13 : vector<16xf32> to vector<16x1xf32>
    %15 = vector.broadcast %14 : vector<16x1xf32> to vector<16x16xf32>
    %16 = arith.subf %12, %15 : vector<16x16xf32>
    %17 = math.exp %16 : vector<16x16xf32>
    %cst_5 = arith.constant dense<0.000000e+00> : vector<16xf32>
    %18 = vector.multi_reduction <add>, %17, %cst_5 [1] : vector<16x16xf32> to vector<16xf32>
    %19 = vector.shape_cast %18 : vector<16xf32> to vector<16x1xf32>
    %20 = tpu.reciprocal %19 {approx = true} : vector<16x1xf32> -> vector<16x1xf32>
    %21 = vector.broadcast %20 : vector<16x1xf32> to vector<16x16xf32>
    %22 = arith.mulf %17, %21 : vector<16x16xf32>
    %23 = arith.truncf %22 : vector<16x16xf32> to vector<16x16xbf16>
    %cst_6 = arith.constant dense<0.000000e+00> : vector<16x64xf32>
    %24 = tpu.matmul %23, %7, %cst_6 {dimension_numbers = #tpu.dot_dimension_numbers<[1], [0], [0], [1], [0, 0, 1, 1], [], []>} : vector<16x16xbf16>, vector<16x64xbf16>, vector<16x64xf32> -> vector<16x64xf32>
    %25 = vector.extract_strided_slice %1 {offsets = [0, 64], sizes = [16, 64], strides = [1, 1]} : vector<16x1152xbf16> to vector<16x64xbf16>
    %26 = vector.extract_strided_slice %1 {offsets = [0, 448], sizes = [16, 64], strides = [1, 1]} : vector<16x1152xbf16> to vector<16x64xbf16>
    %27 = vector.extract_strided_slice %1 {offsets = [0, 832], sizes = [16, 64], strides = [1, 1]} : vector<16x1152xbf16> to vector<16x64xbf16>
    %cst_7 = arith.constant dense<0.000000e+00> : vector<16x16xf32>
    %28 = tpu.matmul %25, %26, %cst_7 {dimension_numbers = #tpu.dot_dimension_numbers<[1], [1], [0], [0], [0, 0, 1, 0], [], []>} : vector<16x64xbf16>, vector<16x64xbf16>, vector<16x16xf32> -> vector<16x16xf32>
    %cst_8 = arith.constant 0.0510310382 : f32
    %29 = vector.broadcast %cst_8 : f32 to vector<16x16xf32>
    %30 = arith.mulf %28, %29 : vector<16x16xf32>
    %cst_9 = arith.constant 0xFF800000 : f32
    %31 = vector.broadcast %cst_9 : f32 to vector<16x16xf32>
    %32 = arith.select %4, %30, %31 : vector<16x16xi1>, vector<16x16xf32>
    %cst_10 = arith.constant dense<0xFF800000> : vector<16xf32>
    %33 = vector.multi_reduction <maximumf>, %32, %cst_10 [1] : vector<16x16xf32> to vector<16xf32>
    %34 = vector.shape_cast %33 : vector<16xf32> to vector<16x1xf32>
    %35 = vector.broadcast %34 : vector<16x1xf32> to vector<16x16xf32>
    %36 = arith.subf %32, %35 : vector<16x16xf32>
    %37 = math.exp %36 : vector<16x16xf32>
    %cst_11 = arith.constant dense<0.000000e+00> : vector<16xf32>
    %38 = vector.multi_reduction <add>, %37, %cst_11 [1] : vector<16x16xf32> to vector<16xf32>
    %39 = vector.shape_cast %38 : vector<16xf32> to vector<16x1xf32>
    %40 = tpu.reciprocal %39 {approx = true} : vector<16x1xf32> -> vector<16x1xf32>
    %41 = vector.broadcast %40 : vector<16x1xf32> to vector<16x16xf32>
    %42 = arith.mulf %37, %41 : vector<16x16xf32>
    %43 = arith.truncf %42 : vector<16x16xf32> to vector<16x16xbf16>
    %cst_12 = arith.constant dense<0.000000e+00> : vector<16x64xf32>
    %44 = tpu.matmul %43, %27, %cst_12 {dimension_numbers = #tpu.dot_dimension_numbers<[1], [0], [0], [1], [0, 0, 1, 1], [], []>} : vector<16x16xbf16>, vector<16x64xbf16>, vector<16x64xf32> -> vector<16x64xf32>
    %45 = vector.extract_strided_slice %1 {offsets = [0, 128], sizes = [16, 64], strides = [1, 1]} : vector<16x1152xbf16> to vector<16x64xbf16>
    %46 = vector.extract_strided_slice %1 {offsets = [0, 512], sizes = [16, 64], strides = [1, 1]} : vector<16x1152xbf16> to vector<16x64xbf16>
    %47 = vector.extract_strided_slice %1 {offsets = [0, 896], sizes = [16, 64], strides = [1, 1]} : vector<16x1152xbf16> to vector<16x64xbf16>
    %cst_13 = arith.constant dense<0.000000e+00> : vector<16x16xf32>
    %48 = tpu.matmul %45, %46, %cst_13 {dimension_numbers = #tpu.dot_dimension_numbers<[1], [1], [0], [0], [0, 0, 1, 0], [], []>} : vector<16x64xbf16>, vector<16x64xbf16>, vector<16x16xf32> -> vector<16x16xf32>
    %cst_14 = arith.constant 0.0510310382 : f32
    %49 = vector.broadcast %cst_14 : f32 to vector<16x16xf32>
    %50 = arith.mulf %48, %49 : vector<16x16xf32>
    %cst_15 = arith.constant 0xFF800000 : f32
    %51 = vector.broadcast %cst_15 : f32 to vector<16x16xf32>
    %52 = arith.select %4, %50, %51 : vector<16x16xi1>, vector<16x16xf32>
    %cst_16 = arith.constant dense<0xFF800000> : vector<16xf32>
    %53 = vector.multi_reduction <maximumf>, %52, %cst_16 [1] : vector<16x16xf32> to vector<16xf32>
    %54 = vector.shape_cast %53 : vector<16xf32> to vector<16x1xf32>
    %55 = vector.broadcast %54 : vector<16x1xf32> to vector<16x16xf32>
    %56 = arith.subf %52, %55 : vector<16x16xf32>
    %57 = math.exp %56 : vector<16x16xf32>
    %cst_17 = arith.constant dense<0.000000e+00> : vector<16xf32>
    %58 = vector.multi_reduction <add>, %57, %cst_17 [1] : vector<16x16xf32> to vector<16xf32>
    %59 = vector.shape_cast %58 : vector<16xf32> to vector<16x1xf32>
    %60 = tpu.reciprocal %59 {approx = true} : vector<16x1xf32> -> vector<16x1xf32>
    %61 = vector.broadcast %60 : vector<16x1xf32> to vector<16x16xf32>
    %62 = arith.mulf %57, %61 : vector<16x16xf32>
    %63 = arith.truncf %62 : vector<16x16xf32> to vector<16x16xbf16>
    %cst_18 = arith.constant dense<0.000000e+00> : vector<16x64xf32>
    %64 = tpu.matmul %63, %47, %cst_18 {dimension_numbers = #tpu.dot_dimension_numbers<[1], [0], [0], [1], [0, 0, 1, 1], [], []>} : vector<16x16xbf16>, vector<16x64xbf16>, vector<16x64xf32> -> vector<16x64xf32>
    %65 = vector.extract_strided_slice %1 {offsets = [0, 192], sizes = [16, 64], strides = [1, 1]} : vector<16x1152xbf16> to vector<16x64xbf16>
    %66 = vector.extract_strided_slice %1 {offsets = [0, 576], sizes = [16, 64], strides = [1, 1]} : vector<16x1152xbf16> to vector<16x64xbf16>
    %67 = vector.extract_strided_slice %1 {offsets = [0, 960], sizes = [16, 64], strides = [1, 1]} : vector<16x1152xbf16> to vector<16x64xbf16>
    %cst_19 = arith.constant dense<0.000000e+00> : vector<16x16xf32>
    %68 = tpu.matmul %65, %66, %cst_19 {dimension_numbers = #tpu.dot_dimension_numbers<[1], [1], [0], [0], [0, 0, 1, 0], [], []>} : vector<16x64xbf16>, vector<16x64xbf16>, vector<16x16xf32> -> vector<16x16xf32>
    %cst_20 = arith.constant 0.0510310382 : f32
    %69 = vector.broadcast %cst_20 : f32 to vector<16x16xf32>
    %70 = arith.mulf %68, %69 : vector<16x16xf32>
    %cst_21 = arith.constant 0xFF800000 : f32
    %71 = vector.broadcast %cst_21 : f32 to vector<16x16xf32>
    %72 = arith.select %4, %70, %71 : vector<16x16xi1>, vector<16x16xf32>
    %cst_22 = arith.constant dense<0xFF800000> : vector<16xf32>
    %73 = vector.multi_reduction <maximumf>, %72, %cst_22 [1] : vector<16x16xf32> to vector<16xf32>
    %74 = vector.shape_cast %73 : vector<16xf32> to vector<16x1xf32>
    %75 = vector.broadcast %74 : vector<16x1xf32> to vector<16x16xf32>
    %76 = arith.subf %72, %75 : vector<16x16xf32>
    %77 = math.exp %76 : vector<16x16xf32>
    %cst_23 = arith.constant dense<0.000000e+00> : vector<16xf32>
    %78 = vector.multi_reduction <add>, %77, %cst_23 [1] : vector<16x16xf32> to vector<16xf32>
    %79 = vector.shape_cast %78 : vector<16xf32> to vector<16x1xf32>
    %80 = tpu.reciprocal %79 {approx = true} : vector<16x1xf32> -> vector<16x1xf32>
    %81 = vector.broadcast %80 : vector<16x1xf32> to vector<16x16xf32>
    %82 = arith.mulf %77, %81 : vector<16x16xf32>
    %83 = arith.truncf %82 : vector<16x16xf32> to vector<16x16xbf16>
    %cst_24 = arith.constant dense<0.000000e+00> : vector<16x64xf32>
    %84 = tpu.matmul %83, %67, %cst_24 {dimension_numbers = #tpu.dot_dimension_numbers<[1], [0], [0], [1], [0, 0, 1, 1], [], []>} : vector<16x16xbf16>, vector<16x64xbf16>, vector<16x64xf32> -> vector<16x64xf32>
    %85 = vector.extract_strided_slice %1 {offsets = [0, 256], sizes = [16, 64], strides = [1, 1]} : vector<16x1152xbf16> to vector<16x64xbf16>
    %86 = vector.extract_strided_slice %1 {offsets = [0, 640], sizes = [16, 64], strides = [1, 1]} : vector<16x1152xbf16> to vector<16x64xbf16>
    %87 = vector.extract_strided_slice %1 {offsets = [0, 1024], sizes = [16, 64], strides = [1, 1]} : vector<16x1152xbf16> to vector<16x64xbf16>
    %cst_25 = arith.constant dense<0.000000e+00> : vector<16x16xf32>
    %88 = tpu.matmul %85, %86, %cst_25 {dimension_numbers = #tpu.dot_dimension_numbers<[1], [1], [0], [0], [0, 0, 1, 0], [], []>} : vector<16x64xbf16>, vector<16x64xbf16>, vector<16x16xf32> -> vector<16x16xf32>
    %cst_26 = arith.constant 0.0510310382 : f32
    %89 = vector.broadcast %cst_26 : f32 to vector<16x16xf32>
    %90 = arith.mulf %88, %89 : vector<16x16xf32>
    %cst_27 = arith.constant 0xFF800000 : f32
    %91 = vector.broadcast %cst_27 : f32 to vector<16x16xf32>
    %92 = arith.select %4, %90, %91 : vector<16x16xi1>, vector<16x16xf32>
    %cst_28 = arith.constant dense<0xFF800000> : vector<16xf32>
    %93 = vector.multi_reduction <maximumf>, %92, %cst_28 [1] : vector<16x16xf32> to vector<16xf32>
    %94 = vector.shape_cast %93 : vector<16xf32> to vector<16x1xf32>
    %95 = vector.broadcast %94 : vector<16x1xf32> to vector<16x16xf32>
    %96 = arith.subf %92, %95 : vector<16x16xf32>
    %97 = math.exp %96 : vector<16x16xf32>
    %cst_29 = arith.constant dense<0.000000e+00> : vector<16xf32>
    %98 = vector.multi_reduction <add>, %97, %cst_29 [1] : vector<16x16xf32> to vector<16xf32>
    %99 = vector.shape_cast %98 : vector<16xf32> to vector<16x1xf32>
    %100 = tpu.reciprocal %99 {approx = true} : vector<16x1xf32> -> vector<16x1xf32>
    %101 = vector.broadcast %100 : vector<16x1xf32> to vector<16x16xf32>
    %102 = arith.mulf %97, %101 : vector<16x16xf32>
    %103 = arith.truncf %102 : vector<16x16xf32> to vector<16x16xbf16>
    %cst_30 = arith.constant dense<0.000000e+00> : vector<16x64xf32>
    %104 = tpu.matmul %103, %87, %cst_30 {dimension_numbers = #tpu.dot_dimension_numbers<[1], [0], [0], [1], [0, 0, 1, 1], [], []>} : vector<16x16xbf16>, vector<16x64xbf16>, vector<16x64xf32> -> vector<16x64xf32>
    %105 = vector.extract_strided_slice %1 {offsets = [0, 320], sizes = [16, 64], strides = [1, 1]} : vector<16x1152xbf16> to vector<16x64xbf16>
    %106 = vector.extract_strided_slice %1 {offsets = [0, 704], sizes = [16, 64], strides = [1, 1]} : vector<16x1152xbf16> to vector<16x64xbf16>
    %107 = vector.extract_strided_slice %1 {offsets = [0, 1088], sizes = [16, 64], strides = [1, 1]} : vector<16x1152xbf16> to vector<16x64xbf16>
    %cst_31 = arith.constant dense<0.000000e+00> : vector<16x16xf32>
    %108 = tpu.matmul %105, %106, %cst_31 {dimension_numbers = #tpu.dot_dimension_numbers<[1], [1], [0], [0], [0, 0, 1, 0], [], []>} : vector<16x64xbf16>, vector<16x64xbf16>, vector<16x16xf32> -> vector<16x16xf32>
    %cst_32 = arith.constant 0.0510310382 : f32
    %109 = vector.broadcast %cst_32 : f32 to vector<16x16xf32>
    %110 = arith.mulf %108, %109 : vector<16x16xf32>
    %cst_33 = arith.constant 0xFF800000 : f32
    %111 = vector.broadcast %cst_33 : f32 to vector<16x16xf32>
    %112 = arith.select %4, %110, %111 : vector<16x16xi1>, vector<16x16xf32>
    %cst_34 = arith.constant dense<0xFF800000> : vector<16xf32>
    %113 = vector.multi_reduction <maximumf>, %112, %cst_34 [1] : vector<16x16xf32> to vector<16xf32>
    %114 = vector.shape_cast %113 : vector<16xf32> to vector<16x1xf32>
    %115 = vector.broadcast %114 : vector<16x1xf32> to vector<16x16xf32>
    %116 = arith.subf %112, %115 : vector<16x16xf32>
    %117 = math.exp %116 : vector<16x16xf32>
    %cst_35 = arith.constant dense<0.000000e+00> : vector<16xf32>
    %118 = vector.multi_reduction <add>, %117, %cst_35 [1] : vector<16x16xf32> to vector<16xf32>
    %119 = vector.shape_cast %118 : vector<16xf32> to vector<16x1xf32>
    %120 = tpu.reciprocal %119 {approx = true} : vector<16x1xf32> -> vector<16x1xf32>
    %121 = vector.broadcast %120 : vector<16x1xf32> to vector<16x16xf32>
    %122 = arith.mulf %117, %121 : vector<16x16xf32>
    %123 = arith.truncf %122 : vector<16x16xf32> to vector<16x16xbf16>
    %cst_36 = arith.constant dense<0.000000e+00> : vector<16x64xf32>
    %124 = tpu.matmul %123, %107, %cst_36 {dimension_numbers = #tpu.dot_dimension_numbers<[1], [0], [0], [1], [0, 0, 1, 1], [], []>} : vector<16x16xbf16>, vector<16x64xbf16>, vector<16x64xf32> -> vector<16x64xf32>
    %125 = tpu.concatenate %24, %44, %64, %84, %104, %124 in 1 : vector<16x64xf32>, vector<16x64xf32>, vector<16x64xf32>, vector<16x64xf32>, vector<16x64xf32>, vector<16x64xf32> -> vector<16x384xf32>
    %126 = arith.truncf %125 : vector<16x384xf32> to vector<16x384xbf16>
    %c0_37 = arith.constant 0 : index
    %c0_38 = arith.constant 0 : index
    %c0_39 = arith.constant 0 : index
    %127 = vector.load %arg2[%c0_37, %c0_38, %c0_39] : memref<1x16x384xbf16, #tpu.memory_space<vmem>>, vector<1x16x384xbf16>
    %128 = vector.shape_cast %127 : vector<1x16x384xbf16> to vector<16x384xbf16>
    %129 = vector.shape_cast %126 : vector<16x384xbf16> to vector<1x16x384xbf16>
    tpu.vector_store %arg2[%c0_37, %c0_38, %c0_39], %129 {strides = array<i32>} : memref<1x16x384xbf16, #tpu.memory_space<vmem>>, vector<1x16x384xbf16>,
    return
  }
  func.func @transform_0(%arg0: i32) -> (i32, i32, i32) {
    %c0_i32 = arith.constant 0 : i32
    %c0_i32_0 = arith.constant 0 : i32
    %c0_i32_1 = arith.constant 0 : i32
    return %arg0, %c0_i32, %c0_i32_0 : i32, i32, i32
  }
  func.func @transform_1(%arg0: i32) -> (i32, i32, i32) {
    %c0_i32 = arith.constant 0 : i32
    %c0_i32_0 = arith.constant 0 : i32
    %c0_i32_1 = arith.constant 0 : i32
    return %arg0, %c0_i32, %c0_i32_0 : i32, i32, i32
  }
}

module attributes {stable_mosaic.version = 11 : i64} {
  func.func @ln_ffn_kernel(%arg0: i32, %arg1: memref<32x384xbf16, #tpu.memory_space<vmem>>, %arg2: memref<1x384xf32, #tpu.memory_space<vmem>>, %arg3: memref<1x384xf32, #tpu.memory_space<vmem>>, %arg4: memref<384x1536xbf16, #tpu.memory_space<vmem>>, %arg5: memref<1x1536xf32, #tpu.memory_space<vmem>>, %arg6: memref<1536x384xbf16, #tpu.memory_space<vmem>>, %arg7: memref<1x384xf32, #tpu.memory_space<vmem>>, %arg8: memref<32x384xbf16, #tpu.memory_space<vmem>>) attributes {dimension_semantics = [#tpu.dimension_semantics<parallel>], iteration_bounds = array<i64: 1>, scalar_prefetch = 0 : i64, scratch_operands = 0 : i64, tpu.core_type = #tpu.core_type<tc>, window_params = [{transform_indices = @transform_0, window_bounds = array<i64: 32, 384>}, {pipeline_mode = #tpu.pipeline_mode<synchronous>, transform_indices = @transform_1, window_bounds = array<i64: 1, 384>}, {pipeline_mode = #tpu.pipeline_mode<synchronous>, transform_indices = @transform_2, window_bounds = array<i64: 1, 384>}, {pipeline_mode = #tpu.pipeline_mode<synchronous>, transform_indices = @transform_3, window_bounds = array<i64: 384, 1536>}, {pipeline_mode = #tpu.pipeline_mode<synchronous>, transform_indices = @transform_4, window_bounds = array<i64: 1, 1536>}, {pipeline_mode = #tpu.pipeline_mode<synchronous>, transform_indices = @transform_5, window_bounds = array<i64: 1536, 384>}, {pipeline_mode = #tpu.pipeline_mode<synchronous>, transform_indices = @transform_6, window_bounds = array<i64: 1, 384>}, {transform_indices = @transform_7, window_bounds = array<i64: 32, 384>}]} {
    %c0 = arith.constant 0 : index
    %c0_0 = arith.constant 0 : index
    %0 = vector.load %arg1[%c0, %c0_0] : memref<32x384xbf16, #tpu.memory_space<vmem>>, vector<32x384xbf16>
    %1 = arith.extf %0 : vector<32x384xbf16> to vector<32x384xf32>
    %cst = arith.constant dense<0.000000e+00> : vector<32xf32>
    %2 = vector.multi_reduction <add>, %1, %cst [1] : vector<32x384xf32> to vector<32xf32>
    %3 = vector.shape_cast %2 : vector<32xf32> to vector<32x1xf32>
    %cst_1 = arith.constant 3.840000e+02 : f32
    %4 = vector.broadcast %cst_1 : f32 to vector<32x1xf32>
    %5 = arith.divf %3, %4 : vector<32x1xf32>
    %6 = vector.broadcast %5 : vector<32x1xf32> to vector<32x384xf32>
    %7 = arith.subf %1, %6 : vector<32x384xf32>
    %8 = arith.mulf %7, %7 : vector<32x384xf32>
    %cst_2 = arith.constant dense<0.000000e+00> : vector<32xf32>
    %9 = vector.multi_reduction <add>, %8, %cst_2 [1] : vector<32x384xf32> to vector<32xf32>
    %10 = vector.shape_cast %9 : vector<32xf32> to vector<32x1xf32>
    %cst_3 = arith.constant 3.840000e+02 : f32
    %11 = vector.broadcast %cst_3 : f32 to vector<32x1xf32>
    %12 = arith.divf %10, %11 : vector<32x1xf32>
    %13 = vector.broadcast %5 : vector<32x1xf32> to vector<32x384xf32>
    %14 = arith.subf %1, %13 : vector<32x384xf32>
    %cst_4 = arith.constant 9.99999974E-6 : f32
    %15 = vector.broadcast %cst_4 : f32 to vector<32x1xf32>
    %16 = arith.addf %12, %15 : vector<32x1xf32>
    %17 = math.rsqrt %16 : vector<32x1xf32>
    %18 = vector.broadcast %17 : vector<32x1xf32> to vector<32x384xf32>
    %19 = arith.mulf %14, %18 : vector<32x384xf32>
    %c0_5 = arith.constant 0 : index
    %c0_6 = arith.constant 0 : index
    %20 = vector.load %arg2[%c0_5, %c0_6] : memref<1x384xf32, #tpu.memory_space<vmem>>, vector<1x384xf32>
    %21 = vector.broadcast %20 : vector<1x384xf32> to vector<32x384xf32>
    %22 = arith.mulf %19, %21 : vector<32x384xf32>
    %c0_7 = arith.constant 0 : index
    %c0_8 = arith.constant 0 : index
    %23 = vector.load %arg3[%c0_7, %c0_8] : memref<1x384xf32, #tpu.memory_space<vmem>>, vector<1x384xf32>
    %24 = vector.broadcast %23 : vector<1x384xf32> to vector<32x384xf32>
    %25 = arith.addf %22, %24 : vector<32x384xf32>
    %26 = arith.truncf %25 : vector<32x384xf32> to vector<32x384xbf16>
    %c0_9 = arith.constant 0 : index
    %c0_10 = arith.constant 0 : index
    %27 = vector.load %arg4[%c0_9, %c0_10] : memref<384x1536xbf16, #tpu.memory_space<vmem>>, vector<384x1536xbf16>
    %cst_11 = arith.constant dense<0.000000e+00> : vector<32x1536xf32>
    %28 = tpu.matmul %26, %27, %cst_11 {dimension_numbers = #tpu.dot_dimension_numbers<[1], [0], [0], [1], [0, 0, 1, 1], [], []>} : vector<32x384xbf16>, vector<384x1536xbf16>, vector<32x1536xf32> -> vector<32x1536xf32>
    %c0_12 = arith.constant 0 : index
    %c0_13 = arith.constant 0 : index
    %29 = vector.load %arg5[%c0_12, %c0_13] : memref<1x1536xf32, #tpu.memory_space<vmem>>, vector<1x1536xf32>
    %30 = vector.broadcast %29 : vector<1x1536xf32> to vector<32x1536xf32>
    %31 = arith.addf %28, %30 : vector<32x1536xf32>
    %cst_14 = arith.constant 0.000000e+00 : f32
    %32 = vector.broadcast %cst_14 : f32 to vector<32x1536xf32>
    %33 = arith.maximumf %31, %32 : vector<32x1536xf32>
    %34 = arith.truncf %33 : vector<32x1536xf32> to vector<32x1536xbf16>
    %c0_15 = arith.constant 0 : index
    %c0_16 = arith.constant 0 : index
    %35 = vector.load %arg6[%c0_15, %c0_16] : memref<1536x384xbf16, #tpu.memory_space<vmem>>, vector<1536x384xbf16>
    %cst_17 = arith.constant dense<0.000000e+00> : vector<32x384xf32>
    %36 = tpu.matmul %34, %35, %cst_17 {dimension_numbers = #tpu.dot_dimension_numbers<[1], [0], [0], [1], [0, 0, 1, 1], [], []>} : vector<32x1536xbf16>, vector<1536x384xbf16>, vector<32x384xf32> -> vector<32x384xf32>
    %c0_18 = arith.constant 0 : index
    %c0_19 = arith.constant 0 : index
    %37 = vector.load %arg7[%c0_18, %c0_19] : memref<1x384xf32, #tpu.memory_space<vmem>>, vector<1x384xf32>
    %38 = vector.broadcast %37 : vector<1x384xf32> to vector<32x384xf32>
    %39 = arith.addf %36, %38 : vector<32x384xf32>
    %40 = arith.addf %39, %1 : vector<32x384xf32>
    %41 = arith.truncf %40 : vector<32x384xf32> to vector<32x384xbf16>
    %c0_20 = arith.constant 0 : index
    %c0_21 = arith.constant 0 : index
    %42 = vector.load %arg8[%c0_20, %c0_21] : memref<32x384xbf16, #tpu.memory_space<vmem>>, vector<32x384xbf16>
    tpu.vector_store %arg8[%c0_20, %c0_21], %41 {strides = array<i32>} : memref<32x384xbf16, #tpu.memory_space<vmem>>, vector<32x384xbf16>,
    return
  }
  func.func @transform_0(%arg0: i32) -> (i32, i32) {
    %c0_i32 = arith.constant 0 : i32
    %c0_i32_0 = arith.constant 0 : i32
    return %arg0, %c0_i32 : i32, i32
  }
  func.func @transform_1(%arg0: i32) -> (i32, i32) {
    %c0_i32 = arith.constant 0 : i32
    %c0_i32_0 = arith.constant 0 : i32
    %c0_i32_1 = arith.constant 0 : i32
    return %c0_i32, %c0_i32_0 : i32, i32
  }
  func.func @transform_2(%arg0: i32) -> (i32, i32) {
    %c0_i32 = arith.constant 0 : i32
    %c0_i32_0 = arith.constant 0 : i32
    %c0_i32_1 = arith.constant 0 : i32
    return %c0_i32, %c0_i32_0 : i32, i32
  }
  func.func @transform_3(%arg0: i32) -> (i32, i32) {
    %c0_i32 = arith.constant 0 : i32
    %c0_i32_0 = arith.constant 0 : i32
    %c0_i32_1 = arith.constant 0 : i32
    return %c0_i32, %c0_i32_0 : i32, i32
  }
  func.func @transform_4(%arg0: i32) -> (i32, i32) {
    %c0_i32 = arith.constant 0 : i32
    %c0_i32_0 = arith.constant 0 : i32
    %c0_i32_1 = arith.constant 0 : i32
    return %c0_i32, %c0_i32_0 : i32, i32
  }
  func.func @transform_5(%arg0: i32) -> (i32, i32) {
    %c0_i32 = arith.constant 0 : i32
    %c0_i32_0 = arith.constant 0 : i32
    %c0_i32_1 = arith.constant 0 : i32
    return %c0_i32, %c0_i32_0 : i32, i32
  }
  func.func @transform_6(%arg0: i32) -> (i32, i32) {
    %c0_i32 = arith.constant 0 : i32
    %c0_i32_0 = arith.constant 0 : i32
    %c0_i32_1 = arith.constant 0 : i32
    return %c0_i32, %c0_i32_0 : i32, i32
  }
  func.func @transform_7(%arg0: i32) -> (i32, i32) {
    %c0_i32 = arith.constant 0 : i32
    %c0_i32_0 = arith.constant 0 : i32
    return %arg0, %c0_i32 : i32, i32
  }
}

module attributes {stable_mosaic.version = 11 : i64} {
  func.func @ln_matmul_kernel(%arg0: i32, %arg1: memref<32x384xbf16, #tpu.memory_space<vmem>>, %arg2: memref<1x384xf32, #tpu.memory_space<vmem>>, %arg3: memref<1x384xf32, #tpu.memory_space<vmem>>, %arg4: memref<384x128xbf16, #tpu.memory_space<vmem>>, %arg5: memref<1x128xf32, #tpu.memory_space<vmem>>, %arg6: memref<32x128xbf16, #tpu.memory_space<vmem>>) attributes {dimension_semantics = [#tpu.dimension_semantics<parallel>], iteration_bounds = array<i64: 1>, scalar_prefetch = 0 : i64, scratch_operands = 0 : i64, tpu.core_type = #tpu.core_type<tc>, window_params = [{transform_indices = @transform_0, window_bounds = array<i64: 32, 384>}, {pipeline_mode = #tpu.pipeline_mode<synchronous>, transform_indices = @transform_1, window_bounds = array<i64: 1, 384>}, {pipeline_mode = #tpu.pipeline_mode<synchronous>, transform_indices = @transform_2, window_bounds = array<i64: 1, 384>}, {pipeline_mode = #tpu.pipeline_mode<synchronous>, transform_indices = @transform_3, window_bounds = array<i64: 384, 128>}, {pipeline_mode = #tpu.pipeline_mode<synchronous>, transform_indices = @transform_4, window_bounds = array<i64: 1, 128>}, {transform_indices = @transform_5, window_bounds = array<i64: 32, 128>}]} {
    %c0 = arith.constant 0 : index
    %c0_0 = arith.constant 0 : index
    %0 = vector.load %arg1[%c0, %c0_0] : memref<32x384xbf16, #tpu.memory_space<vmem>>, vector<32x384xbf16>
    %1 = arith.extf %0 : vector<32x384xbf16> to vector<32x384xf32>
    %cst = arith.constant dense<0.000000e+00> : vector<32xf32>
    %2 = vector.multi_reduction <add>, %1, %cst [1] : vector<32x384xf32> to vector<32xf32>
    %3 = vector.shape_cast %2 : vector<32xf32> to vector<32x1xf32>
    %cst_1 = arith.constant 3.840000e+02 : f32
    %4 = vector.broadcast %cst_1 : f32 to vector<32x1xf32>
    %5 = arith.divf %3, %4 : vector<32x1xf32>
    %6 = vector.broadcast %5 : vector<32x1xf32> to vector<32x384xf32>
    %7 = arith.subf %1, %6 : vector<32x384xf32>
    %8 = arith.mulf %7, %7 : vector<32x384xf32>
    %cst_2 = arith.constant dense<0.000000e+00> : vector<32xf32>
    %9 = vector.multi_reduction <add>, %8, %cst_2 [1] : vector<32x384xf32> to vector<32xf32>
    %10 = vector.shape_cast %9 : vector<32xf32> to vector<32x1xf32>
    %cst_3 = arith.constant 3.840000e+02 : f32
    %11 = vector.broadcast %cst_3 : f32 to vector<32x1xf32>
    %12 = arith.divf %10, %11 : vector<32x1xf32>
    %13 = vector.broadcast %5 : vector<32x1xf32> to vector<32x384xf32>
    %14 = arith.subf %1, %13 : vector<32x384xf32>
    %cst_4 = arith.constant 9.99999974E-6 : f32
    %15 = vector.broadcast %cst_4 : f32 to vector<32x1xf32>
    %16 = arith.addf %12, %15 : vector<32x1xf32>
    %17 = math.rsqrt %16 : vector<32x1xf32>
    %18 = vector.broadcast %17 : vector<32x1xf32> to vector<32x384xf32>
    %19 = arith.mulf %14, %18 : vector<32x384xf32>
    %c0_5 = arith.constant 0 : index
    %c0_6 = arith.constant 0 : index
    %20 = vector.load %arg2[%c0_5, %c0_6] : memref<1x384xf32, #tpu.memory_space<vmem>>, vector<1x384xf32>
    %21 = vector.broadcast %20 : vector<1x384xf32> to vector<32x384xf32>
    %22 = arith.mulf %19, %21 : vector<32x384xf32>
    %c0_7 = arith.constant 0 : index
    %c0_8 = arith.constant 0 : index
    %23 = vector.load %arg3[%c0_7, %c0_8] : memref<1x384xf32, #tpu.memory_space<vmem>>, vector<1x384xf32>
    %24 = vector.broadcast %23 : vector<1x384xf32> to vector<32x384xf32>
    %25 = arith.addf %22, %24 : vector<32x384xf32>
    %26 = arith.truncf %25 : vector<32x384xf32> to vector<32x384xbf16>
    %c0_9 = arith.constant 0 : index
    %c0_10 = arith.constant 0 : index
    %27 = vector.load %arg4[%c0_9, %c0_10] : memref<384x128xbf16, #tpu.memory_space<vmem>>, vector<384x128xbf16>
    %cst_11 = arith.constant dense<0.000000e+00> : vector<32x128xf32>
    %28 = tpu.matmul %26, %27, %cst_11 {dimension_numbers = #tpu.dot_dimension_numbers<[1], [0], [0], [1], [0, 0, 1, 1], [], []>} : vector<32x384xbf16>, vector<384x128xbf16>, vector<32x128xf32> -> vector<32x128xf32>
    %c0_12 = arith.constant 0 : index
    %c0_13 = arith.constant 0 : index
    %29 = vector.load %arg5[%c0_12, %c0_13] : memref<1x128xf32, #tpu.memory_space<vmem>>, vector<1x128xf32>
    %30 = vector.broadcast %29 : vector<1x128xf32> to vector<32x128xf32>
    %31 = arith.addf %28, %30 : vector<32x128xf32>
    %32 = arith.truncf %31 : vector<32x128xf32> to vector<32x128xbf16>
    %c0_14 = arith.constant 0 : index
    %c0_15 = arith.constant 0 : index
    %33 = vector.load %arg6[%c0_14, %c0_15] : memref<32x128xbf16, #tpu.memory_space<vmem>>, vector<32x128xbf16>
    tpu.vector_store %arg6[%c0_14, %c0_15], %32 {strides = array<i32>} : memref<32x128xbf16, #tpu.memory_space<vmem>>, vector<32x128xbf16>,
    return
  }
  func.func @transform_0(%arg0: i32) -> (i32, i32) {
    %c0_i32 = arith.constant 0 : i32
    %c0_i32_0 = arith.constant 0 : i32
    return %arg0, %c0_i32 : i32, i32
  }
  func.func @transform_1(%arg0: i32) -> (i32, i32) {
    %c0_i32 = arith.constant 0 : i32
    %c0_i32_0 = arith.constant 0 : i32
    %c0_i32_1 = arith.constant 0 : i32
    return %c0_i32, %c0_i32_0 : i32, i32
  }
  func.func @transform_2(%arg0: i32) -> (i32, i32) {
    %c0_i32 = arith.constant 0 : i32
    %c0_i32_0 = arith.constant 0 : i32
    %c0_i32_1 = arith.constant 0 : i32
    return %c0_i32, %c0_i32_0 : i32, i32
  }
  func.func @transform_3(%arg0: i32) -> (i32, i32) {
    %c0_i32 = arith.constant 0 : i32
    %c0_i32_0 = arith.constant 0 : i32
    %c0_i32_1 = arith.constant 0 : i32
    return %c0_i32, %c0_i32_0 : i32, i32
  }
  func.func @transform_4(%arg0: i32) -> (i32, i32) {
    %c0_i32 = arith.constant 0 : i32
    %c0_i32_0 = arith.constant 0 : i32
    %c0_i32_1 = arith.constant 0 : i32
    return %c0_i32, %c0_i32_0 : i32, i32
  }
  func.func @transform_5(%arg0: i32) -> (i32, i32) {
    %c0_i32 = arith.constant 0 : i32
    %c0_i32_0 = arith.constant 0 : i32
    return %arg0, %c0_i32 : i32, i32
  }
}

</mosaic_0001>

<bundles_post_ra>
// kernel: forward.26
= control target key start
LH: loop header
LB: loop body
LE: loop exit
PB: predicated region body
PF: predicated region fallthrough
CT: control target
= control target key end

     0   :  { %s1259_s6 = smov 0   ;;  %s1469_s0 = inlined_call_operand.vmem [shape: bf16[2,16,1152], index: 0, kind: input, shape index: {}]   ;;  %s1470_s1 = inlined_call_operand.vmem [shape: bf16[2,16,384], index: 1, kind: output, shape index: {}]  }
   0x1 LB: > { %s1015_s7 = sadd.s32 4294967295, %s1244_s6   ;;  %p1019_p0 = scmp.ge.s32.totalorder %s1244_s6, 1  ;;  %s1244_s6 = sphi %s1259_s6, %s11_s6  }
   0x2   : > { %p87_p1 = scmp.lt.s32.totalorder %s1244_s6, 3 }
   0x4   : > { %p88_p2 = pnand %p1019_p0, %p87_p1 }
   0x5   : > { %p107_p3 = scmp.lt.s32.totalorder (!%p88_p2), %s1015_s7, 1  ;;  %s1248_s12 = smov (!%p88_p2), 64  }
   0x6   : > { %91 = sbr.rel (%p88_p2) target bundleno = 1421 (0x58d), region = 24 }
   0xb   : > { %v1246_v0 = vmov 0.0   ;;  %vm1247_vm0 = vmmov 0   ;;  %s1476_s7 = smov (!%p107_p3, %s1015_s7), 1  ;;  %vm145_vm1 = vcmask 523264   ;;  %v128_v4 = vlaneseq }
   0xc   : > { %1077 = vmatprep.subr.bf16.mxu0 %v1246_v0  ;;  %1079 = vmatprep.mubr.msk.bf16.mxu0 %vm1247_vm0, %v1246_v0  ;;  %s1149_s8 = smul.u32 72, %s1476_s7  ;;  %vm197_vm3 = vcmask 130048  }
   0xd   : > { %1083 = vmatprep.subr.bf16.mxu1 %v1246_v0  ;;  %1085 = vmatprep.mubr.msk.bf16.mxu1 %vm1247_vm0, %v1246_v0  ;;  %v129_v5 = vshrl.u32 %v128_v4, 7  ;;  %v132_v6 = vand.u32 127, %v128_v4  ;;  %s1150_s13 = smul.u32 24, %s1476_s7 }
   0xe   : > { %s1279_s11 = scalar_lea.vmem %s1469_s0, %s1149_s8 }
   0xf   : > { %v1177_v1 = vld [vmem:[%s1279_s11 + $0xc] ss:$36 sps:$4 sm:$0xff]   ;;  %v1179_v3 = vld [vmem:[%s1279_s11] ss:$36 sps:$4 sm:$0xff]   ;;  %vm1288_vm2 = vcmp.le.s32.totalorder %v132_v6, %v129_v5  ;;  %v130_v9 = vadd.s32 8, %v129_v5  ;;  %s116_s16 = scalar_lea.vmem %s1470_s1, %s1150_s13 }
  0x10   : > { %v150_v2 = vsel %vm145_vm1, %v1177_v1, 0  ;;  %v1184_v20 = vld [vmem:[%s1279_s11 + $0x14] ss:$36 sps:$4 sm:$0xff]   ;;  %v1183_v33 = vld [vmem:[%s1279_s11 + $0x4] ss:$36 sps:$4 sm:$0xff]  }
  0x11   : > { %1078 = vmatpush3.bf16.xpose.msra.mxu0 %v150_v2  ;;  %vm1295_vm4 = vcmp.le.s32.totalorder %v132_v6, %v130_v9  ;;  %v1308_v31 = vld [vmem:[%s1279_s11 + $0x18] ss:$36 sps:$4 sm:$0xff]   ;;  %v1181_v32 = vld [vmem:[%s1279_s11 + $0x10] ss:$36 sps:$4 sm:$0xff]   ;;  %v1185_v34 = vld [vmem:[%s1279_s11 + $0x8] ss:$36 sps:$4 sm:$0xff]  }
  0x12   : > { %1095 = vmatprep.subr.bf16.mxu0 %v1246_v0  ;;  %1084 = vmatpush3.bf16.msra.mxu1 %v1308_v31  ;;  %v408_v45 = vsel %vm145_vm1, %v1181_v32, 0  ;;  %v661_v49 = vsel %vm145_vm1, %v1184_v20, 0 }
  0x13   : > { %1089 = vmatprep.subr.bf16.mxu1 %v1246_v0 }
  0x18   : > { %1080 = vmatmul.mubr.msk.bf16.vlgmr.msra.gmra.mxu0 %vm145_vm1, %v1179_v3 }
  0x19   : > { %1097 = vmatprep.mubr.msk.bf16.mxu0 %vm1247_vm0, %v1246_v0 }
  0xd8   : > { %v186_v7 = vpop.f32.mrf.mxu0 }
  0xd9   : > { %v193_v10 = vmul.f32 0.05103104, %v186_v7 }
  0xda   : > { %v1081_v11 = vpop.f32.mrf.mxu0 }
  0xdb   : > { %v195_v12 = vsel %vm1288_vm2, %v193_v10, -inf }
  0xdc   : > { %v189_v13 = vpop.f32.mrf.mxu0  ;;  %v198_v14 = vsel %vm197_vm3, %v195_v12, -inf }
  0xdd   : > { %v194_v16 = vmul.f32 0.05103104, %v189_v13  ;;  %199 = vmax.xlane.f32.xlu0 %v198_v14 }
  0xde   : > { %v1082_v17 = vpop.f32.mrf.mxu0 }
  0xdf   : > { %v196_v18 = vsel %vm1295_vm4, %v194_v16, -inf }
  0xe0   : > { %v201_v19 = vsel %vm197_vm3, %v196_v18, -inf }
  0xe1   : > { %202 = vmax.xlane.f32.xlu0 %v201_v19 }
  0xf7   : > { %273 = vrot.lane.b32.xlu0 %v1177_v1, %s1248_s12 }
  0xfb   : > { %783 = vrot.lane.b32.xlu0 %v1184_v20, %s1248_s12 }
 0x166   : > { %v200_v21 = vpop.xlane.xlu0 %199 }
 0x167   : > { %v204_v22 = vsub.f32 %v195_v12, %v200_v21 }
 0x169   : > { %v206_v23 = vmul.f32 1.442695, %v204_v22 }
 0x16a   : > { %v203_v24 = vpop.xlane.xlu0 %202 }
 0x16b   : > { %1190 = vpow2.f32 %v206_v23  ;;  %v205_v25 = vsub.f32 %v196_v18, %v203_v24 }
 0x16d   : > { %v208_v26 = vmul.f32 1.442695, %v205_v25 }
 0x16e   : > { %v274_v39 = vpop.permute.xlu0 %273 }
 0x16f   : > { %1192 = vpow2.f32 %v208_v26  ;;  %v279_v42 = vsel %vm145_vm1, %v274_v39, 0 }
 0x172   : > { %v784_v50 = vpop.permute.xlu0 %783 }
 0x173   : > { %v789_v51 = vsel %vm145_vm1, %v784_v50, 0 }
 0x178   : > { %v1191_v27 = vpop.eup %1190 }
 0x179   : > { %v210_v28 = vsel %vm197_vm3, %v1191_v27, 0.0 }
 0x17a   : > { %211 = vadd.xlane.f32.xlu1 %v210_v28 }
 0x17c   : > { %v1193_v29 = vpop.eup %1192 }
 0x17d   : > { %v213_v30 = vsel %vm197_vm3, %v1193_v29, 0.0 }
 0x17e   : > { %214 = vadd.xlane.f32.xlu1 %v213_v30 }
 0x18f   : > { %271 = vrot.lane.b32.xlu1 %v1179_v3, %s1248_s12 }
 0x193   : > { %528 = vrot.lane.b32.xlu1 %v1181_v32, %s1248_s12 }
 0x197   : > { %526 = vrot.lane.b32.xlu1 %v1183_v33, %s1248_s12 }
 0x19b   : > { %781 = vrot.lane.b32.xlu1 %v1185_v34, %s1248_s12 }
 0x203   : > { %v212_v35 = vpop.xlane.xlu1 %211 }
 0x204   : > { %1194 = vrcp.f32 %v212_v35 }
 0x207   : > { %v215_v36 = vpop.xlane.xlu1 %214 }
 0x208   : > { %1196 = vrcp.f32 %v215_v36 }
 0x20b   : > { %v272_v44 = vpop.permute.xlu1 %271 }
 0x20f   : > { %v529_v46 = vpop.permute.xlu1 %528 }
 0x210   : > { %v534_v47 = vsel %vm145_vm1, %v529_v46, 0 }
 0x211   : > { %v1195_v37 = vpop.eup %1194 }
 0x212   : > { %v218_v40 = vmul.f32 %v1195_v37, %v1191_v27 }
 0x213   : > { %v527_v48 = vpop.permute.xlu1 %526 }
 0x215   : > { %v1197_v38 = vpop.eup %1196 }
 0x216   : > { %v219_v41 = vmul.f32 %v1197_v38, %v1193_v29 }
 0x217   : > { %v782_v52 = vpop.permute.xlu1 %781 }
 0x218   : > { %v220_v43 = vpack.c.bf16 %v219_v41, %v218_v40 }
 0x21a   : > { %1086 = vmatmul.mubr.msk.bf16.vlgmr.msra.gmra.mxu1 %vm197_vm3, %v220_v43 }
 0x21b   : > { %1090 = vmatpush3.bf16.xpose.msra.mxu1 %v279_v42  ;;  %1091 = vmatprep.mubr.msk.bf16.mxu1 %vm1247_vm0, %v1246_v0 }
 0x21c   : > { %1101 = vmatprep.subr.bf16.mxu1 %v1246_v0 }
 0x222   : > { %1092 = vmatmul.mubr.msk.bf16.vlgmr.msra.gmra.mxu1 %vm145_vm1, %v272_v44 }
 0x223   : > { %1102 = vmatpush3.bf16.xpose.msra.mxu1 %v408_v45  ;;  %1103 = vmatprep.mubr.msk.bf16.mxu1 %vm1247_vm0, %v1246_v0 }
 0x224   : > { %1113 = vmatprep.subr.bf16.mxu1 %v1246_v0 }
 0x22a   : > { %1104 = vmatmul.mubr.msk.bf16.vlgmr.msra.gmra.mxu1 %vm145_vm1, %v1183_v33 }
 0x22b   : > { %1114 = vmatpush3.bf16.xpose.msra.mxu1 %v534_v47  ;;  %1115 = vmatprep.mubr.msk.bf16.mxu1 %vm1247_vm0, %v1246_v0 }
 0x22c   : > { %1125 = vmatprep.subr.bf16.mxu1 %v1246_v0 }
 0x232   : > { %1116 = vmatmul.mubr.msk.bf16.vlgmr.msra.gmra.mxu1 %vm145_vm1, %v527_v48 }
 0x233   : > { %1126 = vmatpush3.bf16.xpose.msra.mxu1 %v661_v49  ;;  %1127 = vmatprep.mubr.msk.bf16.mxu1 %vm1247_vm0, %v1246_v0 }
 0x234   : > { %1137 = vmatprep.subr.bf16.mxu1 %v1246_v0 }
 0x23a   : > { %1128 = vmatmul.mubr.msk.bf16.vlgmr.msra.gmra.mxu1 %vm145_vm1, %v1185_v34 }
 0x23b   : > { %1138 = vmatpush3.bf16.xpose.msra.mxu1 %v789_v51  ;;  %1139 = vmatprep.mubr.msk.bf16.mxu1 %vm1247_vm0, %v1246_v0 }
 0x242   : > { %1140 = vmatmul.mubr.msk.bf16.vlgmr.msra.gmra.mxu1 %vm145_vm1, %v782_v52 }
 0x2da   : > { %v1344_v53 = vpop.f32.mrf.mxu1 }
 0x2dc   : > { %v1087_v54 = vpop.f32.mrf.mxu1 }
 0x2de   : > { %v1346_v55 = vpop.f32.mrf.mxu1 }
 0x2e0   : > { %v1088_v56 = vpop.f32.mrf.mxu1 }
 0x2e2   : > { %v315_v57 = vpop.f32.mrf.mxu1 }
 0x2e3   : > { %v322_v58 = vmul.f32 0.05103104, %v315_v57 }
 0x2e4   : > { %v1093_v59 = vpop.f32.mrf.mxu1 }
 0x2e5   : > { %v324_v60 = vsel %vm1288_vm2, %v322_v58, -inf }
 0x2e6   : > { %v318_v61 = vpop.f32.mrf.mxu1  ;;  %v326_v62 = vsel %vm197_vm3, %v324_v60, -inf }
 0x2e7   : > { %v323_v63 = vmul.f32 0.05103104, %v318_v61  ;;  %327 = vmax.xlane.f32.xlu0 %v326_v62 }
 0x2e8   : > { %v1094_v1 = vpop.f32.mrf.mxu1 }
 0x2e9   : > { %v325_v2 = vsel %vm1295_vm4, %v323_v63, -inf }
 0x2ea   : > { %v444_v3 = vpop.f32.mrf.mxu1  ;;  %v329_v4 = vsel %vm197_vm3, %v325_v2, -inf }
 0x2eb   : > { %v451_v5 = vmul.f32 0.05103104, %v444_v3  ;;  %330 = vmax.xlane.f32.xlu1 %v329_v4 }
 0x2ec   : > { %v1105_v6 = vpop.f32.mrf.mxu1 }
 0x2ed   : > { %v453_v7 = vsel %vm1288_vm2, %v451_v5, -inf }
 0x2ee   : > { %v447_v9 = vpop.f32.mrf.mxu1  ;;  %v455_v10 = vsel %vm197_vm3, %v453_v7, -inf }
 0x2ef   : > { %v452_v11 = vmul.f32 0.05103104, %v447_v9  ;;  %456 = vmax.xlane.f32.xlu0 %v455_v10 }
 0x2f0   : > { %v1106_v12 = vpop.f32.mrf.mxu1 }
 0x2f1   : > { %v454_v13 = vsel %vm1295_vm4, %v452_v11, -inf }
 0x2f2   : > { %v570_v14 = vpop.f32.mrf.mxu1  ;;  %v458_v16 = vsel %vm197_vm3, %v454_v13, -inf }
 0x2f3   : > { %v577_v17 = vmul.f32 0.05103104, %v570_v14  ;;  %459 = vmax.xlane.f32.xlu0 %v458_v16 }
 0x2f4   : > { %v1117_v18 = vpop.f32.mrf.mxu1 }
 0x2f5   : > { %v579_v19 = vsel %vm1288_vm2, %v577_v17, -inf }
 0x2f6   : > { %v573_v20 = vpop.f32.mrf.mxu1  ;;  %v581_v21 = vsel %vm197_vm3, %v579_v19, -inf }
 0x2f7   : > { %v578_v22 = vmul.f32 0.05103104, %v573_v20  ;;  %582 = vmax.xlane.f32.xlu0 %v581_v21 }
 0x2f8   : > { %v1118_v23 = vpop.f32.mrf.mxu1 }
 0x2f9   : > { %v580_v24 = vsel %vm1295_vm4, %v578_v22, -inf }
 0x2fa   : > { %v697_v25 = vpop.f32.mrf.mxu1  ;;  %v584_v26 = vsel %vm197_vm3, %v580_v24, -inf }
 0x2fb   : > { %v704_v27 = vmul.f32 0.05103104, %v697_v25  ;;  %585 = vmax.xlane.f32.xlu1 %v584_v26 }
 0x2fc   : > { %v1129_v28 = vpop.f32.mrf.mxu1 }
 0x2fd   : > { %v706_v29 = vsel %vm1288_vm2, %v704_v27, -inf }
 0x2fe   : > { %v700_v30 = vpop.f32.mrf.mxu1  ;;  %v708_v32 = vsel %vm197_vm3, %v706_v29, -inf }
 0x2ff   : > { %v705_v33 = vmul.f32 0.05103104, %v700_v30  ;;  %709 = vmax.xlane.f32.xlu0 %v708_v32 }
 0x300   : > { %v1130_v34 = vpop.f32.mrf.mxu1 }
 0x301   : > { %v707_v35 = vsel %vm1295_vm4, %v705_v33, -inf }
 0x302   : > { %v825_v36 = vpop.f32.mrf.mxu1  ;;  %v711_v37 = vsel %vm197_vm3, %v707_v35, -inf }
 0x303   : > { %v832_v38 = vmul.f32 0.05103104, %v825_v36  ;;  %712 = vmax.xlane.f32.xlu1 %v711_v37  ;;  %v1189_v37 = vld [vmem:[%s1279_s11 + $0x20] ss:$36 sps:$4 sm:$0xff]  }
 0x304   : > { %v1141_v39 = vpop.f32.mrf.mxu1 }
 0x305   : > { %v834_v40 = vsel %vm1288_vm2, %v832_v38, -inf  ;;  %v1188_v38 = vld [vmem:[%s1279_s11 + $0x1c] ss:$36 sps:$4 sm:$0xff]  }
 0x306   : > { %v828_v41 = vpop.f32.mrf.mxu1  ;;  %v836_v42 = vsel %vm197_vm3, %v834_v40, -inf }
 0x307   : > { %v833_v43 = vmul.f32 0.05103104, %v828_v41  ;;  %837 = vmax.xlane.f32.xlu0 %v836_v42 }
 0x308   : > { %v1142_v44 = vpop.f32.mrf.mxu1 }
 0x309   : > { %v835_v45 = vsel %vm1295_vm4, %v833_v43, -inf }
 0x30a   : > { %v839_v46 = vsel %vm197_vm3, %v835_v45, -inf }
 0x30b   : > { %840 = vmax.xlane.f32.xlu1 %v839_v46 }
 0x370   : > { %v328_v47 = vpop.xlane.xlu0 %327 }
 0x371   : > { %v332_v48 = vsub.f32 %v324_v60, %v328_v47 }
 0x373   : > { %v334_v49 = vmul.f32 1.442695, %v332_v48 }
 0x374   : > { %v331_v50 = vpop.xlane.xlu1 %330 }
 0x375   : > { %1198 = vpow2.f32 %v334_v49  ;;  %v333_v51 = vsub.f32 %v325_v2, %v331_v50 }
 0x377   : > { %v336_v8 = vmul.f32 1.442695, %v333_v51 }
 0x378   : > { %v457_v52 = vpop.xlane.xlu0 %456 }
 0x379   : > { %1200 = vpow2.f32 %v336_v8  ;;  %v461_v54 = vsub.f32 %v453_v7, %v457_v52 }
 0x37b   : > { %v463_v56 = vmul.f32 1.442695, %v461_v54 }
 0x37c   : > { %v460_v57 = vpop.xlane.xlu0 %459 }
 0x37d   : > { %1202 = vpow2.f32 %v463_v56  ;;  %v462_v58 = vsub.f32 %v454_v13, %v460_v57 }
 0x37f   : > { %v465_v59 = vmul.f32 1.442695, %v462_v58 }
 0x380   : > { %v583_v15 = vpop.xlane.xlu0 %582 }
 0x381   : > { %1204 = vpow2.f32 %v465_v59  ;;  %v587_v61 = vsub.f32 %v579_v19, %v583_v15 }
 0x382   : > { %v1378_v62 = vpop.eup %1198 }
 0x383   : > { %v589_v63 = vmul.f32 1.442695, %v587_v61  ;;  %v338_v60 = vsel %vm197_vm3, %v1378_v62, 0.0 }
 0x384   : > { %v586_v1 = vpop.xlane.xlu1 %585  ;;  %339 = vadd.xlane.f32.xlu0 %v338_v60 }
 0x385   : > { %1206 = vpow2.f32 %v589_v63  ;;  %v588_v2 = vsub.f32 %v580_v24, %v586_v1 }
 0x386   : > { %v1382_v3 = vpop.eup %1200 }
 0x387   : > { %v591_v4 = vmul.f32 1.442695, %v588_v2  ;;  %v341_v5 = vsel %vm197_vm3, %v1382_v3, 0.0 }
 0x388   : > { %342 = vadd.xlane.f32.xlu1 %v341_v5  ;;  %v710_v6 = vpop.xlane.xlu0 %709 }
 0x389   : > { %1208 = vpow2.f32 %v591_v4  ;;  %v714_v7 = vsub.f32 %v706_v29, %v710_v6 }
 0x38a   : > { %v1386_v9 = vpop.eup %1202 }
 0x38b   : > { %v716_v10 = vmul.f32 1.442695, %v714_v7  ;;  %v467_v11 = vsel %vm197_vm3, %v1386_v9, 0.0 }
 0x38c   : > { %v713_v12 = vpop.xlane.xlu1 %712  ;;  %468 = vadd.xlane.f32.xlu0 %v467_v11 }
 0x38d   : > { %1210 = vpow2.f32 %v716_v10  ;;  %v715_v13 = vsub.f32 %v707_v35, %v713_v12 }
 0x38e   : > { %v1390_v14 = vpop.eup %1204 }
 0x38f   : > { %v718_v16 = vmul.f32 1.442695, %v715_v13  ;;  %v470_v17 = vsel %vm197_vm3, %v1390_v14, 0.0 }
 0x390   : > { %471 = vadd.xlane.f32.xlu1 %v470_v17  ;;  %v838_v18 = vpop.xlane.xlu0 %837 }
 0x391   : > { %1212 = vpow2.f32 %v718_v16  ;;  %v842_v19 = vsub.f32 %v834_v40, %v838_v18 }
 0x392   : > { %v1394_v20 = vpop.eup %1206 }
 0x393   : > { %v844_v21 = vmul.f32 1.442695, %v842_v19  ;;  %v593_v22 = vsel %vm197_vm3, %v1394_v20, 0.0 }
 0x394   : > { %v841_v23 = vpop.xlane.xlu1 %840  ;;  %594 = vadd.xlane.f32.xlu0 %v593_v22 }
 0x395   : > { %1214 = vpow2.f32 %v844_v21  ;;  %v843_v24 = vsub.f32 %v835_v45, %v841_v23 }
 0x396   : > { %v1398_v25 = vpop.eup %1208 }
 0x397   : > { %v846_v26 = vmul.f32 1.442695, %v843_v24  ;;  %v596_v27 = vsel %vm197_vm3, %v1398_v25, 0.0 }
 0x398   : > { %597 = vadd.xlane.f32.xlu1 %v596_v27 }
 0x399   : > { %1216 = vpow2.f32 %v846_v26 }
 0x39a   : > { %v1402_v28 = vpop.eup %1210 }
 0x39b   : > { %v720_v29 = vsel %vm197_vm3, %v1402_v28, 0.0 }
 0x39c   : > { %721 = vadd.xlane.f32.xlu0 %v720_v29 }
 0x39e   : > { %v1406_v30 = vpop.eup %1212 }
 0x39f   : > { %v723_v32 = vsel %vm197_vm3, %v1406_v30, 0.0 }
 0x3a0   : > { %724 = vadd.xlane.f32.xlu1 %v723_v32 }
 0x3a2   : > { %v1410_v33 = vpop.eup %1214 }
 0x3a3   : > { %v848_v34 = vsel %vm197_vm3, %v1410_v33, 0.0 }
 0x3a4   : > { %849 = vadd.xlane.f32.xlu1 %v848_v34 }
 0x3a6   : > { %v1414_v35 = vpop.eup %1216 }
 0x3a7   : > { %v851_v36 = vsel %vm197_vm3, %v1414_v35, 0.0 }
 0x3a8   : > { %852 = vadd.xlane.f32.xlu1 %v851_v36 }
 0x3b2   : > { %349 = vrot.lane.b32.xlu0 %v1308_v31, %s1248_s12 }
 0x3b6   : > { %859 = vrot.lane.b32.xlu0 %v1189_v37, %s1248_s12 }
 0x3b9   : > { %604 = vrot.lane.b32.xlu1 %v1188_v38, %s1248_s12 }
 0x40d   : > { %v340_v40 = vpop.xlane.xlu0 %339 }
 0x411   : > { %v343_v39 = vpop.xlane.xlu1 %342 }
 0x412   : > { %1218 = vrcp.f32 %v343_v39 }
 0x413   : > { %1220 = vrcp.f32 %v340_v40 }
 0x415   : > { %v469_v42 = vpop.xlane.xlu0 %468 }
 0x419   : > { %v472_v41 = vpop.xlane.xlu1 %471 }
 0x41a   : > { %1222 = vrcp.f32 %v472_v41 }
 0x41b   : > { %1224 = vrcp.f32 %v469_v42 }
 0x41d   : > { %v595_v43 = vpop.xlane.xlu0 %594 }
 0x41f   : > { %v1219_v44 = vpop.eup %1218 }
 0x420   : > { %v1221_v47 = vpop.eup %1220  ;;  %v347_v31 = vmul.f32 %v1219_v44, %v1382_v3 }
 0x421   : > { %v598_v45 = vpop.xlane.xlu1 %597  ;;  %v346_v50 = vmul.f32 %v1221_v47, %v1378_v62 }
 0x422   : > { %1226 = vrcp.f32 %v598_v45 }
 0x423   : > { %1228 = vrcp.f32 %v595_v43  ;;  %v348_v51 = vpack.c.bf16 %v347_v31, %v346_v50 }
 0x425   : > { %v722_v46 = vpop.xlane.xlu0 %721 }
 0x427   : > { %v1223_v8 = vpop.eup %1222 }
 0x428   : > { %v1225_v54 = vpop.eup %1224  ;;  %v476_v56 = vmul.f32 %v1223_v8, %v1390_v14 }
 0x429   : > { %v725_v48 = vpop.xlane.xlu1 %724  ;;  %v350_v49 = vpop.permute.xlu0 %349  ;;  %v475_v58 = vmul.f32 %v1225_v54, %v1386_v9 }
 0x42a   : > { %1096 = vmatpush3.bf16.msra.mxu0 %v350_v49  ;;  %1230 = vrcp.f32 %v725_v48 }
 0x42b   : > { %1107 = vmatprep.subr.bf16.mxu0 %v1246_v0  ;;  %1232 = vrcp.f32 %v722_v46  ;;  %v477_v59 = vpack.c.bf16 %v476_v56, %v475_v58 }
 0x42d   : > { %v850_v52 = vpop.xlane.xlu1 %849  ;;  %1098 = vmatmul.mubr.msk.bf16.vlgmr.msra.gmra.mxu0 %vm197_vm3, %v348_v51  ;;  %v860_v7 = vpop.permute.xlu0 %859 }
 0x42e   : > { %1108 = vmatpush3.bf16.msra.mxu0 %v1188_v38  ;;  %1109 = vmatprep.mubr.msk.bf16.mxu0 %vm1247_vm0, %v1246_v0 }
 0x42f   : > { %1119 = vmatprep.subr.bf16.mxu0 %v1246_v0  ;;  %v1227_v15 = vpop.eup %1226 }
 0x430   : > { %v1229_v62 = vpop.eup %1228  ;;  %v602_v63 = vmul.f32 %v1227_v15, %v1398_v25 }
 0x431   : > { %v853_v57 = vpop.xlane.xlu1 %852  ;;  %v601_v60 = vmul.f32 %v1229_v62, %v1394_v20 }
 0x432   : > { %1234 = vrcp.f32 %v853_v57 }
 0x433   : > { %1236 = vrcp.f32 %v850_v52  ;;  %v603_v1 = vpack.c.bf16 %v602_v63, %v601_v60 }
 0x435   : > { %1110 = vmatmul.mubr.msk.bf16.vlgmr.msra.gmra.mxu0 %vm197_vm3, %v477_v59  ;;  %v605_v61 = vpop.permute.xlu1 %604 }
 0x436   : > { %1120 = vmatpush3.bf16.msra.mxu0 %v605_v61  ;;  %1121 = vmatprep.mubr.msk.bf16.mxu0 %vm1247_vm0, %v1246_v0 }
 0x437   : > { %1131 = vmatprep.subr.bf16.mxu0 %v1246_v0  ;;  %v1231_v2 = vpop.eup %1230 }
 0x438   : > { %v1233_v3 = vpop.eup %1232  ;;  %v729_v4 = vmul.f32 %v1231_v2, %v1406_v30 }
 0x439   : > { %v728_v5 = vmul.f32 %v1233_v3, %v1402_v28 }
 0x43b   : > { %v730_v6 = vpack.c.bf16 %v729_v4, %v728_v5 }
 0x43d   : > { %1122 = vmatmul.mubr.msk.bf16.vlgmr.msra.gmra.mxu0 %vm197_vm3, %v603_v1 }
 0x43e   : > { %1132 = vmatpush3.bf16.msra.mxu0 %v1189_v37  ;;  %1133 = vmatprep.mubr.msk.bf16.mxu0 %vm1247_vm0, %v1246_v0 }
 0x43f   : > { %1143 = vmatprep.subr.bf16.mxu0 %v1246_v0  ;;  %v1235_v9 = vpop.eup %1234 }
 0x440   : > { %v1237_v10 = vpop.eup %1236  ;;  %v857_v11 = vmul.f32 %v1235_v9, %v1414_v35 }
 0x441   : > { %v856_v12 = vmul.f32 %v1237_v10, %v1410_v33 }
 0x443   : > { %v858_v13 = vpack.c.bf16 %v857_v11, %v856_v12 }
 0x445   : > { %1134 = vmatmul.mubr.msk.bf16.vlgmr.msra.gmra.mxu0 %vm197_vm3, %v730_v6 }
 0x446   : > { %1144 = vmatpush3.bf16.msra.mxu0 %v860_v7  ;;  %1145 = vmatprep.mubr.msk.bf16.mxu0 %vm1247_vm0, %v1246_v0 }
 0x44d   : > { %1146 = vmatmul.mubr.msk.bf16.vlgmr.msra.gmra.mxu0 %vm197_vm3, %v858_v13 }
 0x4ed   : > { %v389_v14 = vpop.f32.mrf.mxu0 }
 0x4ef   : > { %v1099_v16 = vpop.f32.mrf.mxu0 }
 0x4f1   : > { %v392_v17 = vpop.f32.mrf.mxu0 }
 0x4f2   : > { %v1162_v18 = vpack.i.bf16 %v392_v17, %v389_v14 }
 0x4f3   : > { %v1100_v19 = vpop.f32.mrf.mxu0 }
 0x4f4   : > { %1163 = vrot.lane.b32.xlu1 %v1162_v18, %s1248_s12 }
 0x4f5   : > { %v519_v20 = vpop.f32.mrf.mxu0 }
 0x4f7   : > { %v1111_v21 = vpop.f32.mrf.mxu0 }
 0x4f9   : > { %v522_v22 = vpop.f32.mrf.mxu0 }
 0x4fb   : > { %v1112_v23 = vpop.f32.mrf.mxu0 }
 0x4fd   : > { %v644_v24 = vpop.f32.mrf.mxu0 }
 0x4ff   : > { %v1123_v0 = vpop.f32.mrf.mxu0 }
 0x501   : > { %v647_v25 = vpop.f32.mrf.mxu0 }
 0x502   : > { %v1167_v26 = vpack.i.bf16 %v647_v25, %v644_v24 }
 0x503   : > { %v1124_v27 = vpop.f32.mrf.mxu0 }
 0x504   : > { %1168 = vrot.lane.b32.xlu0 %v1167_v26, %s1248_s12 }
 0x505   : > { %v774_v28 = vpop.f32.mrf.mxu0 }
 0x507   : > { %v1135_v29 = vpop.f32.mrf.mxu0 }
 0x509   : > { %v777_v30 = vpop.f32.mrf.mxu0 }
 0x50b   : > { %v1136_v32 = vpop.f32.mrf.mxu0 }
 0x50d   : > { %v899_v33 = vpop.f32.mrf.mxu0 }
 0x50f   : > { %v1147_v34 = vpop.f32.mrf.mxu0 }
 0x511   : > { %v902_v35 = vpop.f32.mrf.mxu0 }
 0x512   : > { %v1172_v36 = vpack.i.bf16 %v902_v35, %v899_v33 }
 0x513   : > { %v1148_v37 = vpop.f32.mrf.mxu0 }
 0x514   : > { %1173 = vrot.lane.b32.xlu1 %v1172_v36, %s1248_s12 }
 0x566   : > { %v1164_v38 = vpop.permute.xlu1 %1163 }
 0x567   : > { %v1166_v39 = vunpack.i.h.bf16 %v1164_v38  ;;  %v1165_v40 = vunpack.i.l.bf16 %v1164_v38 }
 0x569   : > { %v931_v44 = vsel %vm145_vm1, %v1346_v55, %v1166_v39  ;;  %v930_v45 = vsel %vm145_vm1, %v1344_v53, %v1165_v40 }
 0x576   : > { %v1169_v41 = vpop.permute.xlu0 %1168 }
 0x577   : > { %v1171_v42 = vunpack.i.h.bf16 %v1169_v41  ;;  %v1170_v43 = vunpack.i.l.bf16 %v1169_v41 }
 0x579   : > { %v933_v46 = vsel %vm145_vm1, %v522_v22, %v1171_v42  ;;  %v932_v47 = vsel %vm145_vm1, %v519_v20, %v1170_v43 }
 0x57a   : > { %v1051_v31 = vpack.c.bf16 %v933_v46, %v931_v44  ;;  %v1049_v48 = vpack.c.bf16 %v932_v47, %v930_v45 }
 0x57c   : > { %958 = vst [vmem:[%s116_s16 + $0xc] sm:$0xff] %v1051_v31  ;;  %956 = vst [vmem:[%s116_s16] sm:$0xff] %v1049_v48 }
 0x586   : > { %v1174_v49 = vpop.permute.xlu1 %1173 }
 0x587   : > { %v1176_v50 = vunpack.i.h.bf16 %v1174_v49  ;;  %v1175_v51 = vunpack.i.l.bf16 %v1174_v49 }
 0x589   : > { %v935_v55 = vsel %vm145_vm1, %v777_v30, %v1176_v50  ;;  %v934_v8 = vsel %vm145_vm1, %v774_v28, %v1175_v51 }
 0x58a   : > { %v1052_v53 = vpack.c.bf16 %v935_v55, %v935_v55  ;;  %v1050_v52 = vpack.c.bf16 %v934_v8, %v934_v8 }
 0x58c   : > { %959 = vst [vmem:[%s116_s16 + $0x14] sm:$0xf] %v1052_v53  ;;  %957 = vst [vmem:[%s116_s16 + $0x8] sm:$0xf] %v1050_v52 }
 0x58d PF: > { %s11_s6 = sadd.s32 1, %s1244_s6  }
 0x58e   : > { %p8_p4 = scmp.ge.s32.totalorder %s11_s6, 4  }
 0x590   :  { %10 = sbr.rel (!%p8_p4) target bundleno = 1 (0x1), region = 54 }

// kernel: forward.27
= control target key start
LH: loop header
LB: loop body
LE: loop exit
PB: predicated region body
PF: predicated region fallthrough
CT: control target
= control target key end

     0   :  { %v1100_v1 = vmov 0   ;;  %s1425_s1 = inlined_call_operand.vmem [shape: bf16[384,384], index: 1, kind: input, shape index: {}]   ;;  %s1426_s0 = inlined_call_operand.vmem [shape: bf16[32,384], index: 0, kind: input, shape index: {}]   ;;  %s1427_s2 = inlined_call_operand.vmem [shape: f32[1,384], index: 2, kind: input, shape index: {}]   ;;  %s1428_s3 = inlined_call_operand.vmem [shape: bf16[32,384], index: 3, kind: input, shape index: {}]   ;;  %s1429_s4 = inlined_call_operand.vmem [shape: bf16[32,384], index: 4, kind: output, shape index: {}]  }
   0x1   :  { %v996_v0 = vld [vmem:[%s1425_s1 + $0xac] ss:$12 sps:$4 sm:$0xff]   ;;  %640 = vmatprep.mubr.bf16.mxu1 %v1100_v1  ;;  %v998_v2 = vld [vmem:[%s1425_s1 + $0xa8] ss:$12 sps:$4 sm:$0xff]   ;;  %v1001_v4 = vld [vmem:[%s1425_s1 + $0x90] ss:$12 sps:$4 sm:$0xff]  }
   0x2   :  { %555 = vmatprep.subr.bf16.mxu0 %v996_v0  ;;  %v999_v3 = vld [vmem:[%s1425_s1 + $0x94] ss:$12 sps:$4 sm:$0xff]   ;;  %v1002_v5 = vld [vmem:[%s1425_s1 + $0x7c] ss:$12 sps:$4 sm:$0xff]   ;;  %v1008_v6 = vld [vmem:[%s1425_s1 + $0x22c] ss:$12 sps:$4 sm:$0xff]  }
   0x3   :  { %556 = vmatpush1.bf16.msra.mxu0 %v998_v2  ;;  %v1010_v7 = vld [vmem:[%s1425_s1 + $0x228] ss:$12 sps:$4 sm:$0xff]   ;;  %v1004_v8 = vld [vmem:[%s1425_s1 + $0x78] ss:$12 sps:$4 sm:$0xff]   ;;  %608 = vmatprep.subr.bf16.mxu1 %v1008_v6  ;;  %v1016_v11 = vld [vmem:[%s1425_s1 + $0x210] ss:$12 sps:$4 sm:$0xff]  }
   0x4   :  { %557 = vmatprep.subr.bf16.mxu0 %v999_v3  ;;  %v1005_v9 = vld [vmem:[%s1425_s1 + $0x64] ss:$12 sps:$4 sm:$0xff]   ;;  %v1014_v10 = vld [vmem:[%s1425_s1 + $0x214] ss:$12 sps:$4 sm:$0xff]   ;;  %609 = vmatpush1.bf16.msra.mxu1 %v1010_v7  ;;  %v1020_v13 = vld [vmem:[%s1425_s1 + $0x1fc] ss:$12 sps:$4 sm:$0xff]  }
   0x5   :  { %610 = vmatprep.subr.bf16.mxu1 %v1014_v10  ;;  %v1007_v12 = vld [vmem:[%s1425_s1 + $0x60] ss:$12 sps:$4 sm:$0xff]   ;;  %v1022_v15 = vld [vmem:[%s1425_s1 + $0x1f8] ss:$12 sps:$4 sm:$0xff]   ;;  %v1013_v17 = vld [vmem:[%s1425_s1 + $0x48] ss:$12 sps:$4 sm:$0xff]  }
   0x6   :  { %v1011_v14 = vld [vmem:[%s1425_s1 + $0x4c] ss:$12 sps:$4 sm:$0xff]   ;;  %v1026_v16 = vld [vmem:[%s1425_s1 + $0x1e4] ss:$12 sps:$4 sm:$0xff]   ;;  %v1017_v18 = vld [vmem:[%s1425_s1 + $0x34] ss:$12 sps:$4 sm:$0xff]  }
   0x7   :  { %558 = vmatpush1.bf16.msra.mxu0 %v1001_v4  ;;  %v1028_v19 = vld [vmem:[%s1425_s1 + $0x1e0] ss:$12 sps:$4 sm:$0xff]   ;;  %v1019_v21 = vld [vmem:[%s1425_s1 + $0x30] ss:$12 sps:$4 sm:$0xff]   ;;  %v1034_v23 = vld [vmem:[%s1425_s1 + $0x1c8] ss:$12 sps:$4 sm:$0xff]  }
   0x8   :  { %559 = vmatprep.subr.bf16.mxu0 %v1002_v5  ;;  %611 = vmatpush1.bf16.msra.mxu1 %v1016_v11  ;;  %v1032_v20 = vld [vmem:[%s1425_s1 + $0x1cc] ss:$12 sps:$4 sm:$0xff]   ;;  %v1023_v22 = vld [vmem:[%s1425_s1 + $0x1c] ss:$12 sps:$4 sm:$0xff]   ;;  %v1038_v24 = vld [vmem:[%s1425_s1 + $0x1b4] ss:$12 sps:$4 sm:$0xff]  }
   0x9   :  { %612 = vmatprep.subr.bf16.mxu1 %v1020_v13  ;;  %v1025_v25 = vld [vmem:[%s1425_s1 + $0x18] ss:$12 sps:$4 sm:$0xff]   ;;  %v1040_v27 = vld [vmem:[%s1425_s1 + $0x1b0] ss:$12 sps:$4 sm:$0xff]   ;;  %v1031_v29 = vld [vmem:[%s1425_s1] ss:$12 sps:$4 sm:$0xff]  }
   0xa   :  { %v1029_v26 = vld [vmem:[%s1425_s1 + $0x4] ss:$12 sps:$4 sm:$0xff]   ;;  %v1044_v28 = vld [vmem:[%s1425_s1 + $0x19c] ss:$12 sps:$4 sm:$0xff]   ;;  %v1035_v30 = vld [vmem:[%s1425_s1 + $0x16c] ss:$12 sps:$4 sm:$0xff]  }
   0xb   :  { %560 = vmatpush1.bf16.msra.mxu0 %v1004_v8  ;;  %v1046_v31 = vld [vmem:[%s1425_s1 + $0x198] ss:$12 sps:$4 sm:$0xff]   ;;  %v1037_v33 = vld [vmem:[%s1425_s1 + $0x168] ss:$12 sps:$4 sm:$0xff]   ;;  %v1043_v35 = vld [vmem:[%s1425_s1 + $0x150] ss:$12 sps:$4 sm:$0xff]  }
   0xc   :  { %561 = vmatprep.subr.bf16.mxu0 %v1005_v9  ;;  %613 = vmatpush1.bf16.msra.mxu1 %v1022_v15  ;;  %v1050_v32 = vld [vmem:[%s1425_s1 + $0x184] ss:$12 sps:$4 sm:$0xff]   ;;  %v1041_v34 = vld [vmem:[%s1425_s1 + $0x154] ss:$12 sps:$4 sm:$0xff]   ;;  %v1047_v38 = vld [vmem:[%s1425_s1 + $0x13c] ss:$12 sps:$4 sm:$0xff]  }
   0xd   :  { %614 = vmatprep.subr.bf16.mxu1 %v1026_v16  ;;  %v1052_v36 = vld [vmem:[%s1425_s1 + $0x180] ss:$12 sps:$4 sm:$0xff]   ;;  %v1056_v37 = vld [vmem:[%s1425_s1 + $0x170] ss:$12 sps:$4 sm:$0xff]   ;;  %v1244_v39 = vld [vmem:[%s1426_s0 + $0x8] ss:$12 sps:$4 sm:$0xff]  }
   0xe   :  { %v1058_v40 = vld [vmem:[%s1425_s1 + $0xb0] ss:$12 sps:$4 sm:$0xff]   ;;  %v1062_v41 = vld [vmem:[%s1425_s1 + $0x158] ss:$12 sps:$4 sm:$0xff]   ;;  %v1055_v44 = vld [vmem:[%s1425_s1 + $0x120] ss:$12 sps:$4 sm:$0xff]  }
   0xf   :  { %562 = vmatpush1.bf16.msra.mxu0 %v1007_v12  ;;  %v1049_v42 = vld [vmem:[%s1425_s1 + $0x138] ss:$12 sps:$4 sm:$0xff]   ;;  %v1067_v46 = vld [vmem:[%s1425_s1 + $0x140] ss:$12 sps:$4 sm:$0xff]   ;;  %v1061_v49 = vld [vmem:[%s1425_s1 + $0x108] ss:$12 sps:$4 sm:$0xff]  }
  0x10   :  { %563 = vmatprep.subr.bf16.mxu0 %v1011_v14  ;;  %615 = vmatpush1.bf16.msra.mxu1 %v1028_v19  ;;  %v1053_v43 = vld [vmem:[%s1425_s1 + $0x124] ss:$12 sps:$4 sm:$0xff]   ;;  %v1059_v48 = vld [vmem:[%s1425_s1 + $0x10c] ss:$12 sps:$4 sm:$0xff]   ;;  %v1072_v51 = vld [vmem:[%s1425_s1 + $0x128] ss:$12 sps:$4 sm:$0xff]  }
  0x11   :  { %616 = vmatprep.subr.bf16.mxu1 %v1032_v20  ;;  %v1063_v45 = vld [vmem:[%s1425_s1 + $0x98] ss:$12 sps:$4 sm:$0xff]   ;;  %v1068_v50 = vld [vmem:[%s1425_s1 + $0x80] ss:$12 sps:$4 sm:$0xff]   ;;  %v1073_v53 = vld [vmem:[%s1425_s1 + $0x68] ss:$12 sps:$4 sm:$0xff]  }
  0x12   :  { %v1080_v47 = vld [vmem:[%s1426_s0 + $0x4] ss:$12 sps:$4 sm:$0xff]   ;;  %v1064_v52 = vld [vmem:[%s1425_s1 + $0xf4] ss:$12 sps:$4 sm:$0xff]   ;;  %v1069_v57 = vld [vmem:[%s1425_s1 + $0xdc] ss:$12 sps:$4 sm:$0xff]  }
  0x13   :  { %564 = vmatpush1.bf16.msra.mxu0 %v1013_v17  ;;  %587 = vmatprep.mubr.bf16.mxu0 %v1080_v47  ;;  %v1293_v54 = vld [vmem:[%s1426_s0 + $0x20] ss:$12 sps:$4 sm:$0xff]   ;;  %v1077_v55 = vld [vmem:[%s1425_s1 + $0x110] ss:$12 sps:$4 sm:$0xff]   ;;  %v1083_v59 = vld [vmem:[%s1425_s1 + $0xf8] ss:$12 sps:$4 sm:$0xff]  }
  0x14   :  { %565 = vmatprep.subr.bf16.mxu0 %v1017_v18  ;;  %617 = vmatpush1.bf16.msra.mxu1 %v1034_v23  ;;  %v1066_v56 = vld [vmem:[%s1425_s1 + $0xf0] ss:$12 sps:$4 sm:$0xff]   ;;  %v1071_v60 = vld [vmem:[%s1425_s1 + $0xd8] ss:$12 sps:$4 sm:$0xff]   ;;  %v1087_v63 = vld [vmem:[%s1425_s1 + $0xe0] ss:$12 sps:$4 sm:$0xff]   ;;  %v124_v18 = vlaneseq }
  0x15   :  { %618 = vmatprep.subr.bf16.mxu1 %v1038_v24  ;;  %v1081_v58 = vld [vmem:[%s1425_s1 + $0x50] ss:$12 sps:$4 sm:$0xff]   ;;  %v1084_v62 = vld [vmem:[%s1425_s1 + $0x38] ss:$12 sps:$4 sm:$0xff]   ;;  %v1076_v0 = vld [vmem:[%s1425_s1 + $0xc0] ss:$12 sps:$4 sm:$0xff]  }
  0x16   :  { %v1074_v61 = vld [vmem:[%s1425_s1 + $0xc4] ss:$12 sps:$4 sm:$0xff]   ;;  %v1090_v2 = vld [vmem:[%s1425_s1 + $0x20] ss:$12 sps:$4 sm:$0xff]   ;;  %v1093_v4 = vld [vmem:[%s1425_s1 + $0xc8] ss:$12 sps:$4 sm:$0xff]  }
  0x17   :  { %566 = vmatpush1.bf16.msra.mxu0 %v1019_v21  ;;  %v1078_v3 = vld [vmem:[%s1426_s0] ss:$12 sps:$4 sm:$0xff]   ;;  %v1088_v5 = vld [vmem:[%s1426_s0 + $0x1c] ss:$12 sps:$4 sm:$0xff]   ;;  %v1085_v6 = vld [vmem:[%s1425_s1 + $0x218] ss:$12 sps:$4 sm:$0xff]  }
  0x18   :  { %567 = vmatprep.subr.bf16.mxu0 %v1023_v22  ;;  %619 = vmatpush1.bf16.msra.mxu1 %v1040_v27  ;;  %v1094_v7 = vld [vmem:[%s1425_s1 + $0x8] ss:$12 sps:$4 sm:$0xff]   ;;  %v1092_v8 = vld [vmem:[%s1425_s1 + $0x200] ss:$12 sps:$4 sm:$0xff]   ;;  %v1091_v9 = vld [vmem:[%s1426_s0 + $0x18] ss:$12 sps:$4 sm:$0xff]  }
  0x19   :  { %620 = vmatprep.subr.bf16.mxu1 %v1044_v28  ;;  %v1095_v10 = vld [vmem:[%s1425_s1 + $0x1e8] ss:$12 sps:$4 sm:$0xff]   ;;  %v1096_v11 = vld [vmem:[%s1425_s1 + $0x1d0] ss:$12 sps:$4 sm:$0xff]   ;;  %v1097_v12 = vld [vmem:[%s1425_s1 + $0x1b8] ss:$12 sps:$4 sm:$0xff]  }
  0x1a   :  { %v1098_v13 = vld [vmem:[%s1425_s1 + $0x1a0] ss:$12 sps:$4 sm:$0xff]   ;;  %v1099_v14 = vld [vmem:[%s1425_s1 + $0x188] ss:$12 sps:$4 sm:$0xff]   ;;  %v1370_v20 = vshrl.u32 %v124_v18, 7 }
  0x1b   :  { %568 = vmatpush1.bf16.msra.mxu0 %v1025_v25  ;;  %v1376_v23 = vld [vmem:[%s1427_s2] sm:$0x7] }
  0x1c   :  { %569 = vmatprep.subr.bf16.mxu0 %v1029_v26  ;;  %621 = vmatpush1.bf16.msra.mxu1 %v1046_v31  ;;  %v126_v22 = vsub.s32 0, %v1370_v20  ;;  %v130_v25 = vsub.s32 1, %v1370_v20 }
  0x1d   :  { %622 = vmatprep.subr.bf16.mxu1 %v1050_v32 }
  0x1e   :  { %v127_v26 = vrot.slane %v1376_v23, %v126_v22  ;;  %v131_v28 = vrot.slane %v1376_v23, %v130_v25 }
  0x1f   :  { %570 = vmatpush1.bf16.msra.mxu0 %v1031_v29 }
  0x20   :  { %571 = vmatprep.subr.bf16.mxu0 %v1035_v30  ;;  %623 = vmatpush1.bf16.msra.mxu1 %v1052_v36  ;;  %v759_v30 = vld [vmem:[%s1428_s3] sm:$0xff] }
  0x21   :  { %937 = vmatprep.subr.bf16.mxu1 %v1056_v37  ;;  %v768_v37 = vunpack.c.h.bf16 %v759_v30 }
  0x23   :  { %572 = vmatpush2.bf16.msra.mxu0 %v1037_v33  ;;  %641 = vmatmul.mubr.bf16.vlgmr.msra.gmra.mxu1 %v1244_v39 }
  0x24   :  { %573 = vmatprep.subr.bf16.mxu0 %v1041_v34  ;;  %938 = vmatpush3.bf16.msra.mxu1 %v1058_v40 }
  0x25   :  { %650 = vmatprep.mubr.bf16.mxu1 %v1100_v1  ;;  %939 = vmatprep.subr.bf16.mxu1 %v1062_v41  ;;  %v1082_v1 = vld [vmem:[%s1425_s1 + $0x230] ss:$12 sps:$4 sm:$0xff]  }
  0x27   :  { %574 = vmatpush2.bf16.msra.mxu0 %v1043_v35  ;;  %v767_v35 = vunpack.c.l.bf16 %v759_v30 }
  0x28   :  { %575 = vmatprep.subr.bf16.mxu0 %v1047_v38  ;;  %940 = vmatpush3.bf16.msra.mxu1 %v1063_v45  ;;  %v761_v38 = vld [vmem:[%s1428_s3 + $0xc] sm:$0xff]  ;;  %v763_v45 = vld [vmem:[%s1428_s3 + $0x18] sm:$0xff] }
  0x29   :  { %941 = vmatprep.subr.bf16.mxu1 %v1067_v46 }
  0x2b   :  { %576 = vmatpush2.bf16.msra.mxu0 %v1049_v42  ;;  %651 = vmatmul.mubr.bf16.gmra.mxu1 %v1293_v54  ;;  %v770_v42 = vunpack.c.l.bf16 %v761_v38 }
  0x2c   :  { %577 = vmatprep.subr.bf16.mxu0 %v1053_v43  ;;  %942 = vmatpush3.bf16.msra.mxu1 %v1068_v50 }
  0x2d   :  { %943 = vmatprep.subr.bf16.mxu1 %v1072_v51  ;;  %693 = vmatprep.mubr.bf16.mxu1 %v1080_v47 }
  0x2f   :  { %578 = vmatpush2.bf16.msra.mxu0 %v1055_v44  ;;  %v771_v44 = vunpack.c.h.bf16 %v761_v38 }
  0x30   :  { %579 = vmatprep.subr.bf16.mxu0 %v1059_v48  ;;  %944 = vmatpush3.bf16.msra.mxu1 %v1073_v53 }
  0x31   :  { %945 = vmatprep.subr.bf16.mxu1 %v1077_v55 }
  0x33   :  { %580 = vmatpush2.bf16.msra.mxu0 %v1061_v49 }
  0x34   :  { %581 = vmatprep.subr.bf16.mxu0 %v1064_v52  ;;  %946 = vmatpush3.bf16.msra.mxu1 %v1081_v58  ;;  %v774_v58 = vunpack.c.h.bf16 %v763_v45 }
  0x35   :  { %947 = vmatprep.subr.bf16.mxu1 %v1083_v59 }
  0x37   :  { %582 = vmatpush2.bf16.msra.mxu0 %v1066_v56  ;;  %v773_v56 = vunpack.c.l.bf16 %v763_v45 }
  0x38   :  { %583 = vmatprep.subr.bf16.mxu0 %v1069_v57  ;;  %948 = vmatpush3.bf16.msra.mxu1 %v1084_v62 }
  0x39   :  { %949 = vmatprep.subr.bf16.mxu1 %v1087_v63 }
  0x3b   :  { %584 = vmatpush2.bf16.msra.mxu0 %v1071_v60 }
  0x3c   :  { %585 = vmatprep.subr.bf16.mxu0 %v1074_v61  ;;  %950 = vmatpush3.bf16.msra.mxu1 %v1090_v2 }
  0x3d   :  { %951 = vmatprep.subr.bf16.mxu1 %v1093_v4 }
  0x3f   :  { %586 = vmatpush2.bf16.msra.mxu0 %v1076_v0  ;;  %v765_v0 = vld [vmem:[%s1428_s3 + $0x24] sm:$0xff] }
  0x40   :  { %975 = vmatprep.subr.bf16.mxu0 %v1082_v1  ;;  %952 = vmatpush3.bf16.msra.mxu1 %v1094_v7  ;;  %v776_v7 = vunpack.c.l.bf16 %v765_v0 }
  0x42   :  { %588 = vmatmul.mubr.bf16.vlgmr.msra.gmra.mxu0 %v1078_v3 }
  0x43   :  { %976 = vmatpush3.bf16.msra.mxu0 %v1082_v1  ;;  %597 = vmatprep.mubr.bf16.mxu0 %v1088_v5 }
  0x44   :  { %977 = vmatprep.subr.bf16.mxu0 %v1085_v6  ;;  %694 = vmatmul.mubr.bf16.vlgmr.msra.gmra.mxu1 %v1078_v3 }
  0x45   :  { %701 = vmatprep.mubr.bf16.mxu1 %v1088_v5 }
  0x47   :  { %978 = vmatpush3.bf16.msra.mxu0 %v1085_v6 }
  0x48   :  { %979 = vmatprep.subr.bf16.mxu0 %v1092_v8 }
  0x4a   :  { %598 = vmatmul.mubr.bf16.gmra.mxu0 %v1091_v9 }
  0x4b   :  { %980 = vmatpush3.bf16.msra.mxu0 %v1092_v8  ;;  %991 = vmatprep.mubr.bf16.mxu0 %v1244_v39 }
  0x4c   :  { %981 = vmatprep.subr.bf16.mxu0 %v1095_v10  ;;  %702 = vmatmul.mubr.bf16.gmra.mxu1 %v1091_v9 }
  0x4f   :  { %982 = vmatpush3.bf16.msra.mxu0 %v1095_v10 }
  0x50   :  { %983 = vmatprep.subr.bf16.mxu0 %v1096_v11 }
  0x53   :  { %984 = vmatpush3.bf16.msra.mxu0 %v1096_v11 }
  0x54   :  { %985 = vmatprep.subr.bf16.mxu0 %v1097_v12 }
  0x57   :  { %986 = vmatpush3.bf16.msra.mxu0 %v1097_v12  ;;  %v777_v12 = vunpack.c.h.bf16 %v765_v0 }
  0x58   :  { %987 = vmatprep.subr.bf16.mxu0 %v1098_v13 }
  0x5b   :  { %988 = vmatpush3.bf16.msra.mxu0 %v1098_v13 }
  0x5c   :  { %989 = vmatprep.subr.bf16.mxu0 %v1099_v14 }
  0x5f   :  { %990 = vmatpush3.bf16.msra.mxu0 %v1099_v14 }
  0x62   :  { %992 = vmatmul.mubr.bf16.vlgmr.msra.gmra.mxu0 %v1293_v54 }
  0xe3   :  { %v642_v15 = vpop.f32.mrf.mxu1 }
  0xe5   :  { %v644_v16 = vpop.f32.mrf.mxu1 }
  0xe7   :  { %v646_v17 = vpop.f32.mrf.mxu1 }
  0xe9   :  { %v648_v19 = vpop.f32.mrf.mxu1 }
  0xeb   :  { %v652_v21 = vpop.f32.mrf.mxu1 }
  0xed   :  { %v654_v24 = vpop.f32.mrf.mxu1 }
  0xef   :  { %v656_v27 = vpop.f32.mrf.mxu1 }
  0xf1   :  { %v658_v33 = vpop.f32.mrf.mxu1 }
 0x102   :  { %v589_v29 = vpop.f32.mrf.mxu0 }
 0x103   :  { %v590_v31 = vadd.f32 %v589_v29, %v127_v26 }
 0x104   :  { %v591_v32 = vpop.f32.mrf.mxu0  ;;  %v953_v46 = vpop.f32.mrf.mxu1 }
 0x105   :  { %v643_v34 = vadd.f32 %v642_v15, %v590_v31  ;;  %v592_v36 = vadd.f32 %v591_v32, %v131_v28 }
 0x106   :  { %v593_v39 = vpop.f32.mrf.mxu0  ;;  %v954_v52 = vpop.f32.mrf.mxu1 }
 0x107   :  { %v645_v40 = vadd.f32 %v644_v16, %v592_v36  ;;  %v594_v41 = vadd.f32 %v593_v39, %v127_v26  ;;  %v779_v47 = vadd.f32 %v767_v35, %v643_v34 }
 0x108   :  { %v595_v43 = vpop.f32.mrf.mxu0  ;;  %v956_v59 = vpop.f32.mrf.mxu1 }
 0x109   :  { %v780_v48 = vadd.f32 %v768_v37, %v645_v40  ;;  %v647_v49 = vadd.f32 %v646_v17, %v594_v41  ;;  %v596_v50 = vadd.f32 %v595_v43, %v131_v28 }
 0x10a   :  { %v599_v51 = vpop.f32.mrf.mxu0  ;;  %v957_v2 = vpop.f32.mrf.mxu1 }
 0x10b   :  { %v929_v53 = vpack.c.bf16 %v780_v48, %v779_v47  ;;  %v649_v54 = vadd.f32 %v648_v19, %v596_v50  ;;  %v600_v55 = vadd.f32 %v599_v51, %v127_v26  ;;  %v782_v60 = vadd.f32 %v770_v42, %v647_v49 }
 0x10c   :  { %v601_v57 = vpop.f32.mrf.mxu0  ;;  %v959_v13 = vpop.f32.mrf.mxu1  ;;  %v958_v34 = vadd.f32 %v957_v2, %v956_v59 }
 0x10d   :  { %831 = vst [vmem:[%s1429_s4] sm:$0xff] %v929_v53  ;;  %v783_v61 = vadd.f32 %v771_v44, %v649_v54  ;;  %v653_v62 = vadd.f32 %v652_v21, %v600_v55  ;;  %v602_v63 = vadd.f32 %v601_v57, %v131_v28  ;;  %v134_v21 = vsub.s32 2, %v1370_v20 }
 0x10e   :  { %v603_v1 = vpop.f32.mrf.mxu0  ;;  %v960_v18 = vpop.f32.mrf.mxu1 }
 0x10f   :  { %v931_v3 = vpack.c.bf16 %v783_v61, %v782_v60  ;;  %v785_v4 = vadd.f32 %v773_v56, %v653_v62  ;;  %v655_v5 = vadd.f32 %v654_v24, %v602_v63  ;;  %v604_v6 = vadd.f32 %v603_v1, %v127_v26 }
 0x110   :  { %v605_v8 = vpop.f32.mrf.mxu0  ;;  %v962_v22 = vpop.f32.mrf.mxu1  ;;  %v961_v24 = vadd.f32 %v960_v18, %v959_v13  ;;  %v135_v25 = vrot.slane %v1376_v23, %v134_v21 }
 0x111   :  { %833 = vst [vmem:[%s1429_s4 + $0xc] sm:$0xff] %v931_v3  ;;  %v786_v9 = vadd.f32 %v774_v58, %v655_v5  ;;  %v657_v10 = vadd.f32 %v656_v27, %v604_v6  ;;  %v606_v11 = vadd.f32 %v605_v8, %v131_v28  ;;  %v764_v27 = vld [vmem:[%s1428_s3 + $0x8] ss:$24 sps:$4 sm:$0xff]   ;;  %v955_v28 = vadd.f32 %v954_v52, %v953_v46 }
 0x112   :  { %v963_v26 = vpop.f32.mrf.mxu1  ;;  %v704_v29 = vadd.f32 %v961_v24, %v135_v25  ;;  %v775_v31 = vunpack.c.h.bf16 %v764_v27  ;;  %v769_v36 = vunpack.c.l.bf16 %v764_v27  ;;  %v699_v46 = vadd.f32 %v958_v34, %v135_v25 }
 0x113   :  { %v933_v14 = vpack.c.bf16 %v786_v9, %v785_v4  ;;  %v659_v15 = vadd.f32 %v658_v33, %v606_v11  ;;  %v788_v16 = vadd.f32 %v776_v7, %v657_v10  ;;  %v964_v30 = vadd.f32 %v963_v26, %v962_v22  ;;  %v766_v33 = vld [vmem:[%s1428_s3 + $0x14] ss:$24 sps:$4 sm:$0xff]  }
 0x114   :  { %v696_v35 = vadd.f32 %v955_v28, %v135_v25  ;;  %v778_v40 = vunpack.c.h.bf16 %v766_v33  ;;  %v772_v42 = vunpack.c.l.bf16 %v766_v33 }
 0x115   :  { %835 = vst [vmem:[%s1429_s4 + $0x18] sm:$0xff] %v933_v14  ;;  %v789_v17 = vadd.f32 %v777_v12, %v659_v15  ;;  %v707_v39 = vadd.f32 %v964_v30, %v135_v25 }
 0x117   :  { %v935_v19 = vpack.c.bf16 %v789_v17, %v788_v16 }
 0x119   :  { %837 = vst [vmem:[%s1429_s4 + $0x24] sm:$0xff] %v935_v19 }
 0x122   :  { %v993_v32 = vpop.f32.mrf.mxu0 }
 0x123   :  { %v753_v20 = vadd.f32 %v993_v32, %v704_v29 }
 0x124   :  { %v744_v37 = vpop.f32.mrf.mxu0 }
 0x125   :  { %v787_v23 = vadd.f32 %v775_v31, %v753_v20  ;;  %v745_v38 = vadd.f32 %v744_v37, %v696_v35 }
 0x126   :  { %v994_v41 = vpop.f32.mrf.mxu0 }
 0x127   :  { %v934_v43 = vpack.c.bf16 %v787_v23, %v787_v23  ;;  %v781_v44 = vadd.f32 %v769_v36, %v745_v38  ;;  %v756_v45 = vadd.f32 %v994_v41, %v707_v39 }
 0x128   :  { %v747_v47 = vpop.f32.mrf.mxu0 }
 0x129   :  { %836 = vst [vmem:[%s1429_s4 + $0x20] sm:$0xf] %v934_v43  ;;  %v930_v48 = vpack.c.bf16 %v781_v44, %v781_v44  ;;  %v790_v49 = vadd.f32 %v778_v40, %v756_v45  ;;  %v748_v50 = vadd.f32 %v747_v47, %v699_v46 }
 0x12b   :  { %832 = vst [vmem:[%s1429_s4 + $0x8] sm:$0xf] %v930_v48  ;;  %v936_v51 = vpack.c.bf16 %v790_v49, %v790_v49  ;;  %v784_v52 = vadd.f32 %v772_v42, %v748_v50 }
 0x12d   :  { %838 = vst [vmem:[%s1429_s4 + $0x2c] sm:$0xf] %v936_v51  ;;  %v932_v53 = vpack.c.bf16 %v784_v52, %v784_v52 }
 0x12f   :  { %834 = vst [vmem:[%s1429_s4 + $0x14] sm:$0xf] %v932_v53 }

// kernel: forward.25
= control target key start
LH: loop header
LB: loop body
LE: loop exit
PB: predicated region body
PF: predicated region fallthrough
CT: control target
= control target key end

     0   :  { %s3863_s0 = inlined_call_operand.vmem [shape: bf16[32,384], index: 0, kind: input, shape index: {}]   ;;  %s3864_s3 = inlined_call_operand.vmem [shape: bf16[384,1152], index: 3, kind: input, shape index: {}]   ;;  %s3865_s1 = inlined_call_operand.vmem [shape: f32[1,384], index: 1, kind: input, shape index: {}]   ;;  %s3866_s2 = inlined_call_operand.vmem [shape: f32[1,384], index: 2, kind: input, shape index: {}]   ;;  %s3867_s4 = inlined_call_operand.vmem [shape: f32[1,1152], index: 4, kind: input, shape index: {}]   ;;  %s3868_s5 = inlined_call_operand.vmem [shape: bf16[32,1152], index: 5, kind: output, shape index: {}]  }
   0x1   :  { %v2911_v0 = vld [vmem:[%s3863_s0] sm:$0xff]  ;;  %v2921_v2 = vld [vmem:[%s3863_s0 + $0x18] sm:$0xff]  ;;  %v2930_v7 = vld [vmem:[%s3863_s0 + $0xc] sm:$0xff] }
   0x2   :  { %v2916_v1 = vld [vmem:[%s3863_s0 + $0x8] ss:$24 sps:$4 sm:$0xff]   ;;  %v29_v3 = vunpack.c.l.bf16 %v2911_v0  ;;  %v30_v4 = vunpack.c.h.bf16 %v2911_v0  ;;  %v35_v6 = vunpack.c.l.bf16 %v2921_v2  ;;  %v2935_v8 = vld [vmem:[%s3863_s0 + $0x14] ss:$24 sps:$4 sm:$0xff]   ;;  %v36_v10 = vunpack.c.h.bf16 %v2921_v2  ;;  %v2559_v27 = vld [vmem:[%s3864_s3 + $0x1f8] ss:$36 sps:$4 sm:$0xff]  }
   0x3   :  { %v31_v5 = vunpack.c.l.bf16 %v2916_v1  ;;  %v2940_v9 = vld [vmem:[%s3863_s0 + $0x24] sm:$0xff]  ;;  %v37_v11 = vunpack.c.h.bf16 %v2916_v1  ;;  %v32_v12 = vunpack.c.l.bf16 %v2930_v7  ;;  %v33_v13 = vunpack.c.h.bf16 %v2930_v7  ;;  %v2557_v26 = vld [vmem:[%s3864_s3 + $0x1fc] ss:$36 sps:$4 sm:$0xff]   ;;  %v2560_v28 = vld [vmem:[%s3864_s3 + $0x1b4] ss:$36 sps:$4 sm:$0xff]  }
   0x4   :  { %v41_v14 = vadd.f32 %v30_v4, %v29_v3  ;;  %v34_v15 = vunpack.c.l.bf16 %v2935_v8  ;;  %v38_v16 = vunpack.c.l.bf16 %v2940_v9  ;;  %v39_v17 = vunpack.c.h.bf16 %v2940_v9  ;;  %1583 = vmatprep.subr.bf16.mxu0 %v2557_v26  ;;  %v2562_v29 = vld [vmem:[%s3864_s3 + $0x1b0] ss:$36 sps:$4 sm:$0xff]   ;;  %v2565_v31 = vld [vmem:[%s3864_s3 + $0x168] ss:$36 sps:$4 sm:$0xff]   ;;  %v2568_v33 = vld [vmem:[%s3864_s3 + $0x120] ss:$36 sps:$4 sm:$0xff]  }
   0x5   :  { %v49_v18 = vadd.f32 %v36_v10, %v35_v6  ;;  %v45_v19 = vadd.f32 %v33_v13, %v32_v12  ;;  %v40_v20 = vunpack.c.h.bf16 %v2935_v8  ;;  %1584 = vmatpush1.bf16.msra.mxu0 %v2559_v27  ;;  %v2563_v30 = vld [vmem:[%s3864_s3 + $0x16c] ss:$36 sps:$4 sm:$0xff]   ;;  %v2566_v32 = vld [vmem:[%s3864_s3 + $0x124] ss:$36 sps:$4 sm:$0xff]   ;;  %v2581_v34 = vld [vmem:[%s3864_s3 + $0x67c] ss:$36 sps:$4 sm:$0xff]  }
   0x6   :  { %v42_v21 = vadd.f32 %v41_v14, %v31_v5  ;;  %v53_v22 = vadd.f32 %v39_v17, %v38_v16  ;;  %1585 = vmatprep.subr.bf16.mxu0 %v2560_v28  ;;  %v2569_v35 = vld [vmem:[%s3864_s3 + $0xdc] ss:$36 sps:$4 sm:$0xff]   ;;  %1636 = vmatprep.subr.bf16.mxu1 %v2581_v34  ;;  %v2572_v38 = vld [vmem:[%s3864_s3 + $0x94] ss:$36 sps:$4 sm:$0xff]   ;;  %v2575_v40 = vld [vmem:[%s3864_s3 + $0x4c] ss:$36 sps:$4 sm:$0xff]  }
   0x7   :  { %v50_v23 = vadd.f32 %v49_v18, %v37_v11  ;;  %v46_v24 = vadd.f32 %v45_v19, %v34_v15  ;;  %v2585_v36 = vld [vmem:[%s3864_s3 + $0x678] ss:$36 sps:$4 sm:$0xff]   ;;  %v2574_v39 = vld [vmem:[%s3864_s3 + $0x90] ss:$36 sps:$4 sm:$0xff]   ;;  %v2577_v41 = vld [vmem:[%s3864_s3 + $0x48] ss:$36 sps:$4 sm:$0xff]  }
   0x8   :  { %43 = vadd.xlane.f32.xlu0 %v42_v21  ;;  %v54_v25 = vadd.f32 %v53_v22, %v40_v20  ;;  %v2571_v37 = vld [vmem:[%s3864_s3 + $0xd8] ss:$36 sps:$4 sm:$0xff]   ;;  %1637 = vmatpush1.bf16.msra.mxu1 %v2585_v36  ;;  %v2578_v42 = vld [vmem:[%s3864_s3 + $0x4] ss:$36 sps:$4 sm:$0xff]   ;;  %v2593_v26 = vld [vmem:[%s3864_s3 + $0x5ec] ss:$36 sps:$4 sm:$0xff]  }
   0x9   :  { %51 = vadd.xlane.f32.xlu1 %v50_v23  ;;  %1586 = vmatpush1.bf16.msra.mxu0 %v2562_v29  ;;  %v2580_v43 = vld [vmem:[%s3864_s3] ss:$36 sps:$4 sm:$0xff]   ;;  %v2586_v45 = vld [vmem:[%s3864_s3 + $0x438] ss:$36 sps:$4 sm:$0xff]   ;;  %v2595_v27 = vld [vmem:[%s3864_s3 + $0x3ac] ss:$36 sps:$4 sm:$0xff]  }
   0xa   :  { %1587 = vmatprep.subr.bf16.mxu0 %v2563_v30  ;;  %v2583_v44 = vld [vmem:[%s3864_s3 + $0x43c] ss:$36 sps:$4 sm:$0xff]   ;;  %v2587_v22 = vld [vmem:[%s3864_s3 + $0x634] ss:$36 sps:$4 sm:$0xff]   ;;  %v2597_v28 = vld [vmem:[%s3864_s3 + $0x5e8] ss:$36 sps:$4 sm:$0xff]  }
   0xb   :  { %v2589_v23 = vld [vmem:[%s3864_s3 + $0x3f4] ss:$36 sps:$4 sm:$0xff]   ;;  %1638 = vmatprep.subr.bf16.mxu1 %v2587_v22  ;;  %v2598_v29 = vld [vmem:[%s3864_s3 + $0x3a8] ss:$36 sps:$4 sm:$0xff]   ;;  %v2605_v34 = vld [vmem:[%s3864_s3 + $0x55c] ss:$36 sps:$4 sm:$0xff]  }
   0xc   :  { %47 = vadd.xlane.f32.xlu0 %v46_v24  ;;  %v2591_v24 = vld [vmem:[%s3864_s3 + $0x630] ss:$36 sps:$4 sm:$0xff]   ;;  %v2599_v30 = vld [vmem:[%s3864_s3 + $0x5a4] ss:$36 sps:$4 sm:$0xff]   ;;  %v2609_v36 = vld [vmem:[%s3864_s3 + $0x558] ss:$36 sps:$4 sm:$0xff]  }
   0xd   :  { %55 = vadd.xlane.f32.xlu1 %v54_v25  ;;  %1588 = vmatpush1.bf16.msra.mxu0 %v2565_v31  ;;  %v2592_v25 = vld [vmem:[%s3864_s3 + $0x3f0] ss:$36 sps:$4 sm:$0xff]   ;;  %v2601_v31 = vld [vmem:[%s3864_s3 + $0x364] ss:$36 sps:$4 sm:$0xff]  }
   0xe   :  { %1589 = vmatprep.subr.bf16.mxu0 %v2566_v32  ;;  %1639 = vmatpush1.bf16.msra.mxu1 %v2591_v24  ;;  %v2603_v32 = vld [vmem:[%s3864_s3 + $0x5a0] ss:$36 sps:$4 sm:$0xff]  }
   0xf   :  { %1640 = vmatprep.subr.bf16.mxu1 %v2593_v26 }
  0x11   :  { %1590 = vmatpush1.bf16.msra.mxu0 %v2568_v33  ;;  %v2604_v33 = vld [vmem:[%s3864_s3 + $0x360] ss:$36 sps:$4 sm:$0xff]  }
  0x12   :  { %1591 = vmatprep.subr.bf16.mxu0 %v2569_v35  ;;  %1641 = vmatpush1.bf16.msra.mxu1 %v2597_v28  ;;  %v2607_v35 = vld [vmem:[%s3864_s3 + $0x31c] ss:$36 sps:$4 sm:$0xff]  }
  0x13   :  { %1642 = vmatprep.subr.bf16.mxu1 %v2599_v30 }
  0x15   :  { %1592 = vmatpush1.bf16.msra.mxu0 %v2571_v37  ;;  %v2610_v37 = vld [vmem:[%s3864_s3 + $0x318] ss:$36 sps:$4 sm:$0xff]  }
  0x16   :  { %1593 = vmatprep.subr.bf16.mxu0 %v2572_v38  ;;  %1643 = vmatpush1.bf16.msra.mxu1 %v2603_v32  ;;  %v2611_v38 = vld [vmem:[%s3864_s3 + $0x514] ss:$36 sps:$4 sm:$0xff]  }
  0x17   :  { %1644 = vmatprep.subr.bf16.mxu1 %v2605_v34 }
  0x19   :  { %1594 = vmatpush1.bf16.msra.mxu0 %v2574_v39  ;;  %v2613_v39 = vld [vmem:[%s3864_s3 + $0x2d4] ss:$36 sps:$4 sm:$0xff]  }
  0x1a   :  { %1595 = vmatprep.subr.bf16.mxu0 %v2575_v40  ;;  %1645 = vmatpush1.bf16.msra.mxu1 %v2609_v36  ;;  %v2615_v40 = vld [vmem:[%s3864_s3 + $0x510] ss:$36 sps:$4 sm:$0xff]  }
  0x1b   :  { %1646 = vmatprep.subr.bf16.mxu1 %v2611_v38 }
  0x1d   :  { %1596 = vmatpush1.bf16.msra.mxu0 %v2577_v41  ;;  %v2616_v41 = vld [vmem:[%s3864_s3 + $0x2d0] ss:$36 sps:$4 sm:$0xff]  }
  0x1e   :  { %1597 = vmatprep.subr.bf16.mxu0 %v2578_v42  ;;  %v2617_v42 = vld [vmem:[%s3864_s3 + $0x4cc] ss:$36 sps:$4 sm:$0xff]   ;;  %1647 = vmatpush1.bf16.msra.mxu1 %v2615_v40 }
  0x1f   :  { %1648 = vmatprep.subr.bf16.mxu1 %v2617_v42 }
  0x21   :  { %1598 = vmatpush1.bf16.msra.mxu0 %v2580_v43  ;;  %v2619_v43 = vld [vmem:[%s3864_s3 + $0x28c] ss:$36 sps:$4 sm:$0xff]  }
  0x22   :  { %1599 = vmatprep.subr.bf16.mxu0 %v2583_v44  ;;  %v2877_v44 = vmov 0  }
  0x23   :  { %1668 = vmatprep.mubr.bf16.mxu1 %v2877_v44 }
  0x25   :  { %1600 = vmatpush2.bf16.msra.mxu0 %v2586_v45  ;;  %v2621_v45 = vld [vmem:[%s3864_s3 + $0x4c8] ss:$36 sps:$4 sm:$0xff]  }
  0x26   :  { %1601 = vmatprep.subr.bf16.mxu0 %v2589_v23  ;;  %1649 = vmatpush1.bf16.msra.mxu1 %v2621_v45 }
  0x29   :  { %1602 = vmatpush2.bf16.msra.mxu0 %v2592_v25 }
  0x2a   :  { %1603 = vmatprep.subr.bf16.mxu0 %v2595_v27 }
  0x2d   :  { %1604 = vmatpush2.bf16.msra.mxu0 %v2598_v29 }
  0x2e   :  { %1605 = vmatprep.subr.bf16.mxu0 %v2601_v31 }
  0x31   :  { %1606 = vmatpush2.bf16.msra.mxu0 %v2604_v33 }
  0x32   :  { %1607 = vmatprep.subr.bf16.mxu0 %v2607_v35 }
  0x35   :  { %1608 = vmatpush2.bf16.msra.mxu0 %v2610_v37 }
  0x36   :  { %1609 = vmatprep.subr.bf16.mxu0 %v2613_v39 }
  0x39   :  { %1610 = vmatpush2.bf16.msra.mxu0 %v2616_v41 }
  0x3a   :  { %1611 = vmatprep.subr.bf16.mxu0 %v2619_v43 }
  0x91   :  { %v44_v46 = vpop.xlane.xlu0 %43 }
  0x92   :  { %v58_v47 = vmul.f32 0.0026041667, %v44_v46  ;;  %v52_v48 = vpop.xlane.xlu1 %51  ;;  %v2622_v46 = vld [vmem:[%s3864_s3 + $0x288] ss:$36 sps:$4 sm:$0xff]  }
  0x93   :  { %v60_v49 = vmul.f32 0.0026041667, %v52_v48  ;;  %v2625_v48 = vld [vmem:[%s3864_s3 + $0x244] ss:$36 sps:$4 sm:$0xff]   ;;  %1612 = vmatpush2.bf16.msra.mxu0 %v2622_v46 }
  0x94   :  { %v3036_v50 = vsub.f32 %v29_v3, %v58_v47  ;;  %v3040_v51 = vsub.f32 %v30_v4, %v58_v47  ;;  %v3044_v52 = vsub.f32 %v31_v5, %v58_v47  ;;  %v2623_v47 = vld [vmem:[%s3864_s3 + $0x484] ss:$36 sps:$4 sm:$0xff]   ;;  %1613 = vmatprep.subr.bf16.mxu0 %v2625_v48 }
  0x95   :  { %v3048_v53 = vsub.f32 %v35_v6, %v60_v49  ;;  %v3052_v54 = vsub.f32 %v36_v10, %v60_v49  ;;  %v3056_v55 = vsub.f32 %v37_v11, %v60_v49  ;;  %v48_v56 = vpop.xlane.xlu0 %47  ;;  %v2627_v49 = vld [vmem:[%s3864_s3 + $0x480] ss:$36 sps:$4 sm:$0xff]   ;;  %1650 = vmatprep.subr.bf16.mxu1 %v2623_v47 }
  0x96   :  { %v59_v57 = vmul.f32 0.0026041667, %v48_v56  ;;  %v56_v58 = vpop.xlane.xlu1 %55  ;;  %v74_v59 = vmul.f32 %v3036_v50, %v3036_v50  ;;  %v75_v60 = vmul.f32 %v3040_v51, %v3040_v51  ;;  %v76_v61 = vmul.f32 %v3044_v52, %v3044_v52  ;;  %v2628_v56 = vld [vmem:[%s3864_s3 + $0x240] ss:$36 sps:$4 sm:$0xff]   ;;  %1651 = vmatpush1.bf16.msra.mxu1 %v2627_v49 }
  0x97   :  { %v61_v62 = vmul.f32 0.0026041667, %v56_v58  ;;  %v80_v63 = vmul.f32 %v3048_v53, %v3048_v53  ;;  %v81_v0 = vmul.f32 %v3052_v54, %v3052_v54  ;;  %v82_v1 = vmul.f32 %v3056_v55, %v3056_v55  ;;  %1614 = vmatpush2.bf16.msra.mxu0 %v2628_v56  ;;  %v2634_v58 = vld [vmem:[%s3864_s3 + $0x684] ss:$36 sps:$4 sm:$0xff]  }
  0x98   :  { %v3072_v2 = vsub.f32 %v32_v12, %v59_v57  ;;  %v3076_v3 = vsub.f32 %v33_v13, %v59_v57  ;;  %v3080_v4 = vsub.f32 %v34_v15, %v59_v57  ;;  %v86_v5 = vadd.f32 %v75_v60, %v74_v59  ;;  %v2631_v57 = vld [vmem:[%s3864_s3 + $0x204] ss:$36 sps:$4 sm:$0xff]   ;;  %1742 = vmatprep.subr.bf16.mxu0 %v2634_v58 }
  0x99   :  { %v3084_v6 = vsub.f32 %v38_v16, %v61_v62  ;;  %v3088_v10 = vsub.f32 %v39_v17, %v61_v62  ;;  %v3092_v11 = vsub.f32 %v40_v20, %v61_v62  ;;  %v94_v7 = vadd.f32 %v81_v0, %v80_v63  ;;  %1689 = vmatprep.subr.bf16.mxu1 %v2631_v57  ;;  %v2629_v46 = vld [vmem:[%s3864_s3 + $0x200] ss:$36 sps:$4 sm:$0xff]  }
  0x9a   :  { %v87_v12 = vadd.f32 %v86_v5, %v76_v61  ;;  %v77_v13 = vmul.f32 %v3072_v2, %v3072_v2  ;;  %v78_v14 = vmul.f32 %v3076_v3, %v3076_v3  ;;  %v79_v8 = vmul.f32 %v3080_v4, %v3080_v4 }
  0x9b   :  { %v83_v15 = vmul.f32 %v3084_v6, %v3084_v6  ;;  %v84_v9 = vmul.f32 %v3088_v10, %v3088_v10  ;;  %v95_v16 = vadd.f32 %v94_v7, %v82_v1  ;;  %v85_v18 = vmul.f32 %v3092_v11, %v3092_v11 }
  0x9c   :  { %88 = vadd.xlane.f32.xlu0 %v87_v12  ;;  %v90_v17 = vadd.f32 %v78_v14, %v77_v13  ;;  %v128_v5 = vlaneseq }
  0x9d   :  { %v98_v19 = vadd.f32 %v84_v9, %v83_v15 }
  0x9e   :  { %v91_v20 = vadd.f32 %v90_v17, %v79_v8  ;;  %v3197_v15 = vshrl.u32 %v128_v5, 7  ;;  %v126_v8 = vld [vmem:[%s3865_s1] sm:$0x7]  ;;  %v2638_v5 = vld [vmem:[%s3864_s3 + $0x638] ss:$36 sps:$4 sm:$0xff]  }
  0x9f   :  { %v99_v21 = vadd.f32 %v98_v19, %v85_v18 }
  0xa0   :  { %96 = vadd.xlane.f32.xlu0 %v95_v16  ;;  %92 = vadd.xlane.f32.xlu1 %v91_v20  ;;  %v3200_v16 = vsub.s32 1, %v3197_v15  ;;  %v3206_v17 = vsub.s32 2, %v3197_v15  ;;  %v3209_v18 = vsub.s32 0, %v3197_v15 }
  0xa2   :  { %v135_v19 = vrot.slane %v126_v8, %v3200_v16  ;;  %v139_v22 = vrot.slane %v126_v8, %v3206_v17  ;;  %v131_v26 = vrot.slane %v126_v8, %v3209_v18  ;;  %v2641_v8 = vld [vmem:[%s3864_s3 + $0x170] ss:$36 sps:$4 sm:$0xff]  }
  0xa4   :  { %100 = vadd.xlane.f32.xlu1 %v99_v21  ;;  %v155_v21 = vld [vmem:[%s3866_s2] sm:$0x7] }
  0xa5   :  { %v164_v28 = vrot.slane %v155_v21, %v3200_v16  ;;  %v168_v31 = vrot.slane %v155_v21, %v3206_v17 }
 0x125   :  { %v89_v59 = vpop.xlane.xlu0 %88 }
 0x126   :  { %v102_v60 = vmul.f32 0.0026041667, %v89_v59 }
 0x128   :  { %v106_v61 = vadd.f32 1e-05, %v102_v60 }
 0x129   :  { %v93_v62 = vpop.xlane.xlu1 %92  ;;  %v97_v63 = vpop.xlane.xlu0 %96 }
 0x12a   :  { %2869 = vrsqrt.f32 %v106_v61  ;;  %v103_v0 = vmul.f32 0.0026041667, %v93_v62  ;;  %v104_v1 = vmul.f32 0.0026041667, %v97_v63  ;;  %v2635_v63 = vld [vmem:[%s3864_s3 + $0x1b8] ss:$36 sps:$4 sm:$0xff]  }
 0x12c   :  { %v107_v7 = vadd.f32 1e-05, %v103_v0  ;;  %v108_v12 = vadd.f32 1e-05, %v104_v1 }
 0x12d   :  { %v101_v13 = vpop.xlane.xlu1 %100 }
 0x12e   :  { %2871 = vrsqrt.f32 %v107_v7  ;;  %v105_v14 = vmul.f32 0.0026041667, %v101_v13  ;;  %v2643_v7 = vld [vmem:[%s3864_s3 + $0x174] ss:$36 sps:$4 sm:$0xff]  }
 0x12f   :  { %2873 = vrsqrt.f32 %v108_v12  ;;  %v2646_v13 = vld [vmem:[%s3864_s3 + $0x5f4] ss:$36 sps:$4 sm:$0xff]  }
 0x130   :  { %v109_v9 = vadd.f32 1e-05, %v105_v14 }
 0x132   :  { %2875 = vrsqrt.f32 %v109_v9 }
 0x137   :  { %v2870_v20 = vpop.eup %2869 }
 0x138   :  { %v115_v23 = vmul.f32 %v2870_v20, %v3040_v51  ;;  %v116_v24 = vmul.f32 %v2870_v20, %v3044_v52  ;;  %v114_v25 = vmul.f32 %v2870_v20, %v3036_v50  ;;  %v160_v52 = vrot.slane %v155_v21, %v3209_v18  ;;  %v2644_v21 = vld [vmem:[%s3864_s3 + $0x5f0] ss:$36 sps:$4 sm:$0xff]  }
 0x13a   :  { %v144_v27 = vmul.f32 %v135_v19, %v115_v23  ;;  %v145_v30 = vmul.f32 %v139_v22, %v116_v24  ;;  %v143_v35 = vmul.f32 %v131_v26, %v114_v25  ;;  %v2649_v23 = vld [vmem:[%s3864_s3 + $0x12c] ss:$36 sps:$4 sm:$0xff]  }
 0x13b   :  { %v2872_v29 = vpop.eup %2871  ;;  %v2652_v24 = vld [vmem:[%s3864_s3 + $0x5ac] ss:$36 sps:$4 sm:$0xff]  }
 0x13c   :  { %v2874_v32 = vpop.eup %2873  ;;  %v118_v33 = vmul.f32 %v2872_v29, %v3076_v3  ;;  %v119_v34 = vmul.f32 %v2872_v29, %v3080_v4  ;;  %v117_v51 = vmul.f32 %v2872_v29, %v3072_v2  ;;  %v173_v37 = vadd.f32 %v164_v28, %v144_v27  ;;  %v2647_v25 = vld [vmem:[%s3864_s3 + $0x128] ss:$36 sps:$4 sm:$0xff]   ;;  %v2653_v29 = vld [vmem:[%s3864_s3 + $0xe0] ss:$36 sps:$4 sm:$0xff]  }
 0x13d   :  { %v121_v50 = vmul.f32 %v2874_v32, %v3052_v54  ;;  %v174_v40 = vadd.f32 %v168_v31, %v145_v30  ;;  %v122_v43 = vmul.f32 %v2874_v32, %v3056_v55  ;;  %v172_v54 = vadd.f32 %v160_v52, %v143_v35  ;;  %v2632_v55 = vld [vmem:[%s3864_s3 + $0x680] ss:$36 sps:$4 sm:$0xff]   ;;  %v2670_v35 = vld [vmem:[%s3864_s3 + $0x4d4] ss:$36 sps:$4 sm:$0xff]  }
 0x13e   :  { %v147_v36 = vmul.f32 %v135_v19, %v118_v33  ;;  %v148_v38 = vmul.f32 %v139_v22, %v119_v34  ;;  %v146_v41 = vmul.f32 %v131_v26, %v117_v51  ;;  %v120_v48 = vmul.f32 %v2874_v32, %v3048_v53  ;;  %v2640_v53 = vld [vmem:[%s3864_s3 + $0x63c] ss:$36 sps:$4 sm:$0xff]   ;;  %v2655_v27 = vld [vmem:[%s3864_s3 + $0xe4] ss:$36 sps:$4 sm:$0xff]   ;;  %v2667_v51 = vld [vmem:[%s3864_s3 + $0x54] ss:$36 sps:$4 sm:$0xff]  }
 0x13f   :  { %v2876_v39 = vpop.eup %2875  ;;  %v150_v42 = vmul.f32 %v135_v19, %v121_v50  ;;  %v151_v62 = vmul.f32 %v139_v22, %v122_v43  ;;  %v2656_v30 = vld [vmem:[%s3864_s3 + $0x560] ss:$36 sps:$4 sm:$0xff]   ;;  %v2659_v33 = vld [vmem:[%s3864_s3 + $0x98] ss:$36 sps:$4 sm:$0xff]   ;;  %v2668_v50 = vld [vmem:[%s3864_s3 + $0x4d0] ss:$36 sps:$4 sm:$0xff]  }
 0x140   :  { %v176_v45 = vadd.f32 %v164_v28, %v147_v36  ;;  %v177_v3 = vadd.f32 %v168_v31, %v148_v38  ;;  %v124_v4 = vmul.f32 %v2876_v39, %v3088_v10  ;;  %v125_v2 = vmul.f32 %v2876_v39, %v3092_v11  ;;  %v2637_v10 = vld [vmem:[%s3864_s3 + $0x1bc] ss:$36 sps:$4 sm:$0xff]   ;;  %v2673_v36 = vld [vmem:[%s3864_s3 + $0xc] ss:$36 sps:$4 sm:$0xff]  }
 0x141   :  { %v175_v47 = vadd.f32 %v160_v52, %v146_v41  ;;  %v123_v49 = vmul.f32 %v2876_v39, %v3084_v6  ;;  %v179_v60 = vadd.f32 %v164_v28, %v150_v42  ;;  %v149_v0 = vmul.f32 %v131_v26, %v120_v48  ;;  %v2664_v32 = vld [vmem:[%s3864_s3 + $0x51c] ss:$36 sps:$4 sm:$0xff]   ;;  %v2671_v38 = vld [vmem:[%s3864_s3 + $0x8] ss:$36 sps:$4 sm:$0xff]  }
 0x142   :  { %v3235_v56 = vpack.c.bf16 %v176_v45, %v173_v37  ;;  %v3237_v57 = vpack.c.bf16 %v177_v3, %v174_v40  ;;  %v153_v11 = vmul.f32 %v135_v19, %v124_v4  ;;  %v154_v58 = vmul.f32 %v139_v22, %v125_v2  ;;  %v2662_v34 = vld [vmem:[%s3864_s3 + $0x518] ss:$36 sps:$4 sm:$0xff]   ;;  %v2676_v37 = vld [vmem:[%s3864_s3 + $0x48c] ss:$36 sps:$4 sm:$0xff]   ;;  %v2679_v40 = vld [vmem:[%s3864_s3 + $0x444] ss:$36 sps:$4 sm:$0xff]  }
 0x143   :  { %v3245_v59 = vpack.c.bf16 %v175_v47, %v172_v54  ;;  %v152_v6 = vmul.f32 %v131_v26, %v123_v49  ;;  %v180_v9 = vadd.f32 %v168_v31, %v151_v62  ;;  %v178_v19 = vadd.f32 %v160_v52, %v149_v0  ;;  %v2650_v26 = vld [vmem:[%s3864_s3 + $0x5a8] ss:$36 sps:$4 sm:$0xff]   ;;  %v2677_v42 = vld [vmem:[%s3864_s3 + $0x440] ss:$36 sps:$4 sm:$0xff]   ;;  %v2683_v4 = vld [vmem:[%s3864_s3 + $0x3f8] ss:$36 sps:$4 sm:$0xff]  }
 0x144   :  { %1615 = vmatprep.mubr.bf16.mxu0 %v3235_v56  ;;  %1669 = vmatmul.mubr.bf16.vlgmr.msra.gmra.mxu1 %v3237_v57  ;;  %v182_v61 = vadd.f32 %v164_v28, %v153_v11  ;;  %v183_v12 = vadd.f32 %v168_v31, %v154_v58  ;;  %v2658_v28 = vld [vmem:[%s3864_s3 + $0x564] ss:$36 sps:$4 sm:$0xff]   ;;  %v2661_v31 = vld [vmem:[%s3864_s3 + $0x9c] ss:$36 sps:$4 sm:$0xff]   ;;  %v2682_v41 = vld [vmem:[%s3864_s3 + $0x20c] ss:$36 sps:$4 sm:$0xff]  }
 0x145   :  { %1690 = vmatpush1.bf16.msra.mxu1 %v2629_v46  ;;  %1616 = vmatmul.mubr.bf16.vlgmr.msra.gmra.mxu0 %v3245_v59  ;;  %v181_v14 = vadd.f32 %v160_v52, %v152_v6  ;;  %v2665_v52 = vld [vmem:[%s3864_s3 + $0x50] ss:$36 sps:$4 sm:$0xff]   ;;  %v2674_v39 = vld [vmem:[%s3864_s3 + $0x488] ss:$36 sps:$4 sm:$0xff]   ;;  %v2685_v45 = vld [vmem:[%s3864_s3 + $0x3fc] ss:$36 sps:$4 sm:$0xff]  }
 0x146   :  { %1743 = vmatpush1.bf16.msra.mxu0 %v2632_v55  ;;  %1691 = vmatprep.subr.bf16.mxu1 %v2637_v10  ;;  %v3256_v1 = vpack.c.bf16 %v182_v61, %v179_v60  ;;  %v3272_v20 = vpack.c.bf16 %v183_v12, %v180_v9  ;;  %v2680_v43 = vld [vmem:[%s3864_s3 + $0x208] ss:$36 sps:$4 sm:$0xff]   ;;  %v2686_v2 = vld [vmem:[%s3864_s3 + $0x1c0] ss:$36 sps:$4 sm:$0xff]   ;;  %v2691_v46 = vld [vmem:[%s3864_s3 + $0x3b4] ss:$36 sps:$4 sm:$0xff]  }
 0x147   :  { %1744 = vmatprep.subr.bf16.mxu0 %v2640_v53  ;;  %1678 = vmatprep.mubr.bf16.mxu1 %v2877_v44  ;;  %v3277_v22 = vpack.c.bf16 %v181_v14, %v178_v19  ;;  %v2688_v3 = vld [vmem:[%s3864_s3 + $0x1c4] ss:$36 sps:$4 sm:$0xff]   ;;  %v2694_v54 = vld [vmem:[%s3864_s3 + $0x17c] ss:$36 sps:$4 sm:$0xff]   ;;  %v2689_v47 = vld [vmem:[%s3864_s3 + $0x3b0] ss:$36 sps:$4 sm:$0xff]  }
 0x148   :  { %1625 = vmatprep.mubr.bf16.mxu0 %v3256_v1  ;;  %v2692_v48 = vld [vmem:[%s3864_s3 + $0x178] ss:$36 sps:$4 sm:$0xff]   ;;  %v2697_v49 = vld [vmem:[%s3864_s3 + $0x36c] ss:$36 sps:$4 sm:$0xff]   ;;  %v2703_v58 = vld [vmem:[%s3864_s3 + $0x324] ss:$36 sps:$4 sm:$0xff]  }
 0x149   :  { %1692 = vmatpush1.bf16.msra.mxu1 %v2635_v63  ;;  %v2700_v55 = vld [vmem:[%s3864_s3 + $0x134] ss:$36 sps:$4 sm:$0xff]   ;;  %v2695_v10 = vld [vmem:[%s3864_s3 + $0x368] ss:$36 sps:$4 sm:$0xff]   ;;  %v2701_v6 = vld [vmem:[%s3864_s3 + $0x320] ss:$36 sps:$4 sm:$0xff]  }
 0x14a   :  { %1745 = vmatpush1.bf16.msra.mxu0 %v2638_v5  ;;  %1693 = vmatprep.subr.bf16.mxu1 %v2643_v7  ;;  %v2698_v11 = vld [vmem:[%s3864_s3 + $0x130] ss:$36 sps:$4 sm:$0xff]   ;;  %v2704_v60 = vld [vmem:[%s3864_s3 + $0xe8] ss:$36 sps:$4 sm:$0xff]   ;;  %v2709_v61 = vld [vmem:[%s3864_s3 + $0x2dc] ss:$36 sps:$4 sm:$0xff]  }
 0x14b   :  { %1746 = vmatprep.subr.bf16.mxu0 %v2646_v13  ;;  %v2706_v53 = vld [vmem:[%s3864_s3 + $0xec] ss:$36 sps:$4 sm:$0xff]   ;;  %v2712_v62 = vld [vmem:[%s3864_s3 + $0xa4] ss:$36 sps:$4 sm:$0xff]   ;;  %v2707_v63 = vld [vmem:[%s3864_s3 + $0x2d8] ss:$36 sps:$4 sm:$0xff]  }
 0x14c   :  { %1679 = vmatmul.mubr.bf16.gmra.mxu1 %v3272_v20  ;;  %v2710_v0 = vld [vmem:[%s3864_s3 + $0xa0] ss:$36 sps:$4 sm:$0xff]   ;;  %v2715_v5 = vld [vmem:[%s3864_s3 + $0x294] ss:$36 sps:$4 sm:$0xff]   ;;  %v2721_v14 = vld [vmem:[%s3864_s3 + $0x24c] ss:$36 sps:$4 sm:$0xff]  }
 0x14d   :  { %1694 = vmatpush1.bf16.msra.mxu1 %v2641_v8  ;;  %1626 = vmatmul.mubr.bf16.gmra.mxu0 %v3277_v22  ;;  %v2718_v7 = vld [vmem:[%s3864_s3 + $0x5c] ss:$36 sps:$4 sm:$0xff]   ;;  %v2713_v12 = vld [vmem:[%s3864_s3 + $0x290] ss:$36 sps:$4 sm:$0xff]   ;;  %v2719_v8 = vld [vmem:[%s3864_s3 + $0x248] ss:$36 sps:$4 sm:$0xff]  }
 0x14e   :  { %1721 = vmatprep.mubr.bf16.mxu1 %v3235_v56  ;;  %1747 = vmatpush1.bf16.msra.mxu0 %v2644_v21  ;;  %v2716_v13 = vld [vmem:[%s3864_s3 + $0x58] ss:$36 sps:$4 sm:$0xff]   ;;  %v2722_v19 = vld [vmem:[%s3864_s3 + $0x10] ss:$36 sps:$4 sm:$0xff]  }
 0x14f   :  { %1695 = vmatprep.subr.bf16.mxu1 %v2649_v23  ;;  %1748 = vmatprep.subr.bf16.mxu0 %v2652_v24  ;;  %v2724_v9 = vld [vmem:[%s3864_s3 + $0x14] ss:$36 sps:$4 sm:$0xff]   ;;  %v2727_v21 = vld [vmem:[%s3864_s3 + $0x68c] ss:$36 sps:$4 sm:$0xff]  }
 0x150   :  { %1774 = vmatprep.mubr.bf16.mxu0 %v2877_v44  ;;  %v2730_v23 = vld [vmem:[%s3864_s3 + $0x44c] ss:$36 sps:$4 sm:$0xff]  }
 0x151   :  { %1696 = vmatpush1.bf16.msra.mxu1 %v2647_v25  ;;  %v2725_v24 = vld [vmem:[%s3864_s3 + $0x688] ss:$36 sps:$4 sm:$0xff]  }
 0x152   :  { %1749 = vmatpush1.bf16.msra.mxu0 %v2650_v26  ;;  %1697 = vmatprep.subr.bf16.mxu1 %v2655_v27  ;;  %v2728_v25 = vld [vmem:[%s3864_s3 + $0x448] ss:$36 sps:$4 sm:$0xff]  }
 0x153   :  { %1750 = vmatprep.subr.bf16.mxu0 %v2658_v28  ;;  %v2733_v26 = vld [vmem:[%s3864_s3 + $0x644] ss:$36 sps:$4 sm:$0xff]  }
 0x154   :  { %v2736_v27 = vld [vmem:[%s3864_s3 + $0x404] ss:$36 sps:$4 sm:$0xff]  }
 0x155   :  { %1698 = vmatpush1.bf16.msra.mxu1 %v2653_v29  ;;  %v2731_v28 = vld [vmem:[%s3864_s3 + $0x640] ss:$36 sps:$4 sm:$0xff]  }
 0x156   :  { %1751 = vmatpush1.bf16.msra.mxu0 %v2656_v30  ;;  %1699 = vmatprep.subr.bf16.mxu1 %v2661_v31  ;;  %v2734_v29 = vld [vmem:[%s3864_s3 + $0x400] ss:$36 sps:$4 sm:$0xff]  }
 0x157   :  { %1752 = vmatprep.subr.bf16.mxu0 %v2664_v32  ;;  %v2739_v30 = vld [vmem:[%s3864_s3 + $0x5fc] ss:$36 sps:$4 sm:$0xff]  }
 0x158   :  { %v2742_v31 = vld [vmem:[%s3864_s3 + $0x3bc] ss:$36 sps:$4 sm:$0xff]  }
 0x159   :  { %1700 = vmatpush1.bf16.msra.mxu1 %v2659_v33  ;;  %v2737_v32 = vld [vmem:[%s3864_s3 + $0x5f8] ss:$36 sps:$4 sm:$0xff]  }
 0x15a   :  { %1753 = vmatpush1.bf16.msra.mxu0 %v2662_v34  ;;  %1701 = vmatprep.subr.bf16.mxu1 %v2667_v51  ;;  %v2740_v33 = vld [vmem:[%s3864_s3 + $0x3b8] ss:$36 sps:$4 sm:$0xff]  }
 0x15b   :  { %1754 = vmatprep.subr.bf16.mxu0 %v2670_v35  ;;  %v2745_v34 = vld [vmem:[%s3864_s3 + $0x5b4] ss:$36 sps:$4 sm:$0xff]  }
 0x15c   :  { %v2748_v51 = vld [vmem:[%s3864_s3 + $0x374] ss:$36 sps:$4 sm:$0xff]  }
 0x15d   :  { %1702 = vmatpush1.bf16.msra.mxu1 %v2665_v52  ;;  %v2743_v35 = vld [vmem:[%s3864_s3 + $0x5b0] ss:$36 sps:$4 sm:$0xff]  }
 0x15e   :  { %1755 = vmatpush1.bf16.msra.mxu0 %v2668_v50  ;;  %1703 = vmatprep.subr.bf16.mxu1 %v2673_v36  ;;  %v2746_v52 = vld [vmem:[%s3864_s3 + $0x370] ss:$36 sps:$4 sm:$0xff]  }
 0x15f   :  { %1756 = vmatprep.subr.bf16.mxu0 %v2676_v37  ;;  %v2751_v50 = vld [vmem:[%s3864_s3 + $0x56c] ss:$36 sps:$4 sm:$0xff]  }
 0x160   :  { %v2754_v36 = vld [vmem:[%s3864_s3 + $0x32c] ss:$36 sps:$4 sm:$0xff]  }
 0x161   :  { %1704 = vmatpush1.bf16.msra.mxu1 %v2671_v38  ;;  %v2749_v37 = vld [vmem:[%s3864_s3 + $0x568] ss:$36 sps:$4 sm:$0xff]  }
 0x162   :  { %1757 = vmatpush1.bf16.msra.mxu0 %v2674_v39  ;;  %1705 = vmatprep.subr.bf16.mxu1 %v2679_v40  ;;  %v2752_v38 = vld [vmem:[%s3864_s3 + $0x328] ss:$36 sps:$4 sm:$0xff]  }
 0x163   :  { %1795 = vmatprep.subr.bf16.mxu0 %v2682_v41  ;;  %v2757_v39 = vld [vmem:[%s3864_s3 + $0x524] ss:$36 sps:$4 sm:$0xff]  }
 0x164   :  { %v2760_v40 = vld [vmem:[%s3864_s3 + $0x2e4] ss:$36 sps:$4 sm:$0xff]  }
 0x165   :  { %1706 = vmatpush2.bf16.msra.mxu1 %v2677_v42  ;;  %1775 = vmatmul.mubr.bf16.vlgmr.msra.gmra.mxu0 %v3237_v57  ;;  %v2755_v41 = vld [vmem:[%s3864_s3 + $0x520] ss:$36 sps:$4 sm:$0xff]  }
 0x166   :  { %1796 = vmatpush1.bf16.msra.mxu0 %v2680_v43  ;;  %1707 = vmatprep.subr.bf16.mxu1 %v2685_v45  ;;  %v2758_v42 = vld [vmem:[%s3864_s3 + $0x2e0] ss:$36 sps:$4 sm:$0xff]  }
 0x167   :  { %1797 = vmatprep.subr.bf16.mxu0 %v2688_v3  ;;  %1784 = vmatprep.mubr.bf16.mxu0 %v2877_v44  ;;  %v2763_v43 = vld [vmem:[%s3864_s3 + $0x4dc] ss:$36 sps:$4 sm:$0xff]  }
 0x168   :  { %v2766_v45 = vld [vmem:[%s3864_s3 + $0x29c] ss:$36 sps:$4 sm:$0xff]  }
 0x169   :  { %1708 = vmatpush2.bf16.msra.mxu1 %v2683_v4  ;;  %v2761_v3 = vld [vmem:[%s3864_s3 + $0x4d8] ss:$36 sps:$4 sm:$0xff]  }
 0x16a   :  { %1798 = vmatpush1.bf16.msra.mxu0 %v2686_v2  ;;  %1709 = vmatprep.subr.bf16.mxu1 %v2691_v46  ;;  %v2764_v4 = vld [vmem:[%s3864_s3 + $0x298] ss:$36 sps:$4 sm:$0xff]  }
 0x16b   :  { %1799 = vmatprep.subr.bf16.mxu0 %v2694_v54  ;;  %v2769_v2 = vld [vmem:[%s3864_s3 + $0x494] ss:$36 sps:$4 sm:$0xff]  }
 0x16c   :  { %v2772_v46 = vld [vmem:[%s3864_s3 + $0x254] ss:$36 sps:$4 sm:$0xff]  }
 0x16d   :  { %1710 = vmatpush2.bf16.msra.mxu1 %v2689_v47  ;;  %1785 = vmatmul.mubr.bf16.gmra.mxu0 %v3272_v20  ;;  %v2767_v54 = vld [vmem:[%s3864_s3 + $0x490] ss:$36 sps:$4 sm:$0xff]  }
 0x16e   :  { %1800 = vmatpush1.bf16.msra.mxu0 %v2692_v48  ;;  %1827 = vmatprep.mubr.bf16.mxu0 %v3235_v56  ;;  %v2770_v47 = vld [vmem:[%s3864_s3 + $0x250] ss:$36 sps:$4 sm:$0xff]  }
 0x16f   :  { %1711 = vmatprep.subr.bf16.mxu1 %v2697_v49  ;;  %1801 = vmatprep.subr.bf16.mxu0 %v2700_v55  ;;  %v2775_v48 = vld [vmem:[%s3864_s3 + $0x214] ss:$36 sps:$4 sm:$0xff]  }
 0x170   :  { %v2778_v49 = vld [vmem:[%s3864_s3 + $0x694] ss:$36 sps:$4 sm:$0xff]  }
 0x171   :  { %1712 = vmatpush2.bf16.msra.mxu1 %v2695_v10  ;;  %v2773_v55 = vld [vmem:[%s3864_s3 + $0x210] ss:$36 sps:$4 sm:$0xff]  }
 0x172   :  { %1802 = vmatpush1.bf16.msra.mxu0 %v2698_v11  ;;  %1713 = vmatprep.subr.bf16.mxu1 %v2703_v58  ;;  %v2776_v10 = vld [vmem:[%s3864_s3 + $0x690] ss:$36 sps:$4 sm:$0xff]  }
 0x173   :  { %1803 = vmatprep.subr.bf16.mxu0 %v2706_v53  ;;  %v2781_v11 = vld [vmem:[%s3864_s3 + $0x1cc] ss:$36 sps:$4 sm:$0xff]  }
 0x174   :  { %v2784_v58 = vld [vmem:[%s3864_s3 + $0x64c] ss:$36 sps:$4 sm:$0xff]  }
 0x175   :  { %1714 = vmatpush2.bf16.msra.mxu1 %v2701_v6  ;;  %v2779_v53 = vld [vmem:[%s3864_s3 + $0x1c8] ss:$36 sps:$4 sm:$0xff]  }
 0x176   :  { %1804 = vmatpush1.bf16.msra.mxu0 %v2704_v60  ;;  %1715 = vmatprep.subr.bf16.mxu1 %v2709_v61  ;;  %v2782_v6 = vld [vmem:[%s3864_s3 + $0x648] ss:$36 sps:$4 sm:$0xff]  }
 0x177   :  { %1805 = vmatprep.subr.bf16.mxu0 %v2712_v62  ;;  %v2787_v60 = vld [vmem:[%s3864_s3 + $0x184] ss:$36 sps:$4 sm:$0xff]  }
 0x178   :  { %v2790_v61 = vld [vmem:[%s3864_s3 + $0x604] ss:$36 sps:$4 sm:$0xff]  }
 0x179   :  { %1716 = vmatpush2.bf16.msra.mxu1 %v2707_v63  ;;  %v2785_v62 = vld [vmem:[%s3864_s3 + $0x180] ss:$36 sps:$4 sm:$0xff]  }
 0x17a   :  { %1806 = vmatpush1.bf16.msra.mxu0 %v2710_v0  ;;  %1717 = vmatprep.subr.bf16.mxu1 %v2715_v5  ;;  %v2788_v63 = vld [vmem:[%s3864_s3 + $0x600] ss:$36 sps:$4 sm:$0xff]  }
 0x17b   :  { %1807 = vmatprep.subr.bf16.mxu0 %v2718_v7  ;;  %v2793_v0 = vld [vmem:[%s3864_s3 + $0x13c] ss:$36 sps:$4 sm:$0xff]  }
 0x17c   :  { %v2796_v5 = vld [vmem:[%s3864_s3 + $0x5bc] ss:$36 sps:$4 sm:$0xff]  }
 0x17d   :  { %1718 = vmatpush2.bf16.msra.mxu1 %v2713_v12  ;;  %v2791_v7 = vld [vmem:[%s3864_s3 + $0x138] ss:$36 sps:$4 sm:$0xff]  }
 0x17e   :  { %1808 = vmatpush1.bf16.msra.mxu0 %v2716_v13  ;;  %1719 = vmatprep.subr.bf16.mxu1 %v2721_v14  ;;  %v2794_v12 = vld [vmem:[%s3864_s3 + $0x5b8] ss:$36 sps:$4 sm:$0xff]  }
 0x17f   :  { %1809 = vmatprep.subr.bf16.mxu0 %v2724_v9  ;;  %v2799_v13 = vld [vmem:[%s3864_s3 + $0xf4] ss:$36 sps:$4 sm:$0xff]  }
 0x180   :  { %v2802_v14 = vld [vmem:[%s3864_s3 + $0x574] ss:$36 sps:$4 sm:$0xff]  }
 0x181   :  { %1720 = vmatpush2.bf16.msra.mxu1 %v2719_v8  ;;  %v2797_v9 = vld [vmem:[%s3864_s3 + $0xf0] ss:$36 sps:$4 sm:$0xff]  }
 0x182   :  { %1810 = vmatpush1.bf16.msra.mxu0 %v2722_v19  ;;  %1848 = vmatprep.subr.bf16.mxu1 %v2727_v21  ;;  %v2800_v8 = vld [vmem:[%s3864_s3 + $0x570] ss:$36 sps:$4 sm:$0xff]  }
 0x183   :  { %1811 = vmatprep.subr.bf16.mxu0 %v2730_v23  ;;  %v2805_v19 = vld [vmem:[%s3864_s3 + $0xac] ss:$36 sps:$4 sm:$0xff]  }
 0x184   :  { %1722 = vmatmul.mubr.bf16.vlgmr.msra.gmra.mxu1 %v3245_v59  ;;  %v2808_v21 = vld [vmem:[%s3864_s3 + $0x52c] ss:$36 sps:$4 sm:$0xff]  }
 0x185   :  { %1731 = vmatprep.mubr.bf16.mxu1 %v3256_v1  ;;  %1849 = vmatpush1.bf16.msra.mxu1 %v2725_v24  ;;  %v2803_v23 = vld [vmem:[%s3864_s3 + $0xa8] ss:$36 sps:$4 sm:$0xff]  }
 0x186   :  { %1812 = vmatpush2.bf16.msra.mxu0 %v2728_v25  ;;  %1850 = vmatprep.subr.bf16.mxu1 %v2733_v26  ;;  %v2806_v24 = vld [vmem:[%s3864_s3 + $0x528] ss:$36 sps:$4 sm:$0xff]  }
 0x187   :  { %1813 = vmatprep.subr.bf16.mxu0 %v2736_v27  ;;  %v2811_v25 = vld [vmem:[%s3864_s3 + $0x64] ss:$36 sps:$4 sm:$0xff]  }
 0x188   :  { %v2814_v26 = vld [vmem:[%s3864_s3 + $0x4e4] ss:$36 sps:$4 sm:$0xff]  }
 0x189   :  { %1851 = vmatpush1.bf16.msra.mxu1 %v2731_v28  ;;  %v2809_v27 = vld [vmem:[%s3864_s3 + $0x60] ss:$36 sps:$4 sm:$0xff]  }
 0x18a   :  { %1814 = vmatpush2.bf16.msra.mxu0 %v2734_v29  ;;  %1852 = vmatprep.subr.bf16.mxu1 %v2739_v30  ;;  %v2812_v28 = vld [vmem:[%s3864_s3 + $0x4e0] ss:$36 sps:$4 sm:$0xff]  }
 0x18b   :  { %1815 = vmatprep.subr.bf16.mxu0 %v2742_v31  ;;  %v2817_v29 = vld [vmem:[%s3864_s3 + $0x1c] ss:$36 sps:$4 sm:$0xff]  }
 0x18c   :  { %1732 = vmatmul.mubr.bf16.gmra.mxu1 %v3277_v22  ;;  %v2820_v30 = vld [vmem:[%s3864_s3 + $0x49c] ss:$36 sps:$4 sm:$0xff]  }
 0x18d   :  { %1853 = vmatpush1.bf16.msra.mxu1 %v2737_v32  ;;  %1880 = vmatprep.mubr.bf16.mxu1 %v2877_v44  ;;  %v2815_v31 = vld [vmem:[%s3864_s3 + $0x18] ss:$36 sps:$4 sm:$0xff]  }
 0x18e   :  { %1816 = vmatpush2.bf16.msra.mxu0 %v2740_v33  ;;  %1854 = vmatprep.subr.bf16.mxu1 %v2745_v34  ;;  %v2818_v32 = vld [vmem:[%s3864_s3 + $0x498] ss:$36 sps:$4 sm:$0xff]  }
 0x18f   :  { %1817 = vmatprep.subr.bf16.mxu0 %v2748_v51  ;;  %v2823_v33 = vld [vmem:[%s3864_s3 + $0x454] ss:$36 sps:$4 sm:$0xff]  }
 0x190   :  { %v2824_v34 = vld [vmem:[%s3864_s3 + $0x458] ss:$36 sps:$4 sm:$0xff]   ;;  %v2821_v51 = vld [vmem:[%s3864_s3 + $0x450] ss:$36 sps:$4 sm:$0xff]  }
 0x191   :  { %1855 = vmatpush1.bf16.msra.mxu1 %v2743_v35  ;;  %v2825_v35 = vld [vmem:[%s3864_s3 + $0x218] ss:$36 sps:$4 sm:$0xff]  }
 0x192   :  { %1818 = vmatpush2.bf16.msra.mxu0 %v2746_v52  ;;  %1856 = vmatprep.subr.bf16.mxu1 %v2751_v50  ;;  %v2828_v52 = vld [vmem:[%s3864_s3 + $0x40c] ss:$36 sps:$4 sm:$0xff]  }
 0x193   :  { %1819 = vmatprep.subr.bf16.mxu0 %v2754_v36  ;;  %v2829_v50 = vld [vmem:[%s3864_s3 + $0x410] ss:$36 sps:$4 sm:$0xff]   ;;  %v2826_v36 = vld [vmem:[%s3864_s3 + $0x408] ss:$36 sps:$4 sm:$0xff]  }
 0x195   :  { %1857 = vmatpush1.bf16.msra.mxu1 %v2749_v37  ;;  %v2830_v37 = vld [vmem:[%s3864_s3 + $0x1d0] ss:$36 sps:$4 sm:$0xff]  }
 0x196   :  { %1820 = vmatpush2.bf16.msra.mxu0 %v2752_v38  ;;  %1858 = vmatprep.subr.bf16.mxu1 %v2757_v39  ;;  %v2833_v38 = vld [vmem:[%s3864_s3 + $0x3c4] ss:$36 sps:$4 sm:$0xff]  }
 0x197   :  { %1821 = vmatprep.subr.bf16.mxu0 %v2760_v40  ;;  %v2834_v39 = vld [vmem:[%s3864_s3 + $0x3c8] ss:$36 sps:$4 sm:$0xff]   ;;  %v2831_v40 = vld [vmem:[%s3864_s3 + $0x3c0] ss:$36 sps:$4 sm:$0xff]  }
 0x199   :  { %1859 = vmatpush1.bf16.msra.mxu1 %v2755_v41  ;;  %v2835_v41 = vld [vmem:[%s3864_s3 + $0x188] ss:$36 sps:$4 sm:$0xff]  }
 0x19a   :  { %1822 = vmatpush2.bf16.msra.mxu0 %v2758_v42  ;;  %1860 = vmatprep.subr.bf16.mxu1 %v2763_v43  ;;  %v2839_v42 = vld [vmem:[%s3864_s3 + $0x380] ss:$36 sps:$4 sm:$0xff]   ;;  %v2836_v43 = vld [vmem:[%s3864_s3 + $0x378] ss:$36 sps:$4 sm:$0xff]  }
 0x19b   :  { %1823 = vmatprep.subr.bf16.mxu0 %v2766_v45  ;;  %v2840_v45 = vld [vmem:[%s3864_s3 + $0x140] ss:$36 sps:$4 sm:$0xff]  }
 0x19d   :  { %1861 = vmatpush1.bf16.msra.mxu1 %v2761_v3  ;;  %v2843_v3 = vld [vmem:[%s3864_s3 + $0x334] ss:$36 sps:$4 sm:$0xff]  }
 0x19e   :  { %1824 = vmatpush2.bf16.msra.mxu0 %v2764_v4  ;;  %1862 = vmatprep.subr.bf16.mxu1 %v2769_v2  ;;  %v2844_v4 = vld [vmem:[%s3864_s3 + $0x338] ss:$36 sps:$4 sm:$0xff]   ;;  %v2841_v2 = vld [vmem:[%s3864_s3 + $0x330] ss:$36 sps:$4 sm:$0xff]  }
 0x19f   :  { %1825 = vmatprep.subr.bf16.mxu0 %v2772_v46  ;;  %v2848_v46 = vld [vmem:[%s3864_s3 + $0x2ec] ss:$36 sps:$4 sm:$0xff]  }
 0x1a1   :  { %1863 = vmatpush1.bf16.msra.mxu1 %v2767_v54  ;;  %v2849_v54 = vld [vmem:[%s3864_s3 + $0x2f0] ss:$36 sps:$4 sm:$0xff]  }
 0x1a2   :  { %1826 = vmatpush2.bf16.msra.mxu0 %v2770_v47  ;;  %1901 = vmatprep.subr.bf16.mxu1 %v2775_v48  ;;  %v2846_v47 = vld [vmem:[%s3864_s3 + $0x2e8] ss:$36 sps:$4 sm:$0xff]   ;;  %v2850_v48 = vld [vmem:[%s3864_s3 + $0xb0] ss:$36 sps:$4 sm:$0xff]  }
 0x1a3   :  { %1954 = vmatprep.subr.bf16.mxu0 %v2778_v49  ;;  %v2853_v49 = vld [vmem:[%s3864_s3 + $0x2a4] ss:$36 sps:$4 sm:$0xff]  }
 0x1a4   :  { %1881 = vmatmul.mubr.bf16.vlgmr.msra.gmra.mxu1 %v3237_v57 }
 0x1a5   :  { %1828 = vmatmul.mubr.bf16.vlgmr.msra.gmra.mxu0 %v3245_v59  ;;  %1902 = vmatpush1.bf16.msra.mxu1 %v2773_v55  ;;  %v2854_v55 = vld [vmem:[%s3864_s3 + $0x2a8] ss:$36 sps:$4 sm:$0xff]  }
 0x1a6   :  { %1837 = vmatprep.mubr.bf16.mxu0 %v3256_v1  ;;  %1955 = vmatpush1.bf16.msra.mxu0 %v2776_v10  ;;  %v2851_v10 = vld [vmem:[%s3864_s3 + $0x2a0] ss:$36 sps:$4 sm:$0xff]  }
 0x1a7   :  { %1903 = vmatprep.subr.bf16.mxu1 %v2781_v11  ;;  %1956 = vmatprep.subr.bf16.mxu0 %v2784_v58  ;;  %v2855_v11 = vld [vmem:[%s3864_s3 + $0x68] ss:$36 sps:$4 sm:$0xff]   ;;  %v2858_v58 = vld [vmem:[%s3864_s3 + $0x25c] ss:$36 sps:$4 sm:$0xff]  }
 0x1a8   :  { %1890 = vmatprep.mubr.bf16.mxu1 %v2877_v44 }
 0x1a9   :  { %1904 = vmatpush1.bf16.msra.mxu1 %v2779_v53  ;;  %v2859_v53 = vld [vmem:[%s3864_s3 + $0x260] ss:$36 sps:$4 sm:$0xff]  }
 0x1aa   :  { %1957 = vmatpush1.bf16.msra.mxu0 %v2782_v6  ;;  %1905 = vmatprep.subr.bf16.mxu1 %v2787_v60  ;;  %v2856_v6 = vld [vmem:[%s3864_s3 + $0x258] ss:$36 sps:$4 sm:$0xff]   ;;  %v2860_v60 = vld [vmem:[%s3864_s3 + $0x20] ss:$36 sps:$4 sm:$0xff]  }
 0x1ab   :  { %1958 = vmatprep.subr.bf16.mxu0 %v2790_v61  ;;  %v2861_v61 = vld [vmem:[%s3864_s3 + $0x698] ss:$36 sps:$4 sm:$0xff]  }
 0x1ac   :  { %1891 = vmatmul.mubr.bf16.gmra.mxu1 %v3272_v20 }
 0x1ad   :  { %1838 = vmatmul.mubr.bf16.gmra.mxu0 %v3277_v22  ;;  %1906 = vmatpush1.bf16.msra.mxu1 %v2785_v62  ;;  %v2862_v62 = vld [vmem:[%s3864_s3 + $0x650] ss:$36 sps:$4 sm:$0xff]  }
 0x1ae   :  { %1933 = vmatprep.mubr.bf16.mxu1 %v3235_v56  ;;  %1959 = vmatpush1.bf16.msra.mxu0 %v2788_v63  ;;  %v2863_v63 = vld [vmem:[%s3864_s3 + $0x608] ss:$36 sps:$4 sm:$0xff]  }
 0x1af   :  { %1907 = vmatprep.subr.bf16.mxu1 %v2793_v0  ;;  %1960 = vmatprep.subr.bf16.mxu0 %v2796_v5  ;;  %v2864_v0 = vld [vmem:[%s3864_s3 + $0x5c0] ss:$36 sps:$4 sm:$0xff]  }
 0x1b0   :  { %1986 = vmatprep.mubr.bf16.mxu0 %v2877_v44  ;;  %v3781_v5 = vld [vmem:[%s3867_s4] sm:$0xff] }
 0x1b1   :  { %1908 = vmatpush1.bf16.msra.mxu1 %v2791_v7  ;;  %v437_v7 = vrot.slane %v3781_v5, %v3209_v18 }
 0x1b2   :  { %1961 = vmatpush1.bf16.msra.mxu0 %v2794_v12  ;;  %1909 = vmatprep.subr.bf16.mxu1 %v2799_v13  ;;  %v441_v13 = vrot.slane %v3781_v5, %v3200_v16 }
 0x1b3   :  { %1962 = vmatprep.subr.bf16.mxu0 %v2802_v14 }
 0x1b5   :  { %1910 = vmatpush1.bf16.msra.mxu1 %v2797_v9 }
 0x1b6   :  { %1963 = vmatpush1.bf16.msra.mxu0 %v2800_v8  ;;  %1911 = vmatprep.subr.bf16.mxu1 %v2805_v19 }
 0x1b7   :  { %1964 = vmatprep.subr.bf16.mxu0 %v2808_v21 }
 0x1b9   :  { %1912 = vmatpush1.bf16.msra.mxu1 %v2803_v23 }
 0x1ba   :  { %1965 = vmatpush1.bf16.msra.mxu0 %v2806_v24  ;;  %1913 = vmatprep.subr.bf16.mxu1 %v2811_v25 }
 0x1bb   :  { %1966 = vmatprep.subr.bf16.mxu0 %v2814_v26 }
 0x1bd   :  { %1914 = vmatpush1.bf16.msra.mxu1 %v2809_v27 }
 0x1be   :  { %1967 = vmatpush1.bf16.msra.mxu0 %v2812_v28  ;;  %1915 = vmatprep.subr.bf16.mxu1 %v2817_v29 }
 0x1bf   :  { %1968 = vmatprep.subr.bf16.mxu0 %v2820_v30 }
 0x1c1   :  { %1916 = vmatpush1.bf16.msra.mxu1 %v2815_v31 }
 0x1c2   :  { %1969 = vmatpush1.bf16.msra.mxu0 %v2818_v32  ;;  %1917 = vmatprep.subr.bf16.mxu1 %v2823_v33 }
 0x1c3   :  { %2498 = vmatprep.subr.bf16.mxu0 %v2824_v34 }
 0x1c5   :  { %1918 = vmatpush2.bf16.msra.mxu1 %v2821_v51  ;;  %1987 = vmatmul.mubr.bf16.vlgmr.msra.gmra.mxu0 %v3237_v57 }
 0x1c6   :  { %2499 = vmatpush3.bf16.msra.mxu0 %v2825_v35  ;;  %1919 = vmatprep.subr.bf16.mxu1 %v2828_v52 }
 0x1c7   :  { %2500 = vmatprep.subr.bf16.mxu0 %v2829_v50  ;;  %1996 = vmatprep.mubr.bf16.mxu0 %v2877_v44  ;;  %v2838_v44 = vld [vmem:[%s3864_s3 + $0x37c] ss:$36 sps:$4 sm:$0xff]  }
 0x1c9   :  { %1920 = vmatpush2.bf16.msra.mxu1 %v2826_v36 }
 0x1ca   :  { %2501 = vmatpush3.bf16.msra.mxu0 %v2830_v37  ;;  %1921 = vmatprep.subr.bf16.mxu1 %v2833_v38 }
 0x1cb   :  { %2502 = vmatprep.subr.bf16.mxu0 %v2834_v39 }
 0x1cd   :  { %1922 = vmatpush2.bf16.msra.mxu1 %v2831_v40  ;;  %1997 = vmatmul.mubr.bf16.gmra.mxu0 %v3272_v20 }
 0x1ce   :  { %2503 = vmatpush3.bf16.msra.mxu0 %v2835_v41  ;;  %2039 = vmatprep.mubr.bf16.mxu0 %v3235_v56  ;;  %v2845_v56 = vld [vmem:[%s3864_s3 + $0xf8] ss:$36 sps:$4 sm:$0xff]  }
 0x1cf   :  { %1923 = vmatprep.subr.bf16.mxu1 %v2838_v44  ;;  %2504 = vmatprep.subr.bf16.mxu0 %v2839_v42 }
 0x1d1   :  { %1924 = vmatpush2.bf16.msra.mxu1 %v2836_v43 }
 0x1d2   :  { %2505 = vmatpush3.bf16.msra.mxu0 %v2840_v45  ;;  %1925 = vmatprep.subr.bf16.mxu1 %v2843_v3 }
 0x1d3   :  { %2506 = vmatprep.subr.bf16.mxu0 %v2844_v4 }
 0x1d5   :  { %1926 = vmatpush2.bf16.msra.mxu1 %v2841_v2 }
 0x1d6   :  { %2507 = vmatpush3.bf16.msra.mxu0 %v2845_v56  ;;  %1927 = vmatprep.subr.bf16.mxu1 %v2848_v46  ;;  %v448_v56 = vsub.s32 3, %v3197_v15 }
 0x1d7   :  { %2508 = vmatprep.subr.bf16.mxu0 %v2849_v54  ;;  %v445_v54 = vrot.slane %v3781_v5, %v3206_v17 }
 0x1d9   :  { %1928 = vmatpush2.bf16.msra.mxu1 %v2846_v47  ;;  %v449_v47 = vrot.slane %v3781_v5, %v448_v56 }
 0x1da   :  { %2509 = vmatpush3.bf16.msra.mxu0 %v2850_v48  ;;  %1929 = vmatprep.subr.bf16.mxu1 %v2853_v49 }
 0x1db   :  { %2510 = vmatprep.subr.bf16.mxu0 %v2854_v55 }
 0x1dd   :  { %1930 = vmatpush2.bf16.msra.mxu1 %v2851_v10 }
 0x1de   :  { %2511 = vmatpush3.bf16.msra.mxu0 %v2855_v11  ;;  %1931 = vmatprep.subr.bf16.mxu1 %v2858_v58 }
 0x1df   :  { %2512 = vmatprep.subr.bf16.mxu0 %v2859_v53 }
 0x1e1   :  { %1932 = vmatpush2.bf16.msra.mxu1 %v2856_v6 }
 0x1e2   :  { %2513 = vmatpush3.bf16.msra.mxu0 %v2860_v60  ;;  %2536 = vmatprep.subr.bf16.mxu1 %v2861_v61 }
 0x1e4   :  { %1934 = vmatmul.mubr.bf16.vlgmr.msra.gmra.mxu1 %v3245_v59 }
 0x1e5   :  { %1943 = vmatprep.mubr.bf16.mxu1 %v3256_v1  ;;  %2040 = vmatmul.mubr.bf16.vlgmr.msra.gmra.mxu0 %v3245_v59  ;;  %v2865_v59 = vld [vmem:[%s3864_s3 + $0x578] ss:$36 sps:$4 sm:$0xff]  }
 0x1e6   :  { %2537 = vmatpush3.bf16.msra.mxu1 %v2861_v61  ;;  %2047 = vmatprep.mubr.bf16.mxu0 %v3256_v1  ;;  %v2866_v1 = vld [vmem:[%s3864_s3 + $0x530] ss:$36 sps:$4 sm:$0xff]  }
 0x1e7   :  { %2538 = vmatprep.subr.bf16.mxu1 %v2862_v62 }
 0x1ea   :  { %2539 = vmatpush3.bf16.msra.mxu1 %v2862_v62 }
 0x1eb   :  { %2540 = vmatprep.subr.bf16.mxu1 %v2863_v63 }
 0x1ec   :  { %1944 = vmatmul.mubr.bf16.gmra.mxu1 %v3277_v22 }
 0x1ed   :  { %2048 = vmatmul.mubr.bf16.gmra.mxu0 %v3277_v22  ;;  %2552 = vmatprep.mubr.bf16.mxu1 %v3237_v57  ;;  %v2867_v22 = vld [vmem:[%s3864_s3 + $0x4e8] ss:$36 sps:$4 sm:$0xff]   ;;  %v2868_v57 = vld [vmem:[%s3864_s3 + $0x4a0] ss:$36 sps:$4 sm:$0xff]  }
 0x1ee   :  { %2541 = vmatpush3.bf16.msra.mxu1 %v2863_v63 }
 0x1ef   :  { %2542 = vmatprep.subr.bf16.mxu1 %v2864_v0 }
 0x1f2   :  { %2543 = vmatpush3.bf16.msra.mxu1 %v2864_v0 }
 0x1f3   :  { %2544 = vmatprep.subr.bf16.mxu1 %v2865_v59 }
 0x1f6   :  { %2545 = vmatpush3.bf16.msra.mxu1 %v2865_v59 }
 0x1f7   :  { %2546 = vmatprep.subr.bf16.mxu1 %v2866_v1 }
 0x1fa   :  { %2547 = vmatpush3.bf16.msra.mxu1 %v2866_v1 }
 0x1fb   :  { %2548 = vmatprep.subr.bf16.mxu1 %v2867_v22 }
 0x1fe   :  { %2549 = vmatpush3.bf16.msra.mxu1 %v2867_v22 }
 0x1ff   :  { %2550 = vmatprep.subr.bf16.mxu1 %v2868_v57 }
 0x202   :  { %2551 = vmatpush3.bf16.msra.mxu1 %v2868_v57 }
 0x204   :  { %v1670_v12 = vpop.f32.mrf.mxu1 }
 0x205   :  { %2553 = vmatmul.mubr.bf16.vlgmr.msra.gmra.mxu1 %v3272_v20  ;;  %v1617_v14 = vpop.f32.mrf.mxu0 }
 0x206   :  { %v1618_v9 = vadd.f32 %v1617_v14, %v437_v7  ;;  %v1672_v8 = vpop.f32.mrf.mxu1 }
 0x207   :  { %v1619_v19 = vpop.f32.mrf.mxu0 }
 0x208   :  { %v1620_v21 = vadd.f32 %v1619_v19, %v441_v13  ;;  %v1674_v23 = vpop.f32.mrf.mxu1  ;;  %v1671_v25 = vadd.f32 %v1670_v12, %v1618_v9 }
 0x209   :  { %v1621_v24 = vpop.f32.mrf.mxu0 }
 0x20a   :  { %v1673_v26 = vadd.f32 %v1672_v8, %v1620_v21  ;;  %v1622_v27 = vadd.f32 %v1621_v24, %v437_v7  ;;  %v1676_v28 = vpop.f32.mrf.mxu1 }
 0x20b   :  { %v1623_v29 = vpop.f32.mrf.mxu0 }
 0x20c   :  { %v2478_v30 = vpack.c.bf16 %v1673_v26, %v1671_v25  ;;  %v1624_v18 = vadd.f32 %v1623_v29, %v441_v13  ;;  %v1680_v31 = vpop.f32.mrf.mxu1  ;;  %v1675_v16 = vadd.f32 %v1674_v23, %v1622_v27 }
 0x20d   :  { %v1627_v32 = vpop.f32.mrf.mxu0 }
 0x20e   :  { %2217 = vst [vmem:[%s3868_s5] sm:$0xff] %v2478_v30  ;;  %v1677_v20 = vadd.f32 %v1676_v28, %v1624_v18  ;;  %v1628_v33 = vadd.f32 %v1627_v32, %v437_v7  ;;  %v1682_v34 = vpop.f32.mrf.mxu1  ;;  %v452_v30 = vsub.s32 4, %v3197_v15  ;;  %v456_v18 = vsub.s32 5, %v3197_v15 }
 0x20f   :  { %v1629_v51 = vpop.f32.mrf.mxu0 }
 0x210   :  { %v2483_v35 = vpack.c.bf16 %v1677_v20, %v1675_v16  ;;  %v1630_v52 = vadd.f32 %v1629_v51, %v441_v13  ;;  %v1684_v50 = vpop.f32.mrf.mxu1  ;;  %v1681_v37 = vadd.f32 %v1680_v31, %v1628_v33  ;;  %v453_v31 = vrot.slane %v3781_v5, %v452_v30 }
 0x211   :  { %v1631_v36 = vpop.f32.mrf.mxu0  ;;  %v457_v16 = vrot.slane %v3781_v5, %v456_v18 }
 0x212   :  { %2222 = vst [vmem:[%s3868_s5 + $0x24] sm:$0xff] %v2483_v35  ;;  %v1683_v38 = vadd.f32 %v1682_v34, %v1630_v52  ;;  %v1632_v39 = vadd.f32 %v1631_v36, %v437_v7  ;;  %v1686_v42 = vpop.f32.mrf.mxu1 }
 0x213   :  { %v1633_v40 = vpop.f32.mrf.mxu0 }
 0x214   :  { %v2488_v41 = vpack.c.bf16 %v1683_v38, %v1681_v37  ;;  %v1634_v44 = vadd.f32 %v1633_v40, %v441_v13  ;;  %v1685_v43 = vadd.f32 %v1684_v50, %v1632_v39 }
 0x216   :  { %2227 = vst [vmem:[%s3868_s5 + $0x48] sm:$0xff] %v2488_v41  ;;  %v1687_v45 = vadd.f32 %v1686_v42, %v1634_v44 }
 0x218   :  { %v2493_v3 = vpack.c.bf16 %v1687_v45, %v1685_v43 }
 0x21a   :  { %2232 = vst [vmem:[%s3868_s5 + $0x6c] sm:$0xff] %v2493_v3 }
 0x225   :  { %v1776_v4 = vpop.f32.mrf.mxu0 }
 0x227   :  { %v1778_v2 = vpop.f32.mrf.mxu0 }
 0x229   :  { %v1780_v46 = vpop.f32.mrf.mxu0 }
 0x22b   :  { %v1782_v48 = vpop.f32.mrf.mxu0 }
 0x22d   :  { %v1786_v58 = vpop.f32.mrf.mxu0 }
 0x22f   :  { %v1788_v59 = vpop.f32.mrf.mxu0 }
 0x231   :  { %v1790_v14 = vpop.f32.mrf.mxu0 }
 0x233   :  { %v1792_v26 = vpop.f32.mrf.mxu0 }
 0x244   :  { %v1723_v49 = vpop.f32.mrf.mxu1 }
 0x245   :  { %v1724_v55 = vadd.f32 %v1723_v49, %v445_v54 }
 0x246   :  { %v1725_v10 = vpop.f32.mrf.mxu1 }
 0x247   :  { %v1726_v11 = vadd.f32 %v1725_v10, %v449_v47  ;;  %v1777_v6 = vadd.f32 %v1776_v4, %v1724_v55 }
 0x248   :  { %v1727_v53 = vpop.f32.mrf.mxu1 }
 0x249   :  { %v1779_v60 = vadd.f32 %v1778_v2, %v1726_v11  ;;  %v1728_v61 = vadd.f32 %v1727_v53, %v445_v54 }
 0x24a   :  { %v1729_v62 = vpop.f32.mrf.mxu1 }
 0x24b   :  { %v2479_v63 = vpack.c.bf16 %v1779_v60, %v1777_v6  ;;  %v1730_v0 = vadd.f32 %v1729_v62, %v449_v47  ;;  %v1781_v17 = vadd.f32 %v1780_v46, %v1728_v61 }
 0x24c   :  { %v1733_v1 = vpop.f32.mrf.mxu1 }
 0x24d   :  { %2218 = vst [vmem:[%s3868_s5 + $0x8] sm:$0xff] %v2479_v63  ;;  %v1783_v22 = vadd.f32 %v1782_v48, %v1730_v0  ;;  %v1734_v57 = vadd.f32 %v1733_v1, %v445_v54 }
 0x24e   :  { %v1735_v7 = vpop.f32.mrf.mxu1 }
 0x24f   :  { %v2484_v12 = vpack.c.bf16 %v1783_v22, %v1781_v17  ;;  %v1736_v13 = vadd.f32 %v1735_v7, %v449_v47  ;;  %v1787_v8 = vadd.f32 %v1786_v58, %v1734_v57  ;;  %v460_v57 = vsub.s32 6, %v3197_v15 }
 0x250   :  { %v1737_v9 = vpop.f32.mrf.mxu1 }
 0x251   :  { %2223 = vst [vmem:[%s3868_s5 + $0x2c] sm:$0xff] %v2484_v12  ;;  %v1789_v19 = vadd.f32 %v1788_v59, %v1736_v13  ;;  %v1738_v21 = vadd.f32 %v1737_v9, %v445_v54  ;;  %v464_v12 = vsub.s32 7, %v3197_v15  ;;  %v461_v13 = vrot.slane %v3781_v5, %v460_v57 }
 0x252   :  { %v1739_v23 = vpop.f32.mrf.mxu1 }
 0x253   :  { %v2489_v24 = vpack.c.bf16 %v1789_v19, %v1787_v8  ;;  %v1740_v25 = vadd.f32 %v1739_v23, %v449_v47  ;;  %v1791_v27 = vadd.f32 %v1790_v14, %v1738_v21  ;;  %v465_v9 = vrot.slane %v3781_v5, %v464_v12 }
 0x255   :  { %2228 = vst [vmem:[%s3868_s5 + $0x50] sm:$0xff] %v2489_v24  ;;  %v1793_v28 = vadd.f32 %v1792_v26, %v1740_v25 }
 0x257   :  { %v2494_v29 = vpack.c.bf16 %v1793_v28, %v1791_v27 }
 0x259   :  { %2233 = vst [vmem:[%s3868_s5 + $0x74] sm:$0xff] %v2494_v29 }
 0x264   :  { %v1882_v32 = vpop.f32.mrf.mxu1 }
 0x265   :  { %v1829_v20 = vpop.f32.mrf.mxu0 }
 0x266   :  { %v1830_v33 = vadd.f32 %v1829_v20, %v453_v31  ;;  %v1884_v34 = vpop.f32.mrf.mxu1 }
 0x267   :  { %v1831_v51 = vpop.f32.mrf.mxu0 }
 0x268   :  { %v1832_v35 = vadd.f32 %v1831_v51, %v457_v16  ;;  %v1886_v52 = vpop.f32.mrf.mxu1  ;;  %v1883_v36 = vadd.f32 %v1882_v32, %v1830_v33 }
 0x269   :  { %v1833_v50 = vpop.f32.mrf.mxu0 }
 0x26a   :  { %v1885_v37 = vadd.f32 %v1884_v34, %v1832_v35  ;;  %v1834_v38 = vadd.f32 %v1833_v50, %v453_v31  ;;  %v1888_v39 = vpop.f32.mrf.mxu1 }
 0x26b   :  { %v1835_v40 = vpop.f32.mrf.mxu0 }
 0x26c   :  { %v2480_v41 = vpack.c.bf16 %v1885_v37, %v1883_v36  ;;  %v1836_v44 = vadd.f32 %v1835_v40, %v457_v16  ;;  %v1892_v42 = vpop.f32.mrf.mxu1  ;;  %v1887_v45 = vadd.f32 %v1886_v52, %v1834_v38 }
 0x26d   :  { %v1839_v43 = vpop.f32.mrf.mxu0 }
 0x26e   :  { %2219 = vst [vmem:[%s3868_s5 + $0x10] sm:$0xff] %v2480_v41  ;;  %v1889_v3 = vadd.f32 %v1888_v39, %v1836_v44  ;;  %v1840_v4 = vadd.f32 %v1839_v43, %v453_v31  ;;  %v1894_v2 = vpop.f32.mrf.mxu1 }
 0x26f   :  { %v1841_v56 = vpop.f32.mrf.mxu0 }
 0x270   :  { %v2485_v46 = vpack.c.bf16 %v1889_v3, %v1887_v45  ;;  %v1842_v54 = vadd.f32 %v1841_v56, %v457_v16  ;;  %v1896_v47 = vpop.f32.mrf.mxu1  ;;  %v1893_v49 = vadd.f32 %v1892_v42, %v1840_v4 }
 0x271   :  { %v1843_v48 = vpop.f32.mrf.mxu0 }
 0x272   :  { %2224 = vst [vmem:[%s3868_s5 + $0x34] sm:$0xff] %v2485_v46  ;;  %v1895_v55 = vadd.f32 %v1894_v2, %v1842_v54  ;;  %v1844_v10 = vadd.f32 %v1843_v48, %v453_v31  ;;  %v1898_v6 = vpop.f32.mrf.mxu1  ;;  %v2241_v46 = vld [vmem:[%s3867_s4 + $0x8] ss:$0 sm:$0xff] }
 0x273   :  { %v1845_v11 = vpop.f32.mrf.mxu0 }
 0x274   :  { %v2490_v58 = vpack.c.bf16 %v1895_v55, %v1893_v49  ;;  %v1846_v53 = vadd.f32 %v1845_v11, %v457_v16  ;;  %v1897_v60 = vadd.f32 %v1896_v47, %v1844_v10 }
 0x276   :  { %2229 = vst [vmem:[%s3868_s5 + $0x58] sm:$0xff] %v2490_v58  ;;  %v1899_v61 = vadd.f32 %v1898_v6, %v1846_v53 }
 0x278   :  { %v2495_v62 = vpack.c.bf16 %v1899_v61, %v1897_v60 }
 0x27a   :  { %2234 = vst [vmem:[%s3868_s5 + $0x7c] sm:$0xff] %v2495_v62 }
 0x285   :  { %v1988_v63 = vpop.f32.mrf.mxu0 }
 0x287   :  { %v1990_v0 = vpop.f32.mrf.mxu0 }
 0x289   :  { %v1992_v59 = vpop.f32.mrf.mxu0 }
 0x28b   :  { %v1994_v1 = vpop.f32.mrf.mxu0 }
 0x28d   :  { %v1998_v17 = vpop.f32.mrf.mxu0 }
 0x28f   :  { %v2000_v22 = vpop.f32.mrf.mxu0 }
 0x291   :  { %v2002_v7 = vpop.f32.mrf.mxu0 }
 0x293   :  { %v2004_v14 = vpop.f32.mrf.mxu0 }
 0x2a4   :  { %v1935_v8 = vpop.f32.mrf.mxu1 }
 0x2a5   :  { %v1936_v19 = vadd.f32 %v1935_v8, %v461_v13  ;;  %v2514_v21 = vpop.f32.mrf.mxu0 }
 0x2a6   :  { %v1937_v23 = vpop.f32.mrf.mxu1 }
 0x2a7   :  { %v1938_v24 = vadd.f32 %v1937_v23, %v465_v9  ;;  %v1989_v26 = vadd.f32 %v1988_v63, %v1936_v19  ;;  %v2515_v28 = vpop.f32.mrf.mxu0 }
 0x2a8   :  { %v1939_v25 = vpop.f32.mrf.mxu1  ;;  %v2516_v56 = vadd.f32 %v2515_v28, %v2514_v21 }
 0x2a9   :  { %v1991_v27 = vadd.f32 %v1990_v0, %v1938_v24  ;;  %v1940_v29 = vadd.f32 %v1939_v25, %v461_v13  ;;  %v2517_v5 = vpop.f32.mrf.mxu0 }
 0x2aa   :  { %v1941_v30 = vpop.f32.mrf.mxu1  ;;  %v2042_v10 = vadd.f32 %v2516_v56, %v2241_v46 }
 0x2ab   :  { %v2481_v18 = vpack.c.bf16 %v1991_v27, %v1989_v26  ;;  %v1942_v31 = vadd.f32 %v1941_v30, %v465_v9  ;;  %v1993_v15 = vadd.f32 %v1992_v59, %v1940_v29  ;;  %v2518_v52 = vpop.f32.mrf.mxu0 }
 0x2ac   :  { %v1945_v32 = vpop.f32.mrf.mxu1  ;;  %v2519_v49 = vadd.f32 %v2518_v52, %v2517_v5 }
 0x2ad   :  { %2220 = vst [vmem:[%s3868_s5 + $0x18] sm:$0xff] %v2481_v18  ;;  %v1995_v16 = vadd.f32 %v1994_v1, %v1942_v31  ;;  %v1946_v20 = vadd.f32 %v1945_v32, %v461_v13  ;;  %v2520_v41 = vpop.f32.mrf.mxu0 }
 0x2ae   :  { %v1947_v33 = vpop.f32.mrf.mxu1  ;;  %v2045_v63 = vadd.f32 %v2519_v49, %v2241_v46 }
 0x2af   :  { %v2486_v34 = vpack.c.bf16 %v1995_v16, %v1993_v15  ;;  %v1948_v51 = vadd.f32 %v1947_v33, %v465_v9  ;;  %v1999_v50 = vadd.f32 %v1998_v17, %v1946_v20  ;;  %v2521_v45 = vpop.f32.mrf.mxu0 }
 0x2b0   :  { %v1949_v35 = vpop.f32.mrf.mxu1  ;;  %v2522_v4 = vadd.f32 %v2521_v45, %v2520_v41 }
 0x2b1   :  { %2225 = vst [vmem:[%s3868_s5 + $0x3c] sm:$0xff] %v2486_v34  ;;  %v2001_v36 = vadd.f32 %v2000_v22, %v1948_v51  ;;  %v1950_v37 = vadd.f32 %v1949_v35, %v461_v13  ;;  %v2523_v3 = vpop.f32.mrf.mxu0 }
 0x2b2   :  { %v1951_v38 = vpop.f32.mrf.mxu1  ;;  %v2050_v47 = vadd.f32 %v2522_v4, %v2241_v46 }
 0x2b3   :  { %v2491_v39 = vpack.c.bf16 %v2001_v36, %v1999_v50  ;;  %v1952_v40 = vadd.f32 %v1951_v38, %v465_v9  ;;  %v2003_v44 = vadd.f32 %v2002_v7, %v1950_v37  ;;  %v2524_v2 = vpop.f32.mrf.mxu0 }
 0x2b4   :  { %v2525_v54 = vadd.f32 %v2524_v2, %v2523_v3 }
 0x2b5   :  { %2230 = vst [vmem:[%s3868_s5 + $0x60] sm:$0xff] %v2491_v39  ;;  %v2005_v42 = vadd.f32 %v2004_v14, %v1952_v40 }
 0x2b6   :  { %v2053_v6 = vadd.f32 %v2525_v54, %v2241_v46 }
 0x2b7   :  { %v2496_v43 = vpack.c.bf16 %v2005_v42, %v2003_v44 }
 0x2b9   :  { %2235 = vst [vmem:[%s3868_s5 + $0x84] sm:$0xff] %v2496_v43 }
 0x2c5   :  { %v2554_v48 = vpop.f32.mrf.mxu1 }
 0x2c6   :  { %v2099_v55 = vadd.f32 %v2554_v48, %v2050_v47 }
 0x2c7   :  { %v2090_v11 = vpop.f32.mrf.mxu1 }
 0x2c8   :  { %v2492_v58 = vpack.c.bf16 %v2099_v55, %v2099_v55  ;;  %v2091_v53 = vadd.f32 %v2090_v11, %v2042_v10 }
 0x2c9   :  { %v2555_v60 = vpop.f32.mrf.mxu1 }
 0x2ca   :  { %2231 = vst [vmem:[%s3868_s5 + $0x68] sm:$0xf] %v2492_v58  ;;  %v2482_v61 = vpack.c.bf16 %v2091_v53, %v2091_v53  ;;  %v2102_v62 = vadd.f32 %v2555_v60, %v2053_v6 }
 0x2cb   :  { %v2093_v0 = vpop.f32.mrf.mxu1 }
 0x2cc   :  { %2221 = vst [vmem:[%s3868_s5 + $0x20] sm:$0xf] %v2482_v61  ;;  %v2497_v59 = vpack.c.bf16 %v2102_v62, %v2102_v62  ;;  %v2094_v1 = vadd.f32 %v2093_v0, %v2045_v63 }
 0x2ce   :  { %2236 = vst [vmem:[%s3868_s5 + $0x8c] sm:$0xf] %v2497_v59  ;;  %v2487_v17 = vpack.c.bf16 %v2094_v1, %v2094_v1 }
 0x2d0   :  { %2226 = vst [vmem:[%s3868_s5 + $0x44] sm:$0xf] %v2487_v17 }

// kernel: forward.49
= control target key start
LH: loop header
LB: loop body
LE: loop exit
PB: predicated region body
PF: predicated region fallthrough
CT: control target
= control target key end

     0   :  { %s840_s0 = inlined_call_operand.vmem [shape: bf16[32,384], index: 0, kind: input, shape index: {}]   ;;  %s841_s3 = inlined_call_operand.vmem [shape: bf16[384,128], index: 3, kind: input, shape index: {}]   ;;  %s842_s1 = inlined_call_operand.vmem [shape: f32[1,384], index: 1, kind: input, shape index: {}]   ;;  %s843_s2 = inlined_call_operand.vmem [shape: f32[1,384], index: 2, kind: input, shape index: {}]   ;;  %s844_s4 = inlined_call_operand.vmem [shape: f32[1,128], index: 4, kind: input, shape index: {}]   ;;  %s845_s5 = inlined_call_operand.vmem [shape: bf16[32,128], index: 5, kind: output, shape index: {}]  }
   0x1   :  { %v21_v0 = vld [vmem:[%s840_s0] sm:$0xff]  ;;  %v25_v2 = vld [vmem:[%s840_s0 + $0x18] sm:$0xff]  ;;  %v23_v7 = vld [vmem:[%s840_s0 + $0xc] sm:$0xff] }
   0x2   :  { %v22_v1 = vld [vmem:[%s840_s0 + $0x8] ss:$24 sps:$4 sm:$0xff]   ;;  %v29_v3 = vunpack.c.l.bf16 %v21_v0  ;;  %v30_v4 = vunpack.c.h.bf16 %v21_v0  ;;  %v35_v6 = vunpack.c.l.bf16 %v25_v2  ;;  %v24_v8 = vld [vmem:[%s840_s0 + $0x14] ss:$24 sps:$4 sm:$0xff]   ;;  %v36_v10 = vunpack.c.h.bf16 %v25_v2  ;;  %v613_v26 = vld [vmem:[%s841_s3 + $0x78] sm:$0xff]  }
   0x3   :  { %v31_v5 = vunpack.c.l.bf16 %v22_v1  ;;  %v27_v9 = vld [vmem:[%s840_s0 + $0x24] sm:$0xff]  ;;  %v37_v11 = vunpack.c.h.bf16 %v22_v1  ;;  %v32_v12 = vunpack.c.l.bf16 %v23_v7  ;;  %v33_v13 = vunpack.c.h.bf16 %v23_v7  ;;  %555 = vmatprep.subr.bf16.mxu0 %v613_v26  ;;  %v618_v7 = vld [vmem:[%s841_s3 + $0xb0] sm:$0xff]  }
   0x4   :  { %v41_v14 = vadd.f32 %v30_v4, %v29_v3  ;;  %v34_v15 = vunpack.c.l.bf16 %v24_v8  ;;  %v38_v16 = vunpack.c.l.bf16 %v27_v9  ;;  %v39_v17 = vunpack.c.h.bf16 %v27_v9  ;;  %v620_v9 = vld [vmem:[%s841_s3 + $0x28] sm:$0xff]  }
   0x5   :  { %v49_v18 = vadd.f32 %v36_v10, %v35_v6  ;;  %v45_v19 = vadd.f32 %v33_v13, %v32_v12  ;;  %v40_v20 = vunpack.c.h.bf16 %v24_v8  ;;  %v619_v8 = vld [vmem:[%s841_s3 + $0x68] sm:$0xff]  }
   0x6   :  { %v42_v21 = vadd.f32 %v41_v14, %v31_v5  ;;  %v53_v22 = vadd.f32 %v39_v17, %v38_v16  ;;  %v625_v14 = vld [vmem:[%s841_s3 + $0x58] sm:$0xff]  }
   0x7   :  { %v50_v23 = vadd.f32 %v49_v18, %v37_v11  ;;  %v46_v24 = vadd.f32 %v45_v19, %v34_v15  ;;  %v629_v18 = vld [vmem:[%s841_s3 + $0x10] sm:$0xff]  }
   0x8   :  { %43 = vadd.xlane.f32.xlu0 %v42_v21  ;;  %v54_v25 = vadd.f32 %v53_v22, %v40_v20  ;;  %v630_v19 = vld [vmem:[%s841_s3 + $0x90] sm:$0xff]   ;;  %v632_v21 = vld [vmem:[%s841_s3 + $0x8] sm:$0xff]  }
   0x9   :  { %51 = vadd.xlane.f32.xlu1 %v50_v23  ;;  %v633_v22 = vld [vmem:[%s841_s3 + $0x88] sm:$0xff]   ;;  %v634_v23 = vld [vmem:[%s841_s3 + $0x40] sm:$0xff]  }
   0xc   :  { %47 = vadd.xlane.f32.xlu0 %v46_v24  ;;  %v635_v24 = vld [vmem:[%s841_s3] sm:$0xff]  }
   0xd   :  { %55 = vadd.xlane.f32.xlu1 %v54_v25  ;;  %v636_v25 = vld [vmem:[%s841_s3 + $0x80] sm:$0xff]  }
  0x91   :  { %v44_v27 = vpop.xlane.xlu0 %43 }
  0x92   :  { %v58_v28 = vmul.f32 0.0026041667, %v44_v27  ;;  %v52_v29 = vpop.xlane.xlu1 %51 }
  0x93   :  { %v60_v30 = vmul.f32 0.0026041667, %v52_v29 }
  0x94   :  { %v696_v31 = vsub.f32 %v29_v3, %v58_v28  ;;  %v698_v32 = vsub.f32 %v30_v4, %v58_v28  ;;  %v700_v33 = vsub.f32 %v31_v5, %v58_v28  ;;  %v614_v3 = vld [vmem:[%s841_s3 + $0x38] sm:$0xff]   ;;  %v616_v5 = vld [vmem:[%s841_s3 + $0x70] sm:$0xff]  }
  0x95   :  { %v702_v34 = vsub.f32 %v35_v6, %v60_v30  ;;  %v704_v35 = vsub.f32 %v36_v10, %v60_v30  ;;  %v706_v36 = vsub.f32 %v37_v11, %v60_v30  ;;  %v48_v37 = vpop.xlane.xlu0 %47  ;;  %556 = vmatpush3.bf16.msra.mxu0 %v614_v3  ;;  %v615_v4 = vld [vmem:[%s841_s3 + $0xb8] sm:$0xff]   ;;  %v617_v6 = vld [vmem:[%s841_s3 + $0x30] sm:$0xff]   ;;  %v621_v10 = vld [vmem:[%s841_s3 + $0xa8] sm:$0xff]  }
  0x96   :  { %v59_v38 = vmul.f32 0.0026041667, %v48_v37  ;;  %v56_v39 = vpop.xlane.xlu1 %55  ;;  %v74_v40 = vmul.f32 %v696_v31, %v696_v31  ;;  %v75_v41 = vmul.f32 %v698_v32, %v698_v32  ;;  %v76_v42 = vmul.f32 %v700_v33, %v700_v33  ;;  %593 = vmatprep.subr.bf16.mxu1 %v615_v4  ;;  %557 = vmatprep.subr.bf16.mxu0 %v616_v5  ;;  %v622_v11 = vld [vmem:[%s841_s3 + $0x60] sm:$0xff]  }
  0x97   :  { %v61_v43 = vmul.f32 0.0026041667, %v56_v39  ;;  %v80_v44 = vmul.f32 %v702_v34, %v702_v34  ;;  %v81_v45 = vmul.f32 %v704_v35, %v704_v35  ;;  %v82_v46 = vmul.f32 %v706_v36, %v706_v36  ;;  %594 = vmatpush3.bf16.msra.mxu1 %v615_v4 }
  0x98   :  { %v720_v47 = vsub.f32 %v32_v12, %v59_v38  ;;  %v722_v48 = vsub.f32 %v33_v13, %v59_v38  ;;  %v724_v49 = vsub.f32 %v34_v15, %v59_v38  ;;  %v86_v50 = vadd.f32 %v75_v41, %v74_v40  ;;  %595 = vmatprep.subr.bf16.mxu1 %v618_v7  ;;  %v623_v12 = vld [vmem:[%s841_s3 + $0x20] sm:$0xff]   ;;  %v626_v15 = vld [vmem:[%s841_s3 + $0x18] sm:$0xff]  }
  0x99   :  { %v726_v51 = vsub.f32 %v38_v16, %v61_v43  ;;  %v728_v52 = vsub.f32 %v39_v17, %v61_v43  ;;  %v730_v53 = vsub.f32 %v40_v20, %v61_v43  ;;  %v94_v54 = vadd.f32 %v81_v45, %v80_v44  ;;  %558 = vmatpush3.bf16.msra.mxu0 %v617_v6  ;;  %v624_v13 = vld [vmem:[%s841_s3 + $0xa0] sm:$0xff]   ;;  %v627_v16 = vld [vmem:[%s841_s3 + $0x98] sm:$0xff]   ;;  %v628_v17 = vld [vmem:[%s841_s3 + $0x50] sm:$0xff]  }
  0x9a   :  { %v87_v55 = vadd.f32 %v86_v50, %v76_v42  ;;  %v77_v56 = vmul.f32 %v720_v47, %v720_v47  ;;  %v78_v57 = vmul.f32 %v722_v48, %v722_v48  ;;  %v79_v61 = vmul.f32 %v724_v49, %v724_v49  ;;  %559 = vmatprep.subr.bf16.mxu0 %v619_v8  ;;  %v631_v20 = vld [vmem:[%s841_s3 + $0x48] sm:$0xff]   ;;  %v126_v50 = vld [vmem:[%s842_s1] sm:$0x7] }
  0x9b   :  { %v83_v58 = vmul.f32 %v726_v51, %v726_v51  ;;  %v84_v59 = vmul.f32 %v728_v52, %v728_v52  ;;  %v95_v60 = vadd.f32 %v94_v54, %v82_v46  ;;  %v85_v63 = vmul.f32 %v730_v53, %v730_v53  ;;  %596 = vmatpush3.bf16.msra.mxu1 %v618_v7 }
  0x9c   :  { %88 = vadd.xlane.f32.xlu0 %v87_v55  ;;  %v90_v62 = vadd.f32 %v78_v57, %v77_v56  ;;  %597 = vmatprep.subr.bf16.mxu1 %v621_v10  ;;  %v128_v39 = vlaneseq }
  0x9d   :  { %v98_v0 = vadd.f32 %v84_v59, %v83_v58  ;;  %560 = vmatpush3.bf16.msra.mxu0 %v620_v9  ;;  %v155_v58 = vld [vmem:[%s843_s2] sm:$0x7] }
  0x9e   :  { %v91_v1 = vadd.f32 %v90_v62, %v79_v61  ;;  %561 = vmatprep.subr.bf16.mxu0 %v622_v11  ;;  %v129_v44 = vshrl.u32 %v128_v39, 7 }
  0x9f   :  { %v99_v2 = vadd.f32 %v98_v0, %v85_v63  ;;  %598 = vmatpush3.bf16.msra.mxu1 %v621_v10 }
  0xa0   :  { %96 = vadd.xlane.f32.xlu0 %v95_v60  ;;  %92 = vadd.xlane.f32.xlu1 %v91_v1  ;;  %v134_v46 = vsub.s32 1, %v129_v44  ;;  %v138_v54 = vsub.s32 2, %v129_v44  ;;  %v130_v55 = vsub.s32 0, %v129_v44  ;;  %v511_v44 = vld [vmem:[%s844_s4] ss:$0 sm:$0xff] }
  0xa1   :  { %562 = vmatpush3.bf16.msra.mxu0 %v623_v12  ;;  %599 = vmatprep.subr.bf16.mxu1 %v624_v13 }
  0xa2   :  { %563 = vmatprep.subr.bf16.mxu0 %v625_v14  ;;  %v135_v56 = vrot.slane %v126_v50, %v134_v46  ;;  %v139_v59 = vrot.slane %v126_v50, %v138_v54  ;;  %v131_v63 = vrot.slane %v126_v50, %v130_v55  ;;  %v164_v1 = vrot.slane %v155_v58, %v134_v46 }
  0xa3   :  { %600 = vmatpush3.bf16.msra.mxu1 %v624_v13  ;;  %v168_v4 = vrot.slane %v155_v58, %v138_v54  ;;  %v160_v8 = vrot.slane %v155_v58, %v130_v55 }
  0xa4   :  { %100 = vadd.xlane.f32.xlu1 %v99_v2  ;;  %601 = vmatprep.subr.bf16.mxu1 %v627_v16 }
  0xa5   :  { %564 = vmatpush3.bf16.msra.mxu0 %v626_v15 }
  0xa6   :  { %565 = vmatprep.subr.bf16.mxu0 %v628_v17 }
  0xa7   :  { %602 = vmatpush3.bf16.msra.mxu1 %v627_v16 }
  0xa8   :  { %603 = vmatprep.subr.bf16.mxu1 %v630_v19 }
  0xa9   :  { %566 = vmatpush3.bf16.msra.mxu0 %v629_v18 }
  0xaa   :  { %567 = vmatprep.subr.bf16.mxu0 %v631_v20 }
  0xab   :  { %604 = vmatpush3.bf16.msra.mxu1 %v630_v19 }
  0xac   :  { %605 = vmatprep.subr.bf16.mxu1 %v633_v22 }
  0xad   :  { %568 = vmatpush3.bf16.msra.mxu0 %v632_v21 }
  0xae   :  { %569 = vmatprep.subr.bf16.mxu0 %v634_v23 }
  0xaf   :  { %606 = vmatpush3.bf16.msra.mxu1 %v633_v22 }
  0xb0   :  { %607 = vmatprep.subr.bf16.mxu1 %v636_v25 }
  0xb1   :  { %570 = vmatpush3.bf16.msra.mxu0 %v635_v24 }
  0xb3   :  { %608 = vmatpush3.bf16.msra.mxu1 %v636_v25 }
 0x125   :  { %v89_v26 = vpop.xlane.xlu0 %88 }
 0x126   :  { %v102_v27 = vmul.f32 0.0026041667, %v89_v26 }
 0x128   :  { %v106_v28 = vadd.f32 1e-05, %v102_v27 }
 0x129   :  { %v93_v29 = vpop.xlane.xlu1 %92  ;;  %v97_v30 = vpop.xlane.xlu0 %96 }
 0x12a   :  { %637 = vrsqrt.f32 %v106_v28  ;;  %v103_v37 = vmul.f32 0.0026041667, %v93_v29  ;;  %v104_v38 = vmul.f32 0.0026041667, %v97_v30 }
 0x12c   :  { %v107_v40 = vadd.f32 1e-05, %v103_v37  ;;  %v108_v41 = vadd.f32 1e-05, %v104_v38 }
 0x12d   :  { %v101_v42 = vpop.xlane.xlu1 %100 }
 0x12e   :  { %639 = vrsqrt.f32 %v107_v40  ;;  %v105_v43 = vmul.f32 0.0026041667, %v101_v42 }
 0x12f   :  { %641 = vrsqrt.f32 %v108_v41 }
 0x130   :  { %v109_v45 = vadd.f32 1e-05, %v105_v43 }
 0x132   :  { %643 = vrsqrt.f32 %v109_v45 }
 0x137   :  { %v638_v57 = vpop.eup %637 }
 0x138   :  { %v115_v60 = vmul.f32 %v638_v57, %v698_v32  ;;  %v116_v61 = vmul.f32 %v638_v57, %v700_v33  ;;  %v114_v62 = vmul.f32 %v638_v57, %v696_v31 }
 0x13a   :  { %v144_v0 = vmul.f32 %v135_v56, %v115_v60  ;;  %v145_v3 = vmul.f32 %v139_v59, %v116_v61  ;;  %v143_v10 = vmul.f32 %v131_v63, %v114_v62 }
 0x13b   :  { %v640_v2 = vpop.eup %639 }
 0x13c   :  { %v642_v5 = vpop.eup %641  ;;  %v118_v6 = vmul.f32 %v640_v2, %v722_v48  ;;  %v119_v7 = vmul.f32 %v640_v2, %v724_v49  ;;  %v117_v9 = vmul.f32 %v640_v2, %v720_v47  ;;  %v173_v11 = vadd.f32 %v164_v1, %v144_v0 }
 0x13d   :  { %v121_v32 = vmul.f32 %v642_v5, %v704_v35  ;;  %v122_v33 = vmul.f32 %v642_v5, %v706_v36  ;;  %v174_v14 = vadd.f32 %v168_v4, %v145_v3  ;;  %v172_v47 = vadd.f32 %v160_v8, %v143_v10 }
 0x13e   :  { %v147_v31 = vmul.f32 %v135_v56, %v118_v6  ;;  %v148_v12 = vmul.f32 %v139_v59, %v119_v7  ;;  %v146_v15 = vmul.f32 %v131_v63, %v117_v9  ;;  %v120_v35 = vmul.f32 %v642_v5, %v702_v34 }
 0x13f   :  { %v644_v13 = vpop.eup %643  ;;  %v150_v16 = vmul.f32 %v135_v56, %v121_v32  ;;  %v151_v17 = vmul.f32 %v139_v59, %v122_v33 }
 0x140   :  { %v176_v18 = vadd.f32 %v164_v1, %v147_v31  ;;  %v177_v48 = vadd.f32 %v168_v4, %v148_v12  ;;  %v124_v49 = vmul.f32 %v644_v13, %v728_v52  ;;  %v125_v19 = vmul.f32 %v644_v13, %v730_v53 }
 0x141   :  { %v175_v20 = vadd.f32 %v160_v8, %v146_v15  ;;  %v123_v36 = vmul.f32 %v644_v13, %v726_v51  ;;  %v179_v26 = vadd.f32 %v164_v1, %v150_v16  ;;  %v180_v29 = vadd.f32 %v168_v4, %v151_v17 }
 0x142   :  { %v185_v21 = vpack.c.bf16 %v176_v18, %v173_v11  ;;  %v186_v22 = vpack.c.bf16 %v177_v48, %v174_v14  ;;  %v153_v23 = vmul.f32 %v135_v56, %v124_v49  ;;  %v154_v24 = vmul.f32 %v139_v59, %v125_v19 }
 0x143   :  { %v184_v25 = vpack.c.bf16 %v175_v20, %v172_v47  ;;  %v152_v27 = vmul.f32 %v131_v63, %v123_v36  ;;  %v149_v53 = vmul.f32 %v131_v63, %v120_v35 }
 0x144   :  { %421 = vmatprep.mubr.bf16.mxu0 %v185_v21  ;;  %609 = vmatprep.mubr.bf16.mxu1 %v186_v22  ;;  %v182_v28 = vadd.f32 %v164_v1, %v153_v23  ;;  %v183_v52 = vadd.f32 %v168_v4, %v154_v24 }
 0x145   :  { %422 = vmatmul.mubr.bf16.vlgmr.msra.gmra.mxu0 %v184_v25  ;;  %v181_v38 = vadd.f32 %v160_v8, %v152_v27  ;;  %v178_v34 = vadd.f32 %v160_v8, %v149_v53 }
 0x146   :  { %v188_v30 = vpack.c.bf16 %v182_v28, %v179_v26  ;;  %v189_v37 = vpack.c.bf16 %v183_v52, %v180_v29 }
 0x147   :  { %v187_v51 = vpack.c.bf16 %v181_v38, %v178_v34 }
 0x148   :  { %429 = vmatprep.mubr.bf16.mxu0 %v188_v30  ;;  %610 = vmatmul.mubr.bf16.vlgmr.msra.gmra.mxu1 %v189_v37 }
 0x14d   :  { %430 = vmatmul.mubr.bf16.gmra.mxu0 %v187_v51 }
 0x205   :  { %v571_v39 = vpop.f32.mrf.mxu0 }
 0x207   :  { %v572_v40 = vpop.f32.mrf.mxu0 }
 0x208   :  { %v573_v41 = vadd.f32 %v572_v40, %v571_v39  ;;  %v611_v42 = vpop.f32.mrf.mxu1 }
 0x209   :  { %v574_v43 = vpop.f32.mrf.mxu0 }
 0x20a   :  { %v472_v45 = vpop.f32.mrf.mxu1  ;;  %v424_v50 = vadd.f32 %v573_v41, %v511_v44 }
 0x20b   :  { %v575_v46 = vpop.f32.mrf.mxu0 }
 0x20c   :  { %v576_v54 = vadd.f32 %v575_v46, %v574_v43  ;;  %v612_v55 = vpop.f32.mrf.mxu1  ;;  %v473_v60 = vadd.f32 %v472_v45, %v424_v50 }
 0x20d   :  { %v577_v56 = vpop.f32.mrf.mxu0 }
 0x20e   :  { %v427_v57 = vadd.f32 %v576_v54, %v511_v44  ;;  %v475_v58 = vpop.f32.mrf.mxu1 }
 0x20f   :  { %v578_v59 = vpop.f32.mrf.mxu0 }
 0x210   :  { %v476_v61 = vadd.f32 %v475_v58, %v427_v57  ;;  %v579_v62 = vadd.f32 %v578_v59, %v577_v56 }
 0x211   :  { %v580_v63 = vpop.f32.mrf.mxu0 }
 0x212   :  { %v547_v0 = vpack.c.bf16 %v476_v61, %v473_v60  ;;  %v432_v2 = vadd.f32 %v579_v62, %v511_v44 }
 0x213   :  { %v581_v1 = vpop.f32.mrf.mxu0 }
 0x214   :  { %548 = vst [vmem:[%s845_s5] sm:$0xff] %v547_v0   ;;  %v582_v3 = vadd.f32 %v581_v1, %v580_v63  ;;  %v481_v5 = vadd.f32 %v611_v42, %v432_v2 }
 0x216   :  { %v435_v4 = vadd.f32 %v582_v3, %v511_v44 }
 0x218   :  { %v484_v6 = vadd.f32 %v612_v55, %v435_v4 }
 0x21a   :  { %v552_v7 = vpack.c.bf16 %v484_v6, %v481_v5 }
 0x21c   :  { %554 = vst [vmem:[%s845_s5 + $0x8] sm:$0xff] %v552_v7  }

// kernel: forward.28
= control target key start
LH: loop header
LB: loop body
LE: loop exit
PB: predicated region body
PF: predicated region fallthrough
CT: control target
= control target key end

     0   :  { %s9211_s0 = inlined_call_operand.vmem [shape: bf16[32,384], index: 0, kind: input, shape index: {}]   ;;  %s9212_s3 = inlined_call_operand.vmem [shape: bf16[384,1536], index: 3, kind: input, shape index: {}]   ;;  %s9213_s1 = inlined_call_operand.vmem [shape: f32[1,384], index: 1, kind: input, shape index: {}]   ;;  %s9214_s2 = inlined_call_operand.vmem [shape: f32[1,384], index: 2, kind: input, shape index: {}]   ;;  %s9215_s5 = inlined_call_operand.vmem [shape: bf16[1536,384], index: 5, kind: input, shape index: {}]   ;;  %s9216_s4 = inlined_call_operand.vmem [shape: f32[1,1536], index: 4, kind: input, shape index: {}]   ;;  %s9217_s6 = inlined_call_operand.vmem [shape: f32[1,384], index: 6, kind: input, shape index: {}]   ;;  %s9218_s7 = inlined_call_operand.vmem [shape: bf16[32,384], index: 7, kind: output, shape index: {}]  }
   0x1   :  { %v27_v0 = vld [vmem:[%s9211_s0] sm:$0xff]  ;;  %v31_v2 = vld [vmem:[%s9211_s0 + $0x18] sm:$0xff]  ;;  %v29_v7 = vld [vmem:[%s9211_s0 + $0xc] sm:$0xff] }
   0x2   :  { %v28_v1 = vld [vmem:[%s9211_s0 + $0x8] ss:$24 sps:$4 sm:$0xff]   ;;  %v6945_v3 = vunpack.c.l.bf16 %v27_v0  ;;  %v6947_v4 = vunpack.c.h.bf16 %v27_v0  ;;  %v6951_v6 = vunpack.c.l.bf16 %v31_v2  ;;  %v30_v8 = vld [vmem:[%s9211_s0 + $0x14] ss:$24 sps:$4 sm:$0xff]   ;;  %v6962_v10 = vunpack.c.h.bf16 %v31_v2 }
   0x3   :  { %v6949_v5 = vunpack.c.l.bf16 %v28_v1  ;;  %v33_v9 = vld [vmem:[%s9211_s0 + $0x24] sm:$0xff]  ;;  %v6964_v11 = vunpack.c.h.bf16 %v28_v1  ;;  %v6966_v12 = vunpack.c.l.bf16 %v29_v7  ;;  %v6968_v13 = vunpack.c.h.bf16 %v29_v7  ;;  %v6072_v27 = vld [vmem:[%s9212_s3 + $0x2a0] ss:$48 sps:$4 sm:$0xff]  }
   0x4   :  { %v47_v14 = vadd.f32 %v6947_v4, %v6945_v3  ;;  %v6972_v15 = vunpack.c.l.bf16 %v30_v8  ;;  %v6974_v16 = vunpack.c.l.bf16 %v33_v9  ;;  %v6976_v17 = vunpack.c.h.bf16 %v33_v9  ;;  %v6070_v26 = vld [vmem:[%s9212_s3 + $0x2a4] ss:$48 sps:$4 sm:$0xff]   ;;  %v6075_v29 = vld [vmem:[%s9212_s3 + $0x240] ss:$48 sps:$4 sm:$0xff]  }
   0x5   :  { %9225 = vst [vmem:[#allocation2_spill] sm:$0xff] %v6949_v5  ;;  %9226 = vst [vmem:[#allocation3_spill] sm:$0xff] %v6964_v11  ;;  %v55_v18 = vadd.f32 %v6962_v10, %v6951_v6  ;;  %v51_v19 = vadd.f32 %v6968_v13, %v6966_v12  ;;  %v6982_v20 = vunpack.c.h.bf16 %v30_v8  ;;  %1988 = vmatprep.subr.bf16.mxu0 %v6070_v26  ;;  %v6073_v28 = vld [vmem:[%s9212_s3 + $0x244] ss:$48 sps:$4 sm:$0xff]   ;;  %v6078_v31 = vld [vmem:[%s9212_s3 + $0x1e0] ss:$48 sps:$4 sm:$0xff]  }
   0x6   :  { %9227 = vst [vmem:[#allocation4_spill] sm:$0xff] %v6972_v15  ;;  %v48_v21 = vadd.f32 %v47_v14, %v6949_v5  ;;  %v59_v22 = vadd.f32 %v6976_v17, %v6974_v16  ;;  %1989 = vmatpush1.bf16.msra.mxu0 %v6072_v27  ;;  %v6076_v30 = vld [vmem:[%s9212_s3 + $0x1e4] ss:$48 sps:$4 sm:$0xff]   ;;  %v6081_v33 = vld [vmem:[%s9212_s3 + $0x180] ss:$48 sps:$4 sm:$0xff]  }
   0x7   :  { %9228 = vst [vmem:[#allocation5_spill] sm:$0xff] %v6982_v20  ;;  %v56_v23 = vadd.f32 %v55_v18, %v6964_v11  ;;  %v52_v24 = vadd.f32 %v51_v19, %v6972_v15  ;;  %1990 = vmatprep.subr.bf16.mxu0 %v6073_v28  ;;  %v6079_v32 = vld [vmem:[%s9212_s3 + $0x184] ss:$48 sps:$4 sm:$0xff]   ;;  %v6098_v36 = vld [vmem:[%s9212_s3 + $0x8a0] ss:$48 sps:$4 sm:$0xff]  }
   0x8   :  { %49 = vadd.xlane.f32.xlu0 %v48_v21  ;;  %v60_v25 = vadd.f32 %v59_v22, %v6982_v20  ;;  %v6094_v34 = vld [vmem:[%s9212_s3 + $0x8a4] ss:$48 sps:$4 sm:$0xff]   ;;  %v6084_v37 = vld [vmem:[%s9212_s3 + $0x120] ss:$48 sps:$4 sm:$0xff]  }
   0x9   :  { %57 = vadd.xlane.f32.xlu1 %v56_v23  ;;  %v6082_v35 = vld [vmem:[%s9212_s3 + $0x124] ss:$48 sps:$4 sm:$0xff]   ;;  %2041 = vmatprep.subr.bf16.mxu1 %v6094_v34  ;;  %v6087_v39 = vld [vmem:[%s9212_s3 + $0xc0] ss:$48 sps:$4 sm:$0xff]  }
   0xa   :  { %1991 = vmatpush1.bf16.msra.mxu0 %v6075_v29  ;;  %v6085_v38 = vld [vmem:[%s9212_s3 + $0xc4] ss:$48 sps:$4 sm:$0xff]   ;;  %2042 = vmatpush1.bf16.msra.mxu1 %v6098_v36  ;;  %v6090_v41 = vld [vmem:[%s9212_s3 + $0x60] ss:$48 sps:$4 sm:$0xff]  }
   0xb   :  { %1992 = vmatprep.subr.bf16.mxu0 %v6076_v30  ;;  %v6088_v40 = vld [vmem:[%s9212_s3 + $0x64] ss:$48 sps:$4 sm:$0xff]   ;;  %v6093_v43 = vld [vmem:[%s9212_s3] ss:$48 sps:$4 sm:$0xff]  }
   0xc   :  { %53 = vadd.xlane.f32.xlu0 %v52_v24  ;;  %v6091_v42 = vld [vmem:[%s9212_s3 + $0x4] ss:$48 sps:$4 sm:$0xff]   ;;  %v6099_v45 = vld [vmem:[%s9212_s3 + $0x5a0] ss:$48 sps:$4 sm:$0xff]  }
   0xd   :  { %61 = vadd.xlane.f32.xlu1 %v60_v25  ;;  %v6096_v44 = vld [vmem:[%s9212_s3 + $0x5a4] ss:$48 sps:$4 sm:$0xff]   ;;  %v6104_v36 = vld [vmem:[%s9212_s3 + $0x840] ss:$48 sps:$4 sm:$0xff]  }
   0xe   :  { %1993 = vmatpush1.bf16.msra.mxu0 %v6078_v31  ;;  %v6100_v34 = vld [vmem:[%s9212_s3 + $0x844] ss:$48 sps:$4 sm:$0xff]  }
   0xf   :  { %1994 = vmatprep.subr.bf16.mxu0 %v6079_v32  ;;  %2043 = vmatprep.subr.bf16.mxu1 %v6100_v34 }
  0x10   :  { %2044 = vmatpush1.bf16.msra.mxu1 %v6104_v36 }
  0x12   :  { %1995 = vmatpush1.bf16.msra.mxu0 %v6081_v33 }
  0x13   :  { %1996 = vmatprep.subr.bf16.mxu0 %v6082_v35  ;;  %v6102_v35 = vld [vmem:[%s9212_s3 + $0x544] ss:$48 sps:$4 sm:$0xff]  }
  0x16   :  { %1997 = vmatpush1.bf16.msra.mxu0 %v6084_v37  ;;  %v6105_v37 = vld [vmem:[%s9212_s3 + $0x540] ss:$48 sps:$4 sm:$0xff]  }
  0x17   :  { %1998 = vmatprep.subr.bf16.mxu0 %v6085_v38  ;;  %v6106_v38 = vld [vmem:[%s9212_s3 + $0x7e4] ss:$48 sps:$4 sm:$0xff]  }
  0x18   :  { %2045 = vmatprep.subr.bf16.mxu1 %v6106_v38 }
  0x1a   :  { %1999 = vmatpush1.bf16.msra.mxu0 %v6087_v39  ;;  %v6108_v39 = vld [vmem:[%s9212_s3 + $0x4e4] ss:$48 sps:$4 sm:$0xff]  }
  0x1b   :  { %2000 = vmatprep.subr.bf16.mxu0 %v6088_v40  ;;  %v6110_v40 = vld [vmem:[%s9212_s3 + $0x7e0] ss:$48 sps:$4 sm:$0xff]  }
  0x1c   :  { %2046 = vmatpush1.bf16.msra.mxu1 %v6110_v40  ;;  %v132_v40 = vld [vmem:[%s9213_s1] sm:$0x7] }
  0x1e   :  { %2001 = vmatpush1.bf16.msra.mxu0 %v6090_v41  ;;  %v6111_v41 = vld [vmem:[%s9212_s3 + $0x4e0] ss:$48 sps:$4 sm:$0xff]  }
  0x1f   :  { %2002 = vmatprep.subr.bf16.mxu0 %v6091_v42  ;;  %v6112_v42 = vld [vmem:[%s9212_s3 + $0x784] ss:$48 sps:$4 sm:$0xff]  }
  0x20   :  { %2047 = vmatprep.subr.bf16.mxu1 %v6112_v42 }
  0x22   :  { %2003 = vmatpush1.bf16.msra.mxu0 %v6093_v43  ;;  %v6114_v43 = vld [vmem:[%s9212_s3 + $0x484] ss:$48 sps:$4 sm:$0xff]  }
  0x23   :  { %2004 = vmatprep.subr.bf16.mxu0 %v6096_v44  ;;  %v6116_v44 = vld [vmem:[%s9212_s3 + $0x780] ss:$48 sps:$4 sm:$0xff]  }
  0x24   :  { %2048 = vmatpush1.bf16.msra.mxu1 %v6116_v44 }
  0x26   :  { %2005 = vmatpush2.bf16.msra.mxu0 %v6099_v45  ;;  %v6117_v45 = vld [vmem:[%s9212_s3 + $0x480] ss:$48 sps:$4 sm:$0xff]  }
  0x27   :  { %2006 = vmatprep.subr.bf16.mxu0 %v6102_v35 }
  0x2a   :  { %2007 = vmatpush2.bf16.msra.mxu0 %v6105_v37 }
  0x2b   :  { %2008 = vmatprep.subr.bf16.mxu0 %v6108_v39 }
  0x2e   :  { %2009 = vmatpush2.bf16.msra.mxu0 %v6111_v41 }
  0x2f   :  { %2010 = vmatprep.subr.bf16.mxu0 %v6114_v43 }
  0x32   :  { %2011 = vmatpush2.bf16.msra.mxu0 %v6117_v45  ;;  %v161_v45 = vld [vmem:[%s9214_s2] sm:$0x7] }
  0x91   :  { %v50_v46 = vpop.xlane.xlu0 %49 }
  0x92   :  { %v64_v47 = vmul.f32 0.0026041667, %v50_v46  ;;  %v58_v48 = vpop.xlane.xlu1 %57  ;;  %v6118_v46 = vld [vmem:[%s9212_s3 + $0x724] ss:$48 sps:$4 sm:$0xff]  }
  0x93   :  { %v66_v49 = vmul.f32 0.0026041667, %v58_v48  ;;  %v6122_v48 = vld [vmem:[%s9212_s3 + $0x720] ss:$48 sps:$4 sm:$0xff]   ;;  %2049 = vmatprep.subr.bf16.mxu1 %v6118_v46 }
  0x94   :  { %v7051_v50 = vsub.f32 %v6945_v3, %v64_v47  ;;  %v7054_v51 = vsub.f32 %v6947_v4, %v64_v47  ;;  %v7057_v52 = vsub.f32 %v6949_v5, %v64_v47  ;;  %v6120_v47 = vld [vmem:[%s9212_s3 + $0x424] ss:$48 sps:$4 sm:$0xff]   ;;  %2050 = vmatpush1.bf16.msra.mxu1 %v6122_v48 }
  0x95   :  { %v7060_v53 = vsub.f32 %v6951_v6, %v66_v49  ;;  %v7063_v54 = vsub.f32 %v6962_v10, %v66_v49  ;;  %v7066_v55 = vsub.f32 %v6964_v11, %v66_v49  ;;  %v54_v56 = vpop.xlane.xlu0 %53  ;;  %v6123_v49 = vld [vmem:[%s9212_s3 + $0x420] ss:$48 sps:$4 sm:$0xff]   ;;  %2012 = vmatprep.subr.bf16.mxu0 %v6120_v47 }
  0x96   :  { %v65_v57 = vmul.f32 0.0026041667, %v54_v56  ;;  %v62_v58 = vpop.xlane.xlu1 %61  ;;  %v80_v59 = vmul.f32 %v7051_v50, %v7051_v50  ;;  %v81_v60 = vmul.f32 %v7054_v51, %v7054_v51  ;;  %v82_v61 = vmul.f32 %v7057_v52, %v7057_v52  ;;  %v6124_v56 = vld [vmem:[%s9212_s3 + $0x6c4] ss:$48 sps:$4 sm:$0xff]   ;;  %2013 = vmatpush2.bf16.msra.mxu0 %v6123_v49 }
  0x97   :  { %v67_v62 = vmul.f32 0.0026041667, %v62_v58  ;;  %v86_v63 = vmul.f32 %v7060_v53, %v7060_v53  ;;  %v87_v0 = vmul.f32 %v7063_v54, %v7063_v54  ;;  %v88_v1 = vmul.f32 %v7066_v55, %v7066_v55  ;;  %v6128_v58 = vld [vmem:[%s9212_s3 + $0x6c0] ss:$48 sps:$4 sm:$0xff]   ;;  %2051 = vmatprep.subr.bf16.mxu1 %v6124_v56 }
  0x98   :  { %v7081_v2 = vsub.f32 %v6966_v12, %v65_v57  ;;  %v7084_v7 = vsub.f32 %v6968_v13, %v65_v57  ;;  %v7087_v8 = vsub.f32 %v6972_v15, %v65_v57  ;;  %v92_v9 = vadd.f32 %v81_v60, %v80_v59  ;;  %v6126_v57 = vld [vmem:[%s9212_s3 + $0x3c4] ss:$48 sps:$4 sm:$0xff]   ;;  %v6129_v59 = vld [vmem:[%s9212_s3 + $0x3c0] ss:$48 sps:$4 sm:$0xff]   ;;  %2052 = vmatpush1.bf16.msra.mxu1 %v6128_v58 }
  0x99   :  { %v7090_v14 = vsub.f32 %v6974_v16, %v67_v62  ;;  %v7093_v18 = vsub.f32 %v6976_v17, %v67_v62  ;;  %v7096_v19 = vsub.f32 %v6982_v20, %v67_v62  ;;  %v100_v21 = vadd.f32 %v87_v0, %v86_v63  ;;  %v6130_v60 = vld [vmem:[%s9212_s3 + $0x664] ss:$48 sps:$4 sm:$0xff]   ;;  %2014 = vmatprep.subr.bf16.mxu0 %v6126_v57  ;;  %v6134_v63 = vld [vmem:[%s9212_s3 + $0x660] ss:$48 sps:$4 sm:$0xff]  }
  0x9a   :  { %v93_v22 = vadd.f32 %v92_v9, %v82_v61  ;;  %v83_v23 = vmul.f32 %v7081_v2, %v7081_v2  ;;  %v84_v24 = vmul.f32 %v7084_v7, %v7084_v7  ;;  %v85_v28 = vmul.f32 %v7087_v8, %v7087_v8  ;;  %v6132_v61 = vld [vmem:[%s9212_s3 + $0x364] ss:$48 sps:$4 sm:$0xff]   ;;  %2015 = vmatpush2.bf16.msra.mxu0 %v6129_v59  ;;  %v6135_v0 = vld [vmem:[%s9212_s3 + $0x360] ss:$48 sps:$4 sm:$0xff]  }
  0x9b   :  { %v89_v25 = vmul.f32 %v7090_v14, %v7090_v14  ;;  %v90_v26 = vmul.f32 %v7093_v18, %v7093_v18  ;;  %v101_v27 = vadd.f32 %v100_v21, %v88_v1  ;;  %v91_v30 = vmul.f32 %v7096_v19, %v7096_v19  ;;  %2053 = vmatprep.subr.bf16.mxu1 %v6130_v60  ;;  %v6136_v1 = vld [vmem:[%s9212_s3 + $0x604] ss:$48 sps:$4 sm:$0xff]   ;;  %v6140_v21 = vld [vmem:[%s9212_s3 + $0x600] ss:$48 sps:$4 sm:$0xff]  }
  0x9c   :  { %94 = vadd.xlane.f32.xlu0 %v93_v22  ;;  %v96_v29 = vadd.f32 %v84_v24, %v83_v23  ;;  %v6895_v62 = vmov 0   ;;  %2016 = vmatprep.subr.bf16.mxu0 %v6132_v61  ;;  %v6138_v9 = vld [vmem:[%s9212_s3 + $0x304] ss:$48 sps:$4 sm:$0xff]   ;;  %v6141_v22 = vld [vmem:[%s9212_s3 + $0x300] ss:$48 sps:$4 sm:$0xff]  }
  0x9d   :  { %v104_v31 = vadd.f32 %v90_v26, %v89_v25  ;;  %2073 = vmatprep.mubr.bf16.mxu1 %v6895_v62  ;;  %2054 = vmatpush1.bf16.msra.mxu1 %v6134_v63  ;;  %v6144_v23 = vld [vmem:[%s9212_s3 + $0x2ac] ss:$48 sps:$4 sm:$0xff]  }
  0x9e   :  { %v97_v32 = vadd.f32 %v96_v29, %v85_v28  ;;  %2017 = vmatpush2.bf16.msra.mxu0 %v6135_v0  ;;  %2055 = vmatprep.subr.bf16.mxu1 %v6136_v1  ;;  %v6147_v24 = vld [vmem:[%s9212_s3 + $0x8ac] ss:$48 sps:$4 sm:$0xff]  }
  0x9f   :  { %v105_v33 = vadd.f32 %v104_v31, %v91_v30  ;;  %2018 = vmatprep.subr.bf16.mxu0 %v6138_v9 }
  0xa0   :  { %102 = vadd.xlane.f32.xlu0 %v101_v27  ;;  %98 = vadd.xlane.f32.xlu1 %v97_v32  ;;  %v134_v32 = vlaneseq }
  0xa1   :  { %2056 = vmatpush1.bf16.msra.mxu1 %v6140_v21 }
  0xa2   :  { %2019 = vmatpush2.bf16.msra.mxu0 %v6141_v22  ;;  %2094 = vmatprep.subr.bf16.mxu1 %v6144_v23  ;;  %v7201_v37 = vshrl.u32 %v134_v32, 7 }
  0xa3   :  { %2147 = vmatprep.subr.bf16.mxu0 %v6147_v24 }
  0xa4   :  { %106 = vadd.xlane.f32.xlu1 %v105_v33  ;;  %v7204_v39 = vsub.s32 1, %v7201_v37  ;;  %v7210_v41 = vsub.s32 2, %v7201_v37  ;;  %v7213_v42 = vsub.s32 0, %v7201_v37 }
  0xa6   :  { %9229 = vst [vmem:[#allocation6_spill] sm:$0xff] %v7210_v41  ;;  %v141_v43 = vrot.slane %v132_v40, %v7204_v39  ;;  %v145_v46 = vrot.slane %v132_v40, %v7210_v41  ;;  %v137_v56 = vrot.slane %v132_v40, %v7213_v42  ;;  %v170_v58 = vrot.slane %v161_v45, %v7204_v39 }
  0xa7   :  { %v174_v61 = vrot.slane %v161_v45, %v7210_v41 }
 0x125   :  { %v95_v25 = vpop.xlane.xlu0 %94 }
 0x126   :  { %v108_v26 = vmul.f32 0.0026041667, %v95_v25 }
 0x128   :  { %v112_v27 = vadd.f32 1e-05, %v108_v26 }
 0x129   :  { %v99_v28 = vpop.xlane.xlu1 %98  ;;  %v103_v29 = vpop.xlane.xlu0 %102 }
 0x12a   :  { %6886 = vrsqrt.f32 %v112_v27  ;;  %v109_v30 = vmul.f32 0.0026041667, %v99_v28  ;;  %v110_v31 = vmul.f32 0.0026041667, %v103_v29 }
 0x12c   :  { %v113_v33 = vadd.f32 1e-05, %v109_v30  ;;  %v114_v34 = vadd.f32 1e-05, %v110_v31  ;;  %v6142_v30 = vld [vmem:[%s9212_s3 + $0x2a8] ss:$48 sps:$4 sm:$0xff]  }
 0x12d   :  { %v107_v35 = vpop.xlane.xlu1 %106 }
 0x12e   :  { %6888 = vrsqrt.f32 %v113_v33  ;;  %v111_v36 = vmul.f32 0.0026041667, %v107_v35 }
 0x12f   :  { %6890 = vrsqrt.f32 %v114_v34 }
 0x130   :  { %v115_v38 = vadd.f32 1e-05, %v111_v36 }
 0x132   :  { %6892 = vrsqrt.f32 %v115_v38 }
 0x137   :  { %v6887_v44 = vpop.eup %6886 }
 0x138   :  { %v121_v47 = vmul.f32 %v6887_v44, %v7054_v51  ;;  %v122_v48 = vmul.f32 %v6887_v44, %v7057_v52  ;;  %v120_v49 = vmul.f32 %v6887_v44, %v7051_v50  ;;  %v166_v52 = vrot.slane %v161_v45, %v7213_v42 }
 0x13a   :  { %v150_v57 = vmul.f32 %v141_v43, %v121_v47  ;;  %v151_v60 = vmul.f32 %v145_v46, %v122_v48  ;;  %v149_v9 = vmul.f32 %v137_v56, %v120_v49  ;;  %v6151_v49 = vld [vmem:[%s9212_s3 + $0x848] ss:$48 sps:$4 sm:$0xff]  }
 0x13b   :  { %v6889_v59 = vpop.eup %6888 }
 0x13c   :  { %v6891_v63 = vpop.eup %6890  ;;  %v124_v0 = vmul.f32 %v6889_v59, %v7084_v7  ;;  %v125_v1 = vmul.f32 %v6889_v59, %v7087_v8  ;;  %v123_v51 = vmul.f32 %v6889_v59, %v7081_v2  ;;  %v179_v22 = vadd.f32 %v170_v58, %v150_v57 }
 0x13d   :  { %v127_v50 = vmul.f32 %v6891_v63, %v7063_v54  ;;  %v180_v25 = vadd.f32 %v174_v61, %v151_v60  ;;  %v128_v28 = vmul.f32 %v6891_v63, %v7066_v55  ;;  %v178_v54 = vadd.f32 %v166_v52, %v149_v9  ;;  %v6145_v55 = vld [vmem:[%s9212_s3 + $0x8a8] ss:$48 sps:$4 sm:$0xff]   ;;  %v6165_v9 = vld [vmem:[%s9212_s3 + $0x78c] ss:$48 sps:$4 sm:$0xff]  }
 0x13e   :  { %v153_v21 = vmul.f32 %v141_v43, %v124_v0  ;;  %v154_v23 = vmul.f32 %v145_v46, %v125_v1  ;;  %v152_v26 = vmul.f32 %v137_v56, %v123_v51  ;;  %v126_v32 = vmul.f32 %v6891_v63, %v7060_v53  ;;  %v6153_v53 = vld [vmem:[%s9212_s3 + $0x84c] ss:$48 sps:$4 sm:$0xff]   ;;  %v6154_v60 = vld [vmem:[%s9212_s3 + $0x1e8] ss:$48 sps:$4 sm:$0xff]  }
 0x13f   :  { %v6893_v24 = vpop.eup %6892  ;;  %v156_v27 = vmul.f32 %v141_v43, %v127_v50  ;;  %v157_v45 = vmul.f32 %v145_v46, %v128_v28  ;;  %v6157_v1 = vld [vmem:[%s9212_s3 + $0x7e8] ss:$48 sps:$4 sm:$0xff]  }
 0x140   :  { %v182_v29 = vadd.f32 %v170_v58, %v153_v21  ;;  %v183_v7 = vadd.f32 %v174_v61, %v154_v23  ;;  %v130_v8 = vmul.f32 %v6893_v24, %v7093_v18  ;;  %v131_v2 = vmul.f32 %v6893_v24, %v7096_v19  ;;  %v6150_v18 = vld [vmem:[%s9212_s3 + $0x24c] ss:$48 sps:$4 sm:$0xff]   ;;  %v6163_v50 = vld [vmem:[%s9212_s3 + $0x788] ss:$48 sps:$4 sm:$0xff]  }
 0x141   :  { %v181_v31 = vadd.f32 %v166_v52, %v152_v26  ;;  %v129_v33 = vmul.f32 %v6893_v24, %v7090_v14  ;;  %v185_v40 = vadd.f32 %v170_v58, %v156_v27  ;;  %v155_v47 = vmul.f32 %v137_v56, %v126_v32  ;;  %v6168_v21 = vld [vmem:[%s9212_s3 + $0x12c] ss:$48 sps:$4 sm:$0xff]   ;;  %v6166_v23 = vld [vmem:[%s9212_s3 + $0x128] ss:$48 sps:$4 sm:$0xff]  }
 0x142   :  { %v7239_v34 = vpack.c.bf16 %v182_v29, %v179_v22  ;;  %v7241_v35 = vpack.c.bf16 %v183_v7, %v180_v25  ;;  %v159_v19 = vmul.f32 %v141_v43, %v130_v8  ;;  %v160_v36 = vmul.f32 %v145_v46, %v131_v2  ;;  %v6148_v43 = vld [vmem:[%s9212_s3 + $0x248] ss:$48 sps:$4 sm:$0xff]   ;;  %v6156_v46 = vld [vmem:[%s9212_s3 + $0x1ec] ss:$48 sps:$4 sm:$0xff]  }
 0x143   :  { %v7249_v38 = vpack.c.bf16 %v181_v31, %v178_v54  ;;  %v158_v14 = vmul.f32 %v137_v56, %v129_v33  ;;  %v6159_v56 = vld [vmem:[%s9212_s3 + $0x7ec] ss:$48 sps:$4 sm:$0xff]   ;;  %v186_v59 = vadd.f32 %v174_v61, %v157_v45  ;;  %v184_v63 = vadd.f32 %v166_v52, %v155_v47  ;;  %v6169_v24 = vld [vmem:[%s9212_s3 + $0x728] ss:$48 sps:$4 sm:$0xff]   ;;  %v6207_v45 = vld [vmem:[%s9212_s3 + $0x1f4] ss:$48 sps:$4 sm:$0xff]  }
 0x144   :  { %2020 = vmatprep.mubr.bf16.mxu0 %v7239_v34  ;;  %2074 = vmatmul.mubr.bf16.vlgmr.msra.gmra.mxu1 %v7241_v35  ;;  %v188_v44 = vadd.f32 %v170_v58, %v159_v19  ;;  %v189_v57 = vadd.f32 %v174_v61, %v160_v36  ;;  %v6162_v61 = vld [vmem:[%s9212_s3 + $0x18c] ss:$48 sps:$4 sm:$0xff]   ;;  %v6172_v27 = vld [vmem:[%s9212_s3 + $0xc8] ss:$48 sps:$4 sm:$0xff]   ;;  %v6193_v19 = vld [vmem:[%s9212_s3 + $0x2b0] ss:$48 sps:$4 sm:$0xff]  }
 0x145   :  { %2095 = vmatpush1.bf16.msra.mxu1 %v6142_v30  ;;  %2021 = vmatmul.mubr.bf16.vlgmr.msra.gmra.mxu0 %v7249_v38  ;;  %v187_v58 = vadd.f32 %v166_v52, %v158_v14  ;;  %v6160_v52 = vld [vmem:[%s9212_s3 + $0x188] ss:$48 sps:$4 sm:$0xff]   ;;  %v6171_v22 = vld [vmem:[%s9212_s3 + $0x72c] ss:$48 sps:$4 sm:$0xff]   ;;  %v6205_v47 = vld [vmem:[%s9212_s3 + $0x1f0] ss:$48 sps:$4 sm:$0xff]  }
 0x146   :  { %2148 = vmatpush1.bf16.msra.mxu0 %v6145_v55  ;;  %2096 = vmatprep.subr.bf16.mxu1 %v6150_v18  ;;  %v7260_v48 = vpack.c.bf16 %v188_v44, %v185_v40  ;;  %v7276_v0 = vpack.c.bf16 %v189_v57, %v186_v59  ;;  %v6174_v25 = vld [vmem:[%s9212_s3 + $0xcc] ss:$48 sps:$4 sm:$0xff]   ;;  %v6175_v28 = vld [vmem:[%s9212_s3 + $0x6c8] ss:$48 sps:$4 sm:$0xff]   ;;  %v6195_v55 = vld [vmem:[%s9212_s3 + $0x2b4] ss:$48 sps:$4 sm:$0xff]  }
 0x147   :  { %2149 = vmatprep.subr.bf16.mxu0 %v6153_v53  ;;  %2083 = vmatprep.mubr.bf16.mxu1 %v6895_v62  ;;  %v7281_v51 = vpack.c.bf16 %v187_v58, %v184_v63  ;;  %v6177_v26 = vld [vmem:[%s9212_s3 + $0x6cc] ss:$48 sps:$4 sm:$0xff]   ;;  %v6178_v8 = vld [vmem:[%s9212_s3 + $0x68] ss:$48 sps:$4 sm:$0xff]   ;;  %v6201_v53 = vld [vmem:[%s9212_s3 + $0x254] ss:$48 sps:$4 sm:$0xff]  }
 0x148   :  { %2030 = vmatprep.mubr.bf16.mxu0 %v7260_v48  ;;  %v6180_v29 = vld [vmem:[%s9212_s3 + $0x6c] ss:$48 sps:$4 sm:$0xff]   ;;  %v6181_v2 = vld [vmem:[%s9212_s3 + $0x668] ss:$48 sps:$4 sm:$0xff]   ;;  %v6199_v40 = vld [vmem:[%s9212_s3 + $0x250] ss:$48 sps:$4 sm:$0xff]  }
 0x149   :  { %2097 = vmatpush1.bf16.msra.mxu1 %v6148_v43  ;;  %v6183_v7 = vld [vmem:[%s9212_s3 + $0x66c] ss:$48 sps:$4 sm:$0xff]   ;;  %v6184_v31 = vld [vmem:[%s9212_s3 + $0x8] ss:$48 sps:$4 sm:$0xff]   ;;  %v6219_v59 = vld [vmem:[%s9212_s3 + $0x134] ss:$48 sps:$4 sm:$0xff]  }
 0x14a   :  { %2150 = vmatpush1.bf16.msra.mxu0 %v6151_v49  ;;  %2098 = vmatprep.subr.bf16.mxu1 %v6156_v46  ;;  %v6186_v30 = vld [vmem:[%s9212_s3 + $0xc] ss:$48 sps:$4 sm:$0xff]   ;;  %v6187_v32 = vld [vmem:[%s9212_s3 + $0x608] ss:$48 sps:$4 sm:$0xff]   ;;  %v6213_v46 = vld [vmem:[%s9212_s3 + $0x194] ss:$48 sps:$4 sm:$0xff]  }
 0x14b   :  { %2151 = vmatprep.subr.bf16.mxu0 %v6159_v56  ;;  %v6189_v54 = vld [vmem:[%s9212_s3 + $0x60c] ss:$48 sps:$4 sm:$0xff]   ;;  %v6190_v18 = vld [vmem:[%s9212_s3 + $0x5a8] ss:$48 sps:$4 sm:$0xff]   ;;  %v6211_v56 = vld [vmem:[%s9212_s3 + $0x190] ss:$48 sps:$4 sm:$0xff]  }
 0x14c   :  { %2084 = vmatmul.mubr.bf16.gmra.mxu1 %v7276_v0  ;;  %v6192_v33 = vld [vmem:[%s9212_s3 + $0x5ac] ss:$48 sps:$4 sm:$0xff]   ;;  %v6196_v14 = vld [vmem:[%s9212_s3 + $0x548] ss:$48 sps:$4 sm:$0xff]   ;;  %v6217_v63 = vld [vmem:[%s9212_s3 + $0x130] ss:$48 sps:$4 sm:$0xff]  }
 0x14d   :  { %2099 = vmatpush1.bf16.msra.mxu1 %v6154_v60  ;;  %2031 = vmatmul.mubr.bf16.gmra.mxu0 %v7281_v51  ;;  %v6198_v36 = vld [vmem:[%s9212_s3 + $0x54c] ss:$48 sps:$4 sm:$0xff]   ;;  %v6202_v43 = vld [vmem:[%s9212_s3 + $0x4e8] ss:$48 sps:$4 sm:$0xff]  }
 0x14e   :  { %2126 = vmatprep.mubr.bf16.mxu1 %v7239_v34  ;;  %2152 = vmatpush1.bf16.msra.mxu0 %v6157_v1  ;;  %v6204_v44 = vld [vmem:[%s9212_s3 + $0x4ec] ss:$48 sps:$4 sm:$0xff]   ;;  %v6208_v57 = vld [vmem:[%s9212_s3 + $0x488] ss:$48 sps:$4 sm:$0xff]  }
 0x14f   :  { %2100 = vmatprep.subr.bf16.mxu1 %v6162_v61  ;;  %2153 = vmatprep.subr.bf16.mxu0 %v6165_v9  ;;  %v6210_v49 = vld [vmem:[%s9212_s3 + $0x48c] ss:$48 sps:$4 sm:$0xff]   ;;  %v6214_v60 = vld [vmem:[%s9212_s3 + $0x428] ss:$48 sps:$4 sm:$0xff]   ;;  %v6225_v61 = vld [vmem:[%s9212_s3 + $0xd4] ss:$48 sps:$4 sm:$0xff]  }
 0x150   :  { %2179 = vmatprep.mubr.bf16.mxu0 %v6895_v62  ;;  %v6216_v58 = vld [vmem:[%s9212_s3 + $0x42c] ss:$48 sps:$4 sm:$0xff]   ;;  %v6220_v9 = vld [vmem:[%s9212_s3 + $0x3c8] ss:$48 sps:$4 sm:$0xff]  }
 0x151   :  { %2101 = vmatpush1.bf16.msra.mxu1 %v6160_v52  ;;  %v6222_v1 = vld [vmem:[%s9212_s3 + $0x3cc] ss:$48 sps:$4 sm:$0xff]   ;;  %v6223_v52 = vld [vmem:[%s9212_s3 + $0xd0] ss:$48 sps:$4 sm:$0xff]  }
 0x152   :  { %2154 = vmatpush1.bf16.msra.mxu0 %v6163_v50  ;;  %2102 = vmatprep.subr.bf16.mxu1 %v6168_v21  ;;  %v6228_v50 = vld [vmem:[%s9212_s3 + $0x36c] ss:$48 sps:$4 sm:$0xff]   ;;  %v6231_v21 = vld [vmem:[%s9212_s3 + $0x74] ss:$48 sps:$4 sm:$0xff]  }
 0x153   :  { %2155 = vmatprep.subr.bf16.mxu0 %v6171_v22  ;;  %v6226_v22 = vld [vmem:[%s9212_s3 + $0x368] ss:$48 sps:$4 sm:$0xff]  }
 0x155   :  { %2103 = vmatpush1.bf16.msra.mxu1 %v6166_v23  ;;  %v6229_v23 = vld [vmem:[%s9212_s3 + $0x70] ss:$48 sps:$4 sm:$0xff]  }
 0x156   :  { %2156 = vmatpush1.bf16.msra.mxu0 %v6169_v24  ;;  %2104 = vmatprep.subr.bf16.mxu1 %v6174_v25  ;;  %v6234_v24 = vld [vmem:[%s9212_s3 + $0x30c] ss:$48 sps:$4 sm:$0xff]   ;;  %v6237_v25 = vld [vmem:[%s9212_s3 + $0x14] ss:$48 sps:$4 sm:$0xff]  }
 0x157   :  { %2157 = vmatprep.subr.bf16.mxu0 %v6177_v26  ;;  %v6232_v26 = vld [vmem:[%s9212_s3 + $0x308] ss:$48 sps:$4 sm:$0xff]  }
 0x159   :  { %2105 = vmatpush1.bf16.msra.mxu1 %v6172_v27  ;;  %v6235_v27 = vld [vmem:[%s9212_s3 + $0x10] ss:$48 sps:$4 sm:$0xff]  }
 0x15a   :  { %2158 = vmatpush1.bf16.msra.mxu0 %v6175_v28  ;;  %2106 = vmatprep.subr.bf16.mxu1 %v6180_v29  ;;  %v6240_v28 = vld [vmem:[%s9212_s3 + $0x8b4] ss:$48 sps:$4 sm:$0xff]  }
 0x15b   :  { %2159 = vmatprep.subr.bf16.mxu0 %v6183_v7  ;;  %v6243_v29 = vld [vmem:[%s9212_s3 + $0x5b4] ss:$48 sps:$4 sm:$0xff]   ;;  %v6238_v7 = vld [vmem:[%s9212_s3 + $0x8b0] ss:$48 sps:$4 sm:$0xff]  }
 0x15d   :  { %2107 = vmatpush1.bf16.msra.mxu1 %v6178_v8  ;;  %v6241_v8 = vld [vmem:[%s9212_s3 + $0x5b0] ss:$48 sps:$4 sm:$0xff]  }
 0x15e   :  { %2160 = vmatpush1.bf16.msra.mxu0 %v6181_v2  ;;  %2108 = vmatprep.subr.bf16.mxu1 %v6186_v30  ;;  %v6246_v2 = vld [vmem:[%s9212_s3 + $0x854] ss:$48 sps:$4 sm:$0xff]  }
 0x15f   :  { %2161 = vmatprep.subr.bf16.mxu0 %v6189_v54  ;;  %v6249_v30 = vld [vmem:[%s9212_s3 + $0x554] ss:$48 sps:$4 sm:$0xff]   ;;  %v6244_v54 = vld [vmem:[%s9212_s3 + $0x850] ss:$48 sps:$4 sm:$0xff]  }
 0x161   :  { %2109 = vmatpush1.bf16.msra.mxu1 %v6184_v31  ;;  %v6247_v31 = vld [vmem:[%s9212_s3 + $0x550] ss:$48 sps:$4 sm:$0xff]  }
 0x162   :  { %2162 = vmatpush1.bf16.msra.mxu0 %v6187_v32  ;;  %2110 = vmatprep.subr.bf16.mxu1 %v6192_v33  ;;  %v6252_v32 = vld [vmem:[%s9212_s3 + $0x7f4] ss:$48 sps:$4 sm:$0xff]  }
 0x163   :  { %2200 = vmatprep.subr.bf16.mxu0 %v6195_v55  ;;  %v6255_v33 = vld [vmem:[%s9212_s3 + $0x4f4] ss:$48 sps:$4 sm:$0xff]   ;;  %v6250_v55 = vld [vmem:[%s9212_s3 + $0x7f0] ss:$48 sps:$4 sm:$0xff]  }
 0x165   :  { %2111 = vmatpush2.bf16.msra.mxu1 %v6190_v18  ;;  %2180 = vmatmul.mubr.bf16.vlgmr.msra.gmra.mxu0 %v7241_v35  ;;  %v6253_v18 = vld [vmem:[%s9212_s3 + $0x4f0] ss:$48 sps:$4 sm:$0xff]  }
 0x166   :  { %2201 = vmatpush1.bf16.msra.mxu0 %v6193_v19  ;;  %2112 = vmatprep.subr.bf16.mxu1 %v6198_v36  ;;  %v6258_v19 = vld [vmem:[%s9212_s3 + $0x794] ss:$48 sps:$4 sm:$0xff]  }
 0x167   :  { %2202 = vmatprep.subr.bf16.mxu0 %v6201_v53  ;;  %2189 = vmatprep.mubr.bf16.mxu0 %v6895_v62  ;;  %v6261_v36 = vld [vmem:[%s9212_s3 + $0x494] ss:$48 sps:$4 sm:$0xff]   ;;  %v6256_v53 = vld [vmem:[%s9212_s3 + $0x790] ss:$48 sps:$4 sm:$0xff]  }
 0x169   :  { %2113 = vmatpush2.bf16.msra.mxu1 %v6196_v14  ;;  %v6259_v14 = vld [vmem:[%s9212_s3 + $0x490] ss:$48 sps:$4 sm:$0xff]  }
 0x16a   :  { %2203 = vmatpush1.bf16.msra.mxu0 %v6199_v40  ;;  %2114 = vmatprep.subr.bf16.mxu1 %v6204_v44  ;;  %v6264_v40 = vld [vmem:[%s9212_s3 + $0x734] ss:$48 sps:$4 sm:$0xff]  }
 0x16b   :  { %2204 = vmatprep.subr.bf16.mxu0 %v6207_v45  ;;  %v6267_v44 = vld [vmem:[%s9212_s3 + $0x434] ss:$48 sps:$4 sm:$0xff]   ;;  %v6262_v45 = vld [vmem:[%s9212_s3 + $0x730] ss:$48 sps:$4 sm:$0xff]  }
 0x16d   :  { %2115 = vmatpush2.bf16.msra.mxu1 %v6202_v43  ;;  %2190 = vmatmul.mubr.bf16.gmra.mxu0 %v7276_v0  ;;  %v6265_v43 = vld [vmem:[%s9212_s3 + $0x430] ss:$48 sps:$4 sm:$0xff]  }
 0x16e   :  { %2205 = vmatpush1.bf16.msra.mxu0 %v6205_v47  ;;  %2232 = vmatprep.mubr.bf16.mxu0 %v7239_v34  ;;  %v6270_v47 = vld [vmem:[%s9212_s3 + $0x6d4] ss:$48 sps:$4 sm:$0xff]  }
 0x16f   :  { %2116 = vmatprep.subr.bf16.mxu1 %v6210_v49  ;;  %2206 = vmatprep.subr.bf16.mxu0 %v6213_v46  ;;  %v6273_v49 = vld [vmem:[%s9212_s3 + $0x3d4] ss:$48 sps:$4 sm:$0xff]   ;;  %v6268_v46 = vld [vmem:[%s9212_s3 + $0x6d0] ss:$48 sps:$4 sm:$0xff]  }
 0x171   :  { %2117 = vmatpush2.bf16.msra.mxu1 %v6208_v57  ;;  %v6271_v57 = vld [vmem:[%s9212_s3 + $0x3d0] ss:$48 sps:$4 sm:$0xff]  }
 0x172   :  { %2207 = vmatpush1.bf16.msra.mxu0 %v6211_v56  ;;  %2118 = vmatprep.subr.bf16.mxu1 %v6216_v58  ;;  %v6276_v56 = vld [vmem:[%s9212_s3 + $0x674] ss:$48 sps:$4 sm:$0xff]  }
 0x173   :  { %2208 = vmatprep.subr.bf16.mxu0 %v6219_v59  ;;  %v6279_v58 = vld [vmem:[%s9212_s3 + $0x374] ss:$48 sps:$4 sm:$0xff]   ;;  %v6274_v59 = vld [vmem:[%s9212_s3 + $0x670] ss:$48 sps:$4 sm:$0xff]  }
 0x175   :  { %2119 = vmatpush2.bf16.msra.mxu1 %v6214_v60  ;;  %v6277_v60 = vld [vmem:[%s9212_s3 + $0x370] ss:$48 sps:$4 sm:$0xff]  }
 0x176   :  { %2209 = vmatpush1.bf16.msra.mxu0 %v6217_v63  ;;  %2120 = vmatprep.subr.bf16.mxu1 %v6222_v1  ;;  %v6282_v63 = vld [vmem:[%s9212_s3 + $0x614] ss:$48 sps:$4 sm:$0xff]  }
 0x177   :  { %2210 = vmatprep.subr.bf16.mxu0 %v6225_v61  ;;  %v6285_v1 = vld [vmem:[%s9212_s3 + $0x314] ss:$48 sps:$4 sm:$0xff]   ;;  %v6280_v61 = vld [vmem:[%s9212_s3 + $0x610] ss:$48 sps:$4 sm:$0xff]  }
 0x179   :  { %2121 = vmatpush2.bf16.msra.mxu1 %v6220_v9  ;;  %v6283_v9 = vld [vmem:[%s9212_s3 + $0x310] ss:$48 sps:$4 sm:$0xff]  }
 0x17a   :  { %2211 = vmatpush1.bf16.msra.mxu0 %v6223_v52  ;;  %2122 = vmatprep.subr.bf16.mxu1 %v6228_v50  ;;  %v6288_v52 = vld [vmem:[%s9212_s3 + $0x2bc] ss:$48 sps:$4 sm:$0xff]  }
 0x17b   :  { %2212 = vmatprep.subr.bf16.mxu0 %v6231_v21  ;;  %v6291_v50 = vld [vmem:[%s9212_s3 + $0x8bc] ss:$48 sps:$4 sm:$0xff]   ;;  %v6286_v21 = vld [vmem:[%s9212_s3 + $0x2b8] ss:$48 sps:$4 sm:$0xff]  }
 0x17d   :  { %2123 = vmatpush2.bf16.msra.mxu1 %v6226_v22  ;;  %v6289_v22 = vld [vmem:[%s9212_s3 + $0x8b8] ss:$48 sps:$4 sm:$0xff]  }
 0x17e   :  { %2213 = vmatpush1.bf16.msra.mxu0 %v6229_v23  ;;  %2124 = vmatprep.subr.bf16.mxu1 %v6234_v24  ;;  %v6294_v23 = vld [vmem:[%s9212_s3 + $0x25c] ss:$48 sps:$4 sm:$0xff]  }
 0x17f   :  { %2214 = vmatprep.subr.bf16.mxu0 %v6237_v25  ;;  %v6297_v24 = vld [vmem:[%s9212_s3 + $0x85c] ss:$48 sps:$4 sm:$0xff]   ;;  %v6292_v25 = vld [vmem:[%s9212_s3 + $0x258] ss:$48 sps:$4 sm:$0xff]  }
 0x181   :  { %2125 = vmatpush2.bf16.msra.mxu1 %v6232_v26  ;;  %v6295_v26 = vld [vmem:[%s9212_s3 + $0x858] ss:$48 sps:$4 sm:$0xff]  }
 0x182   :  { %2215 = vmatpush1.bf16.msra.mxu0 %v6235_v27  ;;  %2253 = vmatprep.subr.bf16.mxu1 %v6240_v28  ;;  %v6300_v27 = vld [vmem:[%s9212_s3 + $0x1fc] ss:$48 sps:$4 sm:$0xff]  }
 0x183   :  { %2216 = vmatprep.subr.bf16.mxu0 %v6243_v29  ;;  %v6303_v28 = vld [vmem:[%s9212_s3 + $0x7fc] ss:$48 sps:$4 sm:$0xff]   ;;  %v6298_v29 = vld [vmem:[%s9212_s3 + $0x1f8] ss:$48 sps:$4 sm:$0xff]  }
 0x184   :  { %2127 = vmatmul.mubr.bf16.vlgmr.msra.gmra.mxu1 %v7249_v38 }
 0x185   :  { %2136 = vmatprep.mubr.bf16.mxu1 %v7260_v48  ;;  %2254 = vmatpush1.bf16.msra.mxu1 %v6238_v7  ;;  %v6301_v7 = vld [vmem:[%s9212_s3 + $0x7f8] ss:$48 sps:$4 sm:$0xff]  }
 0x186   :  { %2217 = vmatpush2.bf16.msra.mxu0 %v6241_v8  ;;  %2255 = vmatprep.subr.bf16.mxu1 %v6246_v2  ;;  %v6304_v8 = vld [vmem:[%s9212_s3 + $0x198] ss:$48 sps:$4 sm:$0xff]   ;;  %v6306_v2 = vld [vmem:[%s9212_s3 + $0x19c] ss:$48 sps:$4 sm:$0xff]  }
 0x187   :  { %2218 = vmatprep.subr.bf16.mxu0 %v6249_v30  ;;  %v6309_v30 = vld [vmem:[%s9212_s3 + $0x79c] ss:$48 sps:$4 sm:$0xff]  }
 0x189   :  { %2256 = vmatpush1.bf16.msra.mxu1 %v6244_v54  ;;  %v6307_v54 = vld [vmem:[%s9212_s3 + $0x798] ss:$48 sps:$4 sm:$0xff]  }
 0x18a   :  { %2219 = vmatpush2.bf16.msra.mxu0 %v6247_v31  ;;  %2257 = vmatprep.subr.bf16.mxu1 %v6252_v32  ;;  %v6312_v31 = vld [vmem:[%s9212_s3 + $0x13c] ss:$48 sps:$4 sm:$0xff]   ;;  %v6310_v32 = vld [vmem:[%s9212_s3 + $0x138] ss:$48 sps:$4 sm:$0xff]  }
 0x18b   :  { %2220 = vmatprep.subr.bf16.mxu0 %v6255_v33  ;;  %v6315_v33 = vld [vmem:[%s9212_s3 + $0x73c] ss:$48 sps:$4 sm:$0xff]  }
 0x18c   :  { %2137 = vmatmul.mubr.bf16.gmra.mxu1 %v7281_v51 }
 0x18d   :  { %2258 = vmatpush1.bf16.msra.mxu1 %v6250_v55  ;;  %2285 = vmatprep.mubr.bf16.mxu1 %v6895_v62  ;;  %v6313_v55 = vld [vmem:[%s9212_s3 + $0x738] ss:$48 sps:$4 sm:$0xff]  }
 0x18e   :  { %2221 = vmatpush2.bf16.msra.mxu0 %v6253_v18  ;;  %2259 = vmatprep.subr.bf16.mxu1 %v6258_v19  ;;  %v6318_v18 = vld [vmem:[%s9212_s3 + $0xdc] ss:$48 sps:$4 sm:$0xff]  }
 0x18f   :  { %2222 = vmatprep.subr.bf16.mxu0 %v6261_v36  ;;  %v6321_v19 = vld [vmem:[%s9212_s3 + $0x6dc] ss:$48 sps:$4 sm:$0xff]   ;;  %v6316_v36 = vld [vmem:[%s9212_s3 + $0xd8] ss:$48 sps:$4 sm:$0xff]  }
 0x191   :  { %2260 = vmatpush1.bf16.msra.mxu1 %v6256_v53  ;;  %v6319_v53 = vld [vmem:[%s9212_s3 + $0x6d8] ss:$48 sps:$4 sm:$0xff]  }
 0x192   :  { %2223 = vmatpush2.bf16.msra.mxu0 %v6259_v14  ;;  %2261 = vmatprep.subr.bf16.mxu1 %v6264_v40  ;;  %v6324_v14 = vld [vmem:[%s9212_s3 + $0x7c] ss:$48 sps:$4 sm:$0xff]  }
 0x193   :  { %2224 = vmatprep.subr.bf16.mxu0 %v6267_v44  ;;  %v6327_v40 = vld [vmem:[%s9212_s3 + $0x67c] ss:$48 sps:$4 sm:$0xff]   ;;  %v6322_v44 = vld [vmem:[%s9212_s3 + $0x78] ss:$48 sps:$4 sm:$0xff]  }
 0x195   :  { %2262 = vmatpush1.bf16.msra.mxu1 %v6262_v45  ;;  %v6325_v45 = vld [vmem:[%s9212_s3 + $0x678] ss:$48 sps:$4 sm:$0xff]  }
 0x196   :  { %2225 = vmatpush2.bf16.msra.mxu0 %v6265_v43  ;;  %2263 = vmatprep.subr.bf16.mxu1 %v6270_v47  ;;  %v6330_v43 = vld [vmem:[%s9212_s3 + $0x1c] ss:$48 sps:$4 sm:$0xff]  }
 0x197   :  { %2226 = vmatprep.subr.bf16.mxu0 %v6273_v49  ;;  %v6333_v47 = vld [vmem:[%s9212_s3 + $0x61c] ss:$48 sps:$4 sm:$0xff]   ;;  %v6328_v49 = vld [vmem:[%s9212_s3 + $0x18] ss:$48 sps:$4 sm:$0xff]  }
 0x199   :  { %2264 = vmatpush1.bf16.msra.mxu1 %v6268_v46  ;;  %v6331_v46 = vld [vmem:[%s9212_s3 + $0x618] ss:$48 sps:$4 sm:$0xff]  }
 0x19a   :  { %2227 = vmatpush2.bf16.msra.mxu0 %v6271_v57  ;;  %2265 = vmatprep.subr.bf16.mxu1 %v6276_v56  ;;  %v6336_v57 = vld [vmem:[%s9212_s3 + $0x5bc] ss:$48 sps:$4 sm:$0xff]   ;;  %v6339_v56 = vld [vmem:[%s9212_s3 + $0x2c4] ss:$48 sps:$4 sm:$0xff]  }
 0x19b   :  { %2228 = vmatprep.subr.bf16.mxu0 %v6279_v58  ;;  %v6334_v58 = vld [vmem:[%s9212_s3 + $0x5b8] ss:$48 sps:$4 sm:$0xff]  }
 0x19d   :  { %2266 = vmatpush1.bf16.msra.mxu1 %v6274_v59  ;;  %v6337_v59 = vld [vmem:[%s9212_s3 + $0x2c0] ss:$48 sps:$4 sm:$0xff]  }
 0x19e   :  { %2229 = vmatpush2.bf16.msra.mxu0 %v6277_v60  ;;  %2267 = vmatprep.subr.bf16.mxu1 %v6282_v63  ;;  %v6342_v60 = vld [vmem:[%s9212_s3 + $0x55c] ss:$48 sps:$4 sm:$0xff]   ;;  %v6345_v63 = vld [vmem:[%s9212_s3 + $0x264] ss:$48 sps:$4 sm:$0xff]  }
 0x19f   :  { %2230 = vmatprep.subr.bf16.mxu0 %v6285_v1  ;;  %v6340_v1 = vld [vmem:[%s9212_s3 + $0x558] ss:$48 sps:$4 sm:$0xff]  }
 0x1a1   :  { %2268 = vmatpush1.bf16.msra.mxu1 %v6280_v61  ;;  %v6343_v61 = vld [vmem:[%s9212_s3 + $0x260] ss:$48 sps:$4 sm:$0xff]  }
 0x1a2   :  { %2231 = vmatpush2.bf16.msra.mxu0 %v6283_v9  ;;  %2306 = vmatprep.subr.bf16.mxu1 %v6288_v52  ;;  %v6348_v9 = vld [vmem:[%s9212_s3 + $0x4fc] ss:$48 sps:$4 sm:$0xff]   ;;  %v6351_v52 = vld [vmem:[%s9212_s3 + $0x204] ss:$48 sps:$4 sm:$0xff]  }
 0x1a3   :  { %2359 = vmatprep.subr.bf16.mxu0 %v6291_v50  ;;  %v6346_v50 = vld [vmem:[%s9212_s3 + $0x4f8] ss:$48 sps:$4 sm:$0xff]  }
 0x1a4   :  { %2286 = vmatmul.mubr.bf16.vlgmr.msra.gmra.mxu1 %v7241_v35 }
 0x1a5   :  { %2233 = vmatmul.mubr.bf16.vlgmr.msra.gmra.mxu0 %v7249_v38  ;;  %2307 = vmatpush1.bf16.msra.mxu1 %v6286_v21  ;;  %v6349_v21 = vld [vmem:[%s9212_s3 + $0x200] ss:$48 sps:$4 sm:$0xff]  }
 0x1a6   :  { %2242 = vmatprep.mubr.bf16.mxu0 %v7260_v48  ;;  %2360 = vmatpush1.bf16.msra.mxu0 %v6289_v22  ;;  %v6352_v22 = vld [vmem:[%s9212_s3 + $0x498] ss:$48 sps:$4 sm:$0xff]  }
 0x1a7   :  { %2308 = vmatprep.subr.bf16.mxu1 %v6294_v23  ;;  %2361 = vmatprep.subr.bf16.mxu0 %v6297_v24  ;;  %v6354_v23 = vld [vmem:[%s9212_s3 + $0x49c] ss:$48 sps:$4 sm:$0xff]   ;;  %v6357_v24 = vld [vmem:[%s9212_s3 + $0x1a4] ss:$48 sps:$4 sm:$0xff]  }
 0x1a8   :  { %2295 = vmatprep.mubr.bf16.mxu1 %v6895_v62 }
 0x1a9   :  { %2309 = vmatpush1.bf16.msra.mxu1 %v6292_v25  ;;  %v6355_v25 = vld [vmem:[%s9212_s3 + $0x1a0] ss:$48 sps:$4 sm:$0xff]  }
 0x1aa   :  { %2362 = vmatpush1.bf16.msra.mxu0 %v6295_v26  ;;  %2310 = vmatprep.subr.bf16.mxu1 %v6300_v27  ;;  %v6360_v26 = vld [vmem:[%s9212_s3 + $0x43c] ss:$48 sps:$4 sm:$0xff]   ;;  %v6358_v27 = vld [vmem:[%s9212_s3 + $0x438] ss:$48 sps:$4 sm:$0xff]  }
 0x1ab   :  { %2363 = vmatprep.subr.bf16.mxu0 %v6303_v28  ;;  %v6363_v28 = vld [vmem:[%s9212_s3 + $0x144] ss:$48 sps:$4 sm:$0xff]  }
 0x1ac   :  { %2296 = vmatmul.mubr.bf16.gmra.mxu1 %v7276_v0 }
 0x1ad   :  { %2243 = vmatmul.mubr.bf16.gmra.mxu0 %v7281_v51  ;;  %2311 = vmatpush1.bf16.msra.mxu1 %v6298_v29  ;;  %v6361_v29 = vld [vmem:[%s9212_s3 + $0x140] ss:$48 sps:$4 sm:$0xff]  }
 0x1ae   :  { %2338 = vmatprep.mubr.bf16.mxu1 %v7239_v34  ;;  %2364 = vmatpush1.bf16.msra.mxu0 %v6301_v7  ;;  %v6366_v7 = vld [vmem:[%s9212_s3 + $0x3dc] ss:$48 sps:$4 sm:$0xff]  }
 0x1af   :  { %2312 = vmatprep.subr.bf16.mxu1 %v6306_v2  ;;  %2365 = vmatprep.subr.bf16.mxu0 %v6309_v30  ;;  %v6369_v2 = vld [vmem:[%s9212_s3 + $0xe4] ss:$48 sps:$4 sm:$0xff]   ;;  %v6367_v30 = vld [vmem:[%s9212_s3 + $0xe0] ss:$48 sps:$4 sm:$0xff]  }
 0x1b0   :  { %2391 = vmatprep.mubr.bf16.mxu0 %v6895_v62 }
 0x1b1   :  { %2313 = vmatpush1.bf16.msra.mxu1 %v6304_v8  ;;  %v6364_v8 = vld [vmem:[%s9212_s3 + $0x3d8] ss:$48 sps:$4 sm:$0xff]  }
 0x1b2   :  { %2366 = vmatpush1.bf16.msra.mxu0 %v6307_v54  ;;  %2314 = vmatprep.subr.bf16.mxu1 %v6312_v31  ;;  %v6372_v54 = vld [vmem:[%s9212_s3 + $0x37c] ss:$48 sps:$4 sm:$0xff]   ;;  %v6375_v31 = vld [vmem:[%s9212_s3 + $0x84] ss:$48 sps:$4 sm:$0xff]  }
 0x1b3   :  { %2367 = vmatprep.subr.bf16.mxu0 %v6315_v33  ;;  %v6373_v33 = vld [vmem:[%s9212_s3 + $0x80] ss:$48 sps:$4 sm:$0xff]  }
 0x1b5   :  { %2315 = vmatpush1.bf16.msra.mxu1 %v6310_v32  ;;  %v6370_v32 = vld [vmem:[%s9212_s3 + $0x378] ss:$48 sps:$4 sm:$0xff]  }
 0x1b6   :  { %2368 = vmatpush1.bf16.msra.mxu0 %v6313_v55  ;;  %2316 = vmatprep.subr.bf16.mxu1 %v6318_v18  ;;  %v6378_v55 = vld [vmem:[%s9212_s3 + $0x31c] ss:$48 sps:$4 sm:$0xff]   ;;  %v6376_v18 = vld [vmem:[%s9212_s3 + $0x318] ss:$48 sps:$4 sm:$0xff]  }
 0x1b7   :  { %2369 = vmatprep.subr.bf16.mxu0 %v6321_v19  ;;  %v6381_v19 = vld [vmem:[%s9212_s3 + $0x24] ss:$48 sps:$4 sm:$0xff]  }
 0x1b9   :  { %2317 = vmatpush1.bf16.msra.mxu1 %v6316_v36  ;;  %v6379_v36 = vld [vmem:[%s9212_s3 + $0x20] ss:$48 sps:$4 sm:$0xff]  }
 0x1ba   :  { %2370 = vmatpush1.bf16.msra.mxu0 %v6319_v53  ;;  %2318 = vmatprep.subr.bf16.mxu1 %v6324_v14  ;;  %v6384_v53 = vld [vmem:[%s9212_s3 + $0x8c4] ss:$48 sps:$4 sm:$0xff]   ;;  %v6382_v14 = vld [vmem:[%s9212_s3 + $0x8c0] ss:$48 sps:$4 sm:$0xff]  }
 0x1bb   :  { %2371 = vmatprep.subr.bf16.mxu0 %v6327_v40  ;;  %v6387_v40 = vld [vmem:[%s9212_s3 + $0x5c4] ss:$48 sps:$4 sm:$0xff]  }
 0x1bd   :  { %2319 = vmatpush1.bf16.msra.mxu1 %v6322_v44  ;;  %v6385_v44 = vld [vmem:[%s9212_s3 + $0x5c0] ss:$48 sps:$4 sm:$0xff]  }
 0x1be   :  { %2372 = vmatpush1.bf16.msra.mxu0 %v6325_v45  ;;  %2320 = vmatprep.subr.bf16.mxu1 %v6330_v43  ;;  %v6390_v45 = vld [vmem:[%s9212_s3 + $0x864] ss:$48 sps:$4 sm:$0xff]  }
 0x1bf   :  { %2373 = vmatprep.subr.bf16.mxu0 %v6333_v47  ;;  %v6393_v43 = vld [vmem:[%s9212_s3 + $0x564] ss:$48 sps:$4 sm:$0xff]   ;;  %v6388_v47 = vld [vmem:[%s9212_s3 + $0x860] ss:$48 sps:$4 sm:$0xff]  }
 0x1c1   :  { %2321 = vmatpush1.bf16.msra.mxu1 %v6328_v49  ;;  %v6391_v49 = vld [vmem:[%s9212_s3 + $0x560] ss:$48 sps:$4 sm:$0xff]  }
 0x1c2   :  { %2374 = vmatpush1.bf16.msra.mxu0 %v6331_v46  ;;  %2322 = vmatprep.subr.bf16.mxu1 %v6336_v57  ;;  %v6396_v46 = vld [vmem:[%s9212_s3 + $0x804] ss:$48 sps:$4 sm:$0xff]   ;;  %v6394_v57 = vld [vmem:[%s9212_s3 + $0x800] ss:$48 sps:$4 sm:$0xff]  }
 0x1c3   :  { %2412 = vmatprep.subr.bf16.mxu0 %v6339_v56  ;;  %v6399_v56 = vld [vmem:[%s9212_s3 + $0x504] ss:$48 sps:$4 sm:$0xff]  }
 0x1c5   :  { %2323 = vmatpush2.bf16.msra.mxu1 %v6334_v58  ;;  %2392 = vmatmul.mubr.bf16.vlgmr.msra.gmra.mxu0 %v7241_v35  ;;  %v6397_v58 = vld [vmem:[%s9212_s3 + $0x500] ss:$48 sps:$4 sm:$0xff]  }
 0x1c6   :  { %2413 = vmatpush1.bf16.msra.mxu0 %v6337_v59  ;;  %2324 = vmatprep.subr.bf16.mxu1 %v6342_v60  ;;  %v6402_v59 = vld [vmem:[%s9212_s3 + $0x7a4] ss:$48 sps:$4 sm:$0xff]   ;;  %v6400_v60 = vld [vmem:[%s9212_s3 + $0x7a0] ss:$48 sps:$4 sm:$0xff]  }
 0x1c7   :  { %2414 = vmatprep.subr.bf16.mxu0 %v6345_v63  ;;  %2401 = vmatprep.mubr.bf16.mxu0 %v6895_v62  ;;  %v6405_v63 = vld [vmem:[%s9212_s3 + $0x4a4] ss:$48 sps:$4 sm:$0xff]  }
 0x1c9   :  { %2325 = vmatpush2.bf16.msra.mxu1 %v6340_v1  ;;  %v6403_v1 = vld [vmem:[%s9212_s3 + $0x4a0] ss:$48 sps:$4 sm:$0xff]  }
 0x1ca   :  { %2415 = vmatpush1.bf16.msra.mxu0 %v6343_v61  ;;  %2326 = vmatprep.subr.bf16.mxu1 %v6348_v9  ;;  %v6408_v61 = vld [vmem:[%s9212_s3 + $0x744] ss:$48 sps:$4 sm:$0xff]   ;;  %v6406_v9 = vld [vmem:[%s9212_s3 + $0x740] ss:$48 sps:$4 sm:$0xff]  }
 0x1cb   :  { %2416 = vmatprep.subr.bf16.mxu0 %v6351_v52  ;;  %v6411_v52 = vld [vmem:[%s9212_s3 + $0x444] ss:$48 sps:$4 sm:$0xff]  }
 0x1cd   :  { %2327 = vmatpush2.bf16.msra.mxu1 %v6346_v50  ;;  %2402 = vmatmul.mubr.bf16.gmra.mxu0 %v7276_v0  ;;  %v6409_v50 = vld [vmem:[%s9212_s3 + $0x440] ss:$48 sps:$4 sm:$0xff]  }
 0x1ce   :  { %2417 = vmatpush1.bf16.msra.mxu0 %v6349_v21  ;;  %2444 = vmatprep.mubr.bf16.mxu0 %v7239_v34  ;;  %v6414_v21 = vld [vmem:[%s9212_s3 + $0x6e4] ss:$48 sps:$4 sm:$0xff]  }
 0x1cf   :  { %2328 = vmatprep.subr.bf16.mxu1 %v6354_v23  ;;  %2418 = vmatprep.subr.bf16.mxu0 %v6357_v24  ;;  %v6417_v23 = vld [vmem:[%s9212_s3 + $0x3e4] ss:$48 sps:$4 sm:$0xff]   ;;  %v6415_v24 = vld [vmem:[%s9212_s3 + $0x3e0] ss:$48 sps:$4 sm:$0xff]  }
 0x1d1   :  { %2329 = vmatpush2.bf16.msra.mxu1 %v6352_v22  ;;  %v6412_v22 = vld [vmem:[%s9212_s3 + $0x6e0] ss:$48 sps:$4 sm:$0xff]  }
 0x1d2   :  { %2419 = vmatpush1.bf16.msra.mxu0 %v6355_v25  ;;  %2330 = vmatprep.subr.bf16.mxu1 %v6360_v26  ;;  %v6420_v25 = vld [vmem:[%s9212_s3 + $0x684] ss:$48 sps:$4 sm:$0xff]  }
 0x1d3   :  { %2420 = vmatprep.subr.bf16.mxu0 %v6363_v28  ;;  %v6423_v26 = vld [vmem:[%s9212_s3 + $0x384] ss:$48 sps:$4 sm:$0xff]   ;;  %v6421_v28 = vld [vmem:[%s9212_s3 + $0x380] ss:$48 sps:$4 sm:$0xff]  }
 0x1d5   :  { %2331 = vmatpush2.bf16.msra.mxu1 %v6358_v27  ;;  %v6418_v27 = vld [vmem:[%s9212_s3 + $0x680] ss:$48 sps:$4 sm:$0xff]  }
 0x1d6   :  { %2421 = vmatpush1.bf16.msra.mxu0 %v6361_v29  ;;  %2332 = vmatprep.subr.bf16.mxu1 %v6366_v7  ;;  %v6426_v29 = vld [vmem:[%s9212_s3 + $0x624] ss:$48 sps:$4 sm:$0xff]  }
 0x1d7   :  { %2422 = vmatprep.subr.bf16.mxu0 %v6369_v2  ;;  %v6429_v7 = vld [vmem:[%s9212_s3 + $0x324] ss:$48 sps:$4 sm:$0xff]   ;;  %v6427_v2 = vld [vmem:[%s9212_s3 + $0x320] ss:$48 sps:$4 sm:$0xff]  }
 0x1d9   :  { %2333 = vmatpush2.bf16.msra.mxu1 %v6364_v8  ;;  %v6424_v8 = vld [vmem:[%s9212_s3 + $0x620] ss:$48 sps:$4 sm:$0xff]  }
 0x1da   :  { %2423 = vmatpush1.bf16.msra.mxu0 %v6367_v30  ;;  %2334 = vmatprep.subr.bf16.mxu1 %v6372_v54  ;;  %v6432_v30 = vld [vmem:[%s9212_s3 + $0x2cc] ss:$48 sps:$4 sm:$0xff]  }
 0x1db   :  { %2424 = vmatprep.subr.bf16.mxu0 %v6375_v31  ;;  %v6435_v54 = vld [vmem:[%s9212_s3 + $0x8cc] ss:$48 sps:$4 sm:$0xff]   ;;  %v6430_v31 = vld [vmem:[%s9212_s3 + $0x2c8] ss:$48 sps:$4 sm:$0xff]  }
 0x1dd   :  { %2335 = vmatpush2.bf16.msra.mxu1 %v6370_v32  ;;  %v6433_v32 = vld [vmem:[%s9212_s3 + $0x8c8] ss:$48 sps:$4 sm:$0xff]  }
 0x1de   :  { %2425 = vmatpush1.bf16.msra.mxu0 %v6373_v33  ;;  %2336 = vmatprep.subr.bf16.mxu1 %v6378_v55  ;;  %v6438_v33 = vld [vmem:[%s9212_s3 + $0x26c] ss:$48 sps:$4 sm:$0xff]  }
 0x1df   :  { %2426 = vmatprep.subr.bf16.mxu0 %v6381_v19  ;;  %v6441_v55 = vld [vmem:[%s9212_s3 + $0x86c] ss:$48 sps:$4 sm:$0xff]   ;;  %v6439_v19 = vld [vmem:[%s9212_s3 + $0x868] ss:$48 sps:$4 sm:$0xff]  }
 0x1e1   :  { %2337 = vmatpush2.bf16.msra.mxu1 %v6376_v18  ;;  %v6436_v18 = vld [vmem:[%s9212_s3 + $0x268] ss:$48 sps:$4 sm:$0xff]  }
 0x1e2   :  { %2427 = vmatpush1.bf16.msra.mxu0 %v6379_v36  ;;  %2465 = vmatprep.subr.bf16.mxu1 %v6384_v53  ;;  %v6444_v36 = vld [vmem:[%s9212_s3 + $0x20c] ss:$48 sps:$4 sm:$0xff]   ;;  %v6442_v53 = vld [vmem:[%s9212_s3 + $0x208] ss:$48 sps:$4 sm:$0xff]  }
 0x1e3   :  { %2428 = vmatprep.subr.bf16.mxu0 %v6387_v40  ;;  %v6445_v40 = vld [vmem:[%s9212_s3 + $0x808] ss:$48 sps:$4 sm:$0xff]  }
 0x1e4   :  { %2339 = vmatmul.mubr.bf16.vlgmr.msra.gmra.mxu1 %v7249_v38 }
 0x1e5   :  { %2348 = vmatprep.mubr.bf16.mxu1 %v7260_v48  ;;  %2466 = vmatpush1.bf16.msra.mxu1 %v6382_v14  ;;  %v6447_v14 = vld [vmem:[%s9212_s3 + $0x80c] ss:$48 sps:$4 sm:$0xff]  }
 0x1e6   :  { %2429 = vmatpush2.bf16.msra.mxu0 %v6385_v44  ;;  %2467 = vmatprep.subr.bf16.mxu1 %v6390_v45  ;;  %v6450_v44 = vld [vmem:[%s9212_s3 + $0x1ac] ss:$48 sps:$4 sm:$0xff]  }
 0x1e7   :  { %2430 = vmatprep.subr.bf16.mxu0 %v6393_v43  ;;  %v6453_v45 = vld [vmem:[%s9212_s3 + $0x7ac] ss:$48 sps:$4 sm:$0xff]   ;;  %v6448_v43 = vld [vmem:[%s9212_s3 + $0x1a8] ss:$48 sps:$4 sm:$0xff]  }
 0x1e9   :  { %2468 = vmatpush1.bf16.msra.mxu1 %v6388_v47  ;;  %v6451_v47 = vld [vmem:[%s9212_s3 + $0x7a8] ss:$48 sps:$4 sm:$0xff]  }
 0x1ea   :  { %2431 = vmatpush2.bf16.msra.mxu0 %v6391_v49  ;;  %2469 = vmatprep.subr.bf16.mxu1 %v6396_v46  ;;  %v6456_v49 = vld [vmem:[%s9212_s3 + $0x14c] ss:$48 sps:$4 sm:$0xff]   ;;  %v6454_v46 = vld [vmem:[%s9212_s3 + $0x148] ss:$48 sps:$4 sm:$0xff]  }
 0x1eb   :  { %2432 = vmatprep.subr.bf16.mxu0 %v6399_v56 }
 0x1ec   :  { %2349 = vmatmul.mubr.bf16.gmra.mxu1 %v7281_v51 }
 0x1ed   :  { %2470 = vmatpush1.bf16.msra.mxu1 %v6394_v57  ;;  %2497 = vmatprep.mubr.bf16.mxu1 %v6895_v62  ;;  %v6459_v57 = vld [vmem:[%s9212_s3 + $0x74c] ss:$48 sps:$4 sm:$0xff]  }
 0x1ee   :  { %2433 = vmatpush2.bf16.msra.mxu0 %v6397_v58  ;;  %2471 = vmatprep.subr.bf16.mxu1 %v6402_v59  ;;  %v6462_v58 = vld [vmem:[%s9212_s3 + $0xec] ss:$48 sps:$4 sm:$0xff]  }
 0x1ef   :  { %2434 = vmatprep.subr.bf16.mxu0 %v6405_v63  ;;  %v6465_v59 = vld [vmem:[%s9212_s3 + $0x6ec] ss:$48 sps:$4 sm:$0xff]  }
 0x1f1   :  { %2472 = vmatpush1.bf16.msra.mxu1 %v6400_v60  ;;  %v6460_v60 = vld [vmem:[%s9212_s3 + $0xe8] ss:$48 sps:$4 sm:$0xff]  }
 0x1f2   :  { %2435 = vmatpush2.bf16.msra.mxu0 %v6403_v1  ;;  %2473 = vmatprep.subr.bf16.mxu1 %v6408_v61  ;;  %v6463_v1 = vld [vmem:[%s9212_s3 + $0x6e8] ss:$48 sps:$4 sm:$0xff]   ;;  %v6468_v61 = vld [vmem:[%s9212_s3 + $0x8c] ss:$48 sps:$4 sm:$0xff]  }
 0x1f3   :  { %2436 = vmatprep.subr.bf16.mxu0 %v6411_v52  ;;  %v6466_v52 = vld [vmem:[%s9212_s3 + $0x88] ss:$48 sps:$4 sm:$0xff]  }
 0x1f5   :  { %2474 = vmatpush1.bf16.msra.mxu1 %v6406_v9 }
 0x1f6   :  { %2437 = vmatpush2.bf16.msra.mxu0 %v6409_v50  ;;  %2475 = vmatprep.subr.bf16.mxu1 %v6414_v21  ;;  %v6471_v50 = vld [vmem:[%s9212_s3 + $0x68c] ss:$48 sps:$4 sm:$0xff]  }
 0x1f7   :  { %2438 = vmatprep.subr.bf16.mxu0 %v6417_v23  ;;  %v6474_v23 = vld [vmem:[%s9212_s3 + $0x2c] ss:$48 sps:$4 sm:$0xff]  }
 0x1f9   :  { %2476 = vmatpush1.bf16.msra.mxu1 %v6412_v22  ;;  %v6469_v22 = vld [vmem:[%s9212_s3 + $0x688] ss:$48 sps:$4 sm:$0xff]  }
 0x1fa   :  { %2439 = vmatpush2.bf16.msra.mxu0 %v6415_v24  ;;  %2477 = vmatprep.subr.bf16.mxu1 %v6420_v25  ;;  %v7955_v24 = vld [vmem:[%s9216_s4] sm:$0xff] }
 0x1fb   :  { %2440 = vmatprep.subr.bf16.mxu0 %v6423_v26  ;;  %v6472_v26 = vld [vmem:[%s9212_s3 + $0x28] ss:$48 sps:$4 sm:$0xff]  }
 0x1fd   :  { %2478 = vmatpush1.bf16.msra.mxu1 %v6418_v27  ;;  %v6477_v27 = vld [vmem:[%s9212_s3 + $0x62c] ss:$48 sps:$4 sm:$0xff]  }
 0x1fe   :  { %2441 = vmatpush2.bf16.msra.mxu0 %v6421_v28  ;;  %2479 = vmatprep.subr.bf16.mxu1 %v6426_v29  ;;  %v7965_v29 = vrot.slane %v7955_v24, %v7204_v39 }
 0x1ff   :  { %2442 = vmatprep.subr.bf16.mxu0 %v6429_v7  ;;  %v6475_v7 = vld [vmem:[%s9212_s3 + $0x628] ss:$48 sps:$4 sm:$0xff]  }
 0x201   :  { %2480 = vmatpush1.bf16.msra.mxu1 %v6424_v8  ;;  %v6480_v8 = vld [vmem:[%s9212_s3 + $0x5cc] ss:$48 sps:$4 sm:$0xff]  }
 0x202   :  { %2443 = vmatpush2.bf16.msra.mxu0 %v6427_v2  ;;  %2518 = vmatprep.subr.bf16.mxu1 %v6432_v30  ;;  %v6478_v30 = vld [vmem:[%s9212_s3 + $0x5c8] ss:$48 sps:$4 sm:$0xff]  }
 0x203   :  { %2571 = vmatprep.subr.bf16.mxu0 %v6435_v54  ;;  %v6483_v54 = vld [vmem:[%s9215_s5 + $0xac] ss:$12 sps:$4 sm:$0xff]  }
 0x204   :  { %2498 = vmatmul.mubr.bf16.vlgmr.msra.gmra.mxu1 %v7241_v35  ;;  %v7936_v9 = vpop.f32.mrf.mxu1 }
 0x205   :  { %2445 = vmatmul.mubr.bf16.vlgmr.msra.gmra.mxu0 %v7249_v38  ;;  %2519 = vmatpush1.bf16.msra.mxu1 %v6430_v31  ;;  %v7916_v56 = vpop.f32.mrf.mxu0 }
 0x206   :  { %2454 = vmatprep.mubr.bf16.mxu0 %v7260_v48  ;;  %2572 = vmatpush1.bf16.msra.mxu0 %v6433_v32  ;;  %v2077_v25 = vpop.f32.mrf.mxu1  ;;  %v6481_v32 = vld [vmem:[%s9215_s5 + $0xa8] ss:$12 sps:$4 sm:$0xff]  }
 0x207   :  { %2520 = vmatprep.subr.bf16.mxu1 %v6438_v33  ;;  %2573 = vmatprep.subr.bf16.mxu0 %v6441_v55  ;;  %v2024_v63 = vpop.f32.mrf.mxu0  ;;  %v6486_v33 = vld [vmem:[%s9212_s3 + $0x56c] ss:$48 sps:$4 sm:$0xff]  }
 0x208   :  { %2507 = vmatprep.mubr.bf16.mxu1 %v6895_v62  ;;  %v7973_v2 = vpop.f32.mrf.mxu1  ;;  %v2025_v55 = vadd.f32 %v2024_v63, %v7965_v29  ;;  %v6507_v63 = vld [vmem:[%s9215_s5 + $0x4c] ss:$12 sps:$4 sm:$0xff]  }
 0x209   :  { %2521 = vmatpush1.bf16.msra.mxu1 %v6436_v18  ;;  %v7944_v21 = vpop.f32.mrf.mxu0  ;;  %v6489_v18 = vld [vmem:[%s9215_s5 + $0x94] ss:$12 sps:$4 sm:$0xff]  }
 0x20a   :  { %2574 = vmatpush1.bf16.msra.mxu0 %v6439_v19  ;;  %2522 = vmatprep.subr.bf16.mxu1 %v6444_v36  ;;  %v2081_v19 = vpop.f32.mrf.mxu1  ;;  %v6484_v36 = vld [vmem:[%s9212_s3 + $0x568] ss:$48 sps:$4 sm:$0xff]  }
 0x20b   :  { %2575 = vmatprep.subr.bf16.mxu0 %v6447_v14  ;;  %v2028_v28 = vpop.f32.mrf.mxu0  ;;  %v6487_v14 = vld [vmem:[%s9215_s5 + $0x90] ss:$12 sps:$4 sm:$0xff]  }
 0x20c   :  { %2508 = vmatmul.mubr.bf16.gmra.mxu1 %v7276_v0  ;;  %v2029_v31 = vadd.f32 %v2028_v28, %v7965_v29  ;;  %v6514_v28 = vld [vmem:[%s9212_s3 + $0x388] ss:$48 sps:$4 sm:$0xff]  }
 0x20d   :  { %2455 = vmatmul.mubr.bf16.gmra.mxu0 %v7281_v51  ;;  %2523 = vmatpush1.bf16.msra.mxu1 %v6442_v53 }
 0x20e   :  { %2550 = vmatprep.mubr.bf16.mxu1 %v7239_v34  ;;  %2576 = vmatpush1.bf16.msra.mxu0 %v6445_v40  ;;  %v6457_v34 = vld [vmem:[%s9212_s3 + $0x748] ss:$48 sps:$4 sm:$0xff]   ;;  %v2082_v53 = vadd.f32 %v2081_v19, %v2029_v31  ;;  %v2078_v40 = vadd.f32 %v2077_v25, %v2025_v55  ;;  %v6525_v31 = vld [vmem:[%s9215_s5 + $0x4] ss:$12 sps:$4 sm:$0xff]  }
 0x20f   :  { %2524 = vmatprep.subr.bf16.mxu1 %v6450_v44  ;;  %2577 = vmatprep.subr.bf16.mxu0 %v6453_v45  ;;  %v6492_v44 = vld [vmem:[%s9212_s3 + $0x50c] ss:$48 sps:$4 sm:$0xff]   ;;  %v6490_v45 = vld [vmem:[%s9212_s3 + $0x508] ss:$48 sps:$4 sm:$0xff]  }
 0x210   :  { %2603 = vmatprep.mubr.bf16.mxu0 %v6895_v62  ;;  %v6528_v55 = vld [vmem:[%s9215_s5 + $0x22c] ss:$12 sps:$4 sm:$0xff]  }
 0x211   :  { %2525 = vmatpush1.bf16.msra.mxu1 %v6448_v43  ;;  %v6495_v43 = vld [vmem:[%s9215_s5 + $0x7c] ss:$12 sps:$4 sm:$0xff]  }
 0x212   :  { %2578 = vmatpush1.bf16.msra.mxu0 %v6451_v47  ;;  %2526 = vmatprep.subr.bf16.mxu1 %v6456_v49  ;;  %v2637_v47 = vmax.f32 %v2082_v53, 0.0  ;;  %v2625_v49 = vmax.f32 %v2078_v40, 0.0  ;;  %v502_v53 = vsub.s32 3, %v7201_v37 }
 0x213   :  { %2579 = vmatprep.subr.bf16.mxu0 %v6459_v57  ;;  %v6501_v57 = vld [vmem:[%s9215_s5 + $0x64] ss:$12 sps:$4 sm:$0xff]  }
 0x215   :  { %2527 = vmatpush1.bf16.msra.mxu1 %v6454_v46  ;;  %v6496_v46 = vld [vmem:[%s9212_s3 + $0x4a8] ss:$48 sps:$4 sm:$0xff]  }
 0x216   :  { %2580 = vmatpush1.bf16.msra.mxu0 %v6457_v34  ;;  %2528 = vmatprep.subr.bf16.mxu1 %v6462_v58  ;;  %v8021_v34 = vpack.c.bf16 %v2637_v47, %v2625_v49  ;;  %v6499_v58 = vld [vmem:[%s9215_s5 + $0x60] ss:$12 sps:$4 sm:$0xff]   ;;  %v6532_v49 = vld [vmem:[%s9215_s5 + $0x210] ss:$12 sps:$4 sm:$0xff]  }
 0x217   :  { %2581 = vmatprep.subr.bf16.mxu0 %v6465_v59  ;;  %v6504_v59 = vld [vmem:[%s9212_s3 + $0x44c] ss:$48 sps:$4 sm:$0xff]  }
 0x219   :  { %2529 = vmatpush1.bf16.msra.mxu1 %v6460_v60  ;;  %v6502_v60 = vld [vmem:[%s9212_s3 + $0x448] ss:$48 sps:$4 sm:$0xff]  }
 0x21a   :  { %2582 = vmatpush1.bf16.msra.mxu0 %v6463_v1  ;;  %2530 = vmatprep.subr.bf16.mxu1 %v6468_v61  ;;  %v8040_v1 = vpop.f32.mrf.mxu0  ;;  %v6510_v61 = vld [vmem:[%s9212_s3 + $0x3ec] ss:$48 sps:$4 sm:$0xff]  }
 0x21b   :  { %2583 = vmatprep.subr.bf16.mxu0 %v6471_v50  ;;  %v6513_v50 = vld [vmem:[%s9215_s5 + $0x34] ss:$12 sps:$4 sm:$0xff]  }
 0x21c   :  { %v8056_v25 = vpop.f32.mrf.mxu0 }
 0x21d   :  { %2531 = vmatpush1.bf16.msra.mxu1 %v6466_v52  ;;  %v6508_v52 = vld [vmem:[%s9212_s3 + $0x3e8] ss:$48 sps:$4 sm:$0xff]  }
 0x21e   :  { %2584 = vmatpush1.bf16.msra.mxu0 %v6469_v22  ;;  %2532 = vmatprep.subr.bf16.mxu1 %v6474_v23  ;;  %v6511_v22 = vld [vmem:[%s9215_s5 + $0x30] ss:$12 sps:$4 sm:$0xff]   ;;  %v8054_v23 = vpop.f32.mrf.mxu1 }
 0x21f   :  { %2585 = vmatprep.subr.bf16.mxu0 %v6477_v27  ;;  %v6519_v27 = vld [vmem:[%s9215_s5 + $0x1c] ss:$12 sps:$4 sm:$0xff]  }
 0x221   :  { %2533 = vmatpush1.bf16.msra.mxu1 %v6472_v26  ;;  %v6516_v26 = vld [vmem:[%s9212_s3 + $0x38c] ss:$48 sps:$4 sm:$0xff]  }
 0x222   :  { %2586 = vmatpush1.bf16.msra.mxu0 %v6475_v7  ;;  %2534 = vmatprep.subr.bf16.mxu1 %v6480_v8  ;;  %v6517_v7 = vld [vmem:[%s9215_s5 + $0x18] ss:$12 sps:$4 sm:$0xff]   ;;  %v8070_v8 = vpop.f32.mrf.mxu1 }
 0x223   :  { %4633 = vmatprep.subr.bf16.mxu0 %v6483_v54  ;;  %v6522_v54 = vld [vmem:[%s9212_s3 + $0x32c] ss:$48 sps:$4 sm:$0xff]  }
 0x225   :  { %2535 = vmatpush2.bf16.msra.mxu1 %v6478_v30  ;;  %2604 = vmatmul.mubr.bf16.vlgmr.msra.gmra.mxu0 %v7241_v35  ;;  %v6493_v35 = vld [vmem:[%s9215_s5 + $0x78] ss:$12 sps:$4 sm:$0xff]   ;;  %v8072_v30 = vpop.f32.mrf.mxu0 }
 0x226   :  { %4634 = vmatpush1.bf16.msra.mxu0 %v6481_v32  ;;  %2536 = vmatprep.subr.bf16.mxu1 %v6486_v33  ;;  %v6520_v32 = vld [vmem:[%s9212_s3 + $0x328] ss:$48 sps:$4 sm:$0xff]   ;;  %v6523_v33 = vld [vmem:[%s9215_s5] ss:$12 sps:$4 sm:$0xff]  }
 0x227   :  { %4635 = vmatprep.subr.bf16.mxu0 %v6489_v18  ;;  %2613 = vmatprep.mubr.bf16.mxu0 %v6895_v62  ;;  %v6498_v62 = vld [vmem:[%s9212_s3 + $0x4ac] ss:$48 sps:$4 sm:$0xff]   ;;  %v8089_v18 = vpop.f32.mrf.mxu1  ;;  %v8091_v19 = vpop.f32.mrf.mxu0 }
 0x229   :  { %2537 = vmatpush2.bf16.msra.mxu1 %v6484_v36  ;;  %v6531_v36 = vld [vmem:[%s9215_s5 + $0x16c] ss:$12 sps:$4 sm:$0xff]   ;;  %v8100_v40 = vpop.f32.mrf.mxu0  ;;  %v8111_v47 = vpop.f32.mrf.mxu1 }
 0x22a   :  { %4636 = vmatpush1.bf16.msra.mxu0 %v6487_v14  ;;  %2538 = vmatprep.subr.bf16.mxu1 %v6492_v44  ;;  %v6526_v14 = vld [vmem:[%s9215_s5 + $0x228] ss:$12 sps:$4 sm:$0xff]  }
 0x22b   :  { %4637 = vmatprep.subr.bf16.mxu0 %v6495_v43  ;;  %v6529_v44 = vld [vmem:[%s9215_s5 + $0x168] ss:$12 sps:$4 sm:$0xff]  }
 0x22c   :  { %v6537_v43 = vld [vmem:[%s9215_s5 + $0x154] ss:$12 sps:$4 sm:$0xff]  }
 0x22d   :  { %2539 = vmatpush2.bf16.msra.mxu1 %v6490_v45  ;;  %2614 = vmatmul.mubr.bf16.gmra.mxu0 %v7276_v0  ;;  %v6505_v0 = vld [vmem:[%s9215_s5 + $0x48] ss:$12 sps:$4 sm:$0xff]  }
 0x22e   :  { %4638 = vmatpush1.bf16.msra.mxu0 %v6493_v35  ;;  %4665 = vmatprep.mubr.bf16.mxu0 %v8021_v34  ;;  %v6534_v45 = vld [vmem:[%s9215_s5 + $0x214] ss:$12 sps:$4 sm:$0xff]   ;;  %v8116_v35 = vrot.slane %v7955_v24, %v502_v53 }
 0x22f   :  { %2540 = vmatprep.subr.bf16.mxu1 %v6498_v62  ;;  %4639 = vmatprep.subr.bf16.mxu0 %v6501_v57  ;;  %v6535_v57 = vld [vmem:[%s9215_s5 + $0x150] ss:$12 sps:$4 sm:$0xff]  }
 0x231   :  { %2541 = vmatpush2.bf16.msra.mxu1 %v6496_v46  ;;  %v2183_v46 = vpop.f32.mrf.mxu0 }
 0x232   :  { %4640 = vmatpush1.bf16.msra.mxu0 %v6499_v58  ;;  %2542 = vmatprep.subr.bf16.mxu1 %v6504_v59  ;;  %v6540_v58 = vld [vmem:[%s9215_s5 + $0x1fc] ss:$12 sps:$4 sm:$0xff]  }
 0x233   :  { %4641 = vmatprep.subr.bf16.mxu0 %v6507_v63  ;;  %v6543_v63 = vld [vmem:[%s9215_s5 + $0x13c] ss:$12 sps:$4 sm:$0xff]  }
 0x235   :  { %2543 = vmatpush2.bf16.msra.mxu1 %v6502_v60 }
 0x236   :  { %4642 = vmatpush1.bf16.msra.mxu0 %v6505_v0  ;;  %2544 = vmatprep.subr.bf16.mxu1 %v6510_v61  ;;  %v8138_v0 = vpop.f32.mrf.mxu0 }
 0x237   :  { %4643 = vmatprep.subr.bf16.mxu0 %v6513_v50 }
 0x239   :  { %2545 = vmatpush2.bf16.msra.mxu1 %v6508_v52  ;;  %v6546_v52 = vld [vmem:[%s9215_s5 + $0x1e4] ss:$12 sps:$4 sm:$0xff]  }
 0x23a   :  { %4644 = vmatpush1.bf16.msra.mxu0 %v6511_v22  ;;  %2546 = vmatprep.subr.bf16.mxu1 %v6516_v26 }
 0x23b   :  { %4645 = vmatprep.subr.bf16.mxu0 %v6519_v27  ;;  %v6544_v27 = vld [vmem:[%s9215_s5 + $0x1e0] ss:$12 sps:$4 sm:$0xff]  }
 0x23d   :  { %2547 = vmatpush2.bf16.msra.mxu1 %v6514_v28  ;;  %v6549_v28 = vld [vmem:[%s9215_s5 + $0x124] ss:$12 sps:$4 sm:$0xff]  }
 0x23e   :  { %4646 = vmatpush1.bf16.msra.mxu0 %v6517_v7  ;;  %2548 = vmatprep.subr.bf16.mxu1 %v6522_v54  ;;  %v2187_v7 = vpop.f32.mrf.mxu0  ;;  %v6547_v54 = vld [vmem:[%s9215_s5 + $0x120] ss:$12 sps:$4 sm:$0xff]  }
 0x23f   :  { %4647 = vmatprep.subr.bf16.mxu0 %v6525_v31 }
 0x241   :  { %2549 = vmatpush2.bf16.msra.mxu1 %v6520_v32  ;;  %v6552_v32 = vld [vmem:[%s9215_s5 + $0x1cc] ss:$12 sps:$4 sm:$0xff]  }
 0x242   :  { %4648 = vmatpush1.bf16.msra.mxu0 %v6523_v33  ;;  %4686 = vmatprep.subr.bf16.mxu1 %v6528_v55 }
 0x243   :  { %4649 = vmatprep.subr.bf16.mxu0 %v6531_v36  ;;  %v6550_v36 = vld [vmem:[%s9215_s5 + $0x1c8] ss:$12 sps:$4 sm:$0xff]  }
 0x244   :  { %v8121_v62 = vpop.f32.mrf.mxu1  ;;  %2551 = vmatmul.mubr.bf16.vlgmr.msra.gmra.mxu1 %v7249_v38  ;;  %v6538_v38 = vld [vmem:[%s9215_s5 + $0x1f8] ss:$12 sps:$4 sm:$0xff]  }
 0x245   :  { %2560 = vmatprep.mubr.bf16.mxu1 %v7260_v48  ;;  %4687 = vmatpush1.bf16.msra.mxu1 %v6526_v14  ;;  %v6541_v48 = vld [vmem:[%s9215_s5 + $0x138] ss:$12 sps:$4 sm:$0xff]   ;;  %v6553_v14 = vld [vmem:[%s9215_s5 + $0x108] ss:$12 sps:$4 sm:$0xff]  }
 0x246   :  { %v2130_v59 = vpop.f32.mrf.mxu1  ;;  %4650 = vmatpush2.bf16.msra.mxu0 %v6529_v44  ;;  %4688 = vmatprep.subr.bf16.mxu1 %v6534_v45  ;;  %v6558_v45 = vld [vmem:[%s9215_s5 + $0x1b4] ss:$12 sps:$4 sm:$0xff]  }
 0x247   :  { %v2131_v60 = vadd.f32 %v2130_v59, %v8116_v35  ;;  %4651 = vmatprep.subr.bf16.mxu0 %v6537_v43  ;;  %v491_v43 = vrot.slane %v7955_v24, %v7213_v42 }
 0x248   :  { %v8140_v61 = vpop.f32.mrf.mxu1 }
 0x249   :  { %4689 = vmatpush1.bf16.msra.mxu1 %v6532_v49  ;;  %v2184_v22 = vadd.f32 %v2183_v46, %v2131_v60  ;;  %v6561_v49 = vld [vmem:[%s9215_s5 + $0xf4] ss:$12 sps:$4 sm:$0xff]   ;;  %v6556_v46 = vld [vmem:[%s9215_s5 + $0x1b0] ss:$12 sps:$4 sm:$0xff]  }
 0x24a   :  { %v2134_v50 = vpop.f32.mrf.mxu1  ;;  %4652 = vmatpush2.bf16.msra.mxu0 %v6535_v57  ;;  %4690 = vmatprep.subr.bf16.mxu1 %v6540_v58  ;;  %v6559_v57 = vld [vmem:[%s9215_s5 + $0xf0] ss:$12 sps:$4 sm:$0xff]   ;;  %v2023_v58 = vadd.f32 %v7916_v56, %v491_v43 }
 0x24b   :  { %v2135_v26 = vadd.f32 %v2134_v50, %v8116_v35  ;;  %4653 = vmatprep.subr.bf16.mxu0 %v6543_v63  ;;  %v2627_v33 = vmax.f32 %v2184_v22, 0.0  ;;  %v6564_v60 = vld [vmem:[%s9215_s5 + $0x19c] ss:$12 sps:$4 sm:$0xff]   ;;  %v2039_v63 = vadd.f32 %v8091_v19, %v7965_v29  ;;  %v6565_v19 = vld [vmem:[%s9215_s5 + $0xd8] ss:$12 sps:$4 sm:$0xff]  }
 0x24c   :  { %2561 = vmatmul.mubr.bf16.gmra.mxu1 %v7281_v51  ;;  %v6555_v51 = vld [vmem:[%s9215_s5 + $0x10c] ss:$12 sps:$4 sm:$0xff]   ;;  %v8189_v59 = vpop.f32.mrf.mxu1  ;;  %v6567_v56 = vld [vmem:[%s9215_s5 + $0xdc] ss:$12 sps:$4 sm:$0xff]   ;;  %v2076_v50 = vadd.f32 %v7936_v9, %v2023_v58  ;;  %v6585_v58 = vld [vmem:[%s9215_s5 + $0x394] ss:$12 sps:$4 sm:$0xff]  }
 0x24d   :  { %v2188_v31 = vadd.f32 %v2187_v7, %v2135_v26  ;;  %4691 = vmatpush1.bf16.msra.mxu1 %v6538_v38  ;;  %v2027_v38 = vadd.f32 %v7944_v21, %v491_v43  ;;  %v2035_v21 = vadd.f32 %v8056_v25, %v7965_v29  ;;  %v6570_v26 = vld [vmem:[%s9215_s5 + $0x184] ss:$12 sps:$4 sm:$0xff]   ;;  %v6568_v29 = vld [vmem:[%s9215_s5 + $0x180] ss:$12 sps:$4 sm:$0xff]  }
 0x24e   :  { %4654 = vmatpush2.bf16.msra.mxu0 %v6541_v48  ;;  %4692 = vmatprep.subr.bf16.mxu1 %v6546_v52  ;;  %v8197_v48 = vpop.f32.mrf.mxu0  ;;  %v6562_v52 = vld [vmem:[%s9215_s5 + $0x198] ss:$12 sps:$4 sm:$0xff]   ;;  %v8208_v22 = vpop.f32.mrf.mxu1  ;;  %v6571_v7 = vld [vmem:[%s9215_s5 + $0xc0] ss:$12 sps:$4 sm:$0xff]  }
 0x24f   :  { %v2639_v55 = vmax.f32 %v2188_v31, 0.0  ;;  %4655 = vmatprep.subr.bf16.mxu0 %v6549_v28  ;;  %v2092_v28 = vadd.f32 %v8111_v47, %v2039_v63  ;;  %v6573_v25 = vld [vmem:[%s9215_s5 + $0xc4] ss:$12 sps:$4 sm:$0xff]   ;;  %v6576_v31 = vld [vmem:[%s9215_s5 + $0x2ec] ss:$12 sps:$4 sm:$0xff]  }
 0x250   :  { %v8218_v9 = vpop.f32.mrf.mxu0  ;;  %v8230_v47 = vpop.f32.mrf.mxu1 }
 0x251   :  { %4693 = vmatpush1.bf16.msra.mxu1 %v6544_v27  ;;  %v8171_v44 = vpack.c.bf16 %v2639_v55, %v2627_v33  ;;  %v2080_v27 = vadd.f32 %v7973_v2, %v2027_v38  ;;  %v2088_v2 = vadd.f32 %v8070_v8, %v2035_v21  ;;  %v510_v33 = vsub.s32 5, %v7201_v37  ;;  %v6574_v8 = vld [vmem:[%s9215_s5 + $0x2e8] ss:$12 sps:$4 sm:$0xff]  }
 0x252   :  { %4656 = vmatpush2.bf16.msra.mxu0 %v6547_v54  ;;  %4694 = vmatprep.subr.bf16.mxu1 %v6552_v32  ;;  %v2624_v54 = vmax.f32 %v2076_v50, 0.0  ;;  %v6579_v32 = vld [vmem:[%s9215_s5 + $0x3ac] ss:$12 sps:$4 sm:$0xff]  }
 0x253   :  { %4718 = vmatprep.mubr.bf16.mxu1 %v8171_v44  ;;  %4657 = vmatprep.subr.bf16.mxu0 %v6555_v51  ;;  %v2636_v55 = vmax.f32 %v2080_v27, 0.0  ;;  %v2661_v51 = vmax.f32 %v2092_v28, 0.0 }
 0x255   :  { %4695 = vmatpush1.bf16.msra.mxu1 %v6550_v36  ;;  %v2037_v36 = vadd.f32 %v8072_v30, %v491_v43  ;;  %v2649_v30 = vmax.f32 %v2088_v2, 0.0  ;;  %v6586_v2 = vld [vmem:[%s9215_s5 + $0x2b8] ss:$12 sps:$4 sm:$0xff]  }
 0x256   :  { %4658 = vmatpush2.bf16.msra.mxu0 %v6553_v14  ;;  %4696 = vmatprep.subr.bf16.mxu1 %v6558_v45  ;;  %v8240_v14 = vpop.f32.mrf.mxu0  ;;  %v6577_v45 = vld [vmem:[%s9215_s5 + $0x3a8] ss:$12 sps:$4 sm:$0xff]  }
 0x257   :  { %4659 = vmatprep.subr.bf16.mxu0 %v6561_v49  ;;  %v2033_v49 = vadd.f32 %v8040_v1, %v491_v43  ;;  %v2090_v38 = vadd.f32 %v8089_v18, %v2037_v36  ;;  %v6580_v1 = vld [vmem:[%s9215_s5 + $0x2d0] ss:$12 sps:$4 sm:$0xff]  }
 0x258   :  { %v8260_v63 = vpop.f32.mrf.mxu0  ;;  %v6583_v18 = vld [vmem:[%s9215_s5 + $0x390] ss:$12 sps:$4 sm:$0xff]  }
 0x259   :  { %4697 = vmatpush1.bf16.msra.mxu1 %v6556_v46  ;;  %v6582_v46 = vld [vmem:[%s9215_s5 + $0x2d4] ss:$12 sps:$4 sm:$0xff]   ;;  %v2086_v50 = vadd.f32 %v8054_v23, %v2033_v49  ;;  %v2660_v27 = vmax.f32 %v2090_v38, 0.0  ;;  %v6591_v23 = vld [vmem:[%s9215_s5 + $0x37c] ss:$12 sps:$4 sm:$0xff]  }
 0x25a   :  { %4660 = vmatpush2.bf16.msra.mxu0 %v6559_v57  ;;  %4698 = vmatprep.subr.bf16.mxu1 %v6564_v60  ;;  %v8252_v57 = vpop.f32.mrf.mxu1  ;;  %v8257_v60 = vpack.c.bf16 %v2636_v55, %v2624_v54  ;;  %v6597_v36 = vld [vmem:[%s9215_s5 + $0x364] ss:$12 sps:$4 sm:$0xff]   ;;  %v6592_v49 = vld [vmem:[%s9215_s5 + $0x2a0] ss:$12 sps:$4 sm:$0xff]  }
 0x25b   :  { %4661 = vmatprep.subr.bf16.mxu0 %v6567_v56  ;;  %v8267_v56 = vpack.c.bf16 %v2661_v51, %v2649_v30  ;;  %v6595_v30 = vld [vmem:[%s9215_s5 + $0x360] ss:$12 sps:$4 sm:$0xff]  }
 0x25c   :  { %v6603_v38 = vld [vmem:[%s9215_s5 + $0x34c] ss:$12 sps:$4 sm:$0xff]  }
 0x25d   :  { %4699 = vmatpush1.bf16.msra.mxu1 %v6562_v52  ;;  %v8270_v52 = vrot.slane %v7955_v24, %v510_v33 }
 0x25e   :  { %4662 = vmatpush2.bf16.msra.mxu0 %v6565_v19  ;;  %4700 = vmatprep.subr.bf16.mxu1 %v6570_v26  ;;  %v6588_v26 = vld [vmem:[%s9215_s5 + $0x2bc] ss:$12 sps:$4 sm:$0xff]  }
 0x25f   :  { %4663 = vmatprep.subr.bf16.mxu0 %v6573_v25  ;;  %v2648_v25 = vmax.f32 %v2086_v50, 0.0 }
 0x261   :  { %4701 = vmatpush1.bf16.msra.mxu1 %v6568_v29  ;;  %v8300_v55 = vpack.c.bf16 %v2660_v27, %v2648_v25  ;;  %v6606_v27 = vld [vmem:[%s9215_s5 + $0x274] ss:$12 sps:$4 sm:$0xff]  }
 0x262   :  { %4664 = vmatpush2.bf16.msra.mxu0 %v6571_v7  ;;  %4702 = vmatprep.subr.bf16.mxu1 %v6576_v31  ;;  %v6589_v31 = vld [vmem:[%s9215_s5 + $0x378] ss:$12 sps:$4 sm:$0xff]  }
 0x263   :  { %4739 = vmatprep.subr.bf16.mxu0 %v6579_v32  ;;  %v6594_v32 = vld [vmem:[%s9215_s5 + $0x2a4] ss:$12 sps:$4 sm:$0xff]  }
 0x264   :  { %v8265_v43 = vpop.f32.mrf.mxu1 }
 0x265   :  { %v8273_v21 = vpop.f32.mrf.mxu0  ;;  %4666 = vmatmul.mubr.bf16.vlgmr.msra.gmra.mxu0 %v8257_v60  ;;  %4703 = vmatpush2.bf16.msra.mxu1 %v6574_v8 }
 0x266   :  { %v2289_v19 = vpop.f32.mrf.mxu1  ;;  %4675 = vmatprep.mubr.bf16.mxu0 %v8267_v56  ;;  %4740 = vmatpush1.bf16.msra.mxu0 %v6577_v45 }
 0x267   :  { %v2236_v28 = vpop.f32.mrf.mxu0  ;;  %4704 = vmatprep.subr.bf16.mxu1 %v6582_v46  ;;  %4741 = vmatprep.subr.bf16.mxu0 %v6585_v58  ;;  %v6600_v58 = vld [vmem:[%s9215_s5 + $0x28c] ss:$12 sps:$4 sm:$0xff]  }
 0x268   :  { %v2237_v29 = vadd.f32 %v2236_v28, %v8270_v52  ;;  %v8287_v7 = vpop.f32.mrf.mxu1  ;;  %v6609_v28 = vld [vmem:[%s9215_s5 + $0x334] ss:$12 sps:$4 sm:$0xff]  }
 0x269   :  { %v8289_v54 = vpop.f32.mrf.mxu0  ;;  %4705 = vmatpush2.bf16.msra.mxu1 %v6580_v1 }
 0x26a   :  { %4742 = vmatpush1.bf16.msra.mxu0 %v6583_v18  ;;  %4706 = vmatprep.subr.bf16.mxu1 %v6588_v26  ;;  %v2290_v51 = vadd.f32 %v2289_v19, %v2237_v29  ;;  %v2293_v45 = vpop.f32.mrf.mxu1  ;;  %v6598_v18 = vld [vmem:[%s9215_s5 + $0x288] ss:$12 sps:$4 sm:$0xff]   ;;  %v6604_v29 = vld [vmem:[%s9215_s5 + $0x270] ss:$12 sps:$4 sm:$0xff]  }
 0x26b   :  { %v2240_v33 = vpop.f32.mrf.mxu0  ;;  %4743 = vmatprep.subr.bf16.mxu0 %v6591_v23  ;;  %v6601_v26 = vld [vmem:[%s9215_s5 + $0x348] ss:$12 sps:$4 sm:$0xff]   ;;  %v499_v23 = vrot.slane %v7955_v24, %v7210_v41  ;;  %v2145_v24 = vadd.f32 %v8252_v57, %v8116_v35  ;;  %v6613_v57 = vld [vmem:[%s9215_s5 + $0x318] ss:$12 sps:$4 sm:$0xff]  }
 0x26c   :  { %v2241_v8 = vadd.f32 %v2240_v33, %v8270_v52  ;;  %v2629_v1 = vmax.f32 %v2290_v51, 0.0  ;;  %v2141_v33 = vadd.f32 %v8208_v22, %v8116_v35  ;;  %v6621_v35 = vld [vmem:[%s9215_s5 + $0x304] ss:$12 sps:$4 sm:$0xff]  }
 0x26d   :  { %4676 = vmatmul.mubr.bf16.gmra.mxu0 %v8300_v55  ;;  %4707 = vmatpush2.bf16.msra.mxu1 %v6586_v2  ;;  %v2133_v25 = vadd.f32 %v8140_v61, %v499_v23  ;;  %v6607_v2 = vld [vmem:[%s9215_s5 + $0x330] ss:$12 sps:$4 sm:$0xff]   ;;  %v2129_v61 = vadd.f32 %v8121_v62, %v499_v23 }
 0x26e   :  { %v2294_v46 = vadd.f32 %v2293_v45, %v2241_v8  ;;  %4744 = vmatpush1.bf16.msra.mxu0 %v6589_v31  ;;  %4708 = vmatprep.subr.bf16.mxu1 %v6594_v32  ;;  %v6612_v31 = vld [vmem:[%s9215_s5 + $0x25c] ss:$12 sps:$4 sm:$0xff]   ;;  %v6618_v62 = vld [vmem:[%s9215_s5 + $0x244] ss:$12 sps:$4 sm:$0xff]   ;;  %v2198_v8 = vadd.f32 %v8260_v63, %v2145_v24  ;;  %v6616_v45 = vld [vmem:[%s9215_s5 + $0x240] ss:$12 sps:$4 sm:$0xff]   ;;  %v8416_v24 = vpop.f32.mrf.mxu0 }
 0x26f   :  { %4745 = vmatprep.subr.bf16.mxu0 %v6597_v36  ;;  %v6615_v32 = vld [vmem:[%s9215_s5 + $0x31c] ss:$12 sps:$4 sm:$0xff]   ;;  %v6610_v36 = vld [vmem:[%s9215_s5 + $0x258] ss:$12 sps:$4 sm:$0xff]   ;;  %v2186_v51 = vadd.f32 %v8138_v0, %v2133_v25  ;;  %v2182_v22 = vadd.f32 %v8100_v40, %v2129_v61  ;;  %v2194_v0 = vadd.f32 %v8218_v9, %v2141_v33  ;;  %v6619_v63 = vld [vmem:[%s9215_s5 + $0x300] ss:$12 sps:$4 sm:$0xff]  }
 0x270   :  { %v2641_v50 = vmax.f32 %v2294_v46, 0.0  ;;  %v2143_v46 = vadd.f32 %v8230_v47, %v499_v23  ;;  %v6624_v40 = vld [vmem:[%s9215_s5 + $0x52c] ss:$12 sps:$4 sm:$0xff]   ;;  %v6631_v25 = vld [vmem:[%s9215_s5 + $0x450] ss:$12 sps:$4 sm:$0xff]  }
 0x271   :  { %4709 = vmatpush2.bf16.msra.mxu1 %v6592_v49  ;;  %v2638_v49 = vmax.f32 %v2186_v51, 0.0  ;;  %v6627_v9 = vld [vmem:[%s9215_s5 + $0x46c] ss:$12 sps:$4 sm:$0xff]   ;;  %v2651_v47 = vmax.f32 %v2194_v0, 0.0  ;;  %v6645_v51 = vld [vmem:[%s9215_s5 + $0x424] ss:$12 sps:$4 sm:$0xff]  }
 0x272   :  { %4746 = vmatpush1.bf16.msra.mxu0 %v6595_v30  ;;  %4710 = vmatprep.subr.bf16.mxu1 %v6600_v58  ;;  %v8322_v19 = vpack.c.bf16 %v2641_v50, %v2629_v1  ;;  %v2663_v30 = vmax.f32 %v2198_v8, 0.0  ;;  %v2626_v58 = vmax.f32 %v2182_v22, 0.0  ;;  %v6622_v1 = vld [vmem:[%s9215_s5 + $0x528] ss:$12 sps:$4 sm:$0xff]   ;;  %v6637_v33 = vld [vmem:[%s9215_s5 + $0x438] ss:$12 sps:$4 sm:$0xff]   ;;  %v8442_v22 = vpop.f32.mrf.mxu1 }
 0x273   :  { %4747 = vmatprep.subr.bf16.mxu0 %v6603_v38  ;;  %v2139_v38 = vadd.f32 %v8189_v59, %v499_v23  ;;  %v6630_v59 = vld [vmem:[%s9215_s5 + $0x514] ss:$12 sps:$4 sm:$0xff]   ;;  %v6651_v0 = vld [vmem:[%s9215_s5 + $0x40c] ss:$12 sps:$4 sm:$0xff]  }
 0x274   :  { %4771 = vmatprep.mubr.bf16.mxu0 %v8322_v19  ;;  %v8387_v50 = vpack.c.bf16 %v2638_v49, %v2626_v58  ;;  %v6643_v8 = vld [vmem:[%s9215_s5 + $0x420] ss:$12 sps:$4 sm:$0xff]  }
 0x275   :  { %4711 = vmatpush2.bf16.msra.mxu1 %v6598_v18  ;;  %v2196_v18 = vadd.f32 %v8240_v14, %v2143_v46  ;;  %v2192_v23 = vadd.f32 %v8197_v48, %v2139_v38  ;;  %v6628_v14 = vld [vmem:[%s9215_s5 + $0x510] ss:$12 sps:$4 sm:$0xff]   ;;  %v6646_v46 = vld [vmem:[%s9215_s5 + $0x4c8] ss:$12 sps:$4 sm:$0xff]   ;;  %v8463_v58 = vld [vmem:[%s9216_s4] sm:$0xff] }
 0x276   :  { %4748 = vmatpush1.bf16.msra.mxu0 %v6601_v26  ;;  %4712 = vmatprep.subr.bf16.mxu1 %v6606_v27  ;;  %v6625_v26 = vld [vmem:[%s9215_s5 + $0x468] ss:$12 sps:$4 sm:$0xff]   ;;  %v8396_v27 = vpack.c.bf16 %v2663_v30, %v2651_v47  ;;  %v2299_v30 = vpop.f32.mrf.mxu1 }
 0x277   :  { %4749 = vmatprep.subr.bf16.mxu0 %v6609_v28  ;;  %v6633_v28 = vld [vmem:[%s9215_s5 + $0x454] ss:$12 sps:$4 sm:$0xff]   ;;  %v6636_v48 = vld [vmem:[%s9215_s5 + $0x4fc] ss:$12 sps:$4 sm:$0xff]  }
 0x279   :  { %4713 = vmatpush2.bf16.msra.mxu1 %v6604_v29  ;;  %v2662_v29 = vmax.f32 %v2196_v18, 0.0  ;;  %v6655_v18 = vld [vmem:[%s9215_s5 + $0x3f0] ss:$12 sps:$4 sm:$0xff]  }
 0x27a   :  { %4750 = vmatpush1.bf16.msra.mxu0 %v6607_v2  ;;  %4714 = vmatprep.subr.bf16.mxu1 %v6612_v31  ;;  %v6639_v2 = vld [vmem:[%s9215_s5 + $0x43c] ss:$12 sps:$4 sm:$0xff]   ;;  %v2650_v31 = vmax.f32 %v2192_v23, 0.0 }
 0x27b   :  { %4751 = vmatprep.subr.bf16.mxu0 %v6615_v32  ;;  %v6634_v32 = vld [vmem:[%s9215_s5 + $0x4f8] ss:$12 sps:$4 sm:$0xff]   ;;  %v6663_v23 = vld [vmem:[%s9215_s5 + $0x3dc] ss:$12 sps:$4 sm:$0xff]  }
 0x27c   :  { %v8421_v61 = vpack.c.bf16 %v2662_v29, %v2650_v31 }
 0x27d   :  { %4715 = vmatpush2.bf16.msra.mxu1 %v6610_v36  ;;  %v6642_v36 = vld [vmem:[%s9215_s5 + $0x4e4] ss:$12 sps:$4 sm:$0xff]  }
 0x27e   :  { %4752 = vmatpush1.bf16.msra.mxu0 %v6613_v57  ;;  %4716 = vmatprep.subr.bf16.mxu1 %v6618_v62  ;;  %v2246_v57 = vpop.f32.mrf.mxu0  ;;  %v6640_v62 = vld [vmem:[%s9215_s5 + $0x4e0] ss:$12 sps:$4 sm:$0xff]  }
 0x27f   :  { %4753 = vmatprep.subr.bf16.mxu0 %v6621_v35  ;;  %v6648_v35 = vld [vmem:[%s9215_s5 + $0x4cc] ss:$12 sps:$4 sm:$0xff]  }
 0x280   :  { %v2248_v49 = vpop.f32.mrf.mxu0 }
 0x281   :  { %4717 = vmatpush2.bf16.msra.mxu1 %v6616_v45  ;;  %v506_v45 = vsub.s32 4, %v7201_v37 }
 0x282   :  { %4754 = vmatpush1.bf16.msra.mxu0 %v6619_v63  ;;  %4792 = vmatprep.subr.bf16.mxu1 %v6624_v40  ;;  %v6649_v63 = vld [vmem:[%s9215_s5 + $0x408] ss:$12 sps:$4 sm:$0xff]   ;;  %v2250_v47 = vpop.f32.mrf.mxu0 }
 0x283   :  { %4755 = vmatprep.subr.bf16.mxu0 %v6627_v9  ;;  %v6654_v40 = vld [vmem:[%s9215_s5 + $0x4b4] ss:$12 sps:$4 sm:$0xff]   ;;  %v507_v38 = vrot.slane %v8463_v58, %v506_v45 }
 0x284   :  { %4719 = vmatmul.mubr.bf16.vlgmr.msra.gmra.mxu1 %v8387_v50  ;;  %v6657_v9 = vld [vmem:[%s9215_s5 + $0x3f4] ss:$12 sps:$4 sm:$0xff]  }
 0x285   :  { %4728 = vmatprep.mubr.bf16.mxu1 %v8396_v27  ;;  %4793 = vmatpush1.bf16.msra.mxu1 %v6622_v1  ;;  %v6652_v1 = vld [vmem:[%s9215_s5 + $0x4b0] ss:$12 sps:$4 sm:$0xff]   ;;  %v2235_v29 = vadd.f32 %v8273_v21, %v507_v38 }
 0x286   :  { %4756 = vmatpush2.bf16.msra.mxu0 %v6625_v26  ;;  %4794 = vmatprep.subr.bf16.mxu1 %v6630_v59  ;;  %v6660_v26 = vld [vmem:[%s9215_s5 + $0x49c] ss:$12 sps:$4 sm:$0xff]   ;;  %v2239_v59 = vadd.f32 %v8289_v54, %v507_v38  ;;  %v6661_v54 = vld [vmem:[%s9215_s5 + $0x3d8] ss:$12 sps:$4 sm:$0xff]  }
 0x287   :  { %4757 = vmatprep.subr.bf16.mxu0 %v6633_v28  ;;  %v2301_v28 = vpop.f32.mrf.mxu1 }
 0x288   :  { %v2292_v31 = vadd.f32 %v8287_v7, %v2239_v59  ;;  %v6667_v7 = vld [vmem:[%s9215_s5 + $0x3c0] ss:$12 sps:$4 sm:$0xff]  }
 0x289   :  { %4795 = vmatpush1.bf16.msra.mxu1 %v6628_v14  ;;  %v2251_v14 = vadd.f32 %v2250_v47, %v8270_v52  ;;  %v2303_v21 = vpop.f32.mrf.mxu1 }
 0x28a   :  { %4758 = vmatpush2.bf16.msra.mxu0 %v6631_v25  ;;  %4796 = vmatprep.subr.bf16.mxu1 %v6636_v48  ;;  %v6658_v25 = vld [vmem:[%s9215_s5 + $0x498] ss:$12 sps:$4 sm:$0xff]   ;;  %v2247_v48 = vadd.f32 %v2246_v57, %v8270_v52  ;;  %v2288_v52 = vadd.f32 %v8265_v43, %v2235_v29  ;;  %v8499_v57 = vpop.f32.mrf.mxu0  ;;  %v2249_v43 = vadd.f32 %v2248_v49, %v507_v38  ;;  %v6673_v49 = vld [vmem:[%s9215_s5 + $0x6a8] ss:$12 sps:$4 sm:$0xff]  }
 0x28b   :  { %4759 = vmatprep.subr.bf16.mxu0 %v6639_v2  ;;  %v6666_v2 = vld [vmem:[%s9215_s5 + $0x484] ss:$12 sps:$4 sm:$0xff]  }
 0x28c   :  { %4729 = vmatmul.mubr.bf16.gmra.mxu1 %v8421_v61 }
 0x28d   :  { %4797 = vmatpush1.bf16.msra.mxu1 %v6634_v32  ;;  %v6669_v32 = vld [vmem:[%s9215_s5 + $0x3c4] ss:$12 sps:$4 sm:$0xff]  }
 0x28e   :  { %4760 = vmatpush2.bf16.msra.mxu0 %v6637_v33  ;;  %4798 = vmatprep.subr.bf16.mxu1 %v6642_v36  ;;  %v2304_v33 = vadd.f32 %v2303_v21, %v2251_v14  ;;  %v6664_v36 = vld [vmem:[%s9215_s5 + $0x480] ss:$12 sps:$4 sm:$0xff]  }
 0x28f   :  { %4761 = vmatprep.subr.bf16.mxu0 %v6645_v51  ;;  %v2300_v51 = vadd.f32 %v2299_v30, %v2247_v48 }
 0x290   :  { %v2665_v45 = vmax.f32 %v2304_v33, 0.0 }
 0x291   :  { %4799 = vmatpush1.bf16.msra.mxu1 %v6640_v62  ;;  %v6672_v62 = vld [vmem:[%s9215_s5 + $0x5ec] ss:$12 sps:$4 sm:$0xff]   ;;  %v2653_v30 = vmax.f32 %v2300_v51, 0.0  ;;  %v6690_v51 = vld [vmem:[%s9215_s5 + $0x5a4] ss:$12 sps:$4 sm:$0xff]  }
 0x292   :  { %4762 = vmatpush2.bf16.msra.mxu0 %v6643_v8  ;;  %4800 = vmatprep.subr.bf16.mxu1 %v6648_v35  ;;  %v2640_v8 = vmax.f32 %v2292_v31, 0.0  ;;  %v6675_v35 = vld [vmem:[%s9215_s5 + $0x6ac] ss:$12 sps:$4 sm:$0xff]  }
 0x293   :  { %4763 = vmatprep.subr.bf16.mxu0 %v6651_v0  ;;  %v518_v0 = vsub.s32 7, %v7201_v37  ;;  %v8531_v59 = vpack.c.bf16 %v2665_v45, %v2653_v30  ;;  %v6688_v45 = vld [vmem:[%s9215_s5 + $0x5a0] ss:$12 sps:$4 sm:$0xff]  }
 0x294   :  { %v6696_v30 = vld [vmem:[%s9215_s5 + $0x58c] ss:$12 sps:$4 sm:$0xff]  }
 0x295   :  { %4801 = vmatpush1.bf16.msra.mxu1 %v6646_v46  ;;  %v2628_v46 = vmax.f32 %v2288_v52, 0.0 }
 0x296   :  { %4764 = vmatpush2.bf16.msra.mxu0 %v6649_v63  ;;  %4802 = vmatprep.subr.bf16.mxu1 %v6654_v40  ;;  %v2245_v63 = vadd.f32 %v8416_v24, %v507_v38  ;;  %v6670_v40 = vld [vmem:[%s9215_s5 + $0x5e8] ss:$12 sps:$4 sm:$0xff]  }
 0x297   :  { %4765 = vmatprep.subr.bf16.mxu0 %v6657_v9  ;;  %v2395_v9 = vpop.f32.mrf.mxu0  ;;  %v8518_v47 = vpack.c.bf16 %v2640_v8, %v2628_v46  ;;  %v6678_v24 = vld [vmem:[%s9215_s5 + $0x5d4] ss:$12 sps:$4 sm:$0xff]  }
 0x298   :  { %v6681_v38 = vld [vmem:[%s9215_s5 + $0x694] ss:$12 sps:$4 sm:$0xff]  }
 0x299   :  { %4803 = vmatpush1.bf16.msra.mxu1 %v6652_v1  ;;  %v2302_v1 = vadd.f32 %v2301_v28, %v2249_v43  ;;  %v6676_v28 = vld [vmem:[%s9215_s5 + $0x5d0] ss:$12 sps:$4 sm:$0xff]   ;;  %v8538_v14 = vpop.f32.mrf.mxu0 }
 0x29a   :  { %4766 = vmatpush2.bf16.msra.mxu0 %v6655_v18  ;;  %4804 = vmatprep.subr.bf16.mxu1 %v6660_v26  ;;  %v8521_v18 = vrot.slane %v8463_v58, %v518_v0  ;;  %v6693_v43 = vld [vmem:[%s9215_s5 + $0x664] ss:$12 sps:$4 sm:$0xff]  }
 0x29b   :  { %4767 = vmatprep.subr.bf16.mxu0 %v6663_v23  ;;  %v2298_v23 = vadd.f32 %v8442_v22, %v2245_v63  ;;  %v6684_v22 = vld [vmem:[%s9215_s5 + $0x5bc] ss:$12 sps:$4 sm:$0xff]   ;;  %v2664_v48 = vmax.f32 %v2302_v1, 0.0  ;;  %v2399_v33 = vpop.f32.mrf.mxu0  ;;  %v6699_v1 = vld [vmem:[%s9215_s5 + $0x64c] ss:$12 sps:$4 sm:$0xff]  }
 0x29d   :  { %4805 = vmatpush1.bf16.msra.mxu1 %v6658_v25  ;;  %v6679_v25 = vld [vmem:[%s9215_s5 + $0x690] ss:$12 sps:$4 sm:$0xff]   ;;  %v2652_v21 = vmax.f32 %v2298_v23, 0.0  ;;  %v8572_v46 = vpop.f32.mrf.mxu0 }
 0x29e   :  { %4768 = vmatpush2.bf16.msra.mxu0 %v6661_v54  ;;  %4806 = vmatprep.subr.bf16.mxu1 %v6666_v2  ;;  %v6687_v2 = vld [vmem:[%s9215_s5 + $0x67c] ss:$12 sps:$4 sm:$0xff]  }
 0x29f   :  { %4769 = vmatprep.subr.bf16.mxu0 %v6669_v32  ;;  %v6682_v32 = vld [vmem:[%s9215_s5 + $0x5b8] ss:$12 sps:$4 sm:$0xff]   ;;  %v8561_v8 = vpack.c.bf16 %v2664_v48, %v2652_v21  ;;  %v6705_v48 = vld [vmem:[%s9215_s5 + $0x634] ss:$12 sps:$4 sm:$0xff]   ;;  %v6700_v21 = vld [vmem:[%s9215_s5 + $0x570] ss:$12 sps:$4 sm:$0xff]  }
 0x2a1   :  { %4807 = vmatpush1.bf16.msra.mxu1 %v6664_v36  ;;  %v6685_v36 = vld [vmem:[%s9215_s5 + $0x678] ss:$12 sps:$4 sm:$0xff]  }
 0x2a2   :  { %4770 = vmatpush2.bf16.msra.mxu0 %v6667_v7  ;;  %4808 = vmatprep.subr.bf16.mxu1 %v6672_v62 }
 0x2a3   :  { %4845 = vmatprep.subr.bf16.mxu0 %v6675_v35 }
 0x2a4   :  { %v8529_v26 = vpop.f32.mrf.mxu1 }
 0x2a5   :  { %4772 = vmatmul.mubr.bf16.vlgmr.msra.gmra.mxu0 %v8518_v47  ;;  %4809 = vmatpush2.bf16.msra.mxu1 %v6670_v40  ;;  %v6691_v40 = vld [vmem:[%s9215_s5 + $0x660] ss:$12 sps:$4 sm:$0xff]  }
 0x2a6   :  { %v2342_v29 = vpop.f32.mrf.mxu1  ;;  %4781 = vmatprep.mubr.bf16.mxu0 %v8531_v59  ;;  %4846 = vmatpush1.bf16.msra.mxu0 %v6673_v49 }
 0x2a7   :  { %v2343_v54 = vadd.f32 %v2342_v29, %v8521_v18  ;;  %4810 = vmatprep.subr.bf16.mxu1 %v6678_v24  ;;  %4847 = vmatprep.subr.bf16.mxu0 %v6681_v38  ;;  %v514_v24 = vsub.s32 6, %v7201_v37  ;;  %v2405_v29 = vpop.f32.mrf.mxu0  ;;  %v6803_v37 = vld [vmem:[%s9215_s5 + $0x398] ss:$12 sps:$4 sm:$0xff]  }
 0x2a8   :  { %v2344_v31 = vpop.f32.mrf.mxu1 }
 0x2a9   :  { %4811 = vmatpush2.bf16.msra.mxu1 %v6676_v28  ;;  %v2396_v7 = vadd.f32 %v2395_v9, %v2343_v54  ;;  %v6694_v28 = vld [vmem:[%s9215_s5 + $0x588] ss:$12 sps:$4 sm:$0xff]   ;;  %v515_v54 = vrot.slane %v8463_v58, %v514_v24  ;;  %v6732_v24 = vld [vmem:[%s9215_s5 + $0x82c] ss:$12 sps:$4 sm:$0xff]  }
 0x2aa   :  { %v2346_v52 = vpop.f32.mrf.mxu1  ;;  %4848 = vmatpush1.bf16.msra.mxu0 %v6679_v25  ;;  %4812 = vmatprep.subr.bf16.mxu1 %v6684_v22  ;;  %v6697_v25 = vld [vmem:[%s9215_s5 + $0x648] ss:$12 sps:$4 sm:$0xff]  }
 0x2ab   :  { %v2347_v62 = vadd.f32 %v2346_v52, %v8521_v18  ;;  %4849 = vmatprep.subr.bf16.mxu0 %v6687_v2  ;;  %v2631_v9 = vmax.f32 %v2396_v7, 0.0  ;;  %v6702_v22 = vld [vmem:[%s9215_s5 + $0x574] ss:$12 sps:$4 sm:$0xff]   ;;  %v6703_v52 = vld [vmem:[%s9215_s5 + $0x630] ss:$12 sps:$4 sm:$0xff]   ;;  %v2341_v7 = vadd.f32 %v8529_v26, %v515_v54 }
 0x2ac   :  { %v8566_v35 = vpop.f32.mrf.mxu1  ;;  %v6714_v26 = vld [vmem:[%s9215_s5 + $0x544] ss:$12 sps:$4 sm:$0xff]  }
 0x2ad   :  { %v2400_v0 = vadd.f32 %v2399_v33, %v2347_v62  ;;  %4782 = vmatmul.mubr.bf16.gmra.mxu0 %v8561_v8  ;;  %4813 = vmatpush2.bf16.msra.mxu1 %v6682_v32  ;;  %v2407_v32 = vpop.f32.mrf.mxu0  ;;  %v2345_v33 = vadd.f32 %v2344_v31, %v515_v54  ;;  %v6706_v62 = vld [vmem:[%s9215_s5 + $0x558] ss:$12 sps:$4 sm:$0xff]  }
 0x2ae   :  { %v2352_v63 = vpop.f32.mrf.mxu1  ;;  %4850 = vmatpush1.bf16.msra.mxu0 %v6685_v36  ;;  %4814 = vmatprep.subr.bf16.mxu1 %v6690_v51  ;;  %v6708_v36 = vld [vmem:[%s9215_s5 + $0x55c] ss:$12 sps:$4 sm:$0xff]  }
 0x2af   :  { %v2643_v49 = vmax.f32 %v2400_v0, 0.0  ;;  %4851 = vmatprep.subr.bf16.mxu0 %v6693_v43  ;;  %v6711_v51 = vld [vmem:[%s9215_s5 + $0x61c] ss:$12 sps:$4 sm:$0xff]   ;;  %v2353_v31 = vadd.f32 %v2352_v63, %v8521_v18  ;;  %v2409_v43 = vpop.f32.mrf.mxu0  ;;  %v2398_v0 = vadd.f32 %v8538_v14, %v2345_v33  ;;  %v2394_v63 = vadd.f32 %v8499_v57, %v2341_v7  ;;  %v6712_v14 = vld [vmem:[%s9215_s5 + $0x540] ss:$12 sps:$4 sm:$0xff]  }
 0x2b0   :  { %v2354_v38 = vpop.f32.mrf.mxu1  ;;  %v6720_v57 = vld [vmem:[%s9215_s5 + $0x76c] ss:$12 sps:$4 sm:$0xff]   ;;  %v6738_v33 = vld [vmem:[%s9215_s5 + $0x814] ss:$12 sps:$4 sm:$0xff]   ;;  %v6736_v7 = vld [vmem:[%s9215_s5 + $0x810] ss:$12 sps:$4 sm:$0xff]  }
 0x2b1   :  { %4815 = vmatpush2.bf16.msra.mxu1 %v6688_v45  ;;  %v8584_v23 = vpack.c.bf16 %v2643_v49, %v2631_v9  ;;  %v6709_v45 = vld [vmem:[%s9215_s5 + $0x618] ss:$12 sps:$4 sm:$0xff]   ;;  %v2642_v9 = vmax.f32 %v2398_v0, 0.0  ;;  %v2355_v49 = vadd.f32 %v2354_v38, %v515_v54 }
 0x2b2   :  { %4852 = vmatpush1.bf16.msra.mxu0 %v6691_v40  ;;  %4816 = vmatprep.subr.bf16.mxu1 %v6696_v30  ;;  %v2356_v2 = vpop.f32.mrf.mxu1  ;;  %v2406_v30 = vadd.f32 %v2405_v29, %v2353_v31  ;;  %v2630_v29 = vmax.f32 %v2394_v63, 0.0 }
 0x2b3   :  { %4824 = vmatprep.mubr.bf16.mxu1 %v8584_v23  ;;  %4853 = vmatprep.subr.bf16.mxu0 %v6699_v1  ;;  %v2357_v58 = vadd.f32 %v2356_v2, %v8521_v18  ;;  %v6717_v18 = vld [vmem:[%s9215_s5 + $0x604] ss:$12 sps:$4 sm:$0xff]   ;;  %v6715_v1 = vld [vmem:[%s9215_s5 + $0x600] ss:$12 sps:$4 sm:$0xff]   ;;  %v2408_v2 = vadd.f32 %v2407_v32, %v2355_v49 }
 0x2b4   :  { %v2655_v38 = vmax.f32 %v2406_v30, 0.0  ;;  %v6723_v32 = vld [vmem:[%s9215_s5 + $0x754] ss:$12 sps:$4 sm:$0xff]   ;;  %v6742_v30 = vld [vmem:[%s9215_s5 + $0x7f8] ss:$12 sps:$4 sm:$0xff]  }
 0x2b5   :  { %4817 = vmatpush2.bf16.msra.mxu1 %v6694_v28  ;;  %v2410_v40 = vadd.f32 %v2409_v43, %v2357_v58  ;;  %v2666_v31 = vmax.f32 %v2408_v2, 0.0  ;;  %v6744_v43 = vld [vmem:[%s9215_s5 + $0x7fc] ss:$12 sps:$4 sm:$0xff]   ;;  %v6750_v49 = vld [vmem:[%s9215_s5 + $0x7e4] ss:$12 sps:$4 sm:$0xff]  }
 0x2b6   :  { %4854 = vmatpush1.bf16.msra.mxu0 %v6697_v25  ;;  %4818 = vmatprep.subr.bf16.mxu1 %v6702_v22  ;;  %v2351_v25 = vadd.f32 %v8566_v35, %v515_v54  ;;  %v6730_v22 = vld [vmem:[%s9215_s5 + $0x828] ss:$12 sps:$4 sm:$0xff]   ;;  %v6727_v2 = vld [vmem:[%s9215_s5 + $0x720] ss:$12 sps:$4 sm:$0xff]  }
 0x2b7   :  { %4855 = vmatprep.subr.bf16.mxu0 %v6705_v48  ;;  %v2667_v28 = vmax.f32 %v2410_v40, 0.0  ;;  %v8645_v48 = vpack.c.bf16 %v2642_v9, %v2630_v29  ;;  %v8656_v35 = vld [vmem:[%s9216_s4 + $0x8] sm:$0xf]  ;;  %v6724_v9 = vld [vmem:[%s9215_s5 + $0x738] ss:$12 sps:$4 sm:$0xff]  }
 0x2b8   :  { %v8669_v58 = vrot.slane %v8656_v35, %v7204_v39 }
 0x2b9   :  { %4819 = vmatpush2.bf16.msra.mxu1 %v6700_v21  ;;  %v6718_v21 = vld [vmem:[%s9215_s5 + $0x768] ss:$12 sps:$4 sm:$0xff]   ;;  %v8658_v54 = vpack.c.bf16 %v2667_v28, %v2655_v38  ;;  %v6729_v28 = vld [vmem:[%s9215_s5 + $0x724] ss:$12 sps:$4 sm:$0xff]   ;;  %v6748_v38 = vld [vmem:[%s9215_s5 + $0x7e0] ss:$12 sps:$4 sm:$0xff]  }
 0x2ba   :  { %4856 = vmatpush1.bf16.msra.mxu0 %v6703_v52  ;;  %4820 = vmatprep.subr.bf16.mxu1 %v6708_v36  ;;  %v2404_v52 = vadd.f32 %v8572_v46, %v2351_v25  ;;  %v6721_v46 = vld [vmem:[%s9215_s5 + $0x750] ss:$12 sps:$4 sm:$0xff]  }
 0x2bb   :  { %4857 = vmatprep.subr.bf16.mxu0 %v6711_v51 }
 0x2bd   :  { %4821 = vmatpush2.bf16.msra.mxu1 %v6706_v62 }
 0x2be   :  { %4858 = vmatpush1.bf16.msra.mxu0 %v6709_v45  ;;  %4822 = vmatprep.subr.bf16.mxu1 %v6714_v26  ;;  %v6726_v45 = vld [vmem:[%s9215_s5 + $0x73c] ss:$12 sps:$4 sm:$0xff]   ;;  %v2654_v26 = vmax.f32 %v2404_v52, 0.0  ;;  %v6735_v52 = vld [vmem:[%s9215_s5 + $0x70c] ss:$12 sps:$4 sm:$0xff]  }
 0x2bf   :  { %4859 = vmatprep.subr.bf16.mxu0 %v6717_v18 }
 0x2c1   :  { %4823 = vmatpush2.bf16.msra.mxu1 %v6712_v14  ;;  %v8692_v14 = vpack.c.bf16 %v2666_v31, %v2654_v26 }
 0x2c2   :  { %4860 = vmatpush1.bf16.msra.mxu0 %v6715_v1  ;;  %4898 = vmatprep.subr.bf16.mxu1 %v6732_v24 }
 0x2c3   :  { %4861 = vmatprep.subr.bf16.mxu0 %v6720_v57 }
 0x2c4   :  { %v8664_v36 = vpop.f32.mrf.mxu1  ;;  %4825 = vmatmul.mubr.bf16.vlgmr.msra.gmra.mxu1 %v8645_v48 }
 0x2c5   :  { %v8671_v51 = vpop.f32.mrf.mxu0  ;;  %4834 = vmatprep.mubr.bf16.mxu1 %v8658_v54  ;;  %4899 = vmatpush1.bf16.msra.mxu1 %v6730_v22 }
 0x2c6   :  { %v2501_v62 = vpop.f32.mrf.mxu1  ;;  %4862 = vmatpush2.bf16.msra.mxu0 %v6718_v21  ;;  %4900 = vmatprep.subr.bf16.mxu1 %v6738_v33  ;;  %v6756_v21 = vld [vmem:[%s9215_s5 + $0x7cc] ss:$12 sps:$4 sm:$0xff]  }
 0x2c7   :  { %v2448_v0 = vpop.f32.mrf.mxu0  ;;  %4863 = vmatprep.subr.bf16.mxu0 %v6723_v32 }
 0x2c8   :  { %v2449_v40 = vadd.f32 %v2448_v0, %v8669_v58  ;;  %v8687_v18 = vpop.f32.mrf.mxu1  ;;  %v6733_v0 = vld [vmem:[%s9215_s5 + $0x708] ss:$12 sps:$4 sm:$0xff]  }
 0x2c9   :  { %v2450_v63 = vpop.f32.mrf.mxu0  ;;  %4901 = vmatpush1.bf16.msra.mxu1 %v6736_v7 }
 0x2ca   :  { %4864 = vmatpush2.bf16.msra.mxu0 %v6721_v46  ;;  %4902 = vmatprep.subr.bf16.mxu1 %v6744_v43  ;;  %v2505_v1 = vpop.f32.mrf.mxu1  ;;  %v2502_v57 = vadd.f32 %v2501_v62, %v2449_v40  ;;  %v6754_v46 = vld [vmem:[%s9215_s5 + $0x7c8] ss:$12 sps:$4 sm:$0xff]  }
 0x2cb   :  { %v2452_v24 = vpop.f32.mrf.mxu0  ;;  %4865 = vmatprep.subr.bf16.mxu0 %v6726_v45  ;;  %v6761_v45 = vld [vmem:[%s9215_s5 + $0x7b4] ss:$12 sps:$4 sm:$0xff]  }
 0x2cc   :  { %v2453_v29 = vadd.f32 %v2452_v24, %v8669_v58  ;;  %4835 = vmatmul.mubr.bf16.gmra.mxu1 %v8692_v14  ;;  %v8716_v33 = vpop.f32.mrf.mxu1  ;;  %v2633_v7 = vmax.f32 %v2502_v57, 0.0  ;;  %v6741_v40 = vld [vmem:[%s9215_s5 + $0x6f4] ss:$12 sps:$4 sm:$0xff]   ;;  %v6766_v24 = vld [vmem:[%s9215_s5 + $0x79c] ss:$12 sps:$4 sm:$0xff]  }
 0x2cd   :  { %v8705_v25 = vpop.f32.mrf.mxu0  ;;  %4903 = vmatpush1.bf16.msra.mxu1 %v6742_v30  ;;  %v523_v30 = vrot.slane %v8656_v35, %v7213_v42 }
 0x2ce   :  { %v2506_v22 = vadd.f32 %v2505_v1, %v2453_v29  ;;  %4866 = vmatpush2.bf16.msra.mxu0 %v6724_v9  ;;  %4904 = vmatprep.subr.bf16.mxu1 %v6750_v49  ;;  %v2511_v26 = vpop.f32.mrf.mxu1  ;;  %v6759_v49 = vld [vmem:[%s9215_s5 + $0x7b0] ss:$12 sps:$4 sm:$0xff]  }
 0x2cf   :  { %v2458_v32 = vpop.f32.mrf.mxu0  ;;  %4867 = vmatprep.subr.bf16.mxu0 %v6729_v28  ;;  %v6739_v1 = vld [vmem:[%s9215_s5 + $0x6f0] ss:$12 sps:$4 sm:$0xff]   ;;  %v2451_v28 = vadd.f32 %v2450_v63, %v523_v30  ;;  %v6745_v63 = vld [vmem:[%s9215_s5 + $0x6d8] ss:$12 sps:$4 sm:$0xff]  }
 0x2d0   :  { %v2645_v31 = vmax.f32 %v2506_v22, 0.0  ;;  %v2513_v57 = vpop.f32.mrf.mxu1  ;;  %v6747_v29 = vld [vmem:[%s9215_s5 + $0x6dc] ss:$12 sps:$4 sm:$0xff]   ;;  %v2447_v22 = vadd.f32 %v8671_v51, %v523_v30 }
 0x2d1   :  { %v2460_v62 = vpop.f32.mrf.mxu0  ;;  %4905 = vmatpush1.bf16.msra.mxu1 %v6748_v38 }
 0x2d2   :  { %4868 = vmatpush2.bf16.msra.mxu0 %v6727_v2  ;;  %v8724_v43 = vpack.c.bf16 %v2645_v31, %v2633_v7  ;;  %4906 = vmatprep.subr.bf16.mxu1 %v6756_v21  ;;  %v6764_v2 = vld [vmem:[%s9215_s5 + $0x798] ss:$12 sps:$4 sm:$0xff]   ;;  %v2459_v21 = vadd.f32 %v2458_v32, %v8669_v58  ;;  %v2504_v7 = vadd.f32 %v8687_v18, %v2451_v28  ;;  %v2515_v51 = vpop.f32.mrf.mxu1  ;;  %v6769_v32 = vld [vmem:[%s9215_s5 + $0x780] ss:$12 sps:$4 sm:$0xff]  }
 0x2d3   :  { %4869 = vmatprep.subr.bf16.mxu0 %v6735_v52  ;;  %v2462_v9 = vpop.f32.mrf.mxu0  ;;  %v6771_v52 = vld [vmem:[%s9215_s5 + $0x784] ss:$12 sps:$4 sm:$0xff]   ;;  %v6751_v18 = vld [vmem:[%s9215_s5 + $0x6c0] ss:$12 sps:$4 sm:$0xff]  }
 0x2d4   :  { %4877 = vmatprep.mubr.bf16.mxu0 %v8724_v43  ;;  %v2463_v38 = vadd.f32 %v2462_v9, %v8669_v58  ;;  %v6753_v31 = vld [vmem:[%s9215_s5 + $0x6c4] ss:$12 sps:$4 sm:$0xff]   ;;  %v2500_v58 = vadd.f32 %v8664_v36, %v2447_v22  ;;  %v2461_v9 = vadd.f32 %v2460_v62, %v523_v30 }
 0x2d5   :  { %4907 = vmatpush1.bf16.msra.mxu1 %v6754_v46  ;;  %v6757_v36 = vld [vmem:[%s9215_s5 + $0x170] ss:$12 sps:$4 sm:$0xff]  }
 0x2d6   :  { %4870 = vmatpush2.bf16.msra.mxu0 %v6733_v0  ;;  %4908 = vmatprep.subr.bf16.mxu1 %v6761_v45  ;;  %v2516_v46 = vadd.f32 %v2515_v51, %v2463_v38  ;;  %v2512_v0 = vadd.f32 %v2511_v26, %v2459_v21  ;;  %v6776_v45 = vld [vmem:[%s9215_s5 + $0x8ec] ss:$12 sps:$4 sm:$0xff]   ;;  %v2457_v26 = vadd.f32 %v8705_v25, %v523_v30  ;;  %v6758_v62 = vld [vmem:[%s9215_s5 + $0xb0] ss:$12 sps:$4 sm:$0xff]   ;;  %v6781_v30 = vld [vmem:[%s9215_s5 + $0x8d4] ss:$12 sps:$4 sm:$0xff]  }
 0x2d7   :  { %4871 = vmatprep.subr.bf16.mxu0 %v6741_v40  ;;  %v2644_v40 = vmax.f32 %v2504_v7, 0.0  ;;  %v2514_v38 = vadd.f32 %v2513_v57, %v2461_v9  ;;  %v6762_v25 = vld [vmem:[%s9215_s5 + $0x158] ss:$12 sps:$4 sm:$0xff]   ;;  %v6779_v57 = vld [vmem:[%s9215_s5 + $0x8d0] ss:$12 sps:$4 sm:$0xff]  }
 0x2d8   :  { %v2657_v28 = vmax.f32 %v2512_v0, 0.0  ;;  %v6763_v21 = vld [vmem:[%s9215_s5 + $0x98] ss:$12 sps:$4 sm:$0xff]   ;;  %v6789_v0 = vld [vmem:[%s9215_s5 + $0x8a0] ss:$12 sps:$4 sm:$0xff]  }
 0x2d9   :  { %4909 = vmatpush1.bf16.msra.mxu1 %v6759_v49  ;;  %v2669_v49 = vmax.f32 %v2516_v46, 0.0  ;;  %v6784_v51 = vld [vmem:[%s9215_s5 + $0x8b8] ss:$12 sps:$4 sm:$0xff]   ;;  %v6794_v9 = vld [vmem:[%s9215_s5 + $0x888] ss:$12 sps:$4 sm:$0xff]  }
 0x2da   :  { %4872 = vmatpush2.bf16.msra.mxu0 %v6739_v1  ;;  %4910 = vmatprep.subr.bf16.mxu1 %v6766_v24  ;;  %v2632_v1 = vmax.f32 %v2500_v58, 0.0  ;;  %v6774_v24 = vld [vmem:[%s9215_s5 + $0x8e8] ss:$12 sps:$4 sm:$0xff]  }
 0x2db   :  { %4873 = vmatprep.subr.bf16.mxu0 %v6747_v29  ;;  %v8794_v22 = vpack.c.bf16 %v2669_v49, %v2657_v28  ;;  %v6772_v58 = vld [vmem:[%s9215_s5 + $0x128] ss:$12 sps:$4 sm:$0xff]   ;;  %v6782_v49 = vld [vmem:[%s9215_s5 + $0xf8] ss:$12 sps:$4 sm:$0xff]   ;;  %v6787_v28 = vld [vmem:[%s9215_s5 + $0xe0] ss:$12 sps:$4 sm:$0xff]  }
 0x2dc   :  { %v8786_v29 = vpack.c.bf16 %v2644_v40, %v2632_v1  ;;  %v6777_v40 = vld [vmem:[%s9215_s5 + $0x110] ss:$12 sps:$4 sm:$0xff]  }
 0x2dd   :  { %4911 = vmatpush1.bf16.msra.mxu1 %v6764_v2  ;;  %v2510_v2 = vadd.f32 %v8716_v33, %v2457_v26  ;;  %v6767_v33 = vld [vmem:[%s9215_s5 + $0x140] ss:$12 sps:$4 sm:$0xff]   ;;  %v6799_v1 = vld [vmem:[%s9215_s5 + $0x870] ss:$12 sps:$4 sm:$0xff]   ;;  %v6783_v26 = vld [vmem:[%s9215_s5 + $0x38] ss:$12 sps:$4 sm:$0xff]  }
 0x2de   :  { %4874 = vmatpush2.bf16.msra.mxu0 %v6745_v63  ;;  %4912 = vmatprep.subr.bf16.mxu1 %v6771_v52  ;;  %v6786_v63 = vld [vmem:[%s9215_s5 + $0x8bc] ss:$12 sps:$4 sm:$0xff]   ;;  %v2668_v52 = vmax.f32 %v2514_v38, 0.0  ;;  %v6804_v38 = vld [vmem:[%s9215_s5 + $0x858] ss:$12 sps:$4 sm:$0xff]  }
 0x2df   :  { %4875 = vmatprep.subr.bf16.mxu0 %v6753_v31  ;;  %v2656_v7 = vmax.f32 %v2510_v2, 0.0  ;;  %v6768_v31 = vld [vmem:[%s9215_s5 + $0x80] ss:$12 sps:$4 sm:$0xff]   ;;  %v6792_v2 = vld [vmem:[%s9215_s5 + $0xc8] ss:$12 sps:$4 sm:$0xff]  }
 0x2e1   :  { %4913 = vmatpush1.bf16.msra.mxu1 %v6769_v32  ;;  %v8817_v46 = vpack.c.bf16 %v2668_v52, %v2656_v7  ;;  %v6791_v32 = vld [vmem:[%s9215_s5 + $0x8a4] ss:$12 sps:$4 sm:$0xff]  }
 0x2e2   :  { %4876 = vmatpush2.bf16.msra.mxu0 %v6751_v18  ;;  %4914 = vmatprep.subr.bf16.mxu1 %v6776_v45  ;;  %v6773_v18 = vld [vmem:[%s9215_s5 + $0x68] ss:$12 sps:$4 sm:$0xff]   ;;  %v6796_v45 = vld [vmem:[%s9215_s5 + $0x88c] ss:$12 sps:$4 sm:$0xff]   ;;  %v6814_v52 = vld [vmem:[%s9215_s5 + $0x2f0] ss:$12 sps:$4 sm:$0xff]  }
 0x2e3   :  { %5901 = vmatprep.subr.bf16.mxu0 %v6757_v36  ;;  %v6801_v36 = vld [vmem:[%s9215_s5 + $0x874] ss:$12 sps:$4 sm:$0xff]  }
 0x2e5   :  { %4878 = vmatmul.mubr.bf16.vlgmr.msra.gmra.mxu0 %v8786_v29  ;;  %4915 = vmatpush2.bf16.msra.mxu1 %v6774_v24  ;;  %v6806_v24 = vld [vmem:[%s9215_s5 + $0x85c] ss:$12 sps:$4 sm:$0xff]  }
 0x2e6   :  { %4887 = vmatprep.mubr.bf16.mxu0 %v8794_v22  ;;  %5902 = vmatpush3.bf16.msra.mxu0 %v6758_v62  ;;  %v2605_v62 = vpop.f32.mrf.mxu0 }
 0x2e7   :  { %5903 = vmatprep.subr.bf16.mxu0 %v6762_v25  ;;  %4916 = vmatprep.subr.bf16.mxu1 %v6781_v30  ;;  %v6788_v25 = vld [vmem:[%s9215_s5 + $0x20] ss:$12 sps:$4 sm:$0xff]   ;;  %v6811_v30 = vld [vmem:[%s9215_s5 + $0x844] ss:$12 sps:$4 sm:$0xff]  }
 0x2e9   :  { %4917 = vmatpush2.bf16.msra.mxu1 %v6779_v57  ;;  %v2607_v57 = vpop.f32.mrf.mxu0 }
 0x2ea   :  { %5904 = vmatpush3.bf16.msra.mxu0 %v6763_v21  ;;  %4918 = vmatprep.subr.bf16.mxu1 %v6786_v63  ;;  %v6809_v21 = vld [vmem:[%s9215_s5 + $0x840] ss:$12 sps:$4 sm:$0xff]   ;;  %v6793_v63 = vld [vmem:[%s9215_s5 + $0x8] ss:$12 sps:$4 sm:$0xff]  }
 0x2eb   :  { %5905 = vmatprep.subr.bf16.mxu0 %v6767_v33  ;;  %v6797_v33 = vld [vmem:[%s9215_s5 + $0x470] ss:$12 sps:$4 sm:$0xff]   ;;  %v2609_v7 = vpop.f32.mrf.mxu0 }
 0x2ed   :  { %4888 = vmatmul.mubr.bf16.gmra.mxu0 %v8817_v46  ;;  %4919 = vmatpush2.bf16.msra.mxu1 %v6784_v51  ;;  %v6798_v51 = vld [vmem:[%s9215_s5 + $0x3b0] ss:$12 sps:$4 sm:$0xff]  }
 0x2ee   :  { %5906 = vmatpush3.bf16.msra.mxu0 %v6768_v31  ;;  %4983 = vmatprep.mubr.bf16.mxu0 %v8021_v34  ;;  %v6778_v34 = vld [vmem:[%s9215_s5 + $0x50] ss:$12 sps:$4 sm:$0xff]   ;;  %v535_v31 = vrot.slane %v8656_v35, %v502_v53 }
 0x2ef   :  { %5907 = vmatprep.subr.bf16.mxu0 %v6772_v58  ;;  %4920 = vmatprep.subr.bf16.mxu1 %v6791_v32  ;;  %v6802_v58 = vld [vmem:[%s9215_s5 + $0x458] ss:$12 sps:$4 sm:$0xff]   ;;  %v2611_v32 = vpop.f32.mrf.mxu0 }
 0x2f1   :  { %4921 = vmatpush2.bf16.msra.mxu1 %v6789_v0  ;;  %v531_v0 = vrot.slane %v8656_v35, %v7210_v41 }
 0x2f2   :  { %5908 = vmatpush3.bf16.msra.mxu0 %v6773_v18  ;;  %4922 = vmatprep.subr.bf16.mxu1 %v6796_v45 }
 0x2f3   :  { %5909 = vmatprep.subr.bf16.mxu0 %v6777_v40  ;;  %v6807_v40 = vld [vmem:[%s9215_s5 + $0x440] ss:$12 sps:$4 sm:$0xff]  }
 0x2f5   :  { %4923 = vmatpush2.bf16.msra.mxu1 %v6794_v9  ;;  %v2615_v9 = vpop.f32.mrf.mxu0 }
 0x2f6   :  { %5910 = vmatpush3.bf16.msra.mxu0 %v6778_v34  ;;  %4924 = vmatprep.subr.bf16.mxu1 %v6801_v36 }
 0x2f7   :  { %5911 = vmatprep.subr.bf16.mxu0 %v6782_v49 }
 0x2f9   :  { %4925 = vmatpush2.bf16.msra.mxu1 %v6799_v1 }
 0x2fa   :  { %5912 = vmatpush3.bf16.msra.mxu0 %v6783_v26  ;;  %4926 = vmatprep.subr.bf16.mxu1 %v6806_v24  ;;  %v6812_v24 = vld [vmem:[%s9215_s5 + $0x428] ss:$12 sps:$4 sm:$0xff]  }
 0x2fb   :  { %5913 = vmatprep.subr.bf16.mxu0 %v6787_v28  ;;  %v2617_v28 = vpop.f32.mrf.mxu0 }
 0x2fd   :  { %4927 = vmatpush2.bf16.msra.mxu1 %v6804_v38 }
 0x2fe   :  { %5914 = vmatpush3.bf16.msra.mxu0 %v6788_v25  ;;  %4928 = vmatprep.subr.bf16.mxu1 %v6811_v30 }
 0x2ff   :  { %5915 = vmatprep.subr.bf16.mxu0 %v6792_v2 }
 0x301   :  { %4929 = vmatpush2.bf16.msra.mxu1 %v6809_v21 }
 0x302   :  { %5916 = vmatpush3.bf16.msra.mxu0 %v6793_v63  ;;  %5929 = vmatprep.subr.bf16.mxu1 %v6814_v52 }
 0x303   :  { %5957 = vmatprep.subr.bf16.mxu0 %v6797_v33 }
 0x304   :  { %v2552_v18 = vpop.f32.mrf.mxu1 }
 0x305   :  { %4984 = vmatmul.mubr.bf16.vlgmr.msra.gmra.mxu0 %v8257_v60  ;;  %v2553_v34 = vadd.f32 %v2552_v18, %v531_v0  ;;  %v6808_v60 = vld [vmem:[%s9215_s5 + $0x380] ss:$12 sps:$4 sm:$0xff]  }
 0x306   :  { %v2554_v45 = vpop.f32.mrf.mxu1  ;;  %4991 = vmatprep.mubr.bf16.mxu0 %v8267_v56  ;;  %5958 = vmatpush3.bf16.msra.mxu0 %v6798_v51 }
 0x307   :  { %v2555_v53 = vadd.f32 %v2554_v45, %v535_v31  ;;  %5959 = vmatprep.subr.bf16.mxu0 %v6802_v58  ;;  %v2606_v38 = vadd.f32 %v2605_v62, %v2553_v34  ;;  %v6816_v62 = vld [vmem:[%s9215_s5 + $0x410] ss:$12 sps:$4 sm:$0xff]  }
 0x308   :  { %v2556_v35 = vpop.f32.mrf.mxu1 }
 0x309   :  { %v2557_v36 = vadd.f32 %v2556_v35, %v531_v0  ;;  %v2608_v56 = vadd.f32 %v2607_v57, %v2555_v53  ;;  %v6813_v57 = vld [vmem:[%s9215_s5 + $0x368] ss:$12 sps:$4 sm:$0xff]   ;;  %v2634_v51 = vmax.f32 %v2606_v38, 0.0  ;;  %v6817_v53 = vld [vmem:[%s9215_s5 + $0x350] ss:$12 sps:$4 sm:$0xff]  }
 0x30a   :  { %v2558_v49 = vpop.f32.mrf.mxu1  ;;  %5960 = vmatpush3.bf16.msra.mxu0 %v6803_v37  ;;  %v6824_v38 = vld [vmem:[%s9215_s5 + $0x3e0] ss:$12 sps:$4 sm:$0xff]  }
 0x30b   :  { %v2610_v1 = vadd.f32 %v2609_v7, %v2557_v36  ;;  %v2559_v26 = vadd.f32 %v2558_v49, %v535_v31  ;;  %5961 = vmatprep.subr.bf16.mxu0 %v6807_v40  ;;  %v2635_v63 = vmax.f32 %v2608_v56, 0.0  ;;  %v2619_v7 = vpop.f32.mrf.mxu0  ;;  %v6818_v40 = vld [vmem:[%s9215_s5 + $0x2d8] ss:$12 sps:$4 sm:$0xff]  }
 0x30c   :  { %v2562_v25 = vpop.f32.mrf.mxu1  ;;  %v6820_v36 = vld [vmem:[%s9215_s5 + $0x3f8] ss:$12 sps:$4 sm:$0xff]  }
 0x30d   :  { %v2612_v30 = vadd.f32 %v2611_v32, %v2559_v26  ;;  %4992 = vmatmul.mubr.bf16.gmra.mxu0 %v8300_v55  ;;  %v2646_v2 = vmax.f32 %v2610_v1, 0.0  ;;  %v2563_v55 = vadd.f32 %v2562_v25, %v531_v0  ;;  %v2621_v49 = vpop.f32.mrf.mxu0  ;;  %v6819_v1 = vld [vmem:[%s9215_s5 + $0x218] ss:$12 sps:$4 sm:$0xff]  }
 0x30e   :  { %v2564_v21 = vpop.f32.mrf.mxu1  ;;  %5962 = vmatpush3.bf16.msra.mxu0 %v6808_v60  ;;  %5081 = vmatprep.mubr.bf16.mxu0 %v8322_v19  ;;  %v6815_v19 = vld [vmem:[%s9215_s5 + $0x230] ss:$12 sps:$4 sm:$0xff]  }
 0x30f   :  { %v2647_v52 = vmax.f32 %v2612_v30, 0.0  ;;  %v2565_v33 = vadd.f32 %v2564_v21, %v535_v31  ;;  %5963 = vmatprep.subr.bf16.mxu0 %v6812_v24  ;;  %v8925_v45 = vpack.c.bf16 %v2646_v2, %v2634_v51  ;;  %v2616_v60 = vadd.f32 %v2615_v9, %v2563_v55  ;;  %v6822_v24 = vld [vmem:[%s9215_s5 + $0x2c0] ss:$12 sps:$4 sm:$0xff]   ;;  %v6832_v51 = vld [vmem:[%s9215_s5 + $0x770] ss:$12 sps:$4 sm:$0xff]  }
 0x310   :  { %v2566_v58 = vpop.f32.mrf.mxu1  ;;  %v6823_v2 = vld [vmem:[%s9215_s5 + $0x200] ss:$12 sps:$4 sm:$0xff]   ;;  %v6833_v55 = vld [vmem:[%s9215_s5 + $0x6b0] ss:$12 sps:$4 sm:$0xff]  }
 0x311   :  { %v2567_v32 = vadd.f32 %v2566_v58, %v531_v0  ;;  %v8920_v18 = vpack.c.bf16 %v2647_v52, %v2635_v63  ;;  %v2618_v34 = vadd.f32 %v2617_v28, %v2565_v33  ;;  %v2658_v25 = vmax.f32 %v2616_v60, 0.0  ;;  %v6826_v63 = vld [vmem:[%s9215_s5 + $0x2a8] ss:$12 sps:$4 sm:$0xff]   ;;  %v6834_v58 = vld [vmem:[%s9215_s5 + $0x278] ss:$12 sps:$4 sm:$0xff]  }
 0x312   :  { %v2568_v37 = vpop.f32.mrf.mxu1  ;;  %5964 = vmatpush3.bf16.msra.mxu0 %v6813_v57  ;;  %v6825_v57 = vld [vmem:[%s9215_s5 + $0x320] ss:$12 sps:$4 sm:$0xff]   ;;  %v6828_v52 = vld [vmem:[%s9215_s5 + $0x3c8] ss:$12 sps:$4 sm:$0xff]   ;;  %v6847_v60 = vld [vmem:[%s9215_s5 + $0x530] ss:$12 sps:$4 sm:$0xff]  }
 0x313   :  { %v2620_v0 = vadd.f32 %v2619_v7, %v2567_v32  ;;  %v2569_v35 = vadd.f32 %v2568_v37, %v535_v31  ;;  %4930 = vmatprep.mubr.bf16.mxu1 %v8920_v18  ;;  %5965 = vmatprep.subr.bf16.mxu0 %v6816_v62  ;;  %v6821_v31 = vld [vmem:[%s9215_s5 + $0x338] ss:$12 sps:$4 sm:$0xff]   ;;  %v2659_v9 = vmax.f32 %v2618_v34, 0.0  ;;  %v6827_v33 = vld [vmem:[%s9215_s5 + $0x1e8] ss:$12 sps:$4 sm:$0xff]  }
 0x314   :  { %4931 = vmatmul.mubr.bf16.vlgmr.msra.gmra.mxu1 %v8925_v45  ;;  %v6829_v62 = vld [vmem:[%s9215_s5 + $0x308] ss:$12 sps:$4 sm:$0xff]   ;;  %v6830_v7 = vld [vmem:[%s9215_s5 + $0x290] ss:$12 sps:$4 sm:$0xff]   ;;  %v6836_v32 = vld [vmem:[%s9215_s5 + $0x758] ss:$12 sps:$4 sm:$0xff]  }
 0x315   :  { %v2622_v56 = vadd.f32 %v2621_v49, %v2569_v35  ;;  %5930 = vmatpush3.bf16.msra.mxu1 %v6815_v19  ;;  %v2670_v26 = vmax.f32 %v2620_v0, 0.0  ;;  %v6835_v19 = vld [vmem:[%s9215_s5 + $0x1b8] ss:$12 sps:$4 sm:$0xff]   ;;  %v6842_v34 = vld [vmem:[%s9215_s5 + $0x248] ss:$12 sps:$4 sm:$0xff]  }
 0x316   :  { %5966 = vmatpush3.bf16.msra.mxu0 %v6817_v53  ;;  %5931 = vmatprep.subr.bf16.mxu1 %v6818_v40  ;;  %v6837_v37 = vld [vmem:[%s9215_s5 + $0x698] ss:$12 sps:$4 sm:$0xff]   ;;  %v6838_v53 = vld [vmem:[%s9215_s5 + $0x260] ss:$12 sps:$4 sm:$0xff]   ;;  %v6844_v0 = vld [vmem:[%s9215_s5 + $0x728] ss:$12 sps:$4 sm:$0xff]  }
 0x317   :  { %v2671_v28 = vmax.f32 %v2622_v56, 0.0  ;;  %5967 = vmatprep.subr.bf16.mxu0 %v6820_v36  ;;  %v8955_v21 = vpack.c.bf16 %v2670_v26, %v2658_v25  ;;  %v6841_v40 = vld [vmem:[%s9215_s5 + $0x680] ss:$12 sps:$4 sm:$0xff]   ;;  %v6843_v35 = vld [vmem:[%s9215_s5 + $0x188] ss:$12 sps:$4 sm:$0xff]  }
 0x318   :  { %v6845_v36 = vld [vmem:[%s9215_s5 + $0x668] ss:$12 sps:$4 sm:$0xff]   ;;  %v6846_v49 = vld [vmem:[%s9215_s5 + $0x5f0] ss:$12 sps:$4 sm:$0xff]   ;;  %v6850_v56 = vld [vmem:[%s9215_s5 + $0x5d8] ss:$12 sps:$4 sm:$0xff]  }
 0x319   :  { %5932 = vmatpush3.bf16.msra.mxu1 %v6819_v1  ;;  %v8950_v30 = vpack.c.bf16 %v2671_v28, %v2659_v9  ;;  %v6852_v1 = vld [vmem:[%s9215_s5 + $0x6f8] ss:$12 sps:$4 sm:$0xff]   ;;  %v6857_v9 = vld [vmem:[%s9215_s5 + $0x620] ss:$12 sps:$4 sm:$0xff]   ;;  %v6858_v28 = vld [vmem:[%s9215_s5 + $0x5a8] ss:$12 sps:$4 sm:$0xff]  }
 0x31a   :  { %5968 = vmatpush3.bf16.msra.mxu0 %v6821_v31  ;;  %5933 = vmatprep.subr.bf16.mxu1 %v6822_v24  ;;  %v6851_v26 = vld [vmem:[%s9215_s5 + $0x518] ss:$12 sps:$4 sm:$0xff]   ;;  %v6854_v24 = vld [vmem:[%s9215_s5 + $0x5c0] ss:$12 sps:$4 sm:$0xff]   ;;  %v6859_v25 = vld [vmem:[%s9215_s5 + $0x4e8] ss:$12 sps:$4 sm:$0xff]  }
 0x31b   :  { %4940 = vmatprep.mubr.bf16.mxu1 %v8950_v30  ;;  %5969 = vmatprep.subr.bf16.mxu0 %v6824_v38  ;;  %v6853_v31 = vld [vmem:[%s9215_s5 + $0x638] ss:$12 sps:$4 sm:$0xff]   ;;  %v6860_v38 = vld [vmem:[%s9215_s5 + $0x6c8] ss:$12 sps:$4 sm:$0xff]  }
 0x31c   :  { %4941 = vmatmul.mubr.bf16.gmra.mxu1 %v8955_v21 }
 0x31d   :  { %5934 = vmatpush3.bf16.msra.mxu1 %v6823_v2  ;;  %5032 = vmatprep.mubr.bf16.mxu1 %v8171_v44  ;;  %v6831_v44 = vld [vmem:[%s9215_s5 + $0x1d0] ss:$12 sps:$4 sm:$0xff]   ;;  %v6861_v2 = vld [vmem:[%s9215_s5 + $0x608] ss:$12 sps:$4 sm:$0xff]  }
 0x31e   :  { %5970 = vmatpush3.bf16.msra.mxu0 %v6825_v57  ;;  %5935 = vmatprep.subr.bf16.mxu1 %v6826_v63  ;;  %v6862_v57 = vld [vmem:[%s9215_s5 + $0x590] ss:$12 sps:$4 sm:$0xff]   ;;  %v6865_v63 = vld [vmem:[%s9215_s5 + $0x4b8] ss:$12 sps:$4 sm:$0xff]  }
 0x31f   :  { %5971 = vmatprep.subr.bf16.mxu0 %v6828_v52  ;;  %v6866_v52 = vld [vmem:[%s9215_s5 + $0x560] ss:$12 sps:$4 sm:$0xff]  }
 0x321   :  { %5936 = vmatpush3.bf16.msra.mxu1 %v6827_v33  ;;  %v6867_v33 = vld [vmem:[%s9215_s5 + $0x4a0] ss:$12 sps:$4 sm:$0xff]  }
 0x322   :  { %5972 = vmatpush3.bf16.msra.mxu0 %v6829_v62  ;;  %5937 = vmatprep.subr.bf16.mxu1 %v6830_v7  ;;  %v6870_v62 = vld [vmem:[%s9215_s5 + $0x8f0] ss:$12 sps:$4 sm:$0xff]  }
 0x323   :  { %6013 = vmatprep.subr.bf16.mxu0 %v6832_v51  ;;  %v6871_v7 = vld [vmem:[%s9215_s5 + $0x830] ss:$12 sps:$4 sm:$0xff]   ;;  %v6872_v51 = vld [vmem:[%s9215_s5 + $0x8d8] ss:$12 sps:$4 sm:$0xff]  }
 0x325   :  { %5938 = vmatpush3.bf16.msra.mxu1 %v6831_v44  ;;  %5082 = vmatmul.mubr.bf16.vlgmr.msra.gmra.mxu0 %v8518_v47  ;;  %v6840_v47 = vld [vmem:[%s9215_s5 + $0x740] ss:$12 sps:$4 sm:$0xff]  }
 0x326   :  { %5089 = vmatprep.mubr.bf16.mxu0 %v8531_v59  ;;  %6014 = vmatpush3.bf16.msra.mxu0 %v6833_v55  ;;  %v6839_v59 = vld [vmem:[%s9215_s5 + $0x1a0] ss:$12 sps:$4 sm:$0xff]  }
 0x327   :  { %5939 = vmatprep.subr.bf16.mxu1 %v6834_v58  ;;  %6015 = vmatprep.subr.bf16.mxu0 %v6836_v32  ;;  %v6874_v44 = vld [vmem:[%s9215_s5 + $0x8c0] ss:$12 sps:$4 sm:$0xff]   ;;  %v6878_v58 = vld [vmem:[%s9215_s5 + $0x890] ss:$12 sps:$4 sm:$0xff]  }
 0x328   :  { %v6875_v55 = vld [vmem:[%s9215_s5 + $0x800] ss:$12 sps:$4 sm:$0xff]   ;;  %v6879_v32 = vld [vmem:[%s9215_s5 + $0x7d0] ss:$12 sps:$4 sm:$0xff]  }
 0x329   :  { %5940 = vmatpush3.bf16.msra.mxu1 %v6835_v19  ;;  %v6882_v19 = vld [vmem:[%s9215_s5 + $0x860] ss:$12 sps:$4 sm:$0xff]  }
 0x32a   :  { %6016 = vmatpush3.bf16.msra.mxu0 %v6837_v37  ;;  %5941 = vmatprep.subr.bf16.mxu1 %v6838_v53  ;;  %v6883_v37 = vld [vmem:[%s9215_s5 + $0x7a0] ss:$12 sps:$4 sm:$0xff]   ;;  %v6884_v53 = vld [vmem:[%s9215_s5 + $0x848] ss:$12 sps:$4 sm:$0xff]  }
 0x32b   :  { %6017 = vmatprep.subr.bf16.mxu0 %v6840_v47  ;;  %v6885_v47 = vld [vmem:[%s9215_s5 + $0x788] ss:$12 sps:$4 sm:$0xff]  }
 0x32d   :  { %5942 = vmatpush3.bf16.msra.mxu1 %v6839_v59  ;;  %5090 = vmatmul.mubr.bf16.gmra.mxu0 %v8561_v8  ;;  %v6848_v8 = vld [vmem:[%s9215_s5 + $0x710] ss:$12 sps:$4 sm:$0xff]   ;;  %v4667_v59 = vpop.f32.mrf.mxu0 }
 0x32e   :  { %6018 = vmatpush3.bf16.msra.mxu0 %v6841_v40  ;;  %5179 = vmatprep.mubr.bf16.mxu0 %v8724_v43  ;;  %v6849_v43 = vld [vmem:[%s9215_s5 + $0x650] ss:$12 sps:$4 sm:$0xff]  }
 0x32f   :  { %5943 = vmatprep.subr.bf16.mxu1 %v6842_v34  ;;  %6019 = vmatprep.subr.bf16.mxu0 %v6844_v0  ;;  %v4669_v40 = vpop.f32.mrf.mxu0 }
 0x331   :  { %5944 = vmatpush3.bf16.msra.mxu1 %v6843_v35  ;;  %v4671_v34 = vpop.f32.mrf.mxu0 }
 0x332   :  { %6020 = vmatpush3.bf16.msra.mxu0 %v6845_v36  ;;  %5985 = vmatprep.subr.bf16.mxu1 %v6846_v49 }
 0x333   :  { %6021 = vmatprep.subr.bf16.mxu0 %v6848_v8  ;;  %v4673_v0 = vpop.f32.mrf.mxu0 }
 0x334   :  { %5033 = vmatmul.mubr.bf16.vlgmr.msra.gmra.mxu1 %v8387_v50  ;;  %v6856_v50 = vld [vmem:[%s9215_s5 + $0x6e0] ss:$12 sps:$4 sm:$0xff]  }
 0x335   :  { %5040 = vmatprep.mubr.bf16.mxu1 %v8396_v27  ;;  %5986 = vmatpush3.bf16.msra.mxu1 %v6847_v60  ;;  %v6855_v27 = vld [vmem:[%s9215_s5 + $0x500] ss:$12 sps:$4 sm:$0xff]   ;;  %v4677_v35 = vpop.f32.mrf.mxu0 }
 0x336   :  { %6022 = vmatpush3.bf16.msra.mxu0 %v6849_v43  ;;  %5987 = vmatprep.subr.bf16.mxu1 %v6850_v56 }
 0x337   :  { %6023 = vmatprep.subr.bf16.mxu0 %v6852_v1  ;;  %v4679_v49 = vpop.f32.mrf.mxu0 }
 0x339   :  { %5988 = vmatpush3.bf16.msra.mxu1 %v6851_v26  ;;  %v4681_v60 = vpop.f32.mrf.mxu0 }
 0x33a   :  { %6024 = vmatpush3.bf16.msra.mxu0 %v6853_v31  ;;  %5989 = vmatprep.subr.bf16.mxu1 %v6854_v24 }
 0x33b   :  { %6025 = vmatprep.subr.bf16.mxu0 %v6856_v50  ;;  %v4683_v56 = vpop.f32.mrf.mxu0 }
 0x33c   :  { %5041 = vmatmul.mubr.bf16.gmra.mxu1 %v8421_v61  ;;  %v6863_v61 = vld [vmem:[%s9215_s5 + $0x4d0] ss:$12 sps:$4 sm:$0xff]  }
 0x33d   :  { %5990 = vmatpush3.bf16.msra.mxu1 %v6855_v27  ;;  %5130 = vmatprep.mubr.bf16.mxu1 %v8584_v23  ;;  %v6864_v23 = vld [vmem:[%s9215_s5 + $0x578] ss:$12 sps:$4 sm:$0xff]  }
 0x33e   :  { %6026 = vmatpush3.bf16.msra.mxu0 %v6857_v9  ;;  %5991 = vmatprep.subr.bf16.mxu1 %v6858_v28 }
 0x33f   :  { %6027 = vmatprep.subr.bf16.mxu0 %v6860_v38 }
 0x341   :  { %5992 = vmatpush3.bf16.msra.mxu1 %v6859_v25 }
 0x342   :  { %6028 = vmatpush3.bf16.msra.mxu0 %v6861_v2  ;;  %5993 = vmatprep.subr.bf16.mxu1 %v6862_v57 }
 0x344   :  { %v4720_v36 = vpop.f32.mrf.mxu1 }
 0x345   :  { %5994 = vmatpush3.bf16.msra.mxu1 %v6863_v61  ;;  %5180 = vmatmul.mubr.bf16.vlgmr.msra.gmra.mxu0 %v8786_v29  ;;  %v6868_v29 = vld [vmem:[%s9215_s5 + $0x548] ss:$12 sps:$4 sm:$0xff]  }
 0x346   :  { %5187 = vmatprep.mubr.bf16.mxu0 %v8794_v22  ;;  %5995 = vmatprep.subr.bf16.mxu1 %v6864_v23  ;;  %v6869_v22 = vld [vmem:[%s9215_s5 + $0x488] ss:$12 sps:$4 sm:$0xff]   ;;  %v4722_v8 = vpop.f32.mrf.mxu1 }
 0x348   :  { %v4724_v43 = vpop.f32.mrf.mxu1 }
 0x349   :  { %5996 = vmatpush3.bf16.msra.mxu1 %v6865_v63 }
 0x34a   :  { %5997 = vmatprep.subr.bf16.mxu1 %v6866_v52  ;;  %v4726_v1 = vpop.f32.mrf.mxu1  ;;  %v9166_v52 = vld [vmem:[%s9217_s6] sm:$0x7] }
 0x34b   :  { %9230 = vst [vmem:[#allocation7_spill] sm:$0xff] %v9166_v52 }
 0x34c   :  { %v4730_v31 = vpop.f32.mrf.mxu1 }
 0x34d   :  { %5998 = vmatpush3.bf16.msra.mxu1 %v6867_v33  ;;  %5188 = vmatmul.mubr.bf16.gmra.mxu0 %v8817_v46  ;;  %v6873_v46 = vld [vmem:[%s9215_s5 + $0x818] ss:$12 sps:$4 sm:$0xff]  }
 0x34e   :  { %5999 = vmatprep.subr.bf16.mxu1 %v6868_v29 }
 0x351   :  { %6000 = vmatpush3.bf16.msra.mxu1 %v6869_v22  ;;  %v3085_v22 = vrot.slane %v9166_v52, %v7213_v42 }
 0x352   :  { %6041 = vmatprep.subr.bf16.mxu1 %v6870_v62  ;;  %v3089_v62 = vrot.slane %v9166_v52, %v7204_v39 }
 0x354   :  { %5131 = vmatmul.mubr.bf16.vlgmr.msra.gmra.mxu1 %v8645_v48  ;;  %v6876_v48 = vld [vmem:[%s9215_s5 + $0x8a8] ss:$12 sps:$4 sm:$0xff]   ;;  %v4680_v52 = vadd.f32 %v4679_v49, %v3089_v62 }
 0x355   :  { %5138 = vmatprep.mubr.bf16.mxu1 %v8658_v54  ;;  %6042 = vmatpush3.bf16.msra.mxu1 %v6871_v7  ;;  %v6877_v54 = vld [vmem:[%s9215_s5 + $0x7e8] ss:$12 sps:$4 sm:$0xff]  }
 0x356   :  { %6043 = vmatprep.subr.bf16.mxu1 %v6872_v51 }
 0x359   :  { %6044 = vmatpush3.bf16.msra.mxu1 %v6873_v46  ;;  %v4668_v46 = vadd.f32 %v4667_v59, %v3085_v22 }
 0x35a   :  { %6045 = vmatprep.subr.bf16.mxu1 %v6874_v44  ;;  %v4670_v44 = vadd.f32 %v4669_v40, %v3089_v62 }
 0x35c   :  { %5139 = vmatmul.mubr.bf16.gmra.mxu1 %v8692_v14  ;;  %v6880_v14 = vld [vmem:[%s9215_s5 + $0x878] ss:$12 sps:$4 sm:$0xff]  }
 0x35d   :  { %6046 = vmatpush3.bf16.msra.mxu1 %v6875_v55  ;;  %5228 = vmatprep.mubr.bf16.mxu1 %v8920_v18  ;;  %v6881_v18 = vld [vmem:[%s9215_s5 + $0x7b8] ss:$12 sps:$4 sm:$0xff]   ;;  %v4721_v55 = vadd.f32 %v4720_v36, %v4668_v46 }
 0x35e   :  { %6047 = vmatprep.subr.bf16.mxu1 %v6876_v48 }
 0x361   :  { %6048 = vmatpush3.bf16.msra.mxu1 %v6877_v54 }
 0x362   :  { %6049 = vmatprep.subr.bf16.mxu1 %v6878_v58  ;;  %v4672_v58 = vadd.f32 %v4671_v34, %v3085_v22 }
 0x365   :  { %6050 = vmatpush3.bf16.msra.mxu1 %v6879_v32  ;;  %v4773_v26 = vpop.f32.mrf.mxu0  ;;  %v4723_v32 = vadd.f32 %v4722_v8, %v4670_v44  ;;  %v4682_v8 = vadd.f32 %v4681_v60, %v3085_v22 }
 0x366   :  { %6051 = vmatprep.subr.bf16.mxu1 %v6880_v14  ;;  %v4774_v14 = vadd.f32 %v4773_v26, %v4721_v55  ;;  %v4684_v55 = vadd.f32 %v4683_v56, %v3089_v62 }
 0x367   :  { %v4775_v24 = vpop.f32.mrf.mxu0 }
 0x369   :  { %6052 = vmatpush3.bf16.msra.mxu1 %v6881_v18  ;;  %v4777_v50 = vpop.f32.mrf.mxu0  ;;  %v4674_v18 = vadd.f32 %v4673_v0, %v3089_v62 }
 0x36a   :  { %6053 = vmatprep.subr.bf16.mxu1 %v6882_v19  ;;  %v4725_v19 = vadd.f32 %v4724_v43, %v4672_v58 }
 0x36b   :  { %v4779_v27 = vpop.f32.mrf.mxu0  ;;  %v4727_v11 = vadd.f32 %v4726_v1, %v4674_v18 }
 0x36c   :  { %v4778_v15 = vadd.f32 %v4777_v50, %v4725_v19 }
 0x36d   :  { %6054 = vmatpush3.bf16.msra.mxu1 %v6883_v37  ;;  %v4783_v9 = vpop.f32.mrf.mxu0  ;;  %v4776_v37 = vadd.f32 %v4775_v24, %v4723_v32  ;;  %v4780_v36 = vadd.f32 %v4779_v27, %v4727_v11 }
 0x36e   :  { %6055 = vmatprep.subr.bf16.mxu1 %v6884_v53 }
 0x36f   :  { %v4785_v38 = vpop.f32.mrf.mxu0 }
 0x371   :  { %6056 = vmatpush3.bf16.msra.mxu1 %v6885_v47  ;;  %v4787_v2 = vpop.f32.mrf.mxu0  ;;  %v4678_v47 = vadd.f32 %v4677_v35, %v3085_v22 }
 0x373   :  { %v9161_v61 = vpop.f32.mrf.mxu0  ;;  %v4731_v59 = vadd.f32 %v4730_v31, %v4678_v47 }
 0x374   :  { %5229 = vmatmul.mubr.bf16.vlgmr.msra.gmra.mxu1 %v8925_v45  ;;  %v4732_v45 = vpop.f32.mrf.mxu1 }
 0x375   :  { %5236 = vmatprep.mubr.bf16.mxu1 %v8950_v30  ;;  %v4733_v26 = vadd.f32 %v4732_v45, %v4680_v52  ;;  %v4784_v0 = vadd.f32 %v4783_v9, %v4731_v59 }
 0x376   :  { %v4734_v30 = vpop.f32.mrf.mxu1 }
 0x377   :  { %v4735_v1 = vadd.f32 %v4734_v30, %v4682_v8  ;;  %v4786_v50 = vadd.f32 %v4785_v38, %v4733_v26 }
 0x379   :  { %v4788_v60 = vadd.f32 %v4787_v2, %v4735_v1 }
 0x37c   :  { %5237 = vmatmul.mubr.bf16.gmra.mxu1 %v8955_v21  ;;  %v4736_v21 = vpop.f32.mrf.mxu1 }
 0x384   :  { %v4826_v28 = vpop.f32.mrf.mxu1 }
 0x385   :  { %v4827_v53 = vadd.f32 %v4826_v28, %v4774_v14 }
 0x386   :  { %v4828_v25 = vpop.f32.mrf.mxu1 }
 0x387   :  { %v4829_v39 = vadd.f32 %v4828_v25, %v4776_v37 }
 0x388   :  { %v4830_v57 = vpop.f32.mrf.mxu1 }
 0x389   :  { %v4831_v46 = vadd.f32 %v4830_v57, %v4778_v15 }
 0x38a   :  { %v4832_v23 = vpop.f32.mrf.mxu1 }
 0x38b   :  { %v4833_v28 = vadd.f32 %v4832_v23, %v4780_v36 }
 0x38c   :  { %v4836_v33 = vpop.f32.mrf.mxu1 }
 0x38d   :  { %v4837_v25 = vadd.f32 %v4836_v33, %v4784_v0 }
 0x38e   :  { %v4838_v7 = vpop.f32.mrf.mxu1 }
 0x38f   :  { %v4839_v9 = vadd.f32 %v4838_v7, %v4786_v50 }
 0x390   :  { %v4840_v48 = vpop.f32.mrf.mxu1 }
 0x391   :  { %v4841_v56 = vadd.f32 %v4840_v48, %v4788_v60 }
 0x392   :  { %v4842_v20 = vpop.f32.mrf.mxu1 }
 0x3a5   :  { %v4879_v63 = vpop.f32.mrf.mxu0 }
 0x3a6   :  { %v4880_v5 = vadd.f32 %v4879_v63, %v4827_v53 }
 0x3a7   :  { %v4881_v29 = vpop.f32.mrf.mxu0 }
 0x3a8   :  { %v4882_v41 = vadd.f32 %v4881_v29, %v4829_v39 }
 0x3a9   :  { %v4883_v51 = vpop.f32.mrf.mxu0 }
 0x3aa   :  { %v4884_v35 = vadd.f32 %v4883_v51, %v4831_v46 }
 0x3ab   :  { %v4885_v54 = vpop.f32.mrf.mxu0 }
 0x3ac   :  { %v4886_v49 = vadd.f32 %v4885_v54, %v4833_v28 }
 0x3ad   :  { %v4889_v42 = vpop.f32.mrf.mxu0 }
 0x3ae   :  { %v4890_v57 = vadd.f32 %v4889_v42, %v4837_v25 }
 0x3af   :  { %v4891_v43 = vpop.f32.mrf.mxu0 }
 0x3b0   :  { %v4892_v38 = vadd.f32 %v4891_v43, %v4839_v9 }
 0x3b1   :  { %v4893_v45 = vpop.f32.mrf.mxu0 }
 0x3b2   :  { %v4894_v22 = vadd.f32 %v4893_v45, %v4841_v56 }
 0x3b3   :  { %v4895_v2 = vpop.f32.mrf.mxu0 }
 0x3c5   :  { %v5917_v18 = vpop.f32.mrf.mxu0 }
 0x3d4   :  { %v4932_v40 = vpop.f32.mrf.mxu1 }
 0x3d5   :  { %v4933_v34 = vadd.f32 %v4932_v40, %v4880_v5  ;;  %v4737_v5 = vadd.f32 %v4736_v21, %v4684_v55 }
 0x3d6   :  { %v4934_v24 = vpop.f32.mrf.mxu1 }
 0x3d7   :  { %v4935_v44 = vadd.f32 %v4934_v24, %v4882_v41  ;;  %v5245_v31 = vadd.f32 %v4933_v34, %v6945_v3  ;;  %v4790_v41 = vadd.f32 %v9161_v61, %v4737_v5  ;;  %v9232_v5 = vld [vmem:[#allocation7_spill] sm:$0xff] }
 0x3d8   :  { %v4936_v63 = vpop.f32.mrf.mxu1 }
 0x3d9   :  { %v5246_v11 = vadd.f32 %v4935_v44, %v6947_v4  ;;  %v4937_v15 = vadd.f32 %v4936_v63, %v4884_v35  ;;  %v4843_v29 = vadd.f32 %v4842_v20, %v4790_v41 }
 0x3da   :  { %v4938_v27 = vpop.f32.mrf.mxu1 }
 0x3db   :  { %v5893_v23 = vpack.c.bf16 %v5246_v11, %v5245_v31  ;;  %v4939_v52 = vadd.f32 %v4938_v27, %v4886_v49  ;;  %v5248_v3 = vadd.f32 %v4937_v15, %v6966_v12  ;;  %v4896_v61 = vadd.f32 %v4895_v2, %v4843_v29  ;;  %v9231_v15 = vld [vmem:[#allocation6_spill] sm:$0xff] }
 0x3dc   :  { %v4942_v30 = vpop.f32.mrf.mxu1  ;;  %v3093_v60 = vrot.slane %v9232_v5, %v9231_v15 }
 0x3dd   :  { %5297 = vst [vmem:[%s9218_s7] sm:$0xff] %v5893_v23  ;;  %v5249_v4 = vadd.f32 %v4939_v52, %v6968_v13  ;;  %v4943_v21 = vadd.f32 %v4942_v30, %v4890_v57 }
 0x3de   :  { %v4944_v33 = vpop.f32.mrf.mxu1 }
 0x3df   :  { %v5895_v62 = vpack.c.bf16 %v5249_v4, %v5248_v3  ;;  %v4945_v7 = vadd.f32 %v4944_v33, %v4892_v38  ;;  %v5251_v48 = vadd.f32 %v4943_v21, %v6951_v6  ;;  %v5918_v6 = vpop.f32.mrf.mxu0 }
 0x3e0   :  { %v4946_v51 = vpop.f32.mrf.mxu1  ;;  %v5919_v45 = vadd.f32 %v5918_v6, %v5917_v18 }
 0x3e1   :  { %5299 = vst [vmem:[%s9218_s7 + $0xc] sm:$0xff] %v5895_v62  ;;  %v5252_v54 = vadd.f32 %v4945_v7, %v6962_v10  ;;  %v4947_v12 = vadd.f32 %v4946_v51, %v4894_v22  ;;  %v5920_v10 = vpop.f32.mrf.mxu0 }
 0x3e2   :  { %v4948_v58 = vpop.f32.mrf.mxu1  ;;  %v4986_v52 = vadd.f32 %v5919_v45, %v3093_v60 }
 0x3e3   :  { %v5897_v13 = vpack.c.bf16 %v5252_v54, %v5251_v48  ;;  %v4949_v32 = vadd.f32 %v4948_v58, %v4896_v61  ;;  %v5254_v20 = vadd.f32 %v4947_v12, %v6974_v16  ;;  %v5921_v37 = vpop.f32.mrf.mxu0 }
 0x3e4   :  { %v5922_v9 = vadd.f32 %v5921_v37, %v5920_v10 }
 0x3e5   :  { %5301 = vst [vmem:[%s9218_s7 + $0x18] sm:$0xff] %v5897_v13  ;;  %v5255_v14 = vadd.f32 %v4949_v32, %v6976_v17  ;;  %v5923_v53 = vpop.f32.mrf.mxu0 }
 0x3e6   :  { %v4989_v30 = vadd.f32 %v5922_v9, %v3093_v60 }
 0x3e7   :  { %v5899_v19 = vpack.c.bf16 %v5255_v14, %v5254_v20  ;;  %v5924_v42 = vpop.f32.mrf.mxu0 }
 0x3e8   :  { %v5925_v4 = vadd.f32 %v5924_v42, %v5923_v53 }
 0x3e9   :  { %5303 = vst [vmem:[%s9218_s7 + $0x24] sm:$0xff] %v5899_v19  ;;  %v5926_v59 = vpop.f32.mrf.mxu0 }
 0x3ea   :  { %v4994_v54 = vadd.f32 %v5925_v4, %v3093_v60 }
 0x3eb   :  { %v5927_v36 = vpop.f32.mrf.mxu0 }
 0x3ec   :  { %v5928_v62 = vadd.f32 %v5927_v36, %v5926_v59 }
 0x3ed   :  { %v5973_v46 = vpop.f32.mrf.mxu0 }
 0x3ee   :  { %v4997_v18 = vadd.f32 %v5928_v62, %v3093_v60 }
 0x3ef   :  { %v5974_v34 = vpop.f32.mrf.mxu0 }
 0x3f0   :  { %v5975_v21 = vadd.f32 %v5974_v34, %v5973_v46 }
 0x3f1   :  { %v5976_v8 = vpop.f32.mrf.mxu0 }
 0x3f3   :  { %v5977_v0 = vpop.f32.mrf.mxu0 }
 0x3f4   :  { %v5945_v47 = vpop.f32.mrf.mxu1  ;;  %v5978_v7 = vadd.f32 %v5977_v0, %v5976_v8 }
 0x3f5   :  { %v5979_v24 = vpop.f32.mrf.mxu0 }
 0x3f6   :  { %v5946_v39 = vpop.f32.mrf.mxu1 }
 0x3f7   :  { %v5980_v44 = vpop.f32.mrf.mxu0  ;;  %v5947_v27 = vadd.f32 %v5946_v39, %v5945_v47 }
 0x3f8   :  { %v5948_v40 = vpop.f32.mrf.mxu1  ;;  %v5981_v37 = vadd.f32 %v5980_v44, %v5979_v24 }
 0x3f9   :  { %v5982_v1 = vpop.f32.mrf.mxu0  ;;  %v5035_v56 = vadd.f32 %v5947_v27, %v4986_v52 }
 0x3fa   :  { %v5949_v16 = vpop.f32.mrf.mxu1 }
 0x3fb   :  { %v5983_v25 = vpop.f32.mrf.mxu0  ;;  %v5950_v41 = vadd.f32 %v5949_v16, %v5948_v40  ;;  %v5084_v22 = vadd.f32 %v5975_v21, %v5035_v56 }
 0x3fc   :  { %v5951_v17 = vpop.f32.mrf.mxu1  ;;  %v5984_v16 = vadd.f32 %v5983_v25, %v5982_v1  ;;  %v9234_v1 = vld [vmem:[#allocation4_spill] sm:$0xff] }
 0x3fd   :  { %v5038_v33 = vadd.f32 %v5950_v41, %v4989_v30 }
 0x3fe   :  { %v5952_v26 = vpop.f32.mrf.mxu1 }
 0x3ff   :  { %v5953_v29 = vadd.f32 %v5952_v26, %v5951_v17  ;;  %v5087_v58 = vadd.f32 %v5978_v7, %v5038_v33 }
 0x400   :  { %v5954_v43 = vpop.f32.mrf.mxu1 }
 0x401   :  { %v5043_v32 = vadd.f32 %v5953_v29, %v4994_v54 }
 0x402   :  { %v5955_v28 = vpop.f32.mrf.mxu1 }
 0x403   :  { %v5956_v20 = vadd.f32 %v5955_v28, %v5954_v43  ;;  %v5092_v36 = vadd.f32 %v5981_v37, %v5043_v32  ;;  %v9233_v43 = vld [vmem:[#allocation2_spill] sm:$0xff] }
 0x405   :  { %v6029_v63 = vpop.f32.mrf.mxu0  ;;  %v5046_v40 = vadd.f32 %v5956_v20, %v4997_v18 }
 0x407   :  { %v6030_v31 = vpop.f32.mrf.mxu0  ;;  %v5095_v24 = vadd.f32 %v5984_v16, %v5046_v40 }
 0x408   :  { %v6031_v14 = vadd.f32 %v6030_v31, %v6029_v63 }
 0x409   :  { %v6032_v57 = vpop.f32.mrf.mxu0 }
 0x40b   :  { %v6033_v38 = vpop.f32.mrf.mxu0 }
 0x40c   :  { %v6034_v39 = vadd.f32 %v6033_v38, %v6032_v57 }
 0x40d   :  { %v6035_v51 = vpop.f32.mrf.mxu0 }
 0x40f   :  { %v6036_v19 = vpop.f32.mrf.mxu0 }
 0x411   :  { %v6038_v34 = vpop.f32.mrf.mxu0 }
 0x414   :  { %v6001_v35 = vpop.f32.mrf.mxu1 }
 0x416   :  { %v6002_v55 = vpop.f32.mrf.mxu1 }
 0x417   :  { %v6003_v2 = vadd.f32 %v6002_v55, %v6001_v35 }
 0x418   :  { %v6004_v50 = vpop.f32.mrf.mxu1 }
 0x419   :  { %v5133_v12 = vadd.f32 %v6003_v2, %v5084_v22 }
 0x41a   :  { %v6005_v49 = vpop.f32.mrf.mxu1 }
 0x41b   :  { %v6006_v61 = vadd.f32 %v6005_v49, %v6004_v50  ;;  %v5182_v47 = vadd.f32 %v6031_v14, %v5133_v12  ;;  %v6037_v50 = vadd.f32 %v6036_v19, %v6035_v51  ;;  %v6039_v49 = vpop.f32.mrf.mxu0 }
 0x41c   :  { %v6007_v11 = vpop.f32.mrf.mxu1  ;;  %v6040_v45 = vadd.f32 %v6039_v49, %v6038_v34 }
 0x41d   :  { %v5136_v6 = vadd.f32 %v6006_v61, %v5087_v58 }
 0x41e   :  { %v6008_v23 = vpop.f32.mrf.mxu1 }
 0x41f   :  { %v6009_v53 = vadd.f32 %v6008_v23, %v6007_v11  ;;  %v5185_v17 = vadd.f32 %v6034_v39, %v5136_v6  ;;  %v9235_v23 = vld [vmem:[#allocation3_spill] sm:$0xff] }
 0x420   :  { %v6010_v3 = vpop.f32.mrf.mxu1 }
 0x421   :  { %v5141_v26 = vadd.f32 %v6009_v53, %v5092_v36 }
 0x422   :  { %v6011_v48 = vpop.f32.mrf.mxu1 }
 0x423   :  { %v6012_v0 = vadd.f32 %v6011_v48, %v6010_v3  ;;  %v5190_v15 = vadd.f32 %v6037_v50, %v5141_v26  ;;  %v9236_v3 = vld [vmem:[#allocation5_spill] sm:$0xff] }
 0x425   :  { %v5144_v11 = vadd.f32 %v6012_v0, %v5095_v24 }
 0x427   :  { %v5193_v41 = vadd.f32 %v6040_v45, %v5144_v11 }
 0x434   :  { %v6057_v13 = vpop.f32.mrf.mxu1 }
 0x436   :  { %v6058_v10 = vpop.f32.mrf.mxu1 }
 0x437   :  { %v6059_v42 = vadd.f32 %v6058_v10, %v6057_v13 }
 0x438   :  { %v6060_v59 = vpop.f32.mrf.mxu1 }
 0x439   :  { %v5231_v46 = vadd.f32 %v6059_v42, %v5182_v47 }
 0x43a   :  { %v6061_v8 = vpop.f32.mrf.mxu1 }
 0x43b   :  { %v5247_v28 = vadd.f32 %v5231_v46, %v9233_v43  ;;  %v6062_v35 = vadd.f32 %v6061_v8, %v6060_v59 }
 0x43c   :  { %v6063_v55 = vpop.f32.mrf.mxu1 }
 0x43d   :  { %v5894_v44 = vpack.c.bf16 %v5247_v28, %v5247_v28  ;;  %v5234_v63 = vadd.f32 %v6062_v35, %v5185_v17 }
 0x43e   :  { %v6064_v31 = vpop.f32.mrf.mxu1 }
 0x43f   :  { %5298 = vst [vmem:[%s9218_s7 + $0x8] sm:$0xf] %v5894_v44  ;;  %v5250_v25 = vadd.f32 %v5234_v63, %v9234_v1  ;;  %v6065_v5 = vadd.f32 %v6064_v31, %v6063_v55 }
 0x440   :  { %v6066_v60 = vpop.f32.mrf.mxu1 }
 0x441   :  { %v5896_v27 = vpack.c.bf16 %v5250_v25, %v5250_v25  ;;  %v5239_v9 = vadd.f32 %v6065_v5, %v5190_v15 }
 0x442   :  { %v6067_v57 = vpop.f32.mrf.mxu1 }
 0x443   :  { %5300 = vst [vmem:[%s9218_s7 + $0x14] sm:$0xf] %v5896_v27  ;;  %v5253_v52 = vadd.f32 %v5239_v9, %v9235_v23  ;;  %v6068_v56 = vadd.f32 %v6067_v57, %v6066_v60 }
 0x445   :  { %v5898_v30 = vpack.c.bf16 %v5253_v52, %v5253_v52  ;;  %v5242_v38 = vadd.f32 %v6068_v56, %v5193_v41 }
 0x447   :  { %5302 = vst [vmem:[%s9218_s7 + $0x20] sm:$0xf] %v5898_v30  ;;  %v5256_v4 = vadd.f32 %v5242_v38, %v9236_v3 }
 0x449   :  { %v5900_v21 = vpack.c.bf16 %v5256_v4, %v5256_v4 }
 0x44b   :  { %5304 = vst [vmem:[%s9218_s7 + $0x2c] sm:$0xf] %v5900_v21 }

</bundles_post_ra>
